<compile_context>
chip_gen: v7x
topology: tpu7x:2x2x1
jax: 0.10.0
libtpu: 0.0.40
codegen_flags: <defaults>
</compile_context>

<pallas_src>
import functools

import jax
import jax.numpy as jnp
from jax.experimental import pallas as pl
from jax.experimental.pallas import tpu as pltpu

# ----------------------------- configuration --------------------------------
INPUT_SIZE = 6          # 2 coordinates + 4 homology types (one-hot)
HIDDEN = 32
NUM_LAYERS = 2
NUM_HEADS = 4
HEAD_DIM = HIDDEN // NUM_HEADS
INTERMEDIATE = 32
OUTPUT_SIZE = 2
OUT_PAD = 128           # lane-dense padded classifier output width

BATCH = 16
SEQ = 8

# the (L, H, 192) per-layer weight packing needs matching row counts
assert INTERMEDIATE == HIDDEN


def _gelu(x):
    # exact (erf-based) GELU, matching torch.nn.GELU() default
    return 0.5 * x * (1.0 + jax.lax.erf(x / jnp.sqrt(2.0).astype(x.dtype)))


# ------------------------------- kernel --------------------------------------
def persformer_kernel(
    x_ref,                 # (B_BLK, S, INPUT_SIZE)
    mask_ref,              # (BS, BS)  additive block-diagonal mask (0 / -1e30)
    ew_ref,                # (INPUT_SIZE, H)
    lw_ref,                # (L, H, 6H)  lanes: [wqkv(3H) | wo(H) | f1w(I) | f2w(H)]
    lb_ref,                # (L, 6, H)   rows:  bq, bk, bv, bo, f1b, f2b
    misc_ref,              # (4, OUT_PAD) rows: emb_b, c1b, pool_q (first H lanes), c2b
    cw_ref,                # (H, OUT_PAD + H)  lanes: [c2w_padded | c1w]
    out_ref,               # (B_BLK, OUT_PAD)
):
    b_blk, seq, feat = x_ref.shape
    bs = b_blk * seq
    H = HIDDEN
    HD = HEAD_DIM

    x = x_ref[...].reshape(bs, feat)                          # (BS, F)
    mask = mask_ref[...]                                      # (BS, BS)

    misc = misc_ref[...]
    emb_b = misc[0:1, 0:H]                                    # (1, H)
    c1b = misc[1:2, 0:H]                                      # (1, H)
    poolq = misc[2:3, 0:H]                                    # (1, H)
    c2b = misc[3:4, :]                                        # (1, OUT_PAD)

    # ---- embedding: Linear + GELU over all tokens of the block ----
    h = _gelu(
        jnp.dot(x, ew_ref[...], preferred_element_type=jnp.float32) + emb_b
    )                                                         # (BS, H)

    scale = jnp.float32(HEAD_DIM) ** jnp.float32(-0.5)

    # ---- persformer blocks (static loop, no layer norm, residuals) ----
    for l in range(NUM_LAYERS):
        lw = lw_ref[l]                                        # (H, 6H)
        lb = lb_ref[l]                                        # (6, H)
        wqkv = lw[:, 0:3 * H]                                 # (H, 3H)
        wo = lw[:, 3 * H:4 * H]                               # (H, H)
        f1w = lw[:, 4 * H:4 * H + INTERMEDIATE]               # (H, I)
        f2w = lw[:, 4 * H + INTERMEDIATE:4 * H + INTERMEDIATE + H]  # (I, H)

        # fused Q|K|V projection: one (BS,H)@(H,3H) matmul
        qkv = jnp.dot(h, wqkv, preferred_element_type=jnp.float32)   # (BS, 3H)
        q = qkv[:, 0:H] + lb[0:1, :]
        k = qkv[:, H:2 * H] + lb[1:2, :]
        v = qkv[:, 2 * H:3 * H] + lb[2:3, :]
        kt = jnp.transpose(k)                                 # (H, BS) one transpose/layer

        attn = jnp.zeros((bs, H), jnp.float32)
        for hi in range(NUM_HEADS):
            s0 = hi * HD
            qh = q[:, s0:s0 + HD]                             # (BS, HD)
            kth = kt[s0:s0 + HD, :]                           # (HD, BS) sublane slice
            vh = v[:, s0:s0 + HD]                             # (BS, HD)
            scores = (
                jnp.dot(qh, kth, preferred_element_type=jnp.float32) * scale
                + mask
            )                                                 # (BS, BS)
            m = jnp.max(scores, axis=-1, keepdims=True)
            e = jnp.exp(scores - m)
            p = e * pl.reciprocal(
                jnp.sum(e, axis=-1, keepdims=True), approx=True
            )
            oh = jnp.dot(p, vh, preferred_element_type=jnp.float32)  # (BS, HD)
            # accumulate through the matching Wo rows (no head lane-concat)
            attn = attn + jnp.dot(
                oh, wo[s0:s0 + HD, :], preferred_element_type=jnp.float32
            )
        h = attn + lb[3:4, :] + h                             # residual

        ff = _gelu(
            jnp.dot(h, f1w, preferred_element_type=jnp.float32) + lb[4:5, :]
        )
        ff = jnp.dot(ff, f2w, preferred_element_type=jnp.float32) + lb[5:6, :]
        h = ff + h                                            # residual

    # ---- attention pooling over the sequence (VPU reduce, no MXU) ----
    h3 = h.reshape(b_blk, seq, H)                             # (B, S, H)
    ps = jnp.sum(h3 * poolq, axis=-1, keepdims=True)          # (B, S, 1)
    m = jnp.max(ps, axis=1, keepdims=True)
    e = jnp.exp(ps - m)
    w = e * pl.reciprocal(jnp.sum(e, axis=1, keepdims=True), approx=True)
    pooled = jnp.sum(w * h3, axis=1)                          # (B, H)

    # ---- classifier: Linear + GELU + (dropout=id) + Linear (lane-padded) ----
    cw = cw_ref[...]                                          # (H, OUT_PAD + H)
    c1w = cw[:, OUT_PAD:OUT_PAD + H]                          # 128-aligned slice
    c2w = cw[:, 0:OUT_PAD]
    c = _gelu(jnp.dot(pooled, c1w, preferred_element_type=jnp.float32) + c1b)
    out_ref[...] = (
        jnp.dot(c, c2w, preferred_element_type=jnp.float32) + c2b
    )                                                         # (B_BLK, OUT_PAD)


# ------------------------------ wrapper ---------------------------------------
def _full_spec(shape):
    nd = len(shape)
    return pl.BlockSpec(shape, lambda b, _nd=nd: (0,) * _nd)


def _pick_b_blk(batch):
    """Whole batch per step on single-TC chips; two blocks on dual-TC v7x."""
    try:
        kind = jax.devices()[0].device_kind.lower()
    except Exception:
        kind = ""
    if ("v7" in kind or "7x" in kind) and batch % 2 == 0 and batch > 1:
        return batch // 2
    return batch


def _make_mask(b_blk, seq):
    """Additive block-diagonal mask: 0 within a sample, -1e30 across samples."""
    bs = b_blk * seq
    sample = jnp.arange(bs, dtype=jnp.int32) // seq
    same = sample[:, None] == sample[None, :]
    return jnp.where(same, 0.0, -1e30).astype(jnp.float32)


def persformer_forward(x, params, b_blk=None):
    """x: (B, S, INPUT_SIZE) float32 -> logits (B, OUTPUT_SIZE) float32."""
    B, S, F = x.shape
    H = HIDDEN
    if b_blk is None:
        b_blk = _pick_b_blk(B)
    b_blk = min(b_blk, B)
    assert B % b_blk == 0, "batch must be divisible by the block size"

    # ---- host-side packing ----
    # per-layer weights along lanes: [wqkv | wo | f1w | f2w] -> (L, H, 6H)
    lw = jnp.concatenate(
        [params["wq"], params["wk"], params["wv"], params["wo"],
         params["f1w"], params["f2w"]], axis=-1)
    # per-layer biases as rows: (L, 6, H) = bq, bk, bv, bo, f1b, f2b
    lb = jnp.stack(
        [params["bq"], params["bk"], params["bv"],
         params["bo"], params["f1b"], params["f2b"]], axis=1)
    # misc biases, lane-padded: rows emb_b, c1b, pool_q, c2b
    misc = jnp.zeros((4, OUT_PAD), jnp.float32)
    misc = misc.at[0, :H].set(params["emb_b"][0])
    misc = misc.at[1, :H].set(params["c1b"][0])
    misc = misc.at[2, :H].set(params["pool_q"][0])
    misc = misc.at[3, :OUTPUT_SIZE].set(params["c2b"][0])
    # classifier weights: [c2w_padded (OUT_PAD lanes) | c1w (H lanes)]
    c2w_p = jnp.zeros((H, OUT_PAD), jnp.float32).at[:, :OUTPUT_SIZE].set(
        params["c2w"])
    cw = jnp.concatenate([c2w_p, params["c1w"]], axis=1)       # (H, OUT_PAD+H)

    mask = _make_mask(b_blk, S)

    weight_args = [mask, params["emb_w"], lw, lb, misc, cw]

    in_specs = [pl.BlockSpec((b_blk, S, F), lambda b: (b, 0, 0))] + [
        _full_spec(w.shape) for w in weight_args
    ]
    out = pl.pallas_call(
        persformer_kernel,
        out_shape=jax.ShapeDtypeStruct((B, OUT_PAD), jnp.float32),
        grid=(B // b_blk,),
        in_specs=in_specs,
        out_specs=pl.BlockSpec((b_blk, OUT_PAD), lambda b: (b, 0)),
        compiler_params=pltpu.CompilerParams(
            dimension_semantics=("parallel",)   # independent batch blocks
        ),
    )(x, *weight_args)
    return out[:, :OUTPUT_SIZE]


# ----------------------- deterministic parameter init -------------------------
def init_params(key):
    keys = iter(jax.random.split(key, 32))

    def w(shape, scale=0.05):
        return scale * jax.random.normal(next(keys), shape, jnp.float32)

    params = {
        "emb_w": w((INPUT_SIZE, HIDDEN)),
        "emb_b": w((1, HIDDEN), 0.02),
        "wq": w((NUM_LAYERS, HIDDEN, HIDDEN)),
        "bq": w((NUM_LAYERS, HIDDEN), 0.02),
        "wk": w((NUM_LAYERS, HIDDEN, HIDDEN)),
        "bk": w((NUM_LAYERS, HIDDEN), 0.02),
        "wv": w((NUM_LAYERS, HIDDEN, HIDDEN)),
        "bv": w((NUM_LAYERS, HIDDEN), 0.02),
        "wo": w((NUM_LAYERS, HIDDEN, HIDDEN)),
        "bo": w((NUM_LAYERS, HIDDEN), 0.02),
        "f1w": w((NUM_LAYERS, HIDDEN, INTERMEDIATE)),
        "f1b": w((NUM_LAYERS, INTERMEDIATE), 0.02),
        "f2w": w((NUM_LAYERS, INTERMEDIATE, HIDDEN)),
        "f2b": w((NUM_LAYERS, HIDDEN), 0.02),
        "pool_q": w((1, HIDDEN)),
        "c1w": w((HIDDEN, HIDDEN)),
        "c1b": w((1, HIDDEN), 0.02),
        "c2w": w((HIDDEN, OUTPUT_SIZE)),
        "c2b": w((1, OUTPUT_SIZE), 0.02),
    }
    return params


# ---------------------------- pure-JAX reference ------------------------------
def reference_forward(x, p):
    dot = functools.partial(jnp.matmul, precision=jax.lax.Precision.HIGHEST)
    h = _gelu(dot(x, p["emb_w"]) + p["emb_b"])                   # (B, S, H)
    scale = 1.0 / jnp.sqrt(jnp.float32(HEAD_DIM))
    for l in range(NUM_LAYERS):
        q = dot(h, p["wq"][l]) + p["bq"][l]
        k = dot(h, p["wk"][l]) + p["bk"][l]
        v = dot(h, p["wv"][l]) + p["bv"][l]
        B, S, _ = q.shape
        qh = q.reshape(B, S, NUM_HEADS, HEAD_DIM)
        kh = k.reshape(B, S, NUM_HEADS, HEAD_DIM)
        vh = v.reshape(B, S, NUM_HEADS, HEAD_DIM)
        scores = jnp.einsum("bqnd,bknd->bnqk", qh, kh,
                            precision=jax.lax.Precision.HIGHEST) * scale
        probs = jax.nn.softmax(scores, axis=-1)
        ao = jnp.einsum("bnqk,bknd->bqnd", probs, vh,
                        precision=jax.lax.Precision.HIGHEST).reshape(B, S, HIDDEN)
        h = dot(ao, p["wo"][l]) + p["bo"][l] + h
        ff = _gelu(dot(h, p["f1w"][l]) + p["f1b"][l])
        h = dot(ff, p["f2w"][l]) + p["f2b"][l] + h
    pool_scores = jnp.sum(h * p["pool_q"], axis=-1, keepdims=True)   # (B, S, 1)
    probs = jax.nn.softmax(pool_scores, axis=1)
    pooled = jnp.sum(probs * h, axis=1)                              # (B, H)
    c = _gelu(dot(pooled, p["c1w"]) + p["c1b"])
    return dot(c, p["c2w"]) + p["c2b"]                               # (B, OUTPUT_SIZE)


# --------------------------------- main ---------------------------------------
if __name__ == "__main__":
    key = jax.random.PRNGKey(0)
    k_x, k_p = jax.random.split(key)
    # input_batch: (batch_size, sequence_length, 2 + num_homology_types)
    x = jax.random.normal(k_x, (BATCH, SEQ, INPUT_SIZE), jnp.float32)
    params = init_params(k_p)

    out = persformer_forward(x, params)
    out = jax.block_until_ready(out)

    ref = jax.block_until_ready(reference_forward(x, params))
    assert out.shape == (BATCH, OUTPUT_SIZE), out.shape
    assert jnp.allclose(out, ref, rtol=1e-2, atol=1e-2), (
        f"max abs diff {jnp.max(jnp.abs(out - ref))}"
    )
    print("KERNEL_OK")
</pallas_src>

<mosaic_0001>
module attributes {stable_mosaic.version = 11 : i64} {
  func.func @persformer_kernel(%arg0: i32, %arg1: memref<16x8x6xf32, #tpu.memory_space<vmem>>, %arg2: memref<128x128xf32, #tpu.memory_space<vmem>>, %arg3: memref<6x32xf32, #tpu.memory_space<vmem>>, %arg4: memref<2x32x192xf32, #tpu.memory_space<vmem>>, %arg5: memref<2x6x32xf32, #tpu.memory_space<vmem>>, %arg6: memref<4x128xf32, #tpu.memory_space<vmem>>, %arg7: memref<32x160xf32, #tpu.memory_space<vmem>>, %arg8: memref<16x128xf32, #tpu.memory_space<vmem>>) attributes {dimension_semantics = [#tpu.dimension_semantics<parallel>], iteration_bounds = array<i64: 1>, scalar_prefetch = 0 : i64, scratch_operands = 0 : i64, tpu.core_type = #tpu.core_type<tc>, window_params = [{transform_indices = @transform_0, window_bounds = array<i64: 16, 8, 6>}, {pipeline_mode = #tpu.pipeline_mode<synchronous>, transform_indices = @transform_1, window_bounds = array<i64: 128, 128>}, {pipeline_mode = #tpu.pipeline_mode<synchronous>, transform_indices = @transform_2, window_bounds = array<i64: 6, 32>}, {pipeline_mode = #tpu.pipeline_mode<synchronous>, transform_indices = @transform_3, window_bounds = array<i64: 2, 32, 192>}, {pipeline_mode = #tpu.pipeline_mode<synchronous>, transform_indices = @transform_4, window_bounds = array<i64: 2, 6, 32>}, {pipeline_mode = #tpu.pipeline_mode<synchronous>, transform_indices = @transform_5, window_bounds = array<i64: 4, 128>}, {pipeline_mode = #tpu.pipeline_mode<synchronous>, transform_indices = @transform_6, window_bounds = array<i64: 32, 160>}, {transform_indices = @transform_7, window_bounds = array<i64: 16, 128>}]} {
    %c0 = arith.constant 0 : index
    %c0_0 = arith.constant 0 : index
    %c0_1 = arith.constant 0 : index
    %0 = vector.load %arg1[%c0, %c0_0, %c0_1] : memref<16x8x6xf32, #tpu.memory_space<vmem>>, vector<16x8x6xf32>
    %1 = vector.shape_cast %0 : vector<16x8x6xf32> to vector<128x6xf32>
    %c0_2 = arith.constant 0 : index
    %c0_3 = arith.constant 0 : index
    %2 = vector.load %arg2[%c0_2, %c0_3] : memref<128x128xf32, #tpu.memory_space<vmem>>, vector<128x128xf32>
    %c0_4 = arith.constant 0 : index
    %c0_5 = arith.constant 0 : index
    %3 = vector.load %arg6[%c0_4, %c0_5] : memref<4x128xf32, #tpu.memory_space<vmem>>, vector<4x128xf32>
    %4 = vector.extract_strided_slice %3 {offsets = [0, 0], sizes = [1, 32], strides = [1, 1]} : vector<4x128xf32> to vector<1x32xf32>
    %5 = vector.extract_strided_slice %3 {offsets = [1, 0], sizes = [1, 32], strides = [1, 1]} : vector<4x128xf32> to vector<1x32xf32>
    %6 = vector.extract_strided_slice %3 {offsets = [2, 0], sizes = [1, 32], strides = [1, 1]} : vector<4x128xf32> to vector<1x32xf32>
    %7 = vector.extract_strided_slice %3 {offsets = [3, 0], sizes = [1, 128], strides = [1, 1]} : vector<4x128xf32> to vector<1x128xf32>
    %c0_6 = arith.constant 0 : index
    %c0_7 = arith.constant 0 : index
    %8 = vector.load %arg3[%c0_6, %c0_7] : memref<6x32xf32, #tpu.memory_space<vmem>>, vector<6x32xf32>
    %cst = arith.constant dense<0.000000e+00> : vector<128x32xf32>
    %9 = tpu.matmul %1, %8, %cst {dimension_numbers = #tpu.dot_dimension_numbers<[1], [0], [0], [1], [0, 0, 1, 1], [], []>} : vector<128x6xf32>, vector<6x32xf32>, vector<128x32xf32> -> vector<128x32xf32>
    %10 = vector.broadcast %4 : vector<1x32xf32> to vector<128x32xf32>
    %11 = arith.addf %9, %10 : vector<128x32xf32>
    %cst_8 = arith.constant 5.000000e-01 : f32
    %12 = vector.broadcast %cst_8 : f32 to vector<128x32xf32>
    %13 = arith.mulf %12, %11 : vector<128x32xf32>
    %cst_9 = arith.constant 2.000000e+00 : f32
    %14 = math.sqrt %cst_9 : f32
    %15 = vector.broadcast %14 : f32 to vector<128x32xf32>
    %16 = arith.divf %11, %15 : vector<128x32xf32>
    %17 = math.erf %16 : vector<128x32xf32>
    %cst_10 = arith.constant 1.000000e+00 : f32
    %18 = vector.broadcast %cst_10 : f32 to vector<128x32xf32>
    %19 = arith.addf %18, %17 : vector<128x32xf32>
    %20 = arith.mulf %13, %19 : vector<128x32xf32>
    %cst_11 = arith.constant 8.000000e+00 : f32
    %cst_12 = arith.constant -5.000000e-01 : f32
    %21 = math.powf %cst_11, %cst_12 : f32
    %c0_13 = arith.constant 0 : index
    %c0_14 = arith.constant 0 : index
    %c0_15 = arith.constant 0 : index
    %22 = vector.load %arg4[%c0_13, %c0_14, %c0_15] : memref<2x32x192xf32, #tpu.memory_space<vmem>>, vector<1x32x192xf32>
    %23 = vector.shape_cast %22 : vector<1x32x192xf32> to vector<32x192xf32>
    %c0_16 = arith.constant 0 : index
    %c0_17 = arith.constant 0 : index
    %c0_18 = arith.constant 0 : index
    %24 = vector.load %arg5[%c0_16, %c0_17, %c0_18] : memref<2x6x32xf32, #tpu.memory_space<vmem>>, vector<1x6x32xf32>
    %25 = vector.shape_cast %24 : vector<1x6x32xf32> to vector<6x32xf32>
    %26 = vector.extract_strided_slice %23 {offsets = [0, 0], sizes = [32, 96], strides = [1, 1]} : vector<32x192xf32> to vector<32x96xf32>
    %27 = vector.extract_strided_slice %23 {offsets = [0, 96], sizes = [32, 32], strides = [1, 1]} : vector<32x192xf32> to vector<32x32xf32>
    %28 = vector.extract_strided_slice %23 {offsets = [0, 128], sizes = [32, 32], strides = [1, 1]} : vector<32x192xf32> to vector<32x32xf32>
    %29 = vector.extract_strided_slice %23 {offsets = [0, 160], sizes = [32, 32], strides = [1, 1]} : vector<32x192xf32> to vector<32x32xf32>
    %cst_19 = arith.constant dense<0.000000e+00> : vector<128x96xf32>
    %30 = tpu.matmul %20, %26, %cst_19 {dimension_numbers = #tpu.dot_dimension_numbers<[1], [0], [0], [1], [0, 0, 1, 1], [], []>} : vector<128x32xf32>, vector<32x96xf32>, vector<128x96xf32> -> vector<128x96xf32>
    %31 = vector.extract_strided_slice %30 {offsets = [0, 0], sizes = [128, 32], strides = [1, 1]} : vector<128x96xf32> to vector<128x32xf32>
    %32 = vector.extract_strided_slice %25 {offsets = [0, 0], sizes = [1, 32], strides = [1, 1]} : vector<6x32xf32> to vector<1x32xf32>
    %33 = vector.broadcast %32 : vector<1x32xf32> to vector<128x32xf32>
    %34 = arith.addf %31, %33 : vector<128x32xf32>
    %35 = vector.extract_strided_slice %30 {offsets = [0, 32], sizes = [128, 32], strides = [1, 1]} : vector<128x96xf32> to vector<128x32xf32>
    %36 = vector.extract_strided_slice %25 {offsets = [1, 0], sizes = [1, 32], strides = [1, 1]} : vector<6x32xf32> to vector<1x32xf32>
    %37 = vector.broadcast %36 : vector<1x32xf32> to vector<128x32xf32>
    %38 = arith.addf %35, %37 : vector<128x32xf32>
    %39 = vector.extract_strided_slice %30 {offsets = [0, 64], sizes = [128, 32], strides = [1, 1]} : vector<128x96xf32> to vector<128x32xf32>
    %40 = vector.extract_strided_slice %25 {offsets = [2, 0], sizes = [1, 32], strides = [1, 1]} : vector<6x32xf32> to vector<1x32xf32>
    %41 = vector.broadcast %40 : vector<1x32xf32> to vector<128x32xf32>
    %42 = arith.addf %39, %41 : vector<128x32xf32>
    %43 = tpu.transpose %38, [1, 0] : vector<128x32xf32> -> vector<32x128xf32>
    %cst_20 = arith.constant 0.000000e+00 : f32
    %44 = vector.broadcast %cst_20 : f32 to vector<128x32xf32>
    %45 = vector.extract_strided_slice %34 {offsets = [0, 0], sizes = [128, 8], strides = [1, 1]} : vector<128x32xf32> to vector<128x8xf32>
    %46 = vector.extract_strided_slice %43 {offsets = [0, 0], sizes = [8, 128], strides = [1, 1]} : vector<32x128xf32> to vector<8x128xf32>
    %47 = vector.extract_strided_slice %42 {offsets = [0, 0], sizes = [128, 8], strides = [1, 1]} : vector<128x32xf32> to vector<128x8xf32>
    %cst_21 = arith.constant dense<0.000000e+00> : vector<128x128xf32>
    %48 = tpu.matmul %45, %46, %cst_21 {dimension_numbers = #tpu.dot_dimension_numbers<[1], [0], [0], [1], [0, 0, 1, 1], [], []>} : vector<128x8xf32>, vector<8x128xf32>, vector<128x128xf32> -> vector<128x128xf32>
    %49 = vector.broadcast %21 : f32 to vector<128x128xf32>
    %50 = arith.mulf %48, %49 : vector<128x128xf32>
    %51 = arith.addf %50, %2 : vector<128x128xf32>
    %cst_22 = arith.constant dense<0xFF800000> : vector<128xf32>
    %52 = vector.multi_reduction <maximumf>, %51, %cst_22 [1] : vector<128x128xf32> to vector<128xf32>
    %53 = vector.shape_cast %52 : vector<128xf32> to vector<128x1xf32>
    %54 = vector.broadcast %53 : vector<128x1xf32> to vector<128x128xf32>
    %55 = arith.subf %51, %54 : vector<128x128xf32>
    %56 = math.exp %55 : vector<128x128xf32>
    %cst_23 = arith.constant dense<0.000000e+00> : vector<128xf32>
    %57 = vector.multi_reduction <add>, %56, %cst_23 [1] : vector<128x128xf32> to vector<128xf32>
    %58 = vector.shape_cast %57 : vector<128xf32> to vector<128x1xf32>
    %59 = tpu.reciprocal %58 {approx = true} : vector<128x1xf32> -> vector<128x1xf32>
    %60 = vector.broadcast %59 : vector<128x1xf32> to vector<128x128xf32>
    %61 = arith.mulf %56, %60 : vector<128x128xf32>
    %cst_24 = arith.constant dense<0.000000e+00> : vector<128x8xf32>
    %62 = tpu.matmul %61, %47, %cst_24 {dimension_numbers = #tpu.dot_dimension_numbers<[1], [0], [0], [1], [0, 0, 1, 1], [], []>} : vector<128x128xf32>, vector<128x8xf32>, vector<128x8xf32> -> vector<128x8xf32>
    %63 = vector.extract_strided_slice %27 {offsets = [0, 0], sizes = [8, 32], strides = [1, 1]} : vector<32x32xf32> to vector<8x32xf32>
    %cst_25 = arith.constant dense<0.000000e+00> : vector<128x32xf32>
    %64 = tpu.matmul %62, %63, %cst_25 {dimension_numbers = #tpu.dot_dimension_numbers<[1], [0], [0], [1], [0, 0, 1, 1], [], []>} : vector<128x8xf32>, vector<8x32xf32>, vector<128x32xf32> -> vector<128x32xf32>
    %65 = arith.addf %44, %64 : vector<128x32xf32>
    %66 = vector.extract_strided_slice %34 {offsets = [0, 8], sizes = [128, 8], strides = [1, 1]} : vector<128x32xf32> to vector<128x8xf32>
    %67 = vector.extract_strided_slice %43 {offsets = [8, 0], sizes = [8, 128], strides = [1, 1]} : vector<32x128xf32> to vector<8x128xf32>
    %68 = vector.extract_strided_slice %42 {offsets = [0, 8], sizes = [128, 8], strides = [1, 1]} : vector<128x32xf32> to vector<128x8xf32>
    %cst_26 = arith.constant dense<0.000000e+00> : vector<128x128xf32>
    %69 = tpu.matmul %66, %67, %cst_26 {dimension_numbers = #tpu.dot_dimension_numbers<[1], [0], [0], [1], [0, 0, 1, 1], [], []>} : vector<128x8xf32>, vector<8x128xf32>, vector<128x128xf32> -> vector<128x128xf32>
    %70 = vector.broadcast %21 : f32 to vector<128x128xf32>
    %71 = arith.mulf %69, %70 : vector<128x128xf32>
    %72 = arith.addf %71, %2 : vector<128x128xf32>
    %cst_27 = arith.constant dense<0xFF800000> : vector<128xf32>
    %73 = vector.multi_reduction <maximumf>, %72, %cst_27 [1] : vector<128x128xf32> to vector<128xf32>
    %74 = vector.shape_cast %73 : vector<128xf32> to vector<128x1xf32>
    %75 = vector.broadcast %74 : vector<128x1xf32> to vector<128x128xf32>
    %76 = arith.subf %72, %75 : vector<128x128xf32>
    %77 = math.exp %76 : vector<128x128xf32>
    %cst_28 = arith.constant dense<0.000000e+00> : vector<128xf32>
    %78 = vector.multi_reduction <add>, %77, %cst_28 [1] : vector<128x128xf32> to vector<128xf32>
    %79 = vector.shape_cast %78 : vector<128xf32> to vector<128x1xf32>
    %80 = tpu.reciprocal %79 {approx = true} : vector<128x1xf32> -> vector<128x1xf32>
    %81 = vector.broadcast %80 : vector<128x1xf32> to vector<128x128xf32>
    %82 = arith.mulf %77, %81 : vector<128x128xf32>
    %cst_29 = arith.constant dense<0.000000e+00> : vector<128x8xf32>
    %83 = tpu.matmul %82, %68, %cst_29 {dimension_numbers = #tpu.dot_dimension_numbers<[1], [0], [0], [1], [0, 0, 1, 1], [], []>} : vector<128x128xf32>, vector<128x8xf32>, vector<128x8xf32> -> vector<128x8xf32>
    %84 = vector.extract_strided_slice %27 {offsets = [8, 0], sizes = [8, 32], strides = [1, 1]} : vector<32x32xf32> to vector<8x32xf32>
    %cst_30 = arith.constant dense<0.000000e+00> : vector<128x32xf32>
    %85 = tpu.matmul %83, %84, %cst_30 {dimension_numbers = #tpu.dot_dimension_numbers<[1], [0], [0], [1], [0, 0, 1, 1], [], []>} : vector<128x8xf32>, vector<8x32xf32>, vector<128x32xf32> -> vector<128x32xf32>
    %86 = arith.addf %65, %85 : vector<128x32xf32>
    %87 = vector.extract_strided_slice %34 {offsets = [0, 16], sizes = [128, 8], strides = [1, 1]} : vector<128x32xf32> to vector<128x8xf32>
    %88 = vector.extract_strided_slice %43 {offsets = [16, 0], sizes = [8, 128], strides = [1, 1]} : vector<32x128xf32> to vector<8x128xf32>
    %89 = vector.extract_strided_slice %42 {offsets = [0, 16], sizes = [128, 8], strides = [1, 1]} : vector<128x32xf32> to vector<128x8xf32>
    %cst_31 = arith.constant dense<0.000000e+00> : vector<128x128xf32>
    %90 = tpu.matmul %87, %88, %cst_31 {dimension_numbers = #tpu.dot_dimension_numbers<[1], [0], [0], [1], [0, 0, 1, 1], [], []>} : vector<128x8xf32>, vector<8x128xf32>, vector<128x128xf32> -> vector<128x128xf32>
    %91 = vector.broadcast %21 : f32 to vector<128x128xf32>
    %92 = arith.mulf %90, %91 : vector<128x128xf32>
    %93 = arith.addf %92, %2 : vector<128x128xf32>
    %cst_32 = arith.constant dense<0xFF800000> : vector<128xf32>
    %94 = vector.multi_reduction <maximumf>, %93, %cst_32 [1] : vector<128x128xf32> to vector<128xf32>
    %95 = vector.shape_cast %94 : vector<128xf32> to vector<128x1xf32>
    %96 = vector.broadcast %95 : vector<128x1xf32> to vector<128x128xf32>
    %97 = arith.subf %93, %96 : vector<128x128xf32>
    %98 = math.exp %97 : vector<128x128xf32>
    %cst_33 = arith.constant dense<0.000000e+00> : vector<128xf32>
    %99 = vector.multi_reduction <add>, %98, %cst_33 [1] : vector<128x128xf32> to vector<128xf32>
    %100 = vector.shape_cast %99 : vector<128xf32> to vector<128x1xf32>
    %101 = tpu.reciprocal %100 {approx = true} : vector<128x1xf32> -> vector<128x1xf32>
    %102 = vector.broadcast %101 : vector<128x1xf32> to vector<128x128xf32>
    %103 = arith.mulf %98, %102 : vector<128x128xf32>
    %cst_34 = arith.constant dense<0.000000e+00> : vector<128x8xf32>
    %104 = tpu.matmul %103, %89, %cst_34 {dimension_numbers = #tpu.dot_dimension_numbers<[1], [0], [0], [1], [0, 0, 1, 1], [], []>} : vector<128x128xf32>, vector<128x8xf32>, vector<128x8xf32> -> vector<128x8xf32>
    %105 = vector.extract_strided_slice %27 {offsets = [16, 0], sizes = [8, 32], strides = [1, 1]} : vector<32x32xf32> to vector<8x32xf32>
    %cst_35 = arith.constant dense<0.000000e+00> : vector<128x32xf32>
    %106 = tpu.matmul %104, %105, %cst_35 {dimension_numbers = #tpu.dot_dimension_numbers<[1], [0], [0], [1], [0, 0, 1, 1], [], []>} : vector<128x8xf32>, vector<8x32xf32>, vector<128x32xf32> -> vector<128x32xf32>
    %107 = arith.addf %86, %106 : vector<128x32xf32>
    %108 = vector.extract_strided_slice %34 {offsets = [0, 24], sizes = [128, 8], strides = [1, 1]} : vector<128x32xf32> to vector<128x8xf32>
    %109 = vector.extract_strided_slice %43 {offsets = [24, 0], sizes = [8, 128], strides = [1, 1]} : vector<32x128xf32> to vector<8x128xf32>
    %110 = vector.extract_strided_slice %42 {offsets = [0, 24], sizes = [128, 8], strides = [1, 1]} : vector<128x32xf32> to vector<128x8xf32>
    %cst_36 = arith.constant dense<0.000000e+00> : vector<128x128xf32>
    %111 = tpu.matmul %108, %109, %cst_36 {dimension_numbers = #tpu.dot_dimension_numbers<[1], [0], [0], [1], [0, 0, 1, 1], [], []>} : vector<128x8xf32>, vector<8x128xf32>, vector<128x128xf32> -> vector<128x128xf32>
    %112 = vector.broadcast %21 : f32 to vector<128x128xf32>
    %113 = arith.mulf %111, %112 : vector<128x128xf32>
    %114 = arith.addf %113, %2 : vector<128x128xf32>
    %cst_37 = arith.constant dense<0xFF800000> : vector<128xf32>
    %115 = vector.multi_reduction <maximumf>, %114, %cst_37 [1] : vector<128x128xf32> to vector<128xf32>
    %116 = vector.shape_cast %115 : vector<128xf32> to vector<128x1xf32>
    %117 = vector.broadcast %116 : vector<128x1xf32> to vector<128x128xf32>
    %118 = arith.subf %114, %117 : vector<128x128xf32>
    %119 = math.exp %118 : vector<128x128xf32>
    %cst_38 = arith.constant dense<0.000000e+00> : vector<128xf32>
    %120 = vector.multi_reduction <add>, %119, %cst_38 [1] : vector<128x128xf32> to vector<128xf32>
    %121 = vector.shape_cast %120 : vector<128xf32> to vector<128x1xf32>
    %122 = tpu.reciprocal %121 {approx = true} : vector<128x1xf32> -> vector<128x1xf32>
    %123 = vector.broadcast %122 : vector<128x1xf32> to vector<128x128xf32>
    %124 = arith.mulf %119, %123 : vector<128x128xf32>
    %cst_39 = arith.constant dense<0.000000e+00> : vector<128x8xf32>
    %125 = tpu.matmul %124, %110, %cst_39 {dimension_numbers = #tpu.dot_dimension_numbers<[1], [0], [0], [1], [0, 0, 1, 1], [], []>} : vector<128x128xf32>, vector<128x8xf32>, vector<128x8xf32> -> vector<128x8xf32>
    %126 = vector.extract_strided_slice %27 {offsets = [24, 0], sizes = [8, 32], strides = [1, 1]} : vector<32x32xf32> to vector<8x32xf32>
    %cst_40 = arith.constant dense<0.000000e+00> : vector<128x32xf32>
    %127 = tpu.matmul %125, %126, %cst_40 {dimension_numbers = #tpu.dot_dimension_numbers<[1], [0], [0], [1], [0, 0, 1, 1], [], []>} : vector<128x8xf32>, vector<8x32xf32>, vector<128x32xf32> -> vector<128x32xf32>
    %128 = arith.addf %107, %127 : vector<128x32xf32>
    %129 = vector.extract_strided_slice %25 {offsets = [3, 0], sizes = [1, 32], strides = [1, 1]} : vector<6x32xf32> to vector<1x32xf32>
    %130 = vector.broadcast %129 : vector<1x32xf32> to vector<128x32xf32>
    %131 = arith.addf %128, %130 : vector<128x32xf32>
    %132 = arith.addf %131, %20 : vector<128x32xf32>
    %cst_41 = arith.constant dense<0.000000e+00> : vector<128x32xf32>
    %133 = tpu.matmul %132, %28, %cst_41 {dimension_numbers = #tpu.dot_dimension_numbers<[1], [0], [0], [1], [0, 0, 1, 1], [], []>} : vector<128x32xf32>, vector<32x32xf32>, vector<128x32xf32> -> vector<128x32xf32>
    %134 = vector.extract_strided_slice %25 {offsets = [4, 0], sizes = [1, 32], strides = [1, 1]} : vector<6x32xf32> to vector<1x32xf32>
    %135 = vector.broadcast %134 : vector<1x32xf32> to vector<128x32xf32>
    %136 = arith.addf %133, %135 : vector<128x32xf32>
    %cst_42 = arith.constant 5.000000e-01 : f32
    %137 = vector.broadcast %cst_42 : f32 to vector<128x32xf32>
    %138 = arith.mulf %137, %136 : vector<128x32xf32>
    %cst_43 = arith.constant 2.000000e+00 : f32
    %139 = math.sqrt %cst_43 : f32
    %140 = vector.broadcast %139 : f32 to vector<128x32xf32>
    %141 = arith.divf %136, %140 : vector<128x32xf32>
    %142 = math.erf %141 : vector<128x32xf32>
    %cst_44 = arith.constant 1.000000e+00 : f32
    %143 = vector.broadcast %cst_44 : f32 to vector<128x32xf32>
    %144 = arith.addf %143, %142 : vector<128x32xf32>
    %145 = arith.mulf %138, %144 : vector<128x32xf32>
    %cst_45 = arith.constant dense<0.000000e+00> : vector<128x32xf32>
    %146 = tpu.matmul %145, %29, %cst_45 {dimension_numbers = #tpu.dot_dimension_numbers<[1], [0], [0], [1], [0, 0, 1, 1], [], []>} : vector<128x32xf32>, vector<32x32xf32>, vector<128x32xf32> -> vector<128x32xf32>
    %147 = vector.extract_strided_slice %25 {offsets = [5, 0], sizes = [1, 32], strides = [1, 1]} : vector<6x32xf32> to vector<1x32xf32>
    %148 = vector.broadcast %147 : vector<1x32xf32> to vector<128x32xf32>
    %149 = arith.addf %146, %148 : vector<128x32xf32>
    %150 = arith.addf %149, %132 : vector<128x32xf32>
    %c1 = arith.constant 1 : index
    %c0_46 = arith.constant 0 : index
    %c0_47 = arith.constant 0 : index
    %151 = vector.load %arg4[%c1, %c0_46, %c0_47] : memref<2x32x192xf32, #tpu.memory_space<vmem>>, vector<1x32x192xf32>
    %152 = vector.shape_cast %151 : vector<1x32x192xf32> to vector<32x192xf32>
    %c1_48 = arith.constant 1 : index
    %c0_49 = arith.constant 0 : index
    %c0_50 = arith.constant 0 : index
    %153 = vector.load %arg5[%c1_48, %c0_49, %c0_50] : memref<2x6x32xf32, #tpu.memory_space<vmem>>, vector<1x6x32xf32>
    %154 = vector.shape_cast %153 : vector<1x6x32xf32> to vector<6x32xf32>
    %155 = vector.extract_strided_slice %152 {offsets = [0, 0], sizes = [32, 96], strides = [1, 1]} : vector<32x192xf32> to vector<32x96xf32>
    %156 = vector.extract_strided_slice %152 {offsets = [0, 96], sizes = [32, 32], strides = [1, 1]} : vector<32x192xf32> to vector<32x32xf32>
    %157 = vector.extract_strided_slice %152 {offsets = [0, 128], sizes = [32, 32], strides = [1, 1]} : vector<32x192xf32> to vector<32x32xf32>
    %158 = vector.extract_strided_slice %152 {offsets = [0, 160], sizes = [32, 32], strides = [1, 1]} : vector<32x192xf32> to vector<32x32xf32>
    %cst_51 = arith.constant dense<0.000000e+00> : vector<128x96xf32>
    %159 = tpu.matmul %150, %155, %cst_51 {dimension_numbers = #tpu.dot_dimension_numbers<[1], [0], [0], [1], [0, 0, 1, 1], [], []>} : vector<128x32xf32>, vector<32x96xf32>, vector<128x96xf32> -> vector<128x96xf32>
    %160 = vector.extract_strided_slice %159 {offsets = [0, 0], sizes = [128, 32], strides = [1, 1]} : vector<128x96xf32> to vector<128x32xf32>
    %161 = vector.extract_strided_slice %154 {offsets = [0, 0], sizes = [1, 32], strides = [1, 1]} : vector<6x32xf32> to vector<1x32xf32>
    %162 = vector.broadcast %161 : vector<1x32xf32> to vector<128x32xf32>
    %163 = arith.addf %160, %162 : vector<128x32xf32>
    %164 = vector.extract_strided_slice %159 {offsets = [0, 32], sizes = [128, 32], strides = [1, 1]} : vector<128x96xf32> to vector<128x32xf32>
    %165 = vector.extract_strided_slice %154 {offsets = [1, 0], sizes = [1, 32], strides = [1, 1]} : vector<6x32xf32> to vector<1x32xf32>
    %166 = vector.broadcast %165 : vector<1x32xf32> to vector<128x32xf32>
    %167 = arith.addf %164, %166 : vector<128x32xf32>
    %168 = vector.extract_strided_slice %159 {offsets = [0, 64], sizes = [128, 32], strides = [1, 1]} : vector<128x96xf32> to vector<128x32xf32>
    %169 = vector.extract_strided_slice %154 {offsets = [2, 0], sizes = [1, 32], strides = [1, 1]} : vector<6x32xf32> to vector<1x32xf32>
    %170 = vector.broadcast %169 : vector<1x32xf32> to vector<128x32xf32>
    %171 = arith.addf %168, %170 : vector<128x32xf32>
    %172 = tpu.transpose %167, [1, 0] : vector<128x32xf32> -> vector<32x128xf32>
    %cst_52 = arith.constant 0.000000e+00 : f32
    %173 = vector.broadcast %cst_52 : f32 to vector<128x32xf32>
    %174 = vector.extract_strided_slice %163 {offsets = [0, 0], sizes = [128, 8], strides = [1, 1]} : vector<128x32xf32> to vector<128x8xf32>
    %175 = vector.extract_strided_slice %172 {offsets = [0, 0], sizes = [8, 128], strides = [1, 1]} : vector<32x128xf32> to vector<8x128xf32>
    %176 = vector.extract_strided_slice %171 {offsets = [0, 0], sizes = [128, 8], strides = [1, 1]} : vector<128x32xf32> to vector<128x8xf32>
    %cst_53 = arith.constant dense<0.000000e+00> : vector<128x128xf32>
    %177 = tpu.matmul %174, %175, %cst_53 {dimension_numbers = #tpu.dot_dimension_numbers<[1], [0], [0], [1], [0, 0, 1, 1], [], []>} : vector<128x8xf32>, vector<8x128xf32>, vector<128x128xf32> -> vector<128x128xf32>
    %178 = vector.broadcast %21 : f32 to vector<128x128xf32>
    %179 = arith.mulf %177, %178 : vector<128x128xf32>
    %180 = arith.addf %179, %2 : vector<128x128xf32>
    %cst_54 = arith.constant dense<0xFF800000> : vector<128xf32>
    %181 = vector.multi_reduction <maximumf>, %180, %cst_54 [1] : vector<128x128xf32> to vector<128xf32>
    %182 = vector.shape_cast %181 : vector<128xf32> to vector<128x1xf32>
    %183 = vector.broadcast %182 : vector<128x1xf32> to vector<128x128xf32>
    %184 = arith.subf %180, %183 : vector<128x128xf32>
    %185 = math.exp %184 : vector<128x128xf32>
    %cst_55 = arith.constant dense<0.000000e+00> : vector<128xf32>
    %186 = vector.multi_reduction <add>, %185, %cst_55 [1] : vector<128x128xf32> to vector<128xf32>
    %187 = vector.shape_cast %186 : vector<128xf32> to vector<128x1xf32>
    %188 = tpu.reciprocal %187 {approx = true} : vector<128x1xf32> -> vector<128x1xf32>
    %189 = vector.broadcast %188 : vector<128x1xf32> to vector<128x128xf32>
    %190 = arith.mulf %185, %189 : vector<128x128xf32>
    %cst_56 = arith.constant dense<0.000000e+00> : vector<128x8xf32>
    %191 = tpu.matmul %190, %176, %cst_56 {dimension_numbers = #tpu.dot_dimension_numbers<[1], [0], [0], [1], [0, 0, 1, 1], [], []>} : vector<128x128xf32>, vector<128x8xf32>, vector<128x8xf32> -> vector<128x8xf32>
    %192 = vector.extract_strided_slice %156 {offsets = [0, 0], sizes = [8, 32], strides = [1, 1]} : vector<32x32xf32> to vector<8x32xf32>
    %cst_57 = arith.constant dense<0.000000e+00> : vector<128x32xf32>
    %193 = tpu.matmul %191, %192, %cst_57 {dimension_numbers = #tpu.dot_dimension_numbers<[1], [0], [0], [1], [0, 0, 1, 1], [], []>} : vector<128x8xf32>, vector<8x32xf32>, vector<128x32xf32> -> vector<128x32xf32>
    %194 = arith.addf %173, %193 : vector<128x32xf32>
    %195 = vector.extract_strided_slice %163 {offsets = [0, 8], sizes = [128, 8], strides = [1, 1]} : vector<128x32xf32> to vector<128x8xf32>
    %196 = vector.extract_strided_slice %172 {offsets = [8, 0], sizes = [8, 128], strides = [1, 1]} : vector<32x128xf32> to vector<8x128xf32>
    %197 = vector.extract_strided_slice %171 {offsets = [0, 8], sizes = [128, 8], strides = [1, 1]} : vector<128x32xf32> to vector<128x8xf32>
    %cst_58 = arith.constant dense<0.000000e+00> : vector<128x128xf32>
    %198 = tpu.matmul %195, %196, %cst_58 {dimension_numbers = #tpu.dot_dimension_numbers<[1], [0], [0], [1], [0, 0, 1, 1], [], []>} : vector<128x8xf32>, vector<8x128xf32>, vector<128x128xf32> -> vector<128x128xf32>
    %199 = vector.broadcast %21 : f32 to vector<128x128xf32>
    %200 = arith.mulf %198, %199 : vector<128x128xf32>
    %201 = arith.addf %200, %2 : vector<128x128xf32>
    %cst_59 = arith.constant dense<0xFF800000> : vector<128xf32>
    %202 = vector.multi_reduction <maximumf>, %201, %cst_59 [1] : vector<128x128xf32> to vector<128xf32>
    %203 = vector.shape_cast %202 : vector<128xf32> to vector<128x1xf32>
    %204 = vector.broadcast %203 : vector<128x1xf32> to vector<128x128xf32>
    %205 = arith.subf %201, %204 : vector<128x128xf32>
    %206 = math.exp %205 : vector<128x128xf32>
    %cst_60 = arith.constant dense<0.000000e+00> : vector<128xf32>
    %207 = vector.multi_reduction <add>, %206, %cst_60 [1] : vector<128x128xf32> to vector<128xf32>
    %208 = vector.shape_cast %207 : vector<128xf32> to vector<128x1xf32>
    %209 = tpu.reciprocal %208 {approx = true} : vector<128x1xf32> -> vector<128x1xf32>
    %210 = vector.broadcast %209 : vector<128x1xf32> to vector<128x128xf32>
    %211 = arith.mulf %206, %210 : vector<128x128xf32>
    %cst_61 = arith.constant dense<0.000000e+00> : vector<128x8xf32>
    %212 = tpu.matmul %211, %197, %cst_61 {dimension_numbers = #tpu.dot_dimension_numbers<[1], [0], [0], [1], [0, 0, 1, 1], [], []>} : vector<128x128xf32>, vector<128x8xf32>, vector<128x8xf32> -> vector<128x8xf32>
    %213 = vector.extract_strided_slice %156 {offsets = [8, 0], sizes = [8, 32], strides = [1, 1]} : vector<32x32xf32> to vector<8x32xf32>
    %cst_62 = arith.constant dense<0.000000e+00> : vector<128x32xf32>
    %214 = tpu.matmul %212, %213, %cst_62 {dimension_numbers = #tpu.dot_dimension_numbers<[1], [0], [0], [1], [0, 0, 1, 1], [], []>} : vector<128x8xf32>, vector<8x32xf32>, vector<128x32xf32> -> vector<128x32xf32>
    %215 = arith.addf %194, %214 : vector<128x32xf32>
    %216 = vector.extract_strided_slice %163 {offsets = [0, 16], sizes = [128, 8], strides = [1, 1]} : vector<128x32xf32> to vector<128x8xf32>
    %217 = vector.extract_strided_slice %172 {offsets = [16, 0], sizes = [8, 128], strides = [1, 1]} : vector<32x128xf32> to vector<8x128xf32>
    %218 = vector.extract_strided_slice %171 {offsets = [0, 16], sizes = [128, 8], strides = [1, 1]} : vector<128x32xf32> to vector<128x8xf32>
    %cst_63 = arith.constant dense<0.000000e+00> : vector<128x128xf32>
    %219 = tpu.matmul %216, %217, %cst_63 {dimension_numbers = #tpu.dot_dimension_numbers<[1], [0], [0], [1], [0, 0, 1, 1], [], []>} : vector<128x8xf32>, vector<8x128xf32>, vector<128x128xf32> -> vector<128x128xf32>
    %220 = vector.broadcast %21 : f32 to vector<128x128xf32>
    %221 = arith.mulf %219, %220 : vector<128x128xf32>
    %222 = arith.addf %221, %2 : vector<128x128xf32>
    %cst_64 = arith.constant dense<0xFF800000> : vector<128xf32>
    %223 = vector.multi_reduction <maximumf>, %222, %cst_64 [1] : vector<128x128xf32> to vector<128xf32>
    %224 = vector.shape_cast %223 : vector<128xf32> to vector<128x1xf32>
    %225 = vector.broadcast %224 : vector<128x1xf32> to vector<128x128xf32>
    %226 = arith.subf %222, %225 : vector<128x128xf32>
    %227 = math.exp %226 : vector<128x128xf32>
    %cst_65 = arith.constant dense<0.000000e+00> : vector<128xf32>
    %228 = vector.multi_reduction <add>, %227, %cst_65 [1] : vector<128x128xf32> to vector<128xf32>
    %229 = vector.shape_cast %228 : vector<128xf32> to vector<128x1xf32>
    %230 = tpu.reciprocal %229 {approx = true} : vector<128x1xf32> -> vector<128x1xf32>
    %231 = vector.broadcast %230 : vector<128x1xf32> to vector<128x128xf32>
    %232 = arith.mulf %227, %231 : vector<128x128xf32>
    %cst_66 = arith.constant dense<0.000000e+00> : vector<128x8xf32>
    %233 = tpu.matmul %232, %218, %cst_66 {dimension_numbers = #tpu.dot_dimension_numbers<[1], [0], [0], [1], [0, 0, 1, 1], [], []>} : vector<128x128xf32>, vector<128x8xf32>, vector<128x8xf32> -> vector<128x8xf32>
    %234 = vector.extract_strided_slice %156 {offsets = [16, 0], sizes = [8, 32], strides = [1, 1]} : vector<32x32xf32> to vector<8x32xf32>
    %cst_67 = arith.constant dense<0.000000e+00> : vector<128x32xf32>
    %235 = tpu.matmul %233, %234, %cst_67 {dimension_numbers = #tpu.dot_dimension_numbers<[1], [0], [0], [1], [0, 0, 1, 1], [], []>} : vector<128x8xf32>, vector<8x32xf32>, vector<128x32xf32> -> vector<128x32xf32>
    %236 = arith.addf %215, %235 : vector<128x32xf32>
    %237 = vector.extract_strided_slice %163 {offsets = [0, 24], sizes = [128, 8], strides = [1, 1]} : vector<128x32xf32> to vector<128x8xf32>
    %238 = vector.extract_strided_slice %172 {offsets = [24, 0], sizes = [8, 128], strides = [1, 1]} : vector<32x128xf32> to vector<8x128xf32>
    %239 = vector.extract_strided_slice %171 {offsets = [0, 24], sizes = [128, 8], strides = [1, 1]} : vector<128x32xf32> to vector<128x8xf32>
    %cst_68 = arith.constant dense<0.000000e+00> : vector<128x128xf32>
    %240 = tpu.matmul %237, %238, %cst_68 {dimension_numbers = #tpu.dot_dimension_numbers<[1], [0], [0], [1], [0, 0, 1, 1], [], []>} : vector<128x8xf32>, vector<8x128xf32>, vector<128x128xf32> -> vector<128x128xf32>
    %241 = vector.broadcast %21 : f32 to vector<128x128xf32>
    %242 = arith.mulf %240, %241 : vector<128x128xf32>
    %243 = arith.addf %242, %2 : vector<128x128xf32>
    %cst_69 = arith.constant dense<0xFF800000> : vector<128xf32>
    %244 = vector.multi_reduction <maximumf>, %243, %cst_69 [1] : vector<128x128xf32> to vector<128xf32>
    %245 = vector.shape_cast %244 : vector<128xf32> to vector<128x1xf32>
    %246 = vector.broadcast %245 : vector<128x1xf32> to vector<128x128xf32>
    %247 = arith.subf %243, %246 : vector<128x128xf32>
    %248 = math.exp %247 : vector<128x128xf32>
    %cst_70 = arith.constant dense<0.000000e+00> : vector<128xf32>
    %249 = vector.multi_reduction <add>, %248, %cst_70 [1] : vector<128x128xf32> to vector<128xf32>
    %250 = vector.shape_cast %249 : vector<128xf32> to vector<128x1xf32>
    %251 = tpu.reciprocal %250 {approx = true} : vector<128x1xf32> -> vector<128x1xf32>
    %252 = vector.broadcast %251 : vector<128x1xf32> to vector<128x128xf32>
    %253 = arith.mulf %248, %252 : vector<128x128xf32>
    %cst_71 = arith.constant dense<0.000000e+00> : vector<128x8xf32>
    %254 = tpu.matmul %253, %239, %cst_71 {dimension_numbers = #tpu.dot_dimension_numbers<[1], [0], [0], [1], [0, 0, 1, 1], [], []>} : vector<128x128xf32>, vector<128x8xf32>, vector<128x8xf32> -> vector<128x8xf32>
    %255 = vector.extract_strided_slice %156 {offsets = [24, 0], sizes = [8, 32], strides = [1, 1]} : vector<32x32xf32> to vector<8x32xf32>
    %cst_72 = arith.constant dense<0.000000e+00> : vector<128x32xf32>
    %256 = tpu.matmul %254, %255, %cst_72 {dimension_numbers = #tpu.dot_dimension_numbers<[1], [0], [0], [1], [0, 0, 1, 1], [], []>} : vector<128x8xf32>, vector<8x32xf32>, vector<128x32xf32> -> vector<128x32xf32>
    %257 = arith.addf %236, %256 : vector<128x32xf32>
    %258 = vector.extract_strided_slice %154 {offsets = [3, 0], sizes = [1, 32], strides = [1, 1]} : vector<6x32xf32> to vector<1x32xf32>
    %259 = vector.broadcast %258 : vector<1x32xf32> to vector<128x32xf32>
    %260 = arith.addf %257, %259 : vector<128x32xf32>
    %261 = arith.addf %260, %150 : vector<128x32xf32>
    %cst_73 = arith.constant dense<0.000000e+00> : vector<128x32xf32>
    %262 = tpu.matmul %261, %157, %cst_73 {dimension_numbers = #tpu.dot_dimension_numbers<[1], [0], [0], [1], [0, 0, 1, 1], [], []>} : vector<128x32xf32>, vector<32x32xf32>, vector<128x32xf32> -> vector<128x32xf32>
    %263 = vector.extract_strided_slice %154 {offsets = [4, 0], sizes = [1, 32], strides = [1, 1]} : vector<6x32xf32> to vector<1x32xf32>
    %264 = vector.broadcast %263 : vector<1x32xf32> to vector<128x32xf32>
    %265 = arith.addf %262, %264 : vector<128x32xf32>
    %cst_74 = arith.constant 5.000000e-01 : f32
    %266 = vector.broadcast %cst_74 : f32 to vector<128x32xf32>
    %267 = arith.mulf %266, %265 : vector<128x32xf32>
    %cst_75 = arith.constant 2.000000e+00 : f32
    %268 = math.sqrt %cst_75 : f32
    %269 = vector.broadcast %268 : f32 to vector<128x32xf32>
    %270 = arith.divf %265, %269 : vector<128x32xf32>
    %271 = math.erf %270 : vector<128x32xf32>
    %cst_76 = arith.constant 1.000000e+00 : f32
    %272 = vector.broadcast %cst_76 : f32 to vector<128x32xf32>
    %273 = arith.addf %272, %271 : vector<128x32xf32>
    %274 = arith.mulf %267, %273 : vector<128x32xf32>
    %cst_77 = arith.constant dense<0.000000e+00> : vector<128x32xf32>
    %275 = tpu.matmul %274, %158, %cst_77 {dimension_numbers = #tpu.dot_dimension_numbers<[1], [0], [0], [1], [0, 0, 1, 1], [], []>} : vector<128x32xf32>, vector<32x32xf32>, vector<128x32xf32> -> vector<128x32xf32>
    %276 = vector.extract_strided_slice %154 {offsets = [5, 0], sizes = [1, 32], strides = [1, 1]} : vector<6x32xf32> to vector<1x32xf32>
    %277 = vector.broadcast %276 : vector<1x32xf32> to vector<128x32xf32>
    %278 = arith.addf %275, %277 : vector<128x32xf32>
    %279 = arith.addf %278, %261 : vector<128x32xf32>
    %280 = vector.shape_cast %279 : vector<128x32xf32> to vector<16x8x32xf32>
    %281 = vector.shape_cast %6 : vector<1x32xf32> to vector<1x1x32xf32>
    %282 = vector.broadcast %281 : vector<1x1x32xf32> to vector<16x8x32xf32>
    %283 = arith.mulf %280, %282 : vector<16x8x32xf32>
    %cst_78 = arith.constant dense<0.000000e+00> : vector<16x8xf32>
    %284 = vector.multi_reduction <add>, %283, %cst_78 [2] : vector<16x8x32xf32> to vector<16x8xf32>
    %285 = vector.shape_cast %284 : vector<16x8xf32> to vector<16x8x1xf32>
    %cst_79 = arith.constant dense<0xFF800000> : vector<16x1xf32>
    %286 = vector.multi_reduction <maximumf>, %285, %cst_79 [1] : vector<16x8x1xf32> to vector<16x1xf32>
    %287 = vector.shape_cast %286 : vector<16x1xf32> to vector<16x1x1xf32>
    %288 = vector.broadcast %287 : vector<16x1x1xf32> to vector<16x8x1xf32>
    %289 = arith.subf %285, %288 : vector<16x8x1xf32>
    %290 = math.exp %289 : vector<16x8x1xf32>
    %cst_80 = arith.constant dense<0.000000e+00> : vector<16x1xf32>
    %291 = vector.multi_reduction <add>, %290, %cst_80 [1] : vector<16x8x1xf32> to vector<16x1xf32>
    %292 = vector.shape_cast %291 : vector<16x1xf32> to vector<16x1x1xf32>
    %293 = tpu.reciprocal %292 {approx = true} : vector<16x1x1xf32> -> vector<16x1x1xf32>
    %294 = vector.broadcast %293 : vector<16x1x1xf32> to vector<16x8x1xf32>
    %295 = arith.mulf %290, %294 : vector<16x8x1xf32>
    %296 = vector.broadcast %295 : vector<16x8x1xf32> to vector<16x8x32xf32>
    %297 = arith.mulf %296, %280 : vector<16x8x32xf32>
    %cst_81 = arith.constant dense<0.000000e+00> : vector<16x32xf32>
    %298 = vector.multi_reduction <add>, %297, %cst_81 [1] : vector<16x8x32xf32> to vector<16x32xf32>
    %c0_82 = arith.constant 0 : index
    %c0_83 = arith.constant 0 : index
    %299 = vector.load %arg7[%c0_82, %c0_83] : memref<32x160xf32, #tpu.memory_space<vmem>>, vector<32x160xf32>
    %300 = vector.extract_strided_slice %299 {offsets = [0, 128], sizes = [32, 32], strides = [1, 1]} : vector<32x160xf32> to vector<32x32xf32>
    %301 = vector.extract_strided_slice %299 {offsets = [0, 0], sizes = [32, 128], strides = [1, 1]} : vector<32x160xf32> to vector<32x128xf32>
    %cst_84 = arith.constant dense<0.000000e+00> : vector<16x32xf32>
    %302 = tpu.matmul %298, %300, %cst_84 {dimension_numbers = #tpu.dot_dimension_numbers<[1], [0], [0], [1], [0, 0, 1, 1], [], []>} : vector<16x32xf32>, vector<32x32xf32>, vector<16x32xf32> -> vector<16x32xf32>
    %303 = vector.broadcast %5 : vector<1x32xf32> to vector<16x32xf32>
    %304 = arith.addf %302, %303 : vector<16x32xf32>
    %cst_85 = arith.constant 5.000000e-01 : f32
    %305 = vector.broadcast %cst_85 : f32 to vector<16x32xf32>
    %306 = arith.mulf %305, %304 : vector<16x32xf32>
    %cst_86 = arith.constant 2.000000e+00 : f32
    %307 = math.sqrt %cst_86 : f32
    %308 = vector.broadcast %307 : f32 to vector<16x32xf32>
    %309 = arith.divf %304, %308 : vector<16x32xf32>
    %310 = math.erf %309 : vector<16x32xf32>
    %cst_87 = arith.constant 1.000000e+00 : f32
    %311 = vector.broadcast %cst_87 : f32 to vector<16x32xf32>
    %312 = arith.addf %311, %310 : vector<16x32xf32>
    %313 = arith.mulf %306, %312 : vector<16x32xf32>
    %cst_88 = arith.constant dense<0.000000e+00> : vector<16x128xf32>
    %314 = tpu.matmul %313, %301, %cst_88 {dimension_numbers = #tpu.dot_dimension_numbers<[1], [0], [0], [1], [0, 0, 1, 1], [], []>} : vector<16x32xf32>, vector<32x128xf32>, vector<16x128xf32> -> vector<16x128xf32>
    %315 = vector.broadcast %7 : vector<1x128xf32> to vector<16x128xf32>
    %316 = arith.addf %314, %315 : vector<16x128xf32>
    %c0_89 = arith.constant 0 : index
    %c0_90 = arith.constant 0 : index
    %317 = vector.load %arg8[%c0_89, %c0_90] : memref<16x128xf32, #tpu.memory_space<vmem>>, vector<16x128xf32>
    tpu.vector_store %arg8[%c0_89, %c0_90], %316 {strides = array<i32>} : memref<16x128xf32, #tpu.memory_space<vmem>>, vector<16x128xf32>,
    return
  }
  func.func @transform_0(%arg0: i32) -> (i32, i32, i32) {
    %c0_i32 = arith.constant 0 : i32
    %c0_i32_0 = arith.constant 0 : i32
    %c0_i32_1 = arith.constant 0 : i32
    return %arg0, %c0_i32, %c0_i32_0 : i32, i32, i32
  }
  func.func @transform_1(%arg0: i32) -> (i32, i32) {
    %c0_i32 = arith.constant 0 : i32
    %c0_i32_0 = arith.constant 0 : i32
    %c0_i32_1 = arith.constant 0 : i32
    return %c0_i32, %c0_i32_0 : i32, i32
  }
  func.func @transform_2(%arg0: i32) -> (i32, i32) {
    %c0_i32 = arith.constant 0 : i32
    %c0_i32_0 = arith.constant 0 : i32
    %c0_i32_1 = arith.constant 0 : i32
    return %c0_i32, %c0_i32_0 : i32, i32
  }
  func.func @transform_3(%arg0: i32) -> (i32, i32, i32) {
    %c0_i32 = arith.constant 0 : i32
    %c0_i32_0 = arith.constant 0 : i32
    %c0_i32_1 = arith.constant 0 : i32
    %c0_i32_2 = arith.constant 0 : i32
    return %c0_i32, %c0_i32_0, %c0_i32_1 : i32, i32, i32
  }
  func.func @transform_4(%arg0: i32) -> (i32, i32, i32) {
    %c0_i32 = arith.constant 0 : i32
    %c0_i32_0 = arith.constant 0 : i32
    %c0_i32_1 = arith.constant 0 : i32
    %c0_i32_2 = arith.constant 0 : i32
    return %c0_i32, %c0_i32_0, %c0_i32_1 : i32, i32, i32
  }
  func.func @transform_5(%arg0: i32) -> (i32, i32) {
    %c0_i32 = arith.constant 0 : i32
    %c0_i32_0 = arith.constant 0 : i32
    %c0_i32_1 = arith.constant 0 : i32
    return %c0_i32, %c0_i32_0 : i32, i32
  }
  func.func @transform_6(%arg0: i32) -> (i32, i32) {
    %c0_i32 = arith.constant 0 : i32
    %c0_i32_0 = arith.constant 0 : i32
    %c0_i32_1 = arith.constant 0 : i32
    return %c0_i32, %c0_i32_0 : i32, i32
  }
  func.func @transform_7(%arg0: i32) -> (i32, i32) {
    %c0_i32 = arith.constant 0 : i32
    %c0_i32_0 = arith.constant 0 : i32
    return %arg0, %c0_i32 : i32, i32
  }
}

</mosaic_0001>

<bundles_post_ra>
// kernel: tpu_custom_call.1
= control target key start
LH: loop header
LB: loop body
LE: loop exit
PB: predicated region body
PF: predicated region fallthrough
CT: control target
= control target key end

     0   :  { %12 = vsyncpa [#allocation3], 0  ;;  %s18487_s0 = inlined_call_operand.vmem [shape: f32[16,8,6], index: 0, kind: input, shape index: {}]   ;;  %s18488_s1 = inlined_call_operand.vmem [shape: f32[128,128], index: 1, kind: input, shape index: {}]   ;;  %s18489_s2 = inlined_call_operand.vmem [shape: f32[6,32], index: 2, kind: input, shape index: {}]   ;;  %s18490_s3 = inlined_call_operand.hbm [shape: f32[2,32,192], index: 3, kind: input, shape index: {}]   ;;  %s18491_s4 = inlined_call_operand.vmem [shape: f32[2,6,32], index: 4, kind: input, shape index: {}]   ;;  %s18492_s5 = inlined_call_operand.vmem [shape: f32[4,128], index: 5, kind: input, shape index: {}]   ;;  %s18493_s6 = inlined_call_operand.vmem [shape: f32[32,160], index: 6, kind: input, shape index: {}]   ;;  %s18494_s7 = inlined_call_operand.hbm [shape: f32[16,128], index: 7, kind: output, shape index: {}]  }
   0x1   :  { %13 = vsyncpa [#allocation4], 0  ;;  %s14414_s24 = smov [#allocation2]   ;;  %s14366_s28 = scalar_lea.hbm %s18490_s3, 2048 }
   0x2   :  { %s25_s25 = sshll.u32 %s14414_s24, 4  ;;  %p14367_p0 = scmp.ne.s32.totalorder %s18490_s3, %s14366_s28  ;;  %s26_s25 = int_to_ptr.vmem [resolvable:$true] %s25_s25 }
   0x3   :  { %p14370_p1 = scmp.lt.u32.totalorder %s14366_s28, %s18490_s3 }
   0x5   :  { %p14372_p2 = pnand %p14370_p1, %p14367_p0 }
   0x7   :  { %14375 = shalt.err (!%p14372_p2)
}
   0x8   :  { %s14376_s10 = scalar_lea.vmem %s26_s25, 2048  ;;  %p14381_p4 = scmp.lt.s32.totalorder %s26_s25, %s26_s25 }
   0x9   :  { %p14377_p3 = scmp.ne.s32.totalorder %s26_s25, %s14376_s10  ;;  %p14382_p5 = scmp.lt.s32.totalorder %s14376_s10, %s14376_s10 }
   0xb   :  { %p14383_p6 = por %p14382_p5, %p14381_p4 }
   0xd   :  { %p14384_p7 = pnand %p14383_p6, %p14377_p3 }
   0xf   :  { %14387 = shalt.err (!%p14384_p7)
}
  0x10   :  { %s14415_s11 = smov 256   ;;  %s14416_s12 = smov 16  }
  0x11   :  { %31 = dma.hbm_to_vmem [thread:$0]  %s18490_s3, 2048, %s26_s25, [#allocation3], %s14415_s11, %s14415_s11, %s14416_s12  }
  0x12   :  { %14410 = dma.done.wait [#allocation3], 2048  }
  0x13   :  { %14411 = vsyncadd [#allocation3], 4294965248  ;;  %vm128_vm0 = vcmask 1045504   ;;  %vm79_vm1 = vcmask 48128   ;;  %v74_v0 = vld [vmem:[%s18489_s2] sm:$0x3f]  ;;  %v75_v23 = vlaneseq }
  0x14   :  { %v41_v1 = vld [vmem:[%s18487_s0] sm:$0xff]  ;;  %v42_v2 = vld [vmem:[%s18487_s0 + $0x8] sm:$0xff]  ;;  %10803 = vmatprep.subr.msk.mxu0 %vm128_vm0, %v74_v0  ;;  %v43_v3 = vld [vmem:[%s18487_s0 + $0x10] sm:$0xff]  ;;  %vm367_vm2 = vcmask 261120   ;;  %vm677_vm3 = vcmask 64512   ;;  %s14418_s26 = smov 96  }
  0x15   :  { %10805 = vmatprep.mubr.msk.f32.mxu0 %vm79_vm1, %v41_v1  ;;  %10804 = vmatpush3.msk.msra.mxu0 %vm128_vm0, %v74_v0  ;;  %v44_v4 = vld [vmem:[%s18487_s0 + $0x18] sm:$0xff]  ;;  %v45_v5 = vld [vmem:[%s18487_s0 + $0x20] sm:$0xff]  ;;  %v46_v6 = vld [vmem:[%s18487_s0 + $0x28] sm:$0xff]  ;;  %v14551_v24 = vshrl.u32 %v75_v23, 7  ;;  %s14419_s27 = smov 64   ;;  %s14420_s28 = smov 88  }
  0x16   :  { %10806 = vmatmul.mubr.msk.f32.vlgmr.msra.gmra.mrb[0].mxu0 %vm79_vm1, %v42_v2  ;;  %v47_v7 = vld [vmem:[%s18487_s0 + $0x30] sm:$0xff]  ;;  %v48_v8 = vld [vmem:[%s18487_s0 + $0x38] sm:$0xff]  ;;  %v49_v9 = vld [vmem:[%s18487_s0 + $0x40] sm:$0xff]  ;;  %s14421_s16 = smov 120   ;;  %s14422_s17 = smov 80   ;;  %vm9290_vm5 = vcmask 1041409  }
  0x17   :  { %10808 = vmatprep.mubr.msk.f32.mxu0 %vm79_vm1, %v43_v3  ;;  %v50_v10 = vld [vmem:[%s18487_s0 + $0x48] sm:$0xff]  ;;  %v51_v11 = vld [vmem:[%s18487_s0 + $0x50] sm:$0xff]  ;;  %v52_v12 = vld [vmem:[%s18487_s0 + $0x58] sm:$0xff]  ;;  %18598 = vst [vmem:[#allocation8_spill] sm:$0xff] %v14551_v24  ;;  %v14559_v26 = vsub.s32 1, %v14551_v24  ;;  %v14565_v28 = vsub.s32 0, %v14551_v24 }
  0x18   :  { %v53_v13 = vld [vmem:[%s18487_s0 + $0x60] sm:$0xff]  ;;  %v54_v14 = vld [vmem:[%s18487_s0 + $0x68] sm:$0xff]  ;;  %v55_v15 = vld [vmem:[%s18487_s0 + $0x70] sm:$0xff]  ;;  %s14423_s18 = smov 112   ;;  %s14424_s19 = smov 56   ;;  %vm9292_vm6 = vcmask 1042434  }
  0x19   :  { %v56_v16 = vld [vmem:[%s18487_s0 + $0x78] sm:$0xff]  ;;  %v358_v17 = vld [vmem:[#allocation2] sm:$0xff]  ;;  %v360_v18 = vld [vmem:[#allocation2 + $0x10] sm:$0xff]  ;;  %18599 = vst [vmem:[#allocation9_spill] sm:$0xff] %v14559_v26  ;;  %s14417_s0 = smov 32   ;;  %s14425_s20 = smov 72  }
  0x1a   :  { %10809 = vmatmul.mubr.msk.f32.gmra.mrb[2].mxu0 %vm79_vm1, %v44_v4  ;;  %v12147_v19 = vpack.c.bf16 %v360_v18, %v358_v17  ;;  %v362_v20 = vld [vmem:[#allocation2 + $0x20] sm:$0xff]  ;;  %v364_v21 = vld [vmem:[#allocation2 + $0x30] sm:$0xff]  ;;  %18600 = vst [vmem:[#allocation10_spill] sm:$0xff] %v14565_v28  ;;  %vm14829_vm4 = vmpackc.low %vm677_vm3, %vm677_vm3  ;;  %s14426_s3 = smov 104   ;;  %s14427_s21 = smov 48   ;;  %vm9294_vm7 = vcmask 1043459  }
  0x1b   :  { %10811 = vmatprep.mubr.msk.f32.mxu0 %vm79_vm1, %v45_v5  ;;  %v12151_v22 = vpack.c.bf16 %v364_v21, %v362_v20  ;;  %v14556_v25 = vld [vmem:[%s18491_s4] sm:$0x3f]  ;;  %s14428_s9 = smov 40   ;;  %vm9296_vm8 = vcmask 1044484   ;;  %vm9298_vm9 = vcmask 1045509   ;;  %vm9300_vm10 = vcmask 1046534  }
  0x1c   :  { %12148 = vmatprep.subr.bf16.mxu1 %v12147_v19  ;;  %v584_v27 = vrot.slane %v14556_v25, %v14559_v26  ;;  %v73_v29 = vld [vmem:[%s18492_s5] sm:$0xf]  ;;  %vm9302_vm11 = vcmask 1047559  }
  0x1d   :  { %12150 = vmatpush3.bf16.msra.mxu1 %v12147_v19  ;;  %v14571_v30 = vrot.slane %v73_v29, %v14565_v28 }
  0x1e   :  { %10812 = vmatmul.mubr.msk.f32.gmra.mrb[4].mxu0 %vm79_vm1, %v46_v6  ;;  %12152 = vmatprep.subr.bf16.mxu1 %v12151_v22 }
  0x1f   :  { %10814 = vmatprep.mubr.msk.f32.mxu0 %vm79_vm1, %v47_v7  ;;  %586 = vrot.lane.b32.xlu0 %v584_v27, %s14417_s0 }
  0x21   :  { %12154 = vmatpush3.bf16.msra.mxu1 %v12151_v22 }
  0x22   :  { %10815 = vmatmul.mubr.msk.f32.gmra.mrb[6].mxu0 %vm79_vm1, %v48_v8 }
  0x23   :  { %10817 = vmatprep.mubr.msk.f32.mxu0 %vm79_vm1, %v49_v9 }
  0x26   :  { %10818 = vmatmul.mubr.msk.f32.gmra.mrb[8].mxu0 %vm79_vm1, %v50_v10 }
  0x27   :  { %10820 = vmatprep.mubr.msk.f32.mxu0 %vm79_vm1, %v51_v11 }
  0x2a   :  { %10821 = vmatmul.mubr.msk.f32.gmra.mrb[10].mxu0 %vm79_vm1, %v52_v12 }
  0x2b   :  { %10823 = vmatprep.mubr.msk.f32.mxu0 %vm79_vm1, %v53_v13 }
  0x2e   :  { %10824 = vmatmul.mubr.msk.f32.gmra.mrb[12].mxu0 %vm79_vm1, %v54_v14 }
  0x2f   :  { %10826 = vmatprep.mubr.msk.f32.mxu0 %vm79_vm1, %v55_v15 }
  0x32   :  { %10827 = vmatmul.mubr.msk.f32.gmra.mrb[14].mxu0 %vm79_vm1, %v56_v16 }
  0xe9   :  { %v10807_v31 = vpop.f32.mrb[0].mxu0 }
  0xea   :  { %v204_v32 = vadd.f32 %v10807_v31, %v14571_v30  ;;  %v198_v33 = vpop.f32.mrb[1].mxu0 }
  0xeb   :  { %v199_v34 = vadd.f32 %v198_v33, %v14571_v30 }
  0xec   :  { %v295_v35 = vmul.f32 0.70710677, %v204_v32  ;;  %v278_v63 = vmul.f32 0.5, %v204_v32 }
  0xed   :  { %v294_v36 = vmul.f32 0.70710677, %v199_v34  ;;  %v10810_v37 = vpop.f32.mrb[2].mxu0  ;;  %v277_v59 = vmul.f32 0.5, %v199_v34 }
  0xee   :  { %13625 = verf.f32 %v295_v35  ;;  %v214_v38 = vadd.f32 %v10810_v37, %v14571_v30  ;;  %v208_v39 = vpop.f32.mrb[3].mxu0 }
  0xef   :  { %13627 = verf.f32 %v294_v36  ;;  %v209_v40 = vadd.f32 %v208_v39, %v14571_v30 }
  0xf0   :  { %v297_v41 = vmul.f32 0.70710677, %v214_v38  ;;  %v280_v13 = vmul.f32 0.5, %v214_v38 }
  0xf1   :  { %v296_v42 = vmul.f32 0.70710677, %v209_v40  ;;  %v10813_v43 = vpop.f32.mrb[4].mxu0  ;;  %v279_v9 = vmul.f32 0.5, %v209_v40 }
  0xf2   :  { %13629 = verf.f32 %v297_v41  ;;  %v224_v44 = vadd.f32 %v10813_v43, %v14571_v30  ;;  %v218_v45 = vpop.f32.mrb[5].mxu0 }
  0xf3   :  { %13631 = verf.f32 %v296_v42  ;;  %v219_v46 = vadd.f32 %v218_v45, %v14571_v30 }
  0xf4   :  { %v299_v47 = vmul.f32 0.70710677, %v224_v44  ;;  %v282_v32 = vmul.f32 0.5, %v224_v44 }
  0xf5   :  { %v298_v48 = vmul.f32 0.70710677, %v219_v46  ;;  %v10816_v49 = vpop.f32.mrb[6].mxu0  ;;  %v281_v23 = vmul.f32 0.5, %v219_v46 }
  0xf6   :  { %13633 = verf.f32 %v299_v47  ;;  %v234_v50 = vadd.f32 %v10816_v49, %v14571_v30  ;;  %v228_v51 = vpop.f32.mrb[7].mxu0 }
  0xf7   :  { %13635 = verf.f32 %v298_v48  ;;  %v229_v52 = vadd.f32 %v228_v51, %v14571_v30 }
  0xf8   :  { %v13626_v53 = vpop.eup %13625  ;;  %v301_v54 = vmul.f32 0.70710677, %v234_v50  ;;  %v284_v39 = vmul.f32 0.5, %v234_v50 }
  0xf9   :  { %v13628_v55 = vpop.eup %13627  ;;  %v327_v56 = vadd.f32 1.0, %v13626_v53  ;;  %v300_v57 = vmul.f32 0.70710677, %v229_v52  ;;  %v10819_v58 = vpop.f32.mrb[8].mxu0  ;;  %v283_v43 = vmul.f32 0.5, %v229_v52 }
  0xfa   :  { %13637 = verf.f32 %v301_v54  ;;  %v244_v60 = vadd.f32 %v10819_v58, %v14571_v30  ;;  %v238_v61 = vpop.f32.mrb[9].mxu0  ;;  %v326_v62 = vadd.f32 1.0, %v13628_v55 }
  0xfb   :  { %13639 = verf.f32 %v300_v57  ;;  %v239_v0 = vadd.f32 %v238_v61, %v14571_v30  ;;  %v14585_v5 = vmul.f32 %v327_v56, %v278_v63 }
  0xfc   :  { %v13630_v1 = vpop.eup %13629  ;;  %v303_v2 = vmul.f32 0.70710677, %v244_v60  ;;  %v14583_v3 = vmul.f32 %v326_v62, %v277_v59  ;;  %v286_v47 = vmul.f32 0.5, %v244_v60 }
  0xfd   :  { %v13632_v4 = vpop.eup %13631  ;;  %18602 = vst [vmem:[#allocation12_spill] sm:$0xff] %v14585_v5  ;;  %v329_v6 = vadd.f32 1.0, %v13630_v1  ;;  %v302_v7 = vmul.f32 0.70710677, %v239_v0  ;;  %v10822_v8 = vpop.f32.mrb[10].mxu0  ;;  %v285_v51 = vmul.f32 0.5, %v239_v0 }
  0xfe   :  { %18601 = vst [vmem:[#allocation11_spill] sm:$0xff] %v14583_v3  ;;  %v328_v10 = vadd.f32 1.0, %v13632_v4  ;;  %13641 = verf.f32 %v303_v2  ;;  %v254_v11 = vadd.f32 %v10822_v8, %v14571_v30  ;;  %v248_v12 = vpop.f32.mrb[11].mxu0  ;;  %10837 = vmatprep.mubr.msk.f32.mxu1 %vm367_vm2, %v14583_v3 }
  0xff   :  { %13643 = verf.f32 %v302_v7  ;;  %v249_v14 = vadd.f32 %v248_v12, %v14571_v30  ;;  %10838 = vmatmul.mubr.msk.f32.vlgmr.msra.gmra.mrb[0].mxu1 %vm367_vm2, %v14585_v5  ;;  %v14595_v19 = vmul.f32 %v329_v6, %v280_v13 }
 0x100   :  { %v13634_v15 = vpop.eup %13633  ;;  %v14593_v16 = vmul.f32 %v328_v10, %v279_v9  ;;  %v305_v17 = vmul.f32 0.70710677, %v254_v11 }
 0x101   :  { %v13636_v18 = vpop.eup %13635  ;;  %18604 = vst [vmem:[#allocation14_spill] sm:$0xff] %v14595_v19  ;;  %v331_v20 = vadd.f32 1.0, %v13634_v15  ;;  %v304_v21 = vmul.f32 0.70710677, %v249_v14  ;;  %v10825_v22 = vpop.f32.mrb[12].mxu0  ;;  %v287_v61 = vmul.f32 0.5, %v249_v14 }
 0x102   :  { %18603 = vst [vmem:[#allocation13_spill] sm:$0xff] %v14593_v16  ;;  %v330_v27 = vadd.f32 1.0, %v13636_v18  ;;  %13645 = verf.f32 %v305_v17  ;;  %v264_v29 = vadd.f32 %v10825_v22, %v14571_v30  ;;  %v258_v31 = vpop.f32.mrb[13].mxu0  ;;  %10840 = vmatprep.mubr.msk.f32.mxu1 %vm367_vm2, %v14593_v16 }
 0x103   :  { %13647 = verf.f32 %v304_v21  ;;  %v259_v33 = vadd.f32 %v258_v31, %v14571_v30  ;;  %10841 = vmatmul.mubr.msk.f32.gmra.mrb[2].mxu1 %vm367_vm2, %v14595_v19  ;;  %v14605_v38 = vmul.f32 %v331_v20, %v282_v32 }
 0x104   :  { %v13638_v34 = vpop.eup %13637  ;;  %v14603_v35 = vmul.f32 %v330_v27, %v281_v23  ;;  %v307_v36 = vmul.f32 0.70710677, %v264_v29  ;;  %v290_v2 = vmul.f32 0.5, %v264_v29  ;;  %v14655_v23 = vrot.slane %v14556_v25, %v14565_v28  ;;  %v14657_v27 = vpop.permute.xlu0 %586 }
 0x105   :  { %v13640_v37 = vpop.eup %13639  ;;  %18606 = vst [vmem:[#allocation16_spill] sm:$0xff] %v14605_v38  ;;  %v333_v40 = vadd.f32 1.0, %v13638_v34  ;;  %v306_v41 = vmul.f32 0.70710677, %v259_v33  ;;  %v10828_v42 = vpop.f32.mrb[14].mxu0  ;;  %v289_v7 = vmul.f32 0.5, %v259_v33 }
 0x106   :  { %18605 = vst [vmem:[#allocation15_spill] sm:$0xff] %v14603_v35  ;;  %v332_v45 = vadd.f32 1.0, %v13640_v37  ;;  %13649 = verf.f32 %v307_v36  ;;  %v274_v44 = vadd.f32 %v10828_v42, %v14571_v30  ;;  %v268_v46 = vpop.f32.mrb[15].mxu0  ;;  %10843 = vmatprep.mubr.msk.f32.mxu1 %vm367_vm2, %v14603_v35 }
 0x107   :  { %13651 = verf.f32 %v306_v41  ;;  %v269_v48 = vadd.f32 %v268_v46, %v14571_v30  ;;  %10844 = vmatmul.mubr.msk.f32.gmra.mrb[4].mxu1 %vm367_vm2, %v14605_v38  ;;  %v14615_v54 = vmul.f32 %v333_v40, %v284_v39  ;;  %v288_v30 = vmul.f32 0.5, %v254_v11  ;;  %v68_v38 = vld [vmem:[%s18488_s1 + $0x58] sm:$0xff] }
 0x108   :  { %v13642_v49 = vpop.eup %13641  ;;  %v14613_v50 = vmul.f32 %v332_v45, %v283_v43  ;;  %v309_v52 = vmul.f32 0.70710677, %v274_v44  ;;  %v292_v12 = vmul.f32 0.5, %v274_v44 }
 0x109   :  { %v13644_v53 = vpop.eup %13643  ;;  %18608 = vst [vmem:[#allocation18_spill] sm:$0xff] %v14615_v54  ;;  %v335_v55 = vadd.f32 1.0, %v13642_v49  ;;  %v308_v56 = vmul.f32 0.70710677, %v269_v48  ;;  %v291_v15 = vmul.f32 0.5, %v269_v48 }
 0x10a   :  { %18607 = vst [vmem:[#allocation17_spill] sm:$0xff] %v14613_v50  ;;  %v334_v57 = vadd.f32 1.0, %v13644_v53  ;;  %13653 = verf.f32 %v309_v52  ;;  %10846 = vmatprep.mubr.msk.f32.mxu1 %vm367_vm2, %v14613_v50 }
 0x10b   :  { %v14619_v58 = vmul.f32 %v335_v55, %v286_v47  ;;  %13655 = verf.f32 %v308_v56  ;;  %10847 = vmatmul.mubr.msk.f32.gmra.mrb[6].mxu1 %vm367_vm2, %v14615_v54 }
 0x10c   :  { %v13646_v59 = vpop.eup %13645  ;;  %v14623_v60 = vmul.f32 %v334_v57, %v285_v51 }
 0x10d   :  { %18609 = vst [vmem:[#allocation19_spill] sm:$0xff] %v14619_v58  ;;  %v13648_v62 = vpop.eup %13647  ;;  %v337_v63 = vadd.f32 1.0, %v13646_v59 }
 0x10e   :  { %18610 = vst [vmem:[#allocation20_spill] sm:$0xff] %v14623_v60  ;;  %v336_v0 = vadd.f32 1.0, %v13648_v62  ;;  %10849 = vmatprep.mubr.msk.f32.mxu1 %vm367_vm2, %v14623_v60 }
 0x10f   :  { %v14627_v1 = vmul.f32 %v337_v63, %v288_v30  ;;  %10850 = vmatmul.mubr.msk.f32.gmra.mrb[8].mxu1 %vm367_vm2, %v14619_v58 }
 0x110   :  { %v13650_v4 = vpop.eup %13649  ;;  %v14631_v6 = vmul.f32 %v336_v0, %v287_v61 }
 0x111   :  { %18611 = vst [vmem:[#allocation21_spill] sm:$0xff] %v14627_v1  ;;  %v13652_v8 = vpop.eup %13651  ;;  %v339_v9 = vadd.f32 1.0, %v13650_v4 }
 0x112   :  { %18612 = vst [vmem:[#allocation22_spill] sm:$0xff] %v14631_v6  ;;  %v338_v10 = vadd.f32 1.0, %v13652_v8  ;;  %10852 = vmatprep.mubr.msk.f32.mxu1 %vm367_vm2, %v14631_v6 }
 0x113   :  { %v14635_v11 = vmul.f32 %v339_v9, %v290_v2  ;;  %10853 = vmatmul.mubr.msk.f32.gmra.mrb[10].mxu1 %vm367_vm2, %v14627_v1 }
 0x114   :  { %v13654_v13 = vpop.eup %13653  ;;  %v14639_v14 = vmul.f32 %v338_v10, %v289_v7 }
 0x115   :  { %18613 = vst [vmem:[#allocation23_spill] sm:$0xff] %v14635_v11  ;;  %v13656_v17 = vpop.eup %13655  ;;  %v341_v18 = vadd.f32 1.0, %v13654_v13 }
 0x116   :  { %18614 = vst [vmem:[#allocation24_spill] sm:$0xff] %v14639_v14  ;;  %v340_v20 = vadd.f32 1.0, %v13656_v17  ;;  %10855 = vmatprep.mubr.msk.f32.mxu1 %vm367_vm2, %v14639_v14 }
 0x117   :  { %v14643_v21 = vmul.f32 %v341_v18, %v292_v12  ;;  %10856 = vmatmul.mubr.msk.f32.gmra.mrb[12].mxu1 %vm367_vm2, %v14635_v11 }
 0x118   :  { %v14647_v22 = vmul.f32 %v340_v20, %v291_v15 }
 0x119   :  { %18615 = vst [vmem:[#allocation25_spill] sm:$0xff] %v14643_v21 }
 0x11a   :  { %18616 = vst [vmem:[#allocation26_spill] sm:$0xff] %v14647_v22  ;;  %10858 = vmatprep.mubr.msk.f32.mxu1 %vm367_vm2, %v14647_v22  ;;  %v18618_v22 = vmov 0 }
 0x11b   :  { %10859 = vmatmul.mubr.msk.f32.gmra.mrb[14].mxu1 %vm367_vm2, %v14643_v21  ;;  %v18619_v22 = vsel %vm14829_vm4, 4294967295, %v18618_v22 }
 0x11c   :  { %18620 = vst [vmem:[#allocation28_spill] sm:$0xff] %v18619_v22 }
 0x1d2   :  { %v14659_v29 = vpop.f32.mrb[0].mxu1 }
 0x1d3   :  { %v14663_v31 = vadd.f32 %v14659_v29, %v14655_v23  ;;  %v590_v32 = vadd.f32 %v14659_v29, %v14657_v27  ;;  %v14667_v33 = vpop.f32.mrb[1].mxu1 }
 0x1d4   :  { %v14671_v34 = vadd.f32 %v14655_v23, %v14667_v33  ;;  %v589_v36 = vadd.f32 %v14657_v27, %v14667_v33 }
 0x1d6   :  { %v14675_v37 = vpop.f32.mrb[2].mxu1  ;;  %10893 = vmatprep.mubr.msk.f32.mxu0 %vm677_vm3, %v14671_v34  ;;  %v14679_v39 = vpack.i.bf16 %v590_v32, %v589_v36 }
 0x1d7   :  { %v14683_v40 = vadd.f32 %v14675_v37, %v14655_v23  ;;  %v592_v41 = vadd.f32 %v14675_v37, %v14657_v27  ;;  %v14687_v42 = vpop.f32.mrb[3].mxu1 }
 0x1d8   :  { %v14691_v43 = vadd.f32 %v14655_v23, %v14687_v42  ;;  %v591_v45 = vadd.f32 %v14657_v27, %v14687_v42  ;;  %12966 = vrot.lane.b32.xlu0 %v14679_v39, %s14418_s26 }
 0x1da   :  { %v14697_v44 = vpop.f32.mrb[4].mxu1  ;;  %v14699_v46 = vpack.i.bf16 %v592_v41, %v591_v45 }
 0x1db   :  { %v14703_v47 = vadd.f32 %v14697_v44, %v14655_v23  ;;  %v594_v48 = vadd.f32 %v14697_v44, %v14657_v27  ;;  %v14707_v49 = vpop.f32.mrb[5].mxu1 }
 0x1dc   :  { %v14711_v51 = vadd.f32 %v14655_v23, %v14707_v49  ;;  %v593_v52 = vadd.f32 %v14657_v27, %v14707_v49  ;;  %12971 = vrot.lane.b32.xlu1 %v14699_v46, %s14418_s26 }
 0x1de   :  { %v14717_v53 = vpop.f32.mrb[6].mxu1  ;;  %v14719_v55 = vpack.i.bf16 %v594_v48, %v593_v52 }
 0x1df   :  { %v14723_v56 = vadd.f32 %v14717_v53, %v14655_v23  ;;  %v596_v57 = vadd.f32 %v14717_v53, %v14657_v27  ;;  %v14727_v30 = vpop.f32.mrb[7].mxu1 }
 0x1e0   :  { %v14731_v59 = vadd.f32 %v14655_v23, %v14727_v30  ;;  %v595_v61 = vadd.f32 %v14657_v27, %v14727_v30  ;;  %12976 = vrot.lane.b32.xlu1 %v14719_v55, %s14418_s26 }
 0x1e2   :  { %v14737_v62 = vpop.f32.mrb[8].mxu1  ;;  %v14739_v63 = vpack.i.bf16 %v596_v57, %v595_v61 }
 0x1e3   :  { %v14743_v0 = vadd.f32 %v14737_v62, %v14655_v23  ;;  %v598_v2 = vadd.f32 %v14737_v62, %v14657_v27  ;;  %v14747_v4 = vpop.f32.mrb[9].mxu1 }
 0x1e4   :  { %v14751_v7 = vadd.f32 %v14655_v23, %v14747_v4  ;;  %v597_v8 = vadd.f32 %v14657_v27, %v14747_v4  ;;  %12981 = vrot.lane.b32.xlu0 %v14739_v63, %s14418_s26 }
 0x1e6   :  { %v14757_v9 = vpop.f32.mrb[10].mxu1  ;;  %v14759_v10 = vpack.i.bf16 %v598_v2, %v597_v8 }
 0x1e7   :  { %v14763_v12 = vadd.f32 %v14757_v9, %v14655_v23  ;;  %v600_v13 = vadd.f32 %v14757_v9, %v14657_v27  ;;  %v14767_v15 = vpop.f32.mrb[11].mxu1 }
 0x1e8   :  { %v14771_v17 = vadd.f32 %v14655_v23, %v14767_v15  ;;  %v599_v18 = vadd.f32 %v14657_v27, %v14767_v15  ;;  %12986 = vrot.lane.b32.xlu1 %v14759_v10, %s14418_s26 }
 0x1ea   :  { %v14777_v20 = vpop.f32.mrb[12].mxu1  ;;  %v14779_v32 = vpack.i.bf16 %v600_v13, %v599_v18 }
 0x1eb   :  { %v14783_v36 = vadd.f32 %v14777_v20, %v14655_v23  ;;  %v602_v41 = vadd.f32 %v14777_v20, %v14657_v27  ;;  %v14787_v45 = vpop.f32.mrb[13].mxu1 }
 0x1ec   :  { %v14791_v48 = vadd.f32 %v14655_v23, %v14787_v45  ;;  %v601_v52 = vadd.f32 %v14657_v27, %v14787_v45  ;;  %12991 = vrot.lane.b32.xlu0 %v14779_v32, %s14418_s26 }
 0x1ee   :  { %v14797_v57 = vpop.f32.mrb[14].mxu1  ;;  %v14799_v61 = vpack.i.bf16 %v602_v41, %v601_v52  ;;  %v14818_v41 = vsub.s32 2, %v14551_v24 }
 0x1ef   :  { %v14803_v2 = vadd.f32 %v14797_v57, %v14655_v23  ;;  %v604_v8 = vadd.f32 %v14797_v57, %v14657_v27  ;;  %v14807_v13 = vpop.f32.mrb[15].mxu1 }
 0x1f0   :  { %v14811_v18 = vadd.f32 %v14655_v23, %v14807_v13  ;;  %v603_v28 = vadd.f32 %v14657_v27, %v14807_v13  ;;  %12996 = vrot.lane.b32.xlu1 %v14799_v61, %s14418_s26  ;;  %18617 = vst [vmem:[#allocation27_spill] sm:$0xff] %v14818_v41  ;;  %v608_v26 = vrot.slane %v14556_v25, %v14818_v41 }
 0x1f2   :  { %v14820_v52 = vpack.i.bf16 %v604_v8, %v603_v28 }
 0x1f4   :  { %13001 = vrot.lane.b32.xlu0 %v14820_v52, %s14418_s26 }
 0x1f8   :  { %610 = vrot.lane.b32.xlu0 %v608_v26, %s14419_s27 }
 0x24a   :  { %v12967_v23 = vpop.permute.xlu0 %12966 }
 0x24b   :  { %v12969_v21 = vunpack.i.h.bf16 %v12967_v23  ;;  %v12968_v27 = vunpack.i.l.bf16 %v12967_v23 }
 0x24d   :  { %v12155_v28 = vpack.c.bf16 %v12969_v21, %v12968_v27 }
 0x24e   :  { %v12972_v8 = vpop.permute.xlu1 %12971 }
 0x24f   :  { %v12974_v11 = vunpack.i.h.bf16 %v12972_v8  ;;  %v12973_v14 = vunpack.i.l.bf16 %v12972_v8  ;;  %12157 = vmatprep.subr.msk.bf16.mxu0 %vm14829_vm4, %v12155_v28 }
 0x250   :  { %12160 = vmatpush3.bf16.xpose.msk.msra.mxu0 %vm14829_vm4, %v12155_v28 }
 0x251   :  { %v12161_v25 = vpack.c.bf16 %v12974_v11, %v12973_v14 }
 0x252   :  { %v12977_v26 = vpop.permute.xlu1 %12976 }
 0x253   :  { %v12979_v41 = vunpack.i.h.bf16 %v12977_v26  ;;  %v12978_v23 = vunpack.i.l.bf16 %v12977_v26  ;;  %12163 = vmatprep.subr.msk.bf16.mxu0 %vm14829_vm4, %v12161_v25 }
 0x255   :  { %v12167_v1 = vpack.c.bf16 %v12979_v41, %v12978_v23 }
 0x256   :  { %v12982_v6 = vpop.permute.xlu0 %12981 }
 0x257   :  { %v12984_v21 = vunpack.i.h.bf16 %v12982_v6  ;;  %v12983_v27 = vunpack.i.l.bf16 %v12982_v6 }
 0x258   :  { %12166 = vmatpush3.bf16.xpose.msk.msra.mxu0 %vm14829_vm4, %v12161_v25 }
 0x259   :  { %12169 = vmatprep.subr.msk.bf16.mxu0 %vm14829_vm4, %v12167_v1  ;;  %v12173_v8 = vpack.c.bf16 %v12984_v21, %v12983_v27 }
 0x25a   :  { %v12987_v58 = vpop.permute.xlu1 %12986 }
 0x25b   :  { %v12989_v14 = vunpack.i.h.bf16 %v12987_v58  ;;  %v12988_v41 = vunpack.i.l.bf16 %v12987_v58 }
 0x25d   :  { %v12179_v25 = vpack.c.bf16 %v12989_v14, %v12988_v41 }
 0x25e   :  { %v12992_v11 = vpop.permute.xlu0 %12991 }
 0x25f   :  { %v12994_v28 = vunpack.i.h.bf16 %v12992_v11  ;;  %v12993_v26 = vunpack.i.l.bf16 %v12992_v11 }
 0x260   :  { %12172 = vmatpush3.bf16.xpose.msk.msra.mxu0 %vm14829_vm4, %v12167_v1 }
 0x261   :  { %12175 = vmatprep.subr.msk.bf16.mxu0 %vm14829_vm4, %v12173_v8  ;;  %v12185_v6 = vpack.c.bf16 %v12994_v28, %v12993_v26 }
 0x262   :  { %v12997_v54 = vpop.permute.xlu1 %12996 }
 0x263   :  { %v12999_v26 = vunpack.i.h.bf16 %v12997_v54 }
 0x266   :  { %v13002_v23 = vpop.permute.xlu0 %13001 }
 0x268   :  { %12178 = vmatpush3.bf16.xpose.msk.msra.mxu0 %vm14829_vm4, %v12173_v8 }
 0x269   :  { %12181 = vmatprep.subr.msk.bf16.mxu0 %vm14829_vm4, %v12179_v25 }
 0x26a   :  { %v611_v21 = vpop.permute.xlu0 %610 }
 0x26b   :  { %v615_v1 = vadd.f32 %v611_v21, %v14687_v42  ;;  %v616_v27 = vadd.f32 %v14675_v37, %v611_v21  ;;  %v613_v60 = vadd.f32 %v611_v21, %v14667_v33  ;;  %v614_v58 = vadd.f32 %v14659_v29, %v611_v21 }
 0x26c   :  { %v617_v11 = vadd.f32 %v611_v21, %v14707_v49  ;;  %v618_v14 = vadd.f32 %v14697_v44, %v611_v21  ;;  %v619_v8 = vadd.f32 %v611_v21, %v14727_v30  ;;  %v620_v41 = vadd.f32 %v14717_v53, %v611_v21 }
 0x26d   :  { %v14859_v50 = vpack.i.bf16 %v616_v27, %v615_v1  ;;  %v14861_v28 = vpack.i.bf16 %v614_v58, %v613_v60  ;;  %v623_v42 = vadd.f32 %v611_v21, %v14767_v15  ;;  %v624_v37 = vadd.f32 %v14757_v9, %v611_v21 }
 0x26e   :  { %v14865_v33 = vpack.i.bf16 %v618_v14, %v617_v11  ;;  %v14867_v29 = vpack.i.bf16 %v620_v41, %v619_v8  ;;  %v621_v49 = vadd.f32 %v611_v21, %v14747_v4  ;;  %v622_v44 = vadd.f32 %v14737_v62, %v611_v21 }
 0x26f   :  { %18621 = vst [vmem:[#allocation29_spill] sm:$0xff] %v14859_v50  ;;  %13011 = vrot.lane.b32.xlu1 %v14859_v50, %s14419_s27  ;;  %13006 = vrot.lane.b32.xlu0 %v14861_v28, %s14419_s27  ;;  %v14875_v60 = vpack.i.bf16 %v624_v37, %v623_v42  ;;  %v625_v53 = vadd.f32 %v611_v21, %v14787_v45  ;;  %v12998_v27 = vunpack.i.l.bf16 %v12997_v54  ;;  %v13004_v54 = vunpack.i.h.bf16 %v13002_v23 }
 0x270   :  { %18622 = vst [vmem:[#allocation30_spill] sm:$0xff] %v14867_v29  ;;  %v626_v30 = vadd.f32 %v14777_v20, %v611_v21  ;;  %12184 = vmatpush3.bf16.xpose.msk.msra.mxu0 %vm14829_vm4, %v12179_v25  ;;  %v14881_v9 = vpack.i.bf16 %v622_v44, %v621_v49  ;;  %v627_v62 = vadd.f32 %v611_v21, %v14807_v13  ;;  %v13003_v45 = vunpack.i.l.bf16 %v13002_v23 }
 0x271   :  { %v628_v4 = vadd.f32 %v14797_v57, %v611_v21  ;;  %12187 = vmatprep.subr.msk.bf16.mxu0 %vm14829_vm4, %v12185_v6  ;;  %v12191_v20 = vpack.c.bf16 %v12999_v26, %v12998_v27 }
 0x272   :  { %v14887_v15 = vpack.i.bf16 %v626_v30, %v625_v53  ;;  %v12197_v57 = vpack.c.bf16 %v13004_v54, %v13003_v45 }
 0x273   :  { %v14889_v1 = vpack.i.bf16 %v628_v4, %v627_v62  ;;  %13016 = vrot.lane.b32.xlu1 %v14865_v33, %s14419_s27  ;;  %13021 = vrot.lane.b32.xlu0 %v14867_v29, %s14419_s27 }
 0x274   :  { %18623 = vst [vmem:[#allocation31_spill] sm:$0xff] %v14887_v15 }
 0x275   :  { %18624 = vst [vmem:[#allocation32_spill] sm:$0xff] %v14889_v1 }
 0x277   :  { %13031 = vrot.lane.b32.xlu1 %v14875_v60, %s14419_s27  ;;  %13026 = vrot.lane.b32.xlu0 %v14881_v9, %s14419_s27 }
 0x278   :  { %12190 = vmatpush3.bf16.xpose.msk.msra.mxu0 %vm14829_vm4, %v12185_v6 }
 0x279   :  { %12193 = vmatprep.subr.msk.bf16.mxu0 %vm14829_vm4, %v12191_v20 }
 0x27b   :  { %13036 = vrot.lane.b32.xlu1 %v14887_v15, %s14419_s27  ;;  %13041 = vrot.lane.b32.xlu0 %v14679_v39, %s14420_s28 }
 0x27f   :  { %13046 = vrot.lane.b32.xlu1 %v14699_v46, %s14420_s28 }
 0x280   :  { %12196 = vmatpush3.bf16.xpose.msk.msra.mxu0 %vm14829_vm4, %v12191_v20 }
 0x281   :  { %12199 = vmatprep.subr.msk.bf16.mxu0 %vm14829_vm4, %v12197_v57 }
 0x283   :  { %13051 = vrot.lane.b32.xlu1 %v14889_v1, %s14419_s27 }
 0x287   :  { %13061 = vrot.lane.b32.xlu1 %v14739_v63, %s14420_s28 }
 0x288   :  { %12202 = vmatpush3.bf16.xpose.msk.msra.mxu0 %vm14829_vm4, %v12197_v57 }
 0x28f   :  { %10894 = vmatmul.mubr.msk.f32.vlgmr.msra.gmra.mrb[16].mxu0 %vm677_vm3, %v14663_v31 }
 0x290   :  { %10896 = vmatprep.mubr.msk.f32.mxu0 %vm677_vm3, %v14691_v43 }
 0x293   :  { %10897 = vmatmul.mubr.msk.f32.gmra.mrb[18].mxu0 %vm677_vm3, %v14683_v40 }
 0x294   :  { %10899 = vmatprep.mubr.msk.f32.mxu0 %vm677_vm3, %v14711_v51 }
 0x297   :  { %10900 = vmatmul.mubr.msk.f32.gmra.mrb[20].mxu0 %vm677_vm3, %v14703_v47 }
 0x298   :  { %10902 = vmatprep.mubr.msk.f32.mxu0 %vm677_vm3, %v14731_v59 }
 0x29b   :  { %10903 = vmatmul.mubr.msk.f32.gmra.mrb[22].mxu0 %vm677_vm3, %v14723_v56 }
 0x29c   :  { %10905 = vmatprep.mubr.msk.f32.mxu0 %vm677_vm3, %v14751_v7 }
 0x29f   :  { %10906 = vmatmul.mubr.msk.f32.gmra.mrb[24].mxu0 %vm677_vm3, %v14743_v0 }
 0x2a0   :  { %10908 = vmatprep.mubr.msk.f32.mxu0 %vm677_vm3, %v14771_v17 }
 0x2a3   :  { %10909 = vmatmul.mubr.msk.f32.gmra.mrb[26].mxu0 %vm677_vm3, %v14763_v12 }
 0x2a4   :  { %10911 = vmatprep.mubr.msk.f32.mxu0 %vm677_vm3, %v14791_v48 }
 0x2a7   :  { %10912 = vmatmul.mubr.msk.f32.gmra.mrb[28].mxu0 %vm677_vm3, %v14783_v36 }
 0x2a8   :  { %10914 = vmatprep.mubr.msk.f32.mxu0 %vm677_vm3, %v14811_v18 }
 0x2ab   :  { %10915 = vmatmul.mubr.msk.f32.gmra.mrb[30].mxu0 %vm677_vm3, %v14803_v2 }
 0x2e1   :  { %v13012_v13 = vpop.permute.xlu1 %13011  ;;  %v13007_v23 = vpop.permute.xlu0 %13006 }
 0x2e2   :  { %v13014_v25 = vunpack.i.h.bf16 %v13012_v13  ;;  %v13013_v6 = vunpack.i.l.bf16 %v13012_v13  ;;  %v13009_v21 = vunpack.i.h.bf16 %v13007_v23  ;;  %v13008_v58 = vunpack.i.l.bf16 %v13007_v23 }
 0x2e4   :  { %v12203_v11 = vpack.c.bf16 %v13009_v21, %v13008_v58  ;;  %v12207_v37 = vpack.c.bf16 %v13014_v25, %v13013_v6 }
 0x2e5   :  { %v13017_v14 = vpop.permute.xlu1 %13016  ;;  %v13022_v8 = vpop.permute.xlu0 %13021 }
 0x2e6   :  { %v13019_v41 = vunpack.i.h.bf16 %v13017_v14  ;;  %v13018_v42 = vunpack.i.l.bf16 %v13017_v14  ;;  %12204 = vmatprep.subr.bf16.mxu1 %v12203_v11  ;;  %v13024_v44 = vunpack.i.h.bf16 %v13022_v8  ;;  %v13023_v26 = vunpack.i.l.bf16 %v13022_v8 }
 0x2e7   :  { %12206 = vmatpush3.bf16.msra.mxu1 %v12203_v11 }
 0x2e8   :  { %12208 = vmatprep.subr.bf16.mxu1 %v12207_v37  ;;  %v12211_v53 = vpack.c.bf16 %v13019_v41, %v13018_v42  ;;  %v12215_v20 = vpack.c.bf16 %v13024_v44, %v13023_v26  ;;  %v58_v26 = vld [vmem:[%s18488_s1 + $0x8] sm:$0xff] }
 0x2e9   :  { %v13032_v49 = vpop.permute.xlu1 %13031  ;;  %v13027_v30 = vpop.permute.xlu0 %13026 }
 0x2ea   :  { %v13029_v4 = vunpack.i.h.bf16 %v13027_v30  ;;  %v13028_v27 = vunpack.i.l.bf16 %v13027_v30  ;;  %v13034_v45 = vunpack.i.h.bf16 %v13032_v49  ;;  %v13033_v57 = vunpack.i.l.bf16 %v13032_v49 }
 0x2eb   :  { %12210 = vmatpush3.bf16.msra.mxu1 %v12207_v37 }
 0x2ec   :  { %12212 = vmatprep.subr.bf16.mxu1 %v12211_v53  ;;  %v12219_v13 = vpack.c.bf16 %v13029_v4, %v13028_v27  ;;  %v12223_v6 = vpack.c.bf16 %v13034_v45, %v13033_v57  ;;  %v60_v57 = vld [vmem:[%s18488_s1 + $0x18] sm:$0xff] }
 0x2ed   :  { %v13037_v62 = vpop.permute.xlu1 %13036  ;;  %v13042_v8 = vpop.permute.xlu0 %13041 }
 0x2ee   :  { %v13039_v23 = vunpack.i.h.bf16 %v13037_v62  ;;  %v13038_v25 = vunpack.i.l.bf16 %v13037_v62  ;;  %v13044_v41 = vunpack.i.h.bf16 %v13042_v8  ;;  %v13043_v42 = vunpack.i.l.bf16 %v13042_v8  ;;  %v57_v62 = vld [vmem:[%s18488_s1] sm:$0xff] }
 0x2ef   :  { %12214 = vmatpush3.bf16.msra.mxu1 %v12211_v53 }
 0x2f0   :  { %12216 = vmatprep.subr.bf16.mxu1 %v12215_v20  ;;  %v12227_v14 = vpack.c.bf16 %v13039_v23, %v13038_v25  ;;  %v14951_v49 = vpack.c.bf16 %v13044_v41, %v13043_v42 }
 0x2f1   :  { %v14949_v54 = vpop.permute.xlu1 %13046 }
 0x2f3   :  { %12218 = vmatpush3.bf16.msra.mxu1 %v12215_v20 }
 0x2f4   :  { %12220 = vmatprep.subr.bf16.mxu1 %v12219_v13 }
 0x2f5   :  { %v13052_v21 = vpop.permute.xlu1 %13051 }
 0x2f6   :  { %v13054_v58 = vunpack.i.h.bf16 %v13052_v21  ;;  %v13053_v11 = vunpack.i.l.bf16 %v13052_v21 }
 0x2f7   :  { %12222 = vmatpush3.bf16.msra.mxu1 %v12219_v13 }
 0x2f8   :  { %12224 = vmatprep.subr.bf16.mxu1 %v12223_v6  ;;  %v12231_v37 = vpack.c.bf16 %v13054_v58, %v13053_v11  ;;  %v59_v11 = vld [vmem:[%s18488_s1 + $0x10] sm:$0xff] }
 0x2fb   :  { %12226 = vmatpush3.bf16.msra.mxu1 %v12223_v6 }
 0x2fc   :  { %12228 = vmatprep.subr.bf16.mxu1 %v12227_v14 }
 0x2ff   :  { %12230 = vmatpush3.bf16.msra.mxu1 %v12227_v14 }
 0x300   :  { %12232 = vmatprep.subr.bf16.mxu1 %v12231_v37 }
 0x303   :  { %12234 = vmatpush3.bf16.msra.mxu1 %v12231_v37  ;;  %v62_v37 = vld [vmem:[%s18488_s1 + $0x28] sm:$0xff] }
 0x304   :  { %12237 = vmatprep.subr.msk.bf16.mxu1 %vm14829_vm4, %v14951_v49 }
 0x362   :  { %v10895_v44 = vpop.f32.mrb[16].mxu0 }
 0x363   :  { %v904_v53 = vmul.f32 0.35355338, %v10895_v44  ;;  %v824_v30 = vpop.f32.mrb[17].mxu0 }
 0x364   :  { %v903_v4 = vmul.f32 0.35355338, %v824_v30 }
 0x365   :  { %v14962_v27 = vadd.f32 %v904_v53, %v58_v26 }
 0x366   :  { %v10898_v20 = vpop.f32.mrb[18].mxu0  ;;  %v14964_v45 = vadd.f32 %v903_v4, %v57_v62  ;;  %v61_v62 = vld [vmem:[%s18488_s1 + $0x20] sm:$0xff] }
 0x367   :  { %v906_v13 = vmul.f32 0.35355338, %v10898_v20  ;;  %937 = vmax.xlane.f32.xlu0 %v14962_v27  ;;  %v834_v23 = vpop.f32.mrb[19].mxu0 }
 0x368   :  { %935 = vmax.xlane.f32.xlu1 %v14964_v45  ;;  %v905_v6 = vmul.f32 0.35355338, %v834_v23  ;;  %v64_v23 = vld [vmem:[%s18488_s1 + $0x38] sm:$0xff] }
 0x369   :  { %v14971_v25 = vadd.f32 %v906_v13, %v60_v57 }
 0x36a   :  { %v10901_v21 = vpop.f32.mrb[20].mxu0  ;;  %v14977_v41 = vadd.f32 %v905_v6, %v59_v11 }
 0x36b   :  { %v844_v58 = vpop.f32.mrb[21].mxu0  ;;  %v908_v14 = vmul.f32 0.35355338, %v10901_v21 }
 0x36c   :  { %941 = vmax.xlane.f32.xlu1 %v14971_v25  ;;  %v907_v44 = vmul.f32 0.35355338, %v844_v58 }
 0x36d   :  { %v14983_v53 = vadd.f32 %v908_v14, %v62_v37  ;;  %v63_v14 = vld [vmem:[%s18488_s1 + $0x30] sm:$0xff] }
 0x36e   :  { %v10904_v8 = vpop.f32.mrb[22].mxu0  ;;  %v14989_v57 = vadd.f32 %v907_v44, %v61_v62 }
 0x36f   :  { %v854_v42 = vpop.f32.mrb[23].mxu0  ;;  %v910_v4 = vmul.f32 0.35355338, %v10904_v8 }
 0x370   :  { %939 = vmax.xlane.f32.xlu1 %v14977_v41  ;;  %v909_v6 = vmul.f32 0.35355338, %v854_v42  ;;  %v66_v42 = vld [vmem:[%s18488_s1 + $0x48] sm:$0xff] }
 0x371   :  { %v14995_v58 = vadd.f32 %v910_v4, %v64_v23 }
 0x372   :  { %v10907_v26 = vpop.f32.mrb[24].mxu0  ;;  %v15003_v44 = vadd.f32 %v909_v6, %v63_v14  ;;  %v67_v6 = vld [vmem:[%s18488_s1 + $0x50] sm:$0xff] }
 0x373   :  { %v864_v30 = vpop.f32.mrb[25].mxu0  ;;  %v912_v8 = vmul.f32 0.35355338, %v10907_v26 }
 0x374   :  { %945 = vmax.xlane.f32.xlu1 %v14983_v53 }
 0x375   :  { %v15009_v23 = vadd.f32 %v912_v8, %v66_v42 }
 0x376   :  { %v10910_v20 = vpop.f32.mrb[26].mxu0 }
 0x377   :  { %v874_v13 = vpop.f32.mrb[27].mxu0  ;;  %v914_v4 = vmul.f32 0.35355338, %v10910_v20  ;;  %v70_v20 = vld [vmem:[%s18488_s1 + $0x68] sm:$0xff] }
 0x378   :  { %943 = vmax.xlane.f32.xlu1 %v14989_v57  ;;  %v913_v26 = vmul.f32 0.35355338, %v874_v13 }
 0x379   :  { %v15015_v35 = vadd.f32 %v914_v4, %v68_v38  ;;  %v69_v38 = vld [vmem:[%s18488_s1 + $0x60] sm:$0xff] }
 0x37a   :  { %v10913_v21 = vpop.f32.mrb[28].mxu0  ;;  %v15021_v19 = vadd.f32 %v913_v26, %v67_v6  ;;  %v911_v26 = vmul.f32 0.35355338, %v864_v30  ;;  %v15055_v30 = vpop.permute.xlu1 %13061 }
 0x37b   :  { %v884_v11 = vpop.f32.mrb[29].mxu0  ;;  %v916_v14 = vmul.f32 0.35355338, %v10913_v21  ;;  %v72_v21 = vld [vmem:[%s18488_s1 + $0x78] sm:$0xff] }
 0x37c   :  { %949 = vmax.xlane.f32.xlu1 %v14995_v58  ;;  %v915_v8 = vmul.f32 0.35355338, %v884_v11 }
 0x37d   :  { %13056 = vrot.lane.b32.xlu0 %v14719_v55, %s14420_s28  ;;  %v15027_v42 = vadd.f32 %v916_v14, %v70_v20  ;;  %v65_v14 = vld [vmem:[%s18488_s1 + $0x40] sm:$0xff] }
 0x37e   :  { %v10916_v37 = vpop.f32.mrb[30].mxu0  ;;  %v15033_v4 = vadd.f32 %v915_v8, %v69_v38  ;;  %v927_v20 = vadd.f32 %v911_v26, %v65_v14 }
 0x37f   :  { %v894_v62 = vpop.f32.mrb[31].mxu0  ;;  %v918_v13 = vmul.f32 0.35355338, %v10916_v37  ;;  %v71_v37 = vld [vmem:[%s18488_s1 + $0x70] sm:$0xff] }
 0x380   :  { %947 = vmax.xlane.f32.xlu1 %v15003_v44  ;;  %v917_v6 = vmul.f32 0.35355338, %v894_v62 }
 0x381   :  { %v15039_v11 = vadd.f32 %v918_v13, %v72_v21 }
 0x382   :  { %v15048_v8 = vadd.f32 %v917_v6, %v71_v37 }
 0x384   :  { %953 = vmax.xlane.f32.xlu1 %v15009_v23 }
 0x388   :  { %957 = vmax.xlane.f32.xlu1 %v15015_v35 }
 0x38c   :  { %955 = vmax.xlane.f32.xlu1 %v15021_v19 }
 0x390   :  { %961 = vmax.xlane.f32.xlu1 %v15027_v42 }
 0x394   :  { %959 = vmax.xlane.f32.xlu1 %v15033_v4 }
 0x398   :  { %965 = vmax.xlane.f32.xlu1 %v15039_v11 }
 0x39c   :  { %951 = vmax.xlane.f32.xlu0 %v927_v20  ;;  %963 = vmax.xlane.f32.xlu1 %v15048_v8 }
 0x3ad   :  { %13071 = vrot.lane.b32.xlu1 %v14779_v32, %s14420_s28 }
 0x3b2   :  { %13066 = vrot.lane.b32.xlu0 %v14759_v10, %s14420_s28 }
 0x3f4   :  { %v938_v62 = vpop.xlane.xlu0 %937 }
 0x3f5   :  { %v968_v38 = vsub.f32 %v14962_v27, %v938_v62  ;;  %v936_v13 = vpop.xlane.xlu1 %935 }
 0x3f6   :  { %v967_v21 = vsub.f32 %v14964_v45, %v936_v13 }
 0x3f7   :  { %v985_v26 = vmul.f32 1.442695, %v968_v38 }
 0x3f8   :  { %v983_v6 = vmul.f32 1.442695, %v967_v21 }
 0x3f9   :  { %13657 = vpow2.f32 %v985_v26  ;;  %v942_v14 = vpop.xlane.xlu1 %941 }
 0x3fa   :  { %13659 = vpow2.f32 %v983_v6  ;;  %v970_v37 = vsub.f32 %v14971_v25, %v942_v14 }
 0x3fc   :  { %v989_v16 = vmul.f32 1.442695, %v970_v37 }
 0x3fd   :  { %v940_v5 = vpop.xlane.xlu1 %939 }
 0x3fe   :  { %13661 = vpow2.f32 %v989_v16 }
 0x401   :  { %v946_v3 = vpop.xlane.xlu1 %945 }
 0x403   :  { %v15060_v24 = vpop.eup %13657 }
 0x404   :  { %v15062_v15 = vpop.eup %13659  ;;  %1017 = vadd.xlane.f32.xlu0 %v15060_v24 }
 0x405   :  { %v944_v27 = vpop.xlane.xlu1 %943  ;;  %1015 = vadd.xlane.f32.xlu1 %v15062_v15 }
 0x408   :  { %v15066_v45 = vpop.eup %13661 }
 0x409   :  { %v950_v62 = vpop.xlane.xlu1 %949  ;;  %1021 = vadd.xlane.f32.xlu1 %v15066_v45 }
 0x40a   :  { %v974_v25 = vsub.f32 %v14995_v58, %v950_v62 }
 0x40c   :  { %v997_v38 = vmul.f32 1.442695, %v974_v25 }
 0x40d   :  { %v948_v13 = vpop.xlane.xlu1 %947 }
 0x40e   :  { %13663 = vpow2.f32 %v997_v38  ;;  %v973_v16 = vsub.f32 %v15003_v44, %v948_v13  ;;  %v15083_v44 = vpop.permute.xlu0 %13056  ;;  %v972_v13 = vsub.f32 %v14983_v53, %v946_v3 }
 0x410   :  { %v995_v21 = vmul.f32 1.442695, %v973_v16 }
 0x411   :  { %v954_v26 = vpop.xlane.xlu1 %953 }
 0x412   :  { %13665 = vpow2.f32 %v995_v21  ;;  %v976_v6 = vsub.f32 %v15009_v23, %v954_v26  ;;  %v969_v23 = vsub.f32 %v14977_v41, %v940_v5 }
 0x414   :  { %v1001_v14 = vmul.f32 1.442695, %v976_v6  ;;  %v987_v38 = vmul.f32 1.442695, %v969_v23 }
 0x415   :  { %v958_v25 = vpop.xlane.xlu1 %957 }
 0x416   :  { %13667 = vpow2.f32 %v1001_v14  ;;  %v978_v21 = vsub.f32 %v15015_v35, %v958_v25 }
 0x417   :  { %13669 = vpow2.f32 %v987_v38 }
 0x418   :  { %v15072_v37 = vpop.eup %13663  ;;  %v1005_v29 = vmul.f32 1.442695, %v978_v21 }
 0x419   :  { %18625 = vst [vmem:[#allocation33_spill] sm:$0xff] %v15072_v37  ;;  %1029 = vadd.xlane.f32.xlu1 %v15072_v37  ;;  %v956_v6 = vpop.xlane.xlu1 %955  ;;  %v993_v37 = vmul.f32 1.442695, %v972_v13 }
 0x41a   :  { %13076 = vrot.lane.b32.xlu0 %v14799_v61, %s14420_s28  ;;  %v977_v5 = vsub.f32 %v15021_v19, %v956_v6 }
 0x41c   :  { %v15077_v58 = vpop.eup %13665  ;;  %v1003_v3 = vmul.f32 1.442695, %v977_v5 }
 0x41d   :  { %18626 = vst [vmem:[#allocation34_spill] sm:$0xff] %v15077_v58  ;;  %1027 = vadd.xlane.f32.xlu1 %v15077_v58  ;;  %v971_v58 = vsub.f32 %v14989_v57, %v944_v27 }
 0x41f   :  { %v991_v50 = vmul.f32 1.442695, %v971_v58 }
 0x420   :  { %v15080_v62 = vpop.eup %13667 }
 0x421   :  { %18627 = vst [vmem:[#allocation35_spill] sm:$0xff] %v15080_v62  ;;  %1033 = vadd.xlane.f32.xlu1 %v15080_v62  ;;  %v962_v62 = vpop.xlane.xlu1 %961  ;;  %v15091_v35 = vpop.eup %13669 }
 0x422   :  { %v980_v41 = vsub.f32 %v15027_v42, %v962_v62 }
 0x424   :  { %v1009_v57 = vmul.f32 1.442695, %v980_v41  ;;  %v13049_v41 = vunpack.i.h.bf16 %v14949_v54 }
 0x425   :  { %v960_v53 = vpop.xlane.xlu1 %959 }
 0x426   :  { %v979_v27 = vsub.f32 %v15033_v4, %v960_v53  ;;  %v13048_v53 = vunpack.i.l.bf16 %v14949_v54 }
 0x429   :  { %v952_v16 = vpop.xlane.xlu0 %951  ;;  %v966_v62 = vpop.xlane.xlu1 %965 }
 0x42a   :  { %v975_v26 = vsub.f32 %v927_v20, %v952_v16  ;;  %v982_v23 = vsub.f32 %v15039_v11, %v966_v62 }
 0x42c   :  { %v999_v14 = vmul.f32 1.442695, %v975_v26  ;;  %v1013_v38 = vmul.f32 1.442695, %v982_v23 }
 0x42d   :  { %v964_v25 = vpop.xlane.xlu1 %963  ;;  %v13067_v21 = vpop.permute.xlu0 %13066 }
 0x42e   :  { %13671 = vpow2.f32 %v999_v14  ;;  %v981_v13 = vsub.f32 %v15048_v8, %v964_v25  ;;  %v13068_v23 = vunpack.i.l.bf16 %v13067_v21 }
 0x42f   :  { %13673 = vpow2.f32 %v993_v37 }
 0x430   :  { %13675 = vpow2.f32 %v1005_v29  ;;  %v1011_v16 = vmul.f32 1.442695, %v981_v13 }
 0x431   :  { %13677 = vpow2.f32 %v991_v50  ;;  %v1007_v50 = vmul.f32 1.442695, %v979_v27  ;;  %v15152_v26 = vpop.permute.xlu1 %13071 }
 0x432   :  { %13679 = vpow2.f32 %v1003_v3  ;;  %v13074_v13 = vunpack.i.h.bf16 %v15152_v26 }
 0x433   :  { %13681 = vpow2.f32 %v1009_v57 }
 0x434   :  { %13683 = vpow2.f32 %v1007_v50  ;;  %v12241_v50 = vpack.c.bf16 %v13049_v41, %v13048_v53 }
 0x435   :  { %13685 = vpow2.f32 %v1013_v38 }
 0x436   :  { %13687 = vpow2.f32 %v1011_v16  ;;  %v13073_v16 = vunpack.i.l.bf16 %v15152_v26 }
 0x438   :  { %v15093_v20 = vpop.eup %13671 }
 0x439   :  { %1019 = vadd.xlane.f32.xlu0 %v15091_v35  ;;  %1031 = vadd.xlane.f32.xlu1 %v15093_v20  ;;  %v15098_v29 = vpop.eup %13673 }
 0x43a   :  { %v15100_v19 = vpop.eup %13675 }
 0x43b   :  { %v15104_v42 = vpop.eup %13677 }
 0x43c   :  { %v15107_v37 = vpop.eup %13679 }
 0x43d   :  { %1025 = vadd.xlane.f32.xlu0 %v15098_v29  ;;  %1037 = vadd.xlane.f32.xlu1 %v15100_v19  ;;  %v15110_v4 = vpop.eup %13681 }
 0x43e   :  { %v15113_v58 = vpop.eup %13683 }
 0x43f   :  { %v15128_v11 = vpop.eup %13685 }
 0x440   :  { %v15133_v8 = vpop.eup %13687 }
 0x441   :  { %1023 = vadd.xlane.f32.xlu0 %v15104_v42 }
 0x445   :  { %1035 = vadd.xlane.f32.xlu0 %v15107_v37 }
 0x449   :  { %1041 = vadd.xlane.f32.xlu0 %v15110_v4 }
 0x44d   :  { %1039 = vadd.xlane.f32.xlu0 %v15113_v58 }
 0x44e   :  { %1290 = vrot.lane.b32.xlu1 %v14663_v31, %s14421_s16 }
 0x463   :  { %13081 = vrot.lane.b32.xlu0 %v14820_v52, %s14420_s28 }
 0x467   :  { %1288 = vrot.lane.b32.xlu0 %v14671_v34, %s14421_s16 }
 0x46b   :  { %1292 = vrot.lane.b32.xlu0 %v14691_v43, %s14421_s16 }
 0x46f   :  { %1296 = vrot.lane.b32.xlu0 %v14711_v51, %s14421_s16 }
 0x472   :  { %1045 = vadd.xlane.f32.xlu1 %v15128_v11 }
 0x473   :  { %1300 = vrot.lane.b32.xlu0 %v14731_v59, %s14421_s16 }
 0x476   :  { %1043 = vadd.xlane.f32.xlu1 %v15133_v8 }
 0x477   :  { %1304 = vrot.lane.b32.xlu0 %v14751_v7, %s14421_s16 }
 0x47b   :  { %1308 = vrot.lane.b32.xlu0 %v14771_v17, %s14421_s16 }
 0x47f   :  { %1312 = vrot.lane.b32.xlu0 %v14791_v48, %s14421_s16 }
 0x483   :  { %1316 = vrot.lane.b32.xlu0 %v14811_v18, %s14421_s16 }
 0x487   :  { %13086 = vrot.lane.b32.xlu0 %v14679_v39, %s14422_s17  ;;  %1294 = vrot.lane.b32.xlu1 %v14683_v40, %s14421_s16 }
 0x48b   :  { %13096 = vrot.lane.b32.xlu0 %v14719_v55, %s14422_s17  ;;  %1298 = vrot.lane.b32.xlu1 %v14703_v47, %s14421_s16 }
 0x48f   :  { %13106 = vrot.lane.b32.xlu0 %v14759_v10, %s14422_s17  ;;  %1302 = vrot.lane.b32.xlu1 %v14723_v56, %s14421_s16 }
 0x491   :  { %v1018_v6 = vpop.xlane.xlu0 %1017 }
 0x492   :  { %13689 = vrcp.f32 %v1018_v6  ;;  %v1016_v14 = vpop.xlane.xlu1 %1015  ;;  %v12265_v6 = vpack.c.bf16 %v13074_v13, %v13073_v16 }
 0x493   :  { %13691 = vrcp.f32 %v1016_v14  ;;  %13116 = vrot.lane.b32.xlu0 %v14799_v61, %s14422_s17  ;;  %1306 = vrot.lane.b32.xlu1 %v14743_v0, %s14421_s16 }
 0x495   :  { %v13077_v14 = vpop.permute.xlu0 %13076 }
 0x496   :  { %v1022_v38 = vpop.xlane.xlu1 %1021  ;;  %v13079_v26 = vunpack.i.h.bf16 %v13077_v14 }
 0x497   :  { %2324 = vrot.lane.b32.xlu0 %v14671_v34, %s14423_s18  ;;  %1310 = vrot.lane.b32.xlu1 %v14763_v12, %s14421_s16  ;;  %13693 = vrcp.f32 %v1022_v38 }
 0x49b   :  { %2328 = vrot.lane.b32.xlu0 %v14691_v43, %s14423_s18  ;;  %1314 = vrot.lane.b32.xlu1 %v14783_v36, %s14421_s16 }
 0x49c   :  { %v13690_v5 = vpop.eup %13689 }
 0x49d   :  { %v13692_v3 = vpop.eup %13691  ;;  %v1064_v27 = vmul.f32 %v13690_v5, %v15060_v24  ;;  %v13058_v24 = vunpack.i.l.bf16 %v15083_v44  ;;  %v13078_v5 = vunpack.i.l.bf16 %v13077_v14 }
 0x49e   :  { %v1063_v57 = vmul.f32 %v13692_v3, %v15062_v15  ;;  %v13059_v15 = vunpack.i.h.bf16 %v15083_v44  ;;  %v13063_v44 = vunpack.i.l.bf16 %v15055_v30 }
 0x49f   :  { %2332 = vrot.lane.b32.xlu0 %v14711_v51, %s14423_s18  ;;  %1318 = vrot.lane.b32.xlu1 %v14803_v2, %s14421_s16  ;;  %v12271_v53 = vpack.c.bf16 %v13079_v26, %v13078_v5 }
 0x4a0   :  { %10949 = vmatprep.mubr.f32.mxu1 %v1063_v57  ;;  %v12247_v54 = vpack.c.bf16 %v13059_v15, %v13058_v24 }
 0x4a1   :  { %10950 = vmatmul.mubr.f32.vlgmr.msra.gmra.mrb[16].mxu1 %v1064_v27  ;;  %v13694_v15 = vpop.eup %13693 }
 0x4a2   :  { %12240 = vmatpush3.bf16.xpose.msk.msra.mxu1 %vm14829_vm4, %v14951_v49  ;;  %v13064_v49 = vunpack.i.h.bf16 %v15055_v30  ;;  %v13069_v30 = vunpack.i.h.bf16 %v13067_v21 }
 0x4a3   :  { %12243 = vmatprep.subr.msk.bf16.mxu1 %vm14829_vm4, %v12241_v50  ;;  %2336 = vrot.lane.b32.xlu0 %v14731_v59, %s14423_s18 }
 0x4a4   :  { %13091 = vrot.lane.b32.xlu1 %v14699_v46, %s14422_s17  ;;  %v12253_v62 = vpack.c.bf16 %v13064_v49, %v13063_v44  ;;  %v12259_v25 = vpack.c.bf16 %v13069_v30, %v13068_v23  ;;  %v1066_v44 = vmul.f32 %v13694_v15, %v15066_v45 }
 0x4a6   :  { %v1030_v21 = vpop.xlane.xlu1 %1029 }
 0x4a7   :  { %2340 = vrot.lane.b32.xlu0 %v14751_v7, %s14423_s18 }
 0x4a8   :  { %13101 = vrot.lane.b32.xlu1 %v14739_v63, %s14422_s17 }
 0x4aa   :  { %12246 = vmatpush3.bf16.xpose.msk.msra.mxu1 %vm14829_vm4, %v12241_v50  ;;  %v1028_v3 = vpop.xlane.xlu1 %1027 }
 0x4ab   :  { %12249 = vmatprep.subr.msk.bf16.mxu1 %vm14829_vm4, %v12247_v54  ;;  %2344 = vrot.lane.b32.xlu0 %v14771_v17, %s14423_s18 }
 0x4ac   :  { %13111 = vrot.lane.b32.xlu1 %v14779_v32, %s14422_s17 }
 0x4ae   :  { %v1034_v27 = vpop.xlane.xlu1 %1033 }
 0x4af   :  { %2348 = vrot.lane.b32.xlu0 %v14791_v48, %s14423_s18 }
 0x4b0   :  { %13121 = vrot.lane.b32.xlu1 %v14820_v52, %s14422_s17 }
 0x4b2   :  { %12252 = vmatpush3.bf16.xpose.msk.msra.mxu1 %vm14829_vm4, %v12247_v54 }
 0x4b3   :  { %12255 = vmatprep.subr.msk.bf16.mxu1 %vm14829_vm4, %v12253_v62  ;;  %2352 = vrot.lane.b32.xlu0 %v14811_v18, %s14423_s18 }
 0x4b4   :  { %2326 = vrot.lane.b32.xlu1 %v14663_v31, %s14423_s18 }
 0x4b7   :  { %13126 = vrot.lane.b32.xlu0 %v14861_v28, %s14424_s19 }
 0x4b8   :  { %2330 = vrot.lane.b32.xlu1 %v14683_v40, %s14423_s18 }
 0x4ba   :  { %12258 = vmatpush3.bf16.xpose.msk.msra.mxu1 %vm14829_vm4, %v12253_v62 }
 0x4bb   :  { %12261 = vmatprep.subr.msk.bf16.mxu1 %vm14829_vm4, %v12259_v25  ;;  %13136 = vrot.lane.b32.xlu0 %v14865_v33, %s14424_s19 }
 0x4bc   :  { %2334 = vrot.lane.b32.xlu1 %v14703_v47, %s14423_s18 }
 0x4bf   :  { %13146 = vrot.lane.b32.xlu0 %v14881_v9, %s14424_s19 }
 0x4c0   :  { %2338 = vrot.lane.b32.xlu1 %v14723_v56, %s14423_s18 }
 0x4c2   :  { %12264 = vmatpush3.bf16.xpose.msk.msra.mxu1 %vm14829_vm4, %v12259_v25  ;;  %v18629_v25 = vld [vmem:[#allocation30_spill] sm:$0xff] }
 0x4c3   :  { %12267 = vmatprep.subr.msk.bf16.mxu1 %vm14829_vm4, %v12265_v6  ;;  %13151 = vrot.lane.b32.xlu0 %v14875_v60, %s14424_s19 }
 0x4c4   :  { %2342 = vrot.lane.b32.xlu1 %v14743_v0, %s14423_s18 }
 0x4c6   :  { %v1020_v41 = vpop.xlane.xlu0 %1019  ;;  %v1032_v24 = vpop.xlane.xlu1 %1031 }
 0x4c7   :  { %13695 = vrcp.f32 %v1020_v41  ;;  %13161 = vrot.lane.b32.xlu0 %v14889_v1, %s14424_s19 }
 0x4c8   :  { %2346 = vrot.lane.b32.xlu1 %v14763_v12, %s14423_s18  ;;  %13697 = vrcp.f32 %v1028_v3  ;;  %v18632_v3 = vld [vmem:[#allocation33_spill] sm:$0xff] }
 0x4ca   :  { %12270 = vmatpush3.bf16.xpose.msk.msra.mxu1 %vm14829_vm4, %v12265_v6  ;;  %v1026_v57 = vpop.xlane.xlu0 %1025  ;;  %v1038_v23 = vpop.xlane.xlu1 %1037 }
 0x4cb   :  { %12273 = vmatprep.subr.msk.bf16.mxu1 %vm14829_vm4, %v12271_v53  ;;  %13176 = vrot.lane.b32.xlu0 %v14719_v55, %s14425_s20  ;;  %13699 = vrcp.f32 %v1026_v57 }
 0x4cc   :  { %2350 = vrot.lane.b32.xlu1 %v14783_v36, %s14423_s18 }
 0x4ce   :  { %v1024_v50 = vpop.xlane.xlu0 %1023 }
 0x4cf   :  { %13701 = vrcp.f32 %v1024_v50  ;;  %3181 = vrot.lane.b32.xlu0 %v14663_v31, %s14426_s3  ;;  %v18628_v31 = vld [vmem:[#allocation29_spill] sm:$0xff]  ;;  %v18633_v50 = vld [vmem:[#allocation35_spill] sm:$0xff] }
 0x4d0   :  { %2354 = vrot.lane.b32.xlu1 %v14803_v2, %s14423_s18  ;;  %13703 = vrcp.f32 %v1030_v21  ;;  %v18630_v21 = vld [vmem:[#allocation31_spill] sm:$0xff] }
 0x4d1   :  { %v13696_v54 = vpop.eup %13695  ;;  %13705 = vrcp.f32 %v1032_v24 }
 0x4d2   :  { %12276 = vmatpush3.bf16.xpose.msk.msra.mxu1 %vm14829_vm4, %v12271_v53  ;;  %v1036_v55 = vpop.xlane.xlu0 %1035  ;;  %v1065_v49 = vmul.f32 %v13696_v54, %v15091_v35  ;;  %13707 = vrcp.f32 %v1034_v27  ;;  %v13698_v30 = vpop.eup %13697 }
 0x4d3   :  { %3185 = vrot.lane.b32.xlu0 %v14683_v40, %s14426_s3  ;;  %13709 = vrcp.f32 %v1036_v55 }
 0x4d4   :  { %13131 = vrot.lane.b32.xlu1 %v18628_v31, %s14424_s19  ;;  %10952 = vmatprep.mubr.f32.mxu1 %v1065_v49  ;;  %13711 = vrcp.f32 %v1038_v23 }
 0x4d5   :  { %10953 = vmatmul.mubr.f32.gmra.mrb[18].mxu1 %v1066_v44  ;;  %v13700_v35 = vpop.eup %13699 }
 0x4d6   :  { %v1042_v62 = vpop.xlane.xlu0 %1041  ;;  %v1068_v13 = vmul.f32 %v13700_v35, %v15098_v29 }
 0x4d7   :  { %3189 = vrot.lane.b32.xlu0 %v14703_v47, %s14426_s3  ;;  %v18631_v47 = vld [vmem:[#allocation34_spill] sm:$0xff] }
 0x4d8   :  { %13141 = vrot.lane.b32.xlu1 %v18629_v25, %s14424_s19  ;;  %v1069_v6 = vmul.f32 %v13698_v30, %v18631_v47  ;;  %v1291_v30 = vpop.permute.xlu1 %1290 }
 0x4d9   :  { %v13702_v40 = vpop.eup %13701 }
 0x4da   :  { %v1040_v45 = vpop.xlane.xlu0 %1039  ;;  %v1067_v38 = vmul.f32 %v13702_v40, %v15104_v42  ;;  %v13704_v16 = vpop.eup %13703 }
 0x4db   :  { %13713 = vrcp.f32 %v1040_v45  ;;  %3193 = vrot.lane.b32.xlu0 %v14723_v56, %s14426_s3  ;;  %v13706_v14 = vpop.eup %13705  ;;  %v1070_v41 = vmul.f32 %v13704_v16, %v18632_v3 }
 0x4dc   :  { %13156 = vrot.lane.b32.xlu1 %v18630_v21, %s14424_s19  ;;  %10955 = vmatprep.mubr.f32.mxu1 %v1067_v38  ;;  %13715 = vrcp.f32 %v1042_v62  ;;  %v13708_v53 = vpop.eup %13707  ;;  %v1071_v56 = vmul.f32 %v13706_v14, %v15093_v20 }
 0x4dd   :  { %10956 = vmatmul.mubr.f32.gmra.mrb[20].mxu1 %v1068_v13  ;;  %v13710_v29 = vpop.eup %13709  ;;  %v1072_v15 = vmul.f32 %v13708_v53, %v18633_v50 }
 0x4de   :  { %v13082_v26 = vpop.permute.xlu0 %13081  ;;  %10958 = vmatprep.mubr.f32.mxu1 %v1069_v6  ;;  %v13712_v24 = vpop.eup %13711 }
 0x4df   :  { %v13084_v5 = vunpack.i.h.bf16 %v13082_v26  ;;  %v13083_v42 = vunpack.i.l.bf16 %v13082_v26  ;;  %v1074_v55 = vmul.f32 %v13712_v24, %v15100_v19 }
 0x4e0   :  { %13166 = vrot.lane.b32.xlu1 %v14679_v39, %s14425_s20  ;;  %v1073_v39 = vmul.f32 %v13710_v29, %v15107_v37 }
 0x4e1   :  { %v12277_v57 = vpack.c.bf16 %v13084_v5, %v13083_v42  ;;  %10959 = vmatmul.mubr.f32.gmra.mrb[22].mxu1 %v1070_v41 }
 0x4e2   :  { %v1289_v27 = vpop.permute.xlu0 %1288  ;;  %10961 = vmatprep.mubr.f32.mxu1 %v1071_v56 }
 0x4e3   :  { %12279 = vmatprep.subr.msk.bf16.mxu1 %vm14829_vm4, %v12277_v57 }
 0x4e4   :  { %13171 = vrot.lane.b32.xlu1 %v14699_v46, %s14425_s20  ;;  %12282 = vmatpush3.bf16.xpose.msk.msra.mxu1 %vm14829_vm4, %v12277_v57 }
 0x4e5   :  { %v13714_v20 = vpop.eup %13713  ;;  %10962 = vmatmul.mubr.f32.gmra.mrb[24].mxu1 %v1072_v15 }
 0x4e6   :  { %v1293_v54 = vpop.permute.xlu0 %1292  ;;  %10964 = vmatprep.mubr.f32.mxu1 %v1073_v39  ;;  %v13716_v49 = vpop.eup %13715  ;;  %v1075_v44 = vmul.f32 %v13714_v20, %v15113_v58 }
 0x4e7   :  { %v1076_v46 = vmul.f32 %v13716_v49, %v15110_v4 }
 0x4e8   :  { %13181 = vrot.lane.b32.xlu1 %v14739_v63, %s14425_s20 }
 0x4e9   :  { %10965 = vmatmul.mubr.f32.gmra.mrb[26].mxu1 %v1074_v55 }
 0x4ea   :  { %v1297_v62 = vpop.permute.xlu0 %1296  ;;  %10967 = vmatprep.mubr.f32.mxu1 %v1075_v44 }
 0x4ec   :  { %13186 = vrot.lane.b32.xlu1 %v14759_v10, %s14425_s20 }
 0x4ed   :  { %10968 = vmatmul.mubr.f32.gmra.mrb[28].mxu1 %v1076_v46 }
 0x4ee   :  { %v1301_v37 = vpop.permute.xlu0 %1300 }
 0x4f0   :  { %13191 = vrot.lane.b32.xlu1 %v14779_v32, %s14425_s20 }
 0x4f2   :  { %v1305_v19 = vpop.permute.xlu0 %1304 }
 0x4f4   :  { %13196 = vrot.lane.b32.xlu1 %v14799_v61, %s14425_s20 }
 0x4f6   :  { %v1309_v63 = vpop.permute.xlu0 %1308 }
 0x4f8   :  { %13201 = vrot.lane.b32.xlu1 %v14820_v52, %s14425_s20 }
 0x4fa   :  { %v15301_v58 = vpop.permute.xlu0 %1312 }
 0x4fc   :  { %3179 = vrot.lane.b32.xlu1 %v14671_v34, %s14426_s3 }
 0x4fe   :  { %v15305_v10 = vpop.permute.xlu0 %1316 }
 0x4ff   :  { %v1046_v4 = vpop.xlane.xlu1 %1045 }
 0x500   :  { %3183 = vrot.lane.b32.xlu1 %v14691_v43, %s14426_s3  ;;  %13717 = vrcp.f32 %v1046_v4 }
 0x502   :  { %v13087_v32 = vpop.permute.xlu0 %13086 }
 0x503   :  { %v13089_v23 = vunpack.i.h.bf16 %v13087_v32  ;;  %v13088_v61 = vunpack.i.l.bf16 %v13087_v32  ;;  %v1044_v35 = vpop.xlane.xlu1 %1043 }
 0x504   :  { %3187 = vrot.lane.b32.xlu1 %v14711_v51, %s14426_s3  ;;  %13719 = vrcp.f32 %v1044_v35 }
 0x505   :  { %v12315_v52 = vpack.c.bf16 %v13089_v23, %v13088_v61 }
 0x506   :  { %v13097_v40 = vpop.permute.xlu0 %13096 }
 0x507   :  { %v1295_v45 = vpop.permute.xlu1 %1294  ;;  %12317 = vmatprep.subr.msk.bf16.mxu1 %vm14829_vm4, %v12315_v52  ;;  %v13099_v56 = vunpack.i.h.bf16 %v13097_v40  ;;  %v13098_v29 = vunpack.i.l.bf16 %v13097_v40 }
 0x508   :  { %3191 = vrot.lane.b32.xlu1 %v14731_v59, %s14426_s3 }
 0x509   :  { %v12327_v39 = vpack.c.bf16 %v13099_v56, %v13098_v29 }
 0x50a   :  { %v15315_v34 = vpop.permute.xlu0 %13106  ;;  %v13718_v38 = vpop.eup %13717 }
 0x50b   :  { %v1299_v43 = vpop.permute.xlu1 %1298  ;;  %v1078_v6 = vmul.f32 %v13718_v38, %v15128_v11  ;;  %v13108_v4 = vunpack.i.l.bf16 %v15315_v34 }
 0x50e   :  { %v13720_v13 = vpop.eup %13719  ;;  %v15317_v16 = vpop.permute.xlu0 %13116 }
 0x50f   :  { %v1303_v47 = vpop.permute.xlu1 %1302  ;;  %v1077_v51 = vmul.f32 %v13720_v13, %v15133_v8  ;;  %v13118_v38 = vunpack.i.l.bf16 %v15317_v16 }
 0x511   :  { %10970 = vmatprep.mubr.f32.mxu1 %v1077_v51 }
 0x512   :  { %v2325_v14 = vpop.permute.xlu0 %2324  ;;  %10971 = vmatmul.mubr.f32.gmra.mrb[30].mxu1 %v1078_v6 }
 0x513   :  { %11005 = vmatprep.mubr.msk.f32.mxu1 %vm677_vm3, %v1289_v27  ;;  %v1307_v26 = vpop.permute.xlu1 %1306 }
 0x516   :  { %v15322_v5 = vpop.permute.xlu0 %2328  ;;  %11006 = vmatmul.mubr.msk.f32.vlgmr.msra.gmra.mrb[32].mxu1 %vm677_vm3, %v1291_v30  ;;  %v13109_v30 = vunpack.i.h.bf16 %v15315_v34 }
 0x517   :  { %12320 = vmatpush3.bf16.xpose.msk.msra.mxu1 %vm14829_vm4, %v12315_v52  ;;  %v1311_v59 = vpop.permute.xlu1 %1310  ;;  %11008 = vmatprep.mubr.msk.f32.mxu1 %vm677_vm3, %v1293_v54 }
 0x518   :  { %v12339_v23 = vpack.c.bf16 %v13109_v30, %v13108_v4 }
 0x51a   :  { %v15328_v42 = vpop.permute.xlu0 %2332  ;;  %11009 = vmatmul.mubr.msk.f32.gmra.mrb[34].mxu1 %vm677_vm3, %v1295_v45 }
 0x51b   :  { %v1315_v11 = vpop.permute.xlu1 %1314  ;;  %11011 = vmatprep.mubr.msk.f32.mxu1 %vm677_vm3, %v1297_v62 }
 0x51e   :  { %v15332_v8 = vpop.permute.xlu0 %2336  ;;  %11012 = vmatmul.mubr.msk.f32.gmra.mrb[36].mxu1 %vm677_vm3, %v1299_v43  ;;  %v13119_v43 = vunpack.i.h.bf16 %v15317_v16 }
 0x51f   :  { %v1319_v3 = vpop.permute.xlu1 %1318  ;;  %11014 = vmatprep.mubr.msk.f32.mxu1 %vm677_vm3, %v1301_v37 }
 0x522   :  { %v15336_v41 = vpop.permute.xlu0 %2340  ;;  %11015 = vmatmul.mubr.msk.f32.gmra.mrb[38].mxu1 %vm677_vm3, %v1303_v47  ;;  %v12351_v47 = vpack.c.bf16 %v13119_v43, %v13118_v38 }
 0x523   :  { %v13092_v53 = vpop.permute.xlu1 %13091  ;;  %11017 = vmatprep.mubr.msk.f32.mxu1 %vm677_vm3, %v1305_v19 }
 0x524   :  { %v13094_v57 = vunpack.i.h.bf16 %v13092_v53  ;;  %v13093_v27 = vunpack.i.l.bf16 %v13092_v53 }
 0x526   :  { %v12321_v50 = vpack.c.bf16 %v13094_v57, %v13093_v27  ;;  %v15340_v15 = vpop.permute.xlu0 %2344  ;;  %11018 = vmatmul.mubr.msk.f32.gmra.mrb[40].mxu1 %vm677_vm3, %v1307_v26 }
 0x527   :  { %v13102_v24 = vpop.permute.xlu1 %13101  ;;  %11020 = vmatprep.mubr.msk.f32.mxu1 %vm677_vm3, %v1309_v63 }
 0x528   :  { %12323 = vmatprep.subr.msk.bf16.mxu1 %vm14829_vm4, %v12321_v50  ;;  %v13104_v55 = vunpack.i.h.bf16 %v13102_v24  ;;  %v13103_v49 = vunpack.i.l.bf16 %v13102_v24 }
 0x529   :  { %12326 = vmatpush3.bf16.xpose.msk.msra.mxu1 %vm14829_vm4, %v12321_v50 }
 0x52a   :  { %v15348_v20 = vpop.permute.xlu0 %2348  ;;  %11021 = vmatmul.mubr.msk.f32.gmra.mrb[42].mxu1 %vm677_vm3, %v1311_v59  ;;  %12329 = vmatprep.subr.msk.bf16.mxu1 %vm14829_vm4, %v12327_v39  ;;  %v12333_v46 = vpack.c.bf16 %v13104_v55, %v13103_v49 }
 0x52b   :  { %v13112_v54 = vpop.permute.xlu1 %13111  ;;  %11023 = vmatprep.mubr.msk.f32.mxu1 %vm677_vm3, %v15301_v58 }
 0x52c   :  { %v13114_v35 = vunpack.i.h.bf16 %v13112_v54  ;;  %v13113_v52 = vunpack.i.l.bf16 %v13112_v54 }
 0x52e   :  { %v15355_v44 = vpop.permute.xlu0 %2352  ;;  %11024 = vmatmul.mubr.msk.f32.gmra.mrb[44].mxu1 %vm677_vm3, %v1315_v11  ;;  %v12345_v45 = vpack.c.bf16 %v13114_v35, %v13113_v52 }
 0x52f   :  { %v13122_v62 = vpop.permute.xlu1 %13121  ;;  %11026 = vmatprep.mubr.msk.f32.mxu1 %vm677_vm3, %v15305_v10 }
 0x530   :  { %v13124_v6 = vunpack.i.h.bf16 %v13122_v62 }
 0x531   :  { %12332 = vmatpush3.bf16.xpose.msk.msra.mxu1 %vm14829_vm4, %v12327_v39 }
 0x532   :  { %v13127_v37 = vpop.permute.xlu0 %13126  ;;  %11027 = vmatmul.mubr.msk.f32.gmra.mrb[46].mxu1 %vm677_vm3, %v1319_v3  ;;  %12335 = vmatprep.subr.msk.bf16.mxu1 %vm14829_vm4, %v12333_v46 }
 0x533   :  { %v13129_v19 = vunpack.i.h.bf16 %v13127_v37  ;;  %v13128_v63 = vunpack.i.l.bf16 %v13127_v37  ;;  %v2327_v58 = vpop.permute.xlu1 %2326  ;;  %11169 = vmatprep.mubr.msk.f32.mxu1 %vm677_vm3, %v2325_v14  ;;  %v13123_v14 = vunpack.i.l.bf16 %v13122_v62 }
 0x535   :  { %v12283_v10 = vpack.c.bf16 %v13129_v19, %v13128_v63  ;;  %v12357_v11 = vpack.c.bf16 %v13124_v6, %v13123_v14 }
 0x536   :  { %v13137_v26 = vpop.permute.xlu0 %13136 }
 0x537   :  { %12284 = vmatprep.subr.bf16.mxu0 %v12283_v10  ;;  %v15368_v32 = vpop.permute.xlu1 %2330  ;;  %v13139_v3 = vunpack.i.h.bf16 %v13137_v26  ;;  %v13138_v53 = vunpack.i.l.bf16 %v13137_v26 }
 0x538   :  { %12286 = vmatpush3.bf16.msra.mxu0 %v12283_v10 }
 0x539   :  { %12338 = vmatpush3.bf16.xpose.msk.msra.mxu1 %vm14829_vm4, %v12333_v46  ;;  %v12291_v54 = vpack.c.bf16 %v13139_v3, %v13138_v53 }
 0x53a   :  { %12341 = vmatprep.subr.msk.bf16.mxu1 %vm14829_vm4, %v12339_v23  ;;  %v13147_v56 = vpop.permute.xlu0 %13146 }
 0x53b   :  { %v15374_v61 = vpop.permute.xlu1 %2334  ;;  %v13149_v62 = vunpack.i.h.bf16 %v13147_v56  ;;  %v13148_v46 = vunpack.i.l.bf16 %v13147_v56 }
 0x53d   :  { %v12299_v35 = vpack.c.bf16 %v13149_v62, %v13148_v46 }
 0x53e   :  { %v13152_v55 = vpop.permute.xlu0 %13151 }
 0x53f   :  { %v15376_v40 = vpop.permute.xlu1 %2338  ;;  %v13154_v19 = vunpack.i.h.bf16 %v13152_v55  ;;  %v13153_v63 = vunpack.i.l.bf16 %v13152_v55 }
 0x541   :  { %12344 = vmatpush3.bf16.xpose.msk.msra.mxu1 %vm14829_vm4, %v12339_v23  ;;  %v12303_v43 = vpack.c.bf16 %v13154_v19, %v13153_v63 }
 0x542   :  { %12347 = vmatprep.subr.msk.bf16.mxu1 %vm14829_vm4, %v12345_v45  ;;  %v13162_v4 = vpop.permute.xlu0 %13161 }
 0x543   :  { %v15382_v34 = vpop.permute.xlu1 %2342 }
 0x547   :  { %v15386_v13 = vpop.permute.xlu1 %2346 }
 0x549   :  { %12350 = vmatpush3.bf16.xpose.msk.msra.mxu1 %vm14829_vm4, %v12345_v45 }
 0x54a   :  { %12353 = vmatprep.subr.msk.bf16.mxu1 %vm14829_vm4, %v12351_v47 }
 0x54b   :  { %v15392_v51 = vpop.permute.xlu1 %2350 }
 0x54f   :  { %v15394_v59 = vpop.permute.xlu1 %2354 }
 0x551   :  { %12356 = vmatpush3.bf16.xpose.msk.msra.mxu1 %vm14829_vm4, %v12351_v47 }
 0x552   :  { %12359 = vmatprep.subr.msk.bf16.mxu1 %vm14829_vm4, %v12357_v11 }
 0x553   :  { %v13132_v16 = vpop.permute.xlu1 %13131 }
 0x554   :  { %v13134_v29 = vunpack.i.h.bf16 %v13132_v16  ;;  %v13133_v57 = vunpack.i.l.bf16 %v13132_v16  ;;  %v13163_v16 = vunpack.i.l.bf16 %v13162_v4 }
 0x556   :  { %v12287_v27 = vpack.c.bf16 %v13134_v29, %v13133_v57 }
 0x557   :  { %v13142_v50 = vpop.permute.xlu1 %13141 }
 0x558   :  { %v13144_v24 = vunpack.i.h.bf16 %v13142_v50  ;;  %v13143_v39 = vunpack.i.l.bf16 %v13142_v50  ;;  %12288 = vmatprep.subr.bf16.mxu0 %v12287_v27 }
 0x559   :  { %12290 = vmatpush3.bf16.msra.mxu0 %v12287_v27  ;;  %12362 = vmatpush3.bf16.xpose.msk.msra.mxu1 %vm14829_vm4, %v12357_v11  ;;  %v13164_v11 = vunpack.i.h.bf16 %v13162_v4 }
 0x55a   :  { %12292 = vmatprep.subr.bf16.mxu0 %v12291_v54  ;;  %v12295_v37 = vpack.c.bf16 %v13144_v24, %v13143_v39 }
 0x55b   :  { %v13157_v49 = vpop.permute.xlu1 %13156  ;;  %v12311_v56 = vpack.c.bf16 %v13164_v11, %v13163_v16 }
 0x55c   :  { %v13159_v38 = vunpack.i.h.bf16 %v13157_v49  ;;  %v13158_v47 = vunpack.i.l.bf16 %v13157_v49 }
 0x55d   :  { %12294 = vmatpush3.bf16.msra.mxu0 %v12291_v54 }
 0x55e   :  { %12296 = vmatprep.subr.bf16.mxu0 %v12295_v37 }
 0x55f   :  { %v13167_v30 = vpop.permute.xlu1 %13166 }
 0x560   :  { %v13169_v10 = vunpack.i.h.bf16 %v13167_v30  ;;  %v13168_v23 = vunpack.i.l.bf16 %v13167_v30  ;;  %11170 = vmatmul.mubr.msk.f32.vlgmr.msra.gmra.mrb[48].mxu1 %vm677_vm3, %v2327_v58  ;;  %v13177_v58 = vpop.permute.xlu0 %13176 }
 0x561   :  { %12298 = vmatpush3.bf16.msra.mxu0 %v12295_v37  ;;  %11172 = vmatprep.mubr.msk.f32.mxu1 %vm677_vm3, %v15322_v5  ;;  %v13179_v3 = vunpack.i.h.bf16 %v13177_v58  ;;  %v13178_v53 = vunpack.i.l.bf16 %v13177_v58 }
 0x562   :  { %v12395_v52 = vpack.c.bf16 %v13169_v10, %v13168_v23  ;;  %12300 = vmatprep.subr.bf16.mxu0 %v12299_v35 }
 0x563   :  { %v13172_v45 = vpop.permute.xlu1 %13171  ;;  %v12407_v29 = vpack.c.bf16 %v13179_v3, %v13178_v53 }
 0x564   :  { %v13174_v6 = vunpack.i.h.bf16 %v13172_v45  ;;  %v13173_v14 = vunpack.i.l.bf16 %v13172_v45  ;;  %11173 = vmatmul.mubr.msk.f32.gmra.mrb[50].mxu1 %vm677_vm3, %v15368_v32  ;;  %12397 = vmatprep.subr.msk.bf16.mxu1 %vm14829_vm4, %v12395_v52  ;;  %v12307_v32 = vpack.c.bf16 %v13159_v38, %v13158_v47  ;;  %v3182_v37 = vpop.permute.xlu0 %3181 }
 0x565   :  { %12302 = vmatpush3.bf16.msra.mxu0 %v12299_v35  ;;  %11175 = vmatprep.mubr.msk.f32.mxu1 %vm677_vm3, %v15328_v42 }
 0x566   :  { %v12401_v5 = vpack.c.bf16 %v13174_v6, %v13173_v14  ;;  %12400 = vmatpush3.bf16.xpose.msk.msra.mxu1 %vm14829_vm4, %v12395_v52  ;;  %12304 = vmatprep.subr.bf16.mxu0 %v12303_v43 }
 0x567   :  { %v13182_v26 = vpop.permute.xlu1 %13181 }
 0x568   :  { %11176 = vmatmul.mubr.msk.f32.gmra.mrb[52].mxu1 %vm677_vm3, %v15374_v61  ;;  %12403 = vmatprep.subr.msk.bf16.mxu1 %vm14829_vm4, %v12401_v5  ;;  %v13183_v57 = vunpack.i.l.bf16 %v13182_v26  ;;  %v3186_v63 = vpop.permute.xlu0 %3185 }
 0x569   :  { %12306 = vmatpush3.bf16.msra.mxu0 %v12303_v43  ;;  %11178 = vmatprep.mubr.msk.f32.mxu1 %vm677_vm3, %v15332_v8  ;;  %v13184_v8 = vunpack.i.h.bf16 %v13182_v26 }
 0x56a   :  { %12308 = vmatprep.subr.bf16.mxu0 %v12307_v32 }
 0x56b   :  { %v13187_v42 = vpop.permute.xlu1 %13186 }
 0x56c   :  { %11179 = vmatmul.mubr.msk.f32.gmra.mrb[54].mxu1 %vm677_vm3, %v15376_v40  ;;  %v13188_v24 = vunpack.i.l.bf16 %v13187_v42  ;;  %v3190_v23 = vpop.permute.xlu0 %3189 }
 0x56d   :  { %12310 = vmatpush3.bf16.msra.mxu0 %v12307_v32  ;;  %11181 = vmatprep.mubr.msk.f32.mxu1 %vm677_vm3, %v15336_v41  ;;  %v12413_v41 = vpack.c.bf16 %v13184_v8, %v13183_v57  ;;  %v15514_v8 = vld [vmem:[%s18488_s1] sm:$0xff] }
 0x56e   :  { %12406 = vmatpush3.bf16.xpose.msk.msra.mxu1 %vm14829_vm4, %v12401_v5  ;;  %12312 = vmatprep.subr.bf16.mxu0 %v12311_v56  ;;  %18651 = vst [vmem:[#allocation48_spill] sm:$0xff] %v15514_v8 }
 0x56f   :  { %12409 = vmatprep.subr.msk.bf16.mxu1 %vm14829_vm4, %v12407_v29  ;;  %v13192_v61 = vpop.permute.xlu1 %13191 }
 0x570   :  { %11182 = vmatmul.mubr.msk.f32.gmra.mrb[56].mxu1 %vm677_vm3, %v15382_v34  ;;  %v13194_v39 = vunpack.i.h.bf16 %v13192_v61  ;;  %v3194_v52 = vpop.permute.xlu0 %3193 }
 0x571   :  { %12314 = vmatpush3.bf16.msra.mxu0 %v12311_v56  ;;  %11184 = vmatprep.mubr.msk.f32.mxu1 %vm677_vm3, %v15340_v15  ;;  %v13189_v15 = vunpack.i.h.bf16 %v13187_v42 }
 0x573   :  { %v13197_v40 = vpop.permute.xlu1 %13196 }
 0x574   :  { %v15431_v27 = vpop.f32.mrb[16].mxu1  ;;  %11185 = vmatmul.mubr.msk.f32.gmra.mrb[58].mxu1 %vm677_vm3, %v15386_v13 }
 0x575   :  { %18634 = vst [vmem:[#allocation29_spill] sm:$0xff] %v15431_v27  ;;  %v15435_v50 = vpop.f32.mrb[17].mxu1  ;;  %11187 = vmatprep.mubr.msk.f32.mxu1 %vm677_vm3, %v15348_v20  ;;  %v12419_v20 = vpack.c.bf16 %v13189_v15, %v13188_v24  ;;  %v15524_v24 = vld [vmem:[%s18488_s1 + $0x18] sm:$0xff] }
 0x576   :  { %18635 = vst [vmem:[#allocation30_spill] sm:$0xff] %v15435_v50  ;;  %12412 = vmatpush3.bf16.xpose.msk.msra.mxu1 %vm14829_vm4, %v12407_v29  ;;  %v15506_v29 = vld [vmem:[%s18488_s1 + $0x8] sm:$0xff]  ;;  %18652 = vst [vmem:[#allocation49_spill] sm:$0xff] %v15524_v24 }
 0x577   :  { %12415 = vmatprep.subr.msk.bf16.mxu1 %vm14829_vm4, %v12413_v41  ;;  %v13202_v34 = vpop.permute.xlu1 %13201  ;;  %18650 = vst [vmem:[#allocation47_spill] sm:$0xff] %v15506_v29 }
 0x578   :  { %11188 = vmatmul.mubr.msk.f32.gmra.mrb[60].mxu1 %vm677_vm3, %v15392_v51  ;;  %v13193_v51 = vunpack.i.l.bf16 %v13192_v61  ;;  %v13204_v49 = vunpack.i.h.bf16 %v13202_v34  ;;  %v13203_v62 = vunpack.i.l.bf16 %v13202_v34 }
 0x579   :  { %11190 = vmatprep.mubr.msk.f32.mxu1 %vm677_vm3, %v15355_v44  ;;  %v13199_v44 = vunpack.i.h.bf16 %v13197_v40 }
 0x57a   :  { %v12425_v54 = vpack.c.bf16 %v13194_v39, %v13193_v51  ;;  %v12437_v46 = vpack.c.bf16 %v13204_v49, %v13203_v62  ;;  %v15550_v62 = vld [vmem:[%s18488_s1 + $0x20] sm:$0xff] }
 0x57b   :  { %v3180_v13 = vpop.permute.xlu1 %3179  ;;  %18655 = vst [vmem:[#allocation52_spill] sm:$0xff] %v15550_v62 }
 0x57c   :  { %11191 = vmatmul.mubr.msk.f32.gmra.mrb[62].mxu1 %vm677_vm3, %v15394_v59  ;;  %v13198_v59 = vunpack.i.l.bf16 %v13197_v40 }
 0x57d   :  { %11307 = vmatprep.mubr.msk.f32.mxu1 %vm677_vm3, %v3180_v13 }
 0x57e   :  { %12418 = vmatpush3.bf16.xpose.msk.msra.mxu1 %vm14829_vm4, %v12413_v41  ;;  %v12431_v55 = vpack.c.bf16 %v13199_v44, %v13198_v59 }
 0x57f   :  { %12421 = vmatprep.subr.msk.bf16.mxu1 %vm14829_vm4, %v12419_v20  ;;  %v3184_v19 = vpop.permute.xlu1 %3183 }
 0x583   :  { %v3188_v30 = vpop.permute.xlu1 %3187 }
 0x586   :  { %12424 = vmatpush3.bf16.xpose.msk.msra.mxu1 %vm14829_vm4, %v12419_v20  ;;  %v15532_v20 = vld [vmem:[%s18488_s1 + $0x10] sm:$0xff] }
 0x587   :  { %12427 = vmatprep.subr.msk.bf16.mxu1 %vm14829_vm4, %v12425_v54  ;;  %v3192_v35 = vpop.permute.xlu1 %3191  ;;  %18653 = vst [vmem:[#allocation50_spill] sm:$0xff] %v15532_v20 }
 0x58e   :  { %12430 = vmatpush3.bf16.xpose.msk.msra.mxu1 %vm14829_vm4, %v12425_v54 }
 0x58f   :  { %12433 = vmatprep.subr.msk.bf16.mxu1 %vm14829_vm4, %v12431_v55 }
 0x596   :  { %12436 = vmatpush3.bf16.xpose.msk.msra.mxu1 %vm14829_vm4, %v12431_v55  ;;  %v15542_v55 = vld [vmem:[%s18488_s1 + $0x28] sm:$0xff] }
 0x597   :  { %12439 = vmatprep.subr.msk.bf16.mxu1 %vm14829_vm4, %v12437_v46  ;;  %18654 = vst [vmem:[#allocation51_spill] sm:$0xff] %v15542_v55 }
 0x59e   :  { %12442 = vmatpush3.bf16.xpose.msk.msra.mxu1 %vm14829_vm4, %v12437_v46 }
 0x5a5   :  { %11308 = vmatmul.mubr.msk.f32.vlgmr.msra.gmra.mrb[64].mxu1 %vm677_vm3, %v3182_v37 }
 0x5a6   :  { %11310 = vmatprep.mubr.msk.f32.mxu1 %vm677_vm3, %v3184_v19 }
 0x5a8   :  { %v15470_v4 = vpop.f32.mrb[18].mxu1 }
 0x5a9   :  { %18636 = vst [vmem:[#allocation34_spill] sm:$0xff] %v15470_v4  ;;  %11311 = vmatmul.mubr.msk.f32.gmra.mrb[66].mxu1 %vm677_vm3, %v3186_v63  ;;  %v15473_v10 = vpop.f32.mrb[19].mxu1 }
 0x5aa   :  { %18637 = vst [vmem:[#allocation33_spill] sm:$0xff] %v15473_v10  ;;  %11313 = vmatprep.mubr.msk.f32.mxu1 %vm677_vm3, %v3188_v30 }
 0x5ad   :  { %11314 = vmatmul.mubr.msk.f32.gmra.mrb[68].mxu1 %vm677_vm3, %v3190_v23  ;;  %v15560_v23 = vld [vmem:[%s18488_s1 + $0x38] sm:$0xff] }
 0x5ae   :  { %11316 = vmatprep.mubr.msk.f32.mxu1 %vm677_vm3, %v3192_v35 }
 0x5b0   :  { %v15478_v45 = vpop.f32.mrb[20].mxu1 }
 0x5b1   :  { %18638 = vst [vmem:[#allocation35_spill] sm:$0xff] %v15478_v45  ;;  %11317 = vmatmul.mubr.msk.f32.gmra.mrb[70].mxu1 %vm677_vm3, %v3194_v52  ;;  %v15481_v43 = vpop.f32.mrb[21].mxu1  ;;  %v15568_v52 = vld [vmem:[%s18488_s1 + $0x30] sm:$0xff] }
 0x5b2   :  { %18639 = vst [vmem:[#allocation36_spill] sm:$0xff] %v15481_v43 }
 0x5b4   :  { %v15483_v38 = vpop.f32.mrb[22].mxu1 }
 0x5b5   :  { %18640 = vst [vmem:[#allocation37_spill] sm:$0xff] %v15483_v38  ;;  %v15485_v47 = vpop.f32.mrb[23].mxu1 }
 0x5b6   :  { %18641 = vst [vmem:[#allocation38_spill] sm:$0xff] %v15485_v47 }
 0x5b8   :  { %v15487_v6 = vpop.f32.mrb[24].mxu1 }
 0x5b9   :  { %18642 = vst [vmem:[#allocation39_spill] sm:$0xff] %v15487_v6  ;;  %v15489_v14 = vpop.f32.mrb[25].mxu1 }
 0x5ba   :  { %18643 = vst [vmem:[#allocation40_spill] sm:$0xff] %v15489_v14 }
 0x5bc   :  { %v15491_v58 = vpop.f32.mrb[26].mxu1 }
 0x5bd   :  { %18644 = vst [vmem:[#allocation41_spill] sm:$0xff] %v15491_v58  ;;  %v15493_v5 = vpop.f32.mrb[27].mxu1 }
 0x5be   :  { %18645 = vst [vmem:[#allocation42_spill] sm:$0xff] %v15493_v5 }
 0x5c0   :  { %v15495_v26 = vpop.f32.mrb[28].mxu1 }
 0x5c1   :  { %18646 = vst [vmem:[#allocation43_spill] sm:$0xff] %v15495_v26  ;;  %v15497_v11 = vpop.f32.mrb[29].mxu1 }
 0x5c2   :  { %18647 = vst [vmem:[#allocation44_spill] sm:$0xff] %v15497_v11 }
 0x5e5   :  { %v15499_v16 = vpop.f32.mrb[30].mxu1 }
 0x5e6   :  { %18648 = vst [vmem:[#allocation45_spill] sm:$0xff] %v15499_v16  ;;  %v15501_v32 = vpop.f32.mrb[31].mxu1 }
 0x5e7   :  { %18649 = vst [vmem:[#allocation46_spill] sm:$0xff] %v15501_v32 }
 0x5e9   :  { %v11007_v3 = vpop.f32.mrb[32].mxu1 }
 0x5ea   :  { %v1562_v53 = vmul.f32 0.35355338, %v11007_v3  ;;  %v1482_v42 = vpop.f32.mrb[33].mxu1 }
 0x5eb   :  { %v1561_v56 = vmul.f32 0.35355338, %v1482_v42 }
 0x5ec   :  { %v15509_v61 = vadd.f32 %v15506_v29, %v1562_v53 }
 0x5ed   :  { %v15517_v57 = vadd.f32 %v15514_v8, %v1561_v56  ;;  %v11010_v40 = vpop.f32.mrb[34].mxu1 }
 0x5ee   :  { %v1564_v41 = vmul.f32 0.35355338, %v11010_v40  ;;  %1595 = vmax.xlane.f32.xlu1 %v15509_v61  ;;  %v1492_v34 = vpop.f32.mrb[35].mxu1 }
 0x5ef   :  { %v1563_v15 = vmul.f32 0.35355338, %v1492_v34  ;;  %1593 = vmax.xlane.f32.xlu0 %v15517_v57 }
 0x5f0   :  { %v15527_v13 = vadd.f32 %v15524_v24, %v1564_v41  ;;  %v15578_v41 = vld [vmem:[%s18488_s1 + $0x48] sm:$0xff] }
 0x5f1   :  { %v15535_v39 = vadd.f32 %v15532_v20, %v1563_v15  ;;  %v11013_v51 = vpop.f32.mrb[36].mxu1  ;;  %v15586_v15 = vld [vmem:[%s18488_s1 + $0x40] sm:$0xff] }
 0x5f2   :  { %v1566_v54 = vmul.f32 0.35355338, %v11013_v51  ;;  %1599 = vmax.xlane.f32.xlu1 %v15527_v13  ;;  %v1502_v44 = vpop.f32.mrb[37].mxu1  ;;  %18656 = vst [vmem:[#allocation53_spill] sm:$0xff] %v15586_v15 }
 0x5f3   :  { %v1565_v59 = vmul.f32 0.35355338, %v1502_v44  ;;  %1597 = vmax.xlane.f32.xlu0 %v15535_v39 }
 0x5f4   :  { %v15545_v49 = vadd.f32 %v15542_v55, %v1566_v54 }
 0x5f5   :  { %v15553_v46 = vadd.f32 %v15550_v62, %v1565_v59  ;;  %v11016_v37 = vpop.f32.mrb[38].mxu1 }
 0x5f6   :  { %v1568_v19 = vmul.f32 0.35355338, %v11016_v37  ;;  %1603 = vmax.xlane.f32.xlu1 %v15545_v49  ;;  %v1512_v63 = vpop.f32.mrb[39].mxu1 }
 0x5f7   :  { %v1567_v30 = vmul.f32 0.35355338, %v1512_v63  ;;  %1601 = vmax.xlane.f32.xlu0 %v15553_v46 }
 0x5f8   :  { %v15563_v35 = vadd.f32 %v15560_v23, %v1568_v19  ;;  %v15596_v19 = vld [vmem:[%s18488_s1 + $0x58] sm:$0xff] }
 0x5f9   :  { %v15571_v3 = vadd.f32 %v15568_v52, %v1567_v30  ;;  %v11019_v53 = vpop.f32.mrb[40].mxu1  ;;  %18657 = vst [vmem:[#allocation54_spill] sm:$0xff] %v15596_v19  ;;  %v15604_v30 = vld [vmem:[%s18488_s1 + $0x50] sm:$0xff] }
 0x5fa   :  { %v1570_v42 = vmul.f32 0.35355338, %v11019_v53  ;;  %1607 = vmax.xlane.f32.xlu1 %v15563_v35  ;;  %v1522_v56 = vpop.f32.mrb[41].mxu1  ;;  %18658 = vst [vmem:[#allocation55_spill] sm:$0xff] %v15604_v30 }
 0x5fb   :  { %v1569_v40 = vmul.f32 0.35355338, %v1522_v56  ;;  %1605 = vmax.xlane.f32.xlu0 %v15571_v3 }
 0x5fc   :  { %v15581_v34 = vadd.f32 %v15578_v41, %v1570_v42 }
 0x5fd   :  { %v15589_v51 = vadd.f32 %v15586_v15, %v1569_v40  ;;  %v11022_v54 = vpop.f32.mrb[42].mxu1 }
 0x5fe   :  { %v1572_v44 = vmul.f32 0.35355338, %v11022_v54  ;;  %1611 = vmax.xlane.f32.xlu1 %v15581_v34  ;;  %v1532_v59 = vpop.f32.mrb[43].mxu1 }
 0x5ff   :  { %v1571_v37 = vmul.f32 0.35355338, %v1532_v59  ;;  %1609 = vmax.xlane.f32.xlu0 %v15589_v51 }
 0x600   :  { %v15599_v63 = vadd.f32 %v15596_v19, %v1572_v44  ;;  %v15614_v44 = vld [vmem:[%s18488_s1 + $0x68] sm:$0xff] }
 0x601   :  { %v15607_v53 = vadd.f32 %v15604_v30, %v1571_v37  ;;  %v11025_v42 = vpop.f32.mrb[44].mxu1  ;;  %v15622_v37 = vld [vmem:[%s18488_s1 + $0x60] sm:$0xff] }
 0x602   :  { %v1574_v56 = vmul.f32 0.35355338, %v11025_v42  ;;  %1615 = vmax.xlane.f32.xlu1 %v15599_v63  ;;  %v1542_v40 = vpop.f32.mrb[45].mxu1 }
 0x603   :  { %v1573_v54 = vmul.f32 0.35355338, %v1542_v40  ;;  %1613 = vmax.xlane.f32.xlu0 %v15607_v53 }
 0x604   :  { %v15617_v59 = vadd.f32 %v15614_v44, %v1574_v56  ;;  %v15632_v56 = vld [vmem:[%s18488_s1 + $0x78] sm:$0xff] }
 0x605   :  { %v15625_v42 = vadd.f32 %v15622_v37, %v1573_v54  ;;  %v11028_v22 = vpop.f32.mrb[46].mxu1  ;;  %v15640_v54 = vld [vmem:[%s18488_s1 + $0x70] sm:$0xff] }
 0x606   :  { %v1576_v40 = vmul.f32 0.35355338, %v11028_v22  ;;  %1619 = vmax.xlane.f32.xlu1 %v15617_v59  ;;  %v1552_v16 = vpop.f32.mrb[47].mxu1 }
 0x607   :  { %v1575_v32 = vmul.f32 0.35355338, %v1552_v16  ;;  %1617 = vmax.xlane.f32.xlu0 %v15625_v42 }
 0x608   :  { %v15635_v26 = vadd.f32 %v15632_v56, %v1576_v40 }
 0x609   :  { %v15643_v22 = vadd.f32 %v15640_v54, %v1575_v32 }
 0x60a   :  { %1623 = vmax.xlane.f32.xlu1 %v15635_v26 }
 0x60b   :  { %1621 = vmax.xlane.f32.xlu0 %v15643_v22 }
 0x61b   :  { %3197 = vrot.lane.b32.xlu1 %v14743_v0, %s14426_s3 }
 0x621   :  { %3195 = vrot.lane.b32.xlu0 %v14751_v7, %s14426_s3 }
 0x633   :  { %v11171_v16 = vpop.f32.mrb[48].mxu1 }
 0x634   :  { %v2518_v40 = vpop.f32.mrb[49].mxu1  ;;  %v2598_v6 = vmul.f32 0.35355338, %v11171_v16 }
 0x635   :  { %v2597_v5 = vmul.f32 0.35355338, %v2518_v40 }
 0x636   :  { %v15655_v45 = vadd.f32 %v15506_v29, %v2598_v6 }
 0x637   :  { %v11174_v11 = vpop.f32.mrb[50].mxu1  ;;  %v15652_v32 = vadd.f32 %v15514_v8, %v2597_v5 }
 0x638   :  { %v2528_v58 = vpop.f32.mrb[51].mxu1  ;;  %v2600_v43 = vmul.f32 0.35355338, %v11174_v11 }
 0x639   :  { %v2599_v47 = vmul.f32 0.35355338, %v2528_v58 }
 0x63a   :  { %v15667_v5 = vadd.f32 %v15524_v24, %v2600_v43 }
 0x63b   :  { %v11177_v14 = vpop.f32.mrb[52].mxu1  ;;  %v15664_v16 = vadd.f32 %v15532_v20, %v2599_v47 }
 0x63c   :  { %v2538_v38 = vpop.f32.mrb[53].mxu1  ;;  %v2602_v40 = vmul.f32 0.35355338, %v11177_v14  ;;  %18660 = vst [vmem:[#allocation57_spill] sm:$0xff] %v15667_v5 }
 0x63d   :  { %18659 = vst [vmem:[#allocation56_spill] sm:$0xff] %v15664_v16  ;;  %v2601_v58 = vmul.f32 0.35355338, %v2538_v38 }
 0x63e   :  { %v15676_v4 = vadd.f32 %v15542_v55, %v2602_v40 }
 0x63f   :  { %2629 = vmax.xlane.f32.xlu1 %v15652_v32  ;;  %v15658_v0 = vpop.f32.mrb[54].mxu1  ;;  %v15679_v10 = vadd.f32 %v15550_v62, %v2601_v58 }
 0x640   :  { %v15660_v7 = vpop.f32.mrb[55].mxu1  ;;  %2631 = vmax.xlane.f32.xlu0 %v15655_v45  ;;  %18661 = vst [vmem:[#allocation58_spill] sm:$0xff] %v15676_v4 }
 0x643   :  { %2633 = vmax.xlane.f32.xlu1 %v15664_v16  ;;  %v15670_v6 = vpop.f32.mrb[56].mxu1 }
 0x644   :  { %v15672_v11 = vpop.f32.mrb[57].mxu1  ;;  %2635 = vmax.xlane.f32.xlu0 %v15667_v5 }
 0x647   :  { %2639 = vmax.xlane.f32.xlu1 %v15676_v4  ;;  %v15682_v47 = vpop.f32.mrb[58].mxu1 }
 0x648   :  { %v15684_v43 = vpop.f32.mrb[59].mxu1  ;;  %2637 = vmax.xlane.f32.xlu0 %v15679_v10 }
 0x64b   :  { %v15687_v38 = vpop.f32.mrb[60].mxu1 }
 0x64c   :  { %v15689_v14 = vpop.f32.mrb[61].mxu1 }
 0x64f   :  { %v15691_v27 = vpop.f32.mrb[62].mxu1 }
 0x650   :  { %v15693_v50 = vpop.f32.mrb[63].mxu1 }
 0x678   :  { %v15695_v40 = vpop.f32.mrb[64].mxu1 }
 0x679   :  { %18662 = vst [vmem:[#allocation59_spill] sm:$0xff] %v15695_v40  ;;  %v15697_v58 = vpop.f32.mrb[65].mxu1 }
 0x67a   :  { %18663 = vst [vmem:[#allocation60_spill] sm:$0xff] %v15697_v58 }
 0x67b   :  { %v1596_v62 = vpop.xlane.xlu1 %1595 }
 0x67c   :  { %v1626_v20 = vsub.f32 %v15509_v61, %v1596_v62  ;;  %v15700_v29 = vpop.f32.mrb[66].mxu1  ;;  %v1594_v8 = vpop.xlane.xlu0 %1593 }
 0x67d   :  { %18664 = vst [vmem:[#allocation61_spill] sm:$0xff] %v15700_v29  ;;  %v1625_v55 = vsub.f32 %v15517_v57, %v1594_v8  ;;  %v15703_v24 = vpop.f32.mrb[67].mxu1 }
 0x67e   :  { %18665 = vst [vmem:[#allocation62_spill] sm:$0xff] %v15703_v24  ;;  %v1643_v1 = vmul.f32 1.442695, %v1626_v20 }
 0x67f   :  { %v1641_v21 = vmul.f32 1.442695, %v1625_v55  ;;  %v1600_v4 = vpop.xlane.xlu1 %1599 }
 0x680   :  { %13721 = vpow2.f32 %v1643_v1  ;;  %v1628_v16 = vsub.f32 %v15527_v13, %v1600_v4  ;;  %v15706_v5 = vpop.f32.mrb[68].mxu1  ;;  %v1598_v40 = vpop.xlane.xlu0 %1597 }
 0x681   :  { %13723 = vpow2.f32 %v1641_v21  ;;  %v1627_v58 = vsub.f32 %v15535_v39, %v1598_v40  ;;  %v15709_v61 = vpop.f32.mrb[69].mxu1 }
 0x682   :  { %v1647_v62 = vmul.f32 1.442695, %v1628_v16 }
 0x683   :  { %v1604_v29 = vpop.xlane.xlu1 %1603  ;;  %v1645_v8 = vmul.f32 1.442695, %v1627_v58 }
 0x684   :  { %13725 = vpow2.f32 %v1647_v62  ;;  %v1630_v57 = vsub.f32 %v15545_v49, %v1604_v29  ;;  %v15712_v20 = vpop.f32.mrb[70].mxu1  ;;  %v1602_v55 = vpop.xlane.xlu0 %1601 }
 0x685   :  { %v1629_v1 = vsub.f32 %v15553_v46, %v1602_v55  ;;  %v15715_v4 = vpop.f32.mrb[71].mxu1  ;;  %13727 = vpow2.f32 %v1645_v8 }
 0x686   :  { %v1651_v21 = vmul.f32 1.442695, %v1630_v57 }
 0x687   :  { %v1649_v13 = vmul.f32 1.442695, %v1629_v1  ;;  %v1608_v24 = vpop.xlane.xlu1 %1607 }
 0x688   :  { %v1632_v39 = vsub.f32 %v15563_v35, %v1608_v24  ;;  %v1606_v40 = vpop.xlane.xlu0 %1605 }
 0x689   :  { %13729 = vpow2.f32 %v1649_v13  ;;  %v1631_v49 = vsub.f32 %v15571_v3, %v1606_v40 }
 0x68a   :  { %v15718_v16 = vpop.eup %13721  ;;  %v1655_v29 = vmul.f32 1.442695, %v1632_v39  ;;  %13731 = vpow2.f32 %v1651_v21 }
 0x68b   :  { %v15720_v58 = vpop.eup %13723  ;;  %v1612_v62 = vpop.xlane.xlu1 %1611  ;;  %1675 = vadd.xlane.f32.xlu1 %v15718_v16  ;;  %v1653_v35 = vmul.f32 1.442695, %v1631_v49 }
 0x68c   :  { %v1634_v46 = vsub.f32 %v15581_v34, %v1612_v62  ;;  %v1610_v55 = vpop.xlane.xlu0 %1609  ;;  %1673 = vadd.xlane.f32.xlu0 %v15720_v58  ;;  %13733 = vpow2.f32 %v1655_v29 }
 0x68d   :  { %v1633_v57 = vsub.f32 %v15589_v51, %v1610_v55 }
 0x68e   :  { %v15726_v8 = vpop.eup %13725  ;;  %v1659_v24 = vmul.f32 1.442695, %v1634_v46 }
 0x68f   :  { %v1616_v1 = vpop.xlane.xlu1 %1615  ;;  %1679 = vadd.xlane.f32.xlu1 %v15726_v8  ;;  %v15731_v21 = vpop.eup %13727  ;;  %v1657_v40 = vmul.f32 1.442695, %v1633_v57 }
 0x690   :  { %13735 = vpow2.f32 %v1659_v24  ;;  %v1636_v3 = vsub.f32 %v15599_v63, %v1616_v1  ;;  %v1614_v13 = vpop.xlane.xlu0 %1613 }
 0x691   :  { %13737 = vpow2.f32 %v1653_v35  ;;  %v1635_v51 = vsub.f32 %v15607_v53, %v1614_v13 }
 0x692   :  { %v1663_v34 = vmul.f32 1.442695, %v1636_v3 }
 0x693   :  { %v15733_v39 = vpop.eup %13729  ;;  %v1620_v62 = vpop.xlane.xlu1 %1619  ;;  %1677 = vadd.xlane.f32.xlu1 %v15731_v21  ;;  %v1661_v24 = vmul.f32 1.442695, %v1635_v51 }
 0x694   :  { %13739 = vpow2.f32 %v1663_v34  ;;  %v1638_v29 = vsub.f32 %v15617_v59, %v1620_v62  ;;  %v1618_v49 = vpop.xlane.xlu0 %1617  ;;  %1681 = vadd.xlane.f32.xlu0 %v15733_v39  ;;  %v15739_v63 = vpop.eup %13731 }
 0x695   :  { %13741 = vpow2.f32 %v1657_v40  ;;  %v1637_v35 = vsub.f32 %v15625_v42, %v1618_v49 }
 0x696   :  { %v1667_v46 = vmul.f32 1.442695, %v1638_v29  ;;  %v15743_v1 = vpop.eup %13733 }
 0x697   :  { %v1624_v55 = vpop.xlane.xlu1 %1623  ;;  %1683 = vadd.xlane.f32.xlu1 %v15739_v63  ;;  %v1665_v59 = vmul.f32 1.442695, %v1637_v35  ;;  %v2604_v35 = vmul.f32 0.35355338, %v15658_v0 }
 0x698   :  { %13743 = vpow2.f32 %v1667_v46  ;;  %v1622_v57 = vpop.xlane.xlu0 %1621  ;;  %v1640_v3 = vsub.f32 %v15635_v26, %v1624_v55 }
 0x699   :  { %13745 = vpow2.f32 %v1661_v24  ;;  %v1639_v51 = vsub.f32 %v15643_v22, %v1622_v57  ;;  %v15783_v57 = vadd.f32 %v15560_v23, %v2604_v35 }
 0x69a   :  { %v15745_v53 = vpop.eup %13735  ;;  %13747 = vpow2.f32 %v1665_v59  ;;  %v1671_v62 = vmul.f32 1.442695, %v1640_v3  ;;  %v2605_v59 = vmul.f32 0.35355338, %v15672_v11 }
 0x69b   :  { %1687 = vadd.xlane.f32.xlu1 %v15743_v1  ;;  %1691 = vadd.xlane.f32.xlu0 %v15745_v53  ;;  %v15750_v34 = vpop.eup %13737  ;;  %v3198_v40 = vpop.permute.xlu1 %3197  ;;  %v1669_v49 = vmul.f32 1.442695, %v1639_v51  ;;  %v2609_v51 = vmul.f32 0.35355338, %v15689_v14 }
 0x69c   :  { %v3196_v13 = vpop.permute.xlu0 %3195  ;;  %13749 = vpow2.f32 %v1671_v62  ;;  %v15788_v3 = vadd.f32 %v15586_v15, %v2605_v59 }
 0x69d   :  { %11319 = vmatprep.mubr.msk.f32.mxu1 %vm677_vm3, %v3196_v13  ;;  %13751 = vpow2.f32 %v1669_v49  ;;  %v2603_v13 = vmul.f32 0.35355338, %v15660_v7 }
 0x69e   :  { %v15753_v42 = vpop.eup %13739  ;;  %11320 = vmatmul.mubr.msk.f32.gmra.mrb[72].mxu1 %vm677_vm3, %v3198_v40  ;;  %v2608_v40 = vmul.f32 0.35355338, %v15682_v47 }
 0x69f   :  { %1685 = vadd.xlane.f32.xlu1 %v15750_v34  ;;  %1695 = vadd.xlane.f32.xlu0 %v15753_v42  ;;  %v15759_v29 = vpop.eup %13741 }
 0x6a0   :  { %v15813_v62 = vadd.f32 %v15596_v19, %v2608_v40  ;;  %v2610_v40 = vmul.f32 0.35355338, %v15687_v38 }
 0x6a2   :  { %v15761_v26 = vpop.eup %13743 }
 0x6a3   :  { %1689 = vadd.xlane.f32.xlu1 %v15759_v29  ;;  %1699 = vadd.xlane.f32.xlu0 %v15761_v26  ;;  %v15765_v46 = vpop.eup %13745 }
 0x6a4   :  { %v15768_v55 = vpop.eup %13747 }
 0x6a6   :  { %v15771_v22 = vpop.eup %13749 }
 0x6a7   :  { %1693 = vadd.xlane.f32.xlu1 %v15765_v46  ;;  %v15774_v24 = vpop.eup %13751 }
 0x6ab   :  { %1697 = vadd.xlane.f32.xlu1 %v15768_v55 }
 0x6af   :  { %1703 = vadd.xlane.f32.xlu1 %v15771_v22 }
 0x6b3   :  { %1701 = vadd.xlane.f32.xlu1 %v15774_v24 }
 0x6b9   :  { %3199 = vrot.lane.b32.xlu0 %v14771_v17, %s14426_s3  ;;  %v15793_v17 = vadd.f32 %v15568_v52, %v2603_v13  ;;  %v2607_v13 = vmul.f32 0.35355338, %v15684_v43 }
 0x6c4   :  { %3201 = vrot.lane.b32.xlu1 %v14763_v12, %s14426_s3  ;;  %v2606_v12 = vmul.f32 0.35355338, %v15670_v6 }
 0x6c6   :  { %v15798_v0 = vadd.f32 %v15578_v41, %v2606_v12  ;;  %v15829_v12 = vadd.f32 %v15604_v30, %v2607_v13 }
 0x6cc   :  { %v15805_v11 = vpop.xlane.xlu1 %2629 }
 0x6cd   :  { %v15807_v7 = vpop.xlane.xlu0 %2631 }
 0x6d0   :  { %v15810_v6 = vpop.xlane.xlu1 %2633 }
 0x6d1   :  { %v15816_v49 = vpop.xlane.xlu0 %2635 }
 0x6d5   :  { %v15824_v35 = vpop.xlane.xlu0 %2637 }
 0x6d8   :  { %2643 = vmax.xlane.f32.xlu0 %v15783_v57 }
 0x6dc   :  { %2645 = vmax.xlane.f32.xlu0 %v15788_v3 }
 0x6e8   :  { %2641 = vmax.xlane.f32.xlu1 %v15793_v17 }
 0x6ec   :  { %2647 = vmax.xlane.f32.xlu1 %v15798_v0 }
 0x6f2   :  { %3203 = vrot.lane.b32.xlu0 %v14791_v48, %s14426_s3  ;;  %v15820_v48 = vadd.f32 %v15622_v37, %v2609_v51 }
 0x6fd   :  { %3205 = vrot.lane.b32.xlu1 %v14783_v36, %s14426_s3  ;;  %v15822_v36 = vpop.xlane.xlu1 %2639 }
 0x711   :  { %2651 = vmax.xlane.f32.xlu0 %v15813_v62 }
 0x715   :  { %2653 = vmax.xlane.f32.xlu0 %v15820_v48 }
 0x718   :  { %v1676_v47 = vpop.xlane.xlu1 %1675 }
 0x719   :  { %13753 = vrcp.f32 %v1676_v47  ;;  %v1674_v59 = vpop.xlane.xlu0 %1673  ;;  %v15834_v47 = vadd.f32 %v15614_v44, %v2610_v40 }
 0x71a   :  { %13755 = vrcp.f32 %v1674_v59 }
 0x71c   :  { %v1680_v14 = vpop.xlane.xlu1 %1679 }
 0x71d   :  { %13757 = vrcp.f32 %v1680_v14 }
 0x720   :  { %v1678_v37 = vpop.xlane.xlu1 %1677 }
 0x721   :  { %13759 = vrcp.f32 %v1678_v37  ;;  %2649 = vmax.xlane.f32.xlu1 %v15829_v12  ;;  %v1682_v51 = vpop.xlane.xlu0 %1681 }
 0x722   :  { %13761 = vrcp.f32 %v1682_v51 }
 0x723   :  { %v13754_v19 = vpop.eup %13753 }
 0x724   :  { %v13756_v59 = vpop.eup %13755  ;;  %v1684_v15 = vpop.xlane.xlu1 %1683  ;;  %v1722_v38 = vmul.f32 %v13754_v19, %v15718_v16 }
 0x725   :  { %13763 = vrcp.f32 %v1684_v15  ;;  %2655 = vmax.xlane.f32.xlu1 %v15834_v47  ;;  %v1721_v43 = vmul.f32 %v13756_v59, %v15720_v58 }
 0x727   :  { %11061 = vmatprep.mubr.f32.mxu0 %v1721_v43  ;;  %v13758_v37 = vpop.eup %13757 }
 0x728   :  { %v1688_v13 = vpop.xlane.xlu1 %1687  ;;  %11062 = vmatmul.mubr.f32.vlgmr.msra.gmra.mrb[32].mxu0 %v1722_v38  ;;  %v1692_v14 = vpop.xlane.xlu0 %1691  ;;  %v1724_v58 = vmul.f32 %v13758_v37, %v15726_v8 }
 0x729   :  { %13765 = vrcp.f32 %v1688_v13 }
 0x72b   :  { %v13760_v30 = vpop.eup %13759  ;;  %3207 = vrot.lane.b32.xlu0 %v14811_v18, %s14426_s3 }
 0x72c   :  { %v13762_v44 = vpop.eup %13761  ;;  %v1686_v40 = vpop.xlane.xlu1 %1685  ;;  %v1723_v15 = vmul.f32 %v13760_v30, %v15731_v21 }
 0x72d   :  { %v1696_v51 = vpop.xlane.xlu0 %1695  ;;  %13767 = vrcp.f32 %v1686_v40  ;;  %v1725_v19 = vmul.f32 %v13762_v44, %v15733_v39 }
 0x72e   :  { %11064 = vmatprep.mubr.f32.mxu0 %v1723_v15  ;;  %13769 = vrcp.f32 %v1692_v14 }
 0x72f   :  { %v13764_v16 = vpop.eup %13763  ;;  %11065 = vmatmul.mubr.f32.gmra.mrb[34].mxu0 %v1724_v58 }
 0x730   :  { %v1690_v59 = vpop.xlane.xlu1 %1689  ;;  %11067 = vmatprep.mubr.f32.mxu0 %v1725_v19  ;;  %v1726_v18 = vmul.f32 %v13764_v16, %v15739_v63 }
 0x731   :  { %v1700_v43 = vpop.xlane.xlu0 %1699  ;;  %13771 = vrcp.f32 %v1690_v59  ;;  %v2612_v59 = vmul.f32 0.35355338, %v15691_v27 }
 0x732   :  { %13773 = vrcp.f32 %v1696_v51 }
 0x733   :  { %11068 = vmatmul.mubr.f32.gmra.mrb[36].mxu0 %v1726_v18  ;;  %v13766_v30 = vpop.eup %13765 }
 0x734   :  { %v1694_v38 = vpop.xlane.xlu1 %1693  ;;  %v1728_v63 = vmul.f32 %v13766_v30, %v15743_v1 }
 0x735   :  { %v3200_v13 = vpop.permute.xlu0 %3199  ;;  %13775 = vrcp.f32 %v1694_v38 }
 0x736   :  { %11322 = vmatprep.mubr.msk.f32.mxu1 %vm677_vm3, %v3200_v13  ;;  %3209 = vrot.lane.b32.xlu1 %v14803_v2, %s14426_s3  ;;  %13777 = vrcp.f32 %v1700_v43 }
 0x737   :  { %v13768_v8 = vpop.eup %13767 }
 0x738   :  { %v1698_v21 = vpop.xlane.xlu1 %1697  ;;  %v1727_v39 = vmul.f32 %v13768_v8, %v15750_v34  ;;  %v13770_v14 = vpop.eup %13769 }
 0x739   :  { %13779 = vrcp.f32 %v1698_v21  ;;  %v1730_v51 = vmul.f32 %v13770_v14, %v15745_v53  ;;  %v2662_v21 = vsub.f32 %v15655_v45, %v15807_v7  ;;  %v2665_v14 = vsub.f32 %v15679_v10, %v15824_v35  ;;  %v18666_v7 = vld [vmem:[#allocation57_spill] sm:$0xff]  ;;  %v18667_v10 = vld [vmem:[#allocation56_spill] sm:$0xff] }
 0x73a   :  { %11070 = vmatprep.mubr.f32.mxu0 %v1727_v39  ;;  %v2663_v35 = vsub.f32 %v18667_v10, %v15810_v6 }
 0x73b   :  { %v13772_v37 = vpop.eup %13771  ;;  %11071 = vmatmul.mubr.f32.gmra.mrb[38].mxu0 %v1728_v63  ;;  %v2679_v63 = vmul.f32 1.442695, %v2662_v21 }
 0x73c   :  { %v1704_v44 = vpop.xlane.xlu1 %1703  ;;  %v1729_v40 = vmul.f32 %v13772_v37, %v15759_v29  ;;  %v13774_v15 = vpop.eup %13773 }
 0x73d   :  { %13781 = vrcp.f32 %v1704_v44  ;;  %v1732_v1 = vmul.f32 %v13774_v15, %v15753_v42  ;;  %v2685_v44 = vmul.f32 1.442695, %v2665_v14  ;;  %v2664_v15 = vsub.f32 %v18666_v7, %v15816_v49 }
 0x73e   :  { %11073 = vmatprep.mubr.f32.mxu0 %v1729_v40  ;;  %v2661_v40 = vsub.f32 %v15652_v32, %v15805_v11  ;;  %v18668_v32 = vld [vmem:[#allocation58_spill] sm:$0xff] }
 0x73f   :  { %v13776_v2 = vpop.eup %13775  ;;  %11074 = vmatmul.mubr.f32.gmra.mrb[40].mxu0 %v1730_v51  ;;  %v2666_v11 = vsub.f32 %v18668_v32, %v15822_v36 }
 0x740   :  { %v1702_v58 = vpop.xlane.xlu1 %1701  ;;  %v1731_v34 = vmul.f32 %v13776_v2, %v15765_v46  ;;  %v13778_v19 = vpop.eup %13777  ;;  %v15859_v46 = vadd.f32 %v15632_v56, %v2612_v59  ;;  %v2677_v45 = vmul.f32 1.442695, %v2661_v40 }
 0x741   :  { %13783 = vrcp.f32 %v1702_v58  ;;  %v1734_v43 = vmul.f32 %v13778_v19, %v15761_v26  ;;  %v14317_v26 = vld [vmem:[#allocation2 + $0x10] sm:$0xff]  ;;  %v2683_v58 = vmul.f32 1.442695, %v2664_v15 }
 0x742   :  { %11076 = vmatprep.mubr.f32.mxu0 %v1731_v34  ;;  %13785 = vpow2.f32 %v2679_v63  ;;  %v2681_v34 = vmul.f32 1.442695, %v2663_v35 }
 0x743   :  { %v13780_v16 = vpop.eup %13779  ;;  %11077 = vmatmul.mubr.f32.gmra.mrb[42].mxu0 %v1732_v1  ;;  %13787 = vpow2.f32 %v2685_v44  ;;  %v2687_v1 = vmul.f32 1.442695, %v2666_v11 }
 0x744   :  { %v3202_v29 = vpop.permute.xlu1 %3201  ;;  %v1733_v53 = vmul.f32 %v13780_v16, %v15768_v55  ;;  %v2611_v55 = vmul.f32 0.35355338, %v15693_v50  ;;  %13789 = vpow2.f32 %v2677_v45 }
 0x745   :  { %11323 = vmatmul.mubr.msk.f32.gmra.mrb[74].mxu1 %vm677_vm3, %v3202_v29  ;;  %13791 = vpow2.f32 %v2683_v58  ;;  %v18669_v29 = vld [vmem:[#allocation31_spill] sm:$0xff]  ;;  %v18671_v58 = vld [vmem:[#allocation61_spill] sm:$0xff] }
 0x746   :  { %11079 = vmatprep.mubr.f32.mxu0 %v1733_v53  ;;  %v15866_v13 = vadd.f32 %v15640_v54, %v2611_v55  ;;  %13793 = vpow2.f32 %v2681_v34  ;;  %v3455_v34 = vmul.f32 0.35355338, %v18671_v58 }
 0x747   :  { %11080 = vmatmul.mubr.f32.gmra.mrb[44].mxu0 %v1734_v43  ;;  %v13782_v18 = vpop.eup %13781  ;;  %13795 = vpow2.f32 %v2687_v1 }
 0x748   :  { %v1736_v27 = vmul.f32 %v13782_v18, %v15771_v22 }
 0x74a   :  { %2659 = vmax.xlane.f32.xlu0 %v15859_v46 }
 0x74b   :  { %v13784_v42 = vpop.eup %13783 }
 0x74c   :  { %v1735_v38 = vmul.f32 %v13784_v42, %v15774_v24  ;;  %v14318_v24 = vld [vmem:[#allocation2] sm:$0xff]  ;;  %v15901_v51 = vpop.eup %13785 }
 0x74d   :  { %v15906_v2 = vpop.eup %13787 }
 0x74e   :  { %11082 = vmatprep.mubr.f32.mxu0 %v1735_v38  ;;  %v15913_v19 = vpop.eup %13789 }
 0x74f   :  { %11083 = vmatmul.mubr.f32.gmra.mrb[46].mxu0 %v1736_v27  ;;  %v15916_v49 = vpop.eup %13791 }
 0x750   :  { %v15919_v59 = vpop.eup %13793 }
 0x751   :  { %v15924_v36 = vpop.eup %13795 }
 0x75a   :  { %2657 = vmax.xlane.f32.xlu1 %v15866_v13 }
 0x760   :  { %1931 = vrot.lane.b32.xlu0 %v14317_v26, %s14417_s0  ;;  %v18670_v26 = vld [vmem:[#allocation32_spill] sm:$0xff] }
 0x764   :  { %13211 = vrot.lane.b32.xlu0 %v18628_v31, %s14427_s21 }
 0x765   :  { %v15872_v56 = vpop.xlane.xlu0 %2643 }
 0x768   :  { %13216 = vrot.lane.b32.xlu0 %v14865_v33, %s14427_s21 }
 0x769   :  { %v2646_v22 = vpop.xlane.xlu0 %2645 }
 0x76a   :  { %v2669_v18 = vsub.f32 %v15788_v3, %v2646_v22 }
 0x76b   :  { %2128 = vrot.lane.b32.xlu1 %v14318_v24, %s14417_s0 }
 0x76c   :  { %13226 = vrot.lane.b32.xlu0 %v14881_v9, %s14427_s21  ;;  %v2693_v38 = vmul.f32 1.442695, %v2669_v18  ;;  %v3459_v18 = vmul.f32 0.35355338, %v15712_v20 }
 0x76d   :  { %v3204_v50 = vpop.permute.xlu0 %3203 }
 0x76e   :  { %11325 = vmatprep.mubr.msk.f32.mxu1 %vm677_vm3, %v3204_v50  ;;  %13797 = vpow2.f32 %v2693_v38  ;;  %v15982_v38 = vadd.f32 %v15560_v23, %v3459_v18 }
 0x76f   :  { %13206 = vrot.lane.b32.xlu1 %v14861_v28, %s14427_s21 }
 0x771   :  { %v15882_v54 = vpop.f32.mrb[72].mxu1 }
 0x772   :  { %v15884_v30 = vpop.f32.mrb[73].mxu1 }
 0x773   :  { %13221 = vrot.lane.b32.xlu1 %v18629_v25, %s14427_s21 }
 0x775   :  { %v15888_v8 = vpop.xlane.xlu1 %2641 }
 0x777   :  { %13231 = vrot.lane.b32.xlu1 %v14875_v60, %s14427_s21 }
 0x778   :  { %v15934_v63 = vpop.eup %13797 }
 0x779   :  { %v15894_v39 = vpop.xlane.xlu1 %2647 }
 0x77a   :  { %v2670_v44 = vsub.f32 %v15798_v0, %v15894_v39 }
 0x77c   :  { %v2695_v40 = vmul.f32 1.442695, %v2670_v44 }
 0x77d   :  { %v3206_v37 = vpop.permute.xlu1 %3205 }
 0x77e   :  { %11326 = vmatmul.mubr.msk.f32.gmra.mrb[76].mxu1 %vm677_vm3, %v3206_v37 }
 0x78b   :  { %2711 = vadd.xlane.f32.xlu0 %v15901_v51 }
 0x78f   :  { %2717 = vadd.xlane.f32.xlu0 %v15906_v2 }
 0x79b   :  { %2709 = vadd.xlane.f32.xlu1 %v15913_v19 }
 0x79e   :  { %v2652_v16 = vpop.xlane.xlu0 %2651 }
 0x79f   :  { %2715 = vadd.xlane.f32.xlu1 %v15916_v49  ;;  %v2672_v27 = vsub.f32 %v15813_v62, %v2652_v16  ;;  %v2668_v62 = vsub.f32 %v15783_v57, %v15872_v56 }
 0x7a1   :  { %v2699_v24 = vmul.f32 1.442695, %v2672_v27  ;;  %v2691_v14 = vmul.f32 1.442695, %v2668_v62  ;;  %v3461_v27 = vmul.f32 0.35355338, %v15882_v54 }
 0x7a2   :  { %v2654_v6 = vpop.xlane.xlu0 %2653  ;;  %v18675_v54 = vld [vmem:[#allocation59_spill] sm:$0xff] }
 0x7a3   :  { %2713 = vadd.xlane.f32.xlu1 %v15919_v59  ;;  %13799 = vpow2.f32 %v2699_v24  ;;  %v2673_v57 = vsub.f32 %v15820_v48, %v2654_v6  ;;  %v18672_v6 = vld [vmem:[#allocation49_spill] sm:$0xff]  ;;  %v15991_v20 = vadd.f32 %v15578_v41, %v3461_v27  ;;  %v18677_v41 = vld [vmem:[#allocation47_spill] sm:$0xff] }
 0x7a5   :  { %13236 = vrot.lane.b32.xlu0 %v18669_v29, %s14427_s21 }
 0x7a6   :  { %v3208_v53 = vpop.permute.xlu0 %3207 }
 0x7a7   :  { %2719 = vadd.xlane.f32.xlu1 %v15924_v36  ;;  %11328 = vmatprep.mubr.msk.f32.mxu1 %vm677_vm3, %v3208_v53  ;;  %v15970_v53 = vadd.f32 %v18672_v6, %v3455_v34  ;;  %v18680_v34 = vld [vmem:[#allocation52_spill] sm:$0xff] }
 0x7ad   :  { %v15937_v3 = vpop.eup %13799 }
 0x7ae   :  { %v2650_v43 = vpop.xlane.xlu1 %2649 }
 0x7af   :  { %v2671_v45 = vsub.f32 %v15829_v12, %v2650_v43 }
 0x7b1   :  { %v2697_v56 = vmul.f32 1.442695, %v2671_v45 }
 0x7b2   :  { %v2656_v42 = vpop.xlane.xlu1 %2655 }
 0x7b3   :  { %v2674_v50 = vsub.f32 %v15834_v47, %v2656_v42  ;;  %v2667_v47 = vsub.f32 %v15793_v17, %v15888_v8  ;;  %v2701_v17 = vmul.f32 1.442695, %v2673_v57 }
 0x7b5   :  { %v2703_v21 = vmul.f32 1.442695, %v2674_v50  ;;  %v2689_v37 = vmul.f32 1.442695, %v2667_v47  ;;  %v3453_v47 = vmul.f32 0.35355338, %v18675_v54 }
 0x7b6   :  { %v3210_v55 = vpop.permute.xlu1 %3209 }
 0x7b7   :  { %11329 = vmatmul.mubr.msk.f32.gmra.mrb[78].mxu1 %vm677_vm3, %v3210_v55  ;;  %13801 = vpow2.f32 %v2703_v21  ;;  %v16006_v45 = vadd.f32 %v18677_v41, %v3453_v47 }
 0x7b8   :  { %13241 = vrot.lane.b32.xlu1 %v18670_v26, %s14427_s21  ;;  %13803 = vpow2.f32 %v2691_v14 }
 0x7b9   :  { %13805 = vpow2.f32 %v2689_v37  ;;  %v18676_v37 = vld [vmem:[#allocation48_spill] sm:$0xff] }
 0x7ba   :  { %13807 = vpow2.f32 %v2695_v40 }
 0x7bb   :  { %13809 = vpow2.f32 %v2697_v56 }
 0x7bc   :  { %13811 = vpow2.f32 %v2701_v17  ;;  %v18679_v17 = vld [vmem:[#allocation50_spill] sm:$0xff] }
 0x7c1   :  { %v15942_v22 = vpop.eup %13801 }
 0x7c2   :  { %v15951_v15 = vpop.eup %13803 }
 0x7c3   :  { %v15954_v8 = vpop.eup %13805 }
 0x7c4   :  { %2725 = vadd.xlane.f32.xlu0 %v15934_v63  ;;  %v15957_v0 = vpop.eup %13807 }
 0x7c5   :  { %v15960_v48 = vpop.eup %13809 }
 0x7c6   :  { %v15966_v11 = vpop.eup %13811 }
 0x7c8   :  { %2731 = vadd.xlane.f32.xlu0 %v15937_v3 }
 0x7cc   :  { %2735 = vadd.xlane.f32.xlu0 %v15942_v22 }
 0x7d7   :  { %v2660_v7 = vpop.xlane.xlu0 %2659 }
 0x7d8   :  { %v2676_v39 = vsub.f32 %v15859_v46, %v2660_v7  ;;  %v3457_v46 = vmul.f32 0.35355338, %v15706_v5  ;;  %v18674_v5 = vld [vmem:[#allocation60_spill] sm:$0xff]  ;;  %v18678_v7 = vld [vmem:[#allocation62_spill] sm:$0xff] }
 0x7d9   :  { %v3452_v24 = vmul.f32 0.35355338, %v18674_v5  ;;  %v3454_v57 = vmul.f32 0.35355338, %v18678_v7 }
 0x7da   :  { %v2707_v16 = vmul.f32 1.442695, %v2676_v39  ;;  %v3456_v39 = vmul.f32 0.35355338, %v15709_v61  ;;  %v3460_v61 = vmul.f32 0.35355338, %v15884_v30 }
 0x7db   :  { %v1932_v10 = vpop.permute.xlu0 %1931  ;;  %v15997_v44 = vadd.f32 %v18676_v37, %v3452_v24  ;;  %v18683_v37 = vld [vmem:[#allocation55_spill] sm:$0xff] }
 0x7dc   :  { %2723 = vadd.xlane.f32.xlu1 %v15951_v15  ;;  %11085 = vmatprep.subr.mxu0 %v1932_v10 }
 0x7dd   :  { %11086 = vmatpush3.msra.mxu0 %v1932_v10 }
 0x7e0   :  { %2721 = vadd.xlane.f32.xlu1 %v15954_v8 }
 0x7e4   :  { %2727 = vadd.xlane.f32.xlu1 %v15957_v0 }
 0x7e7   :  { %v2658_v12 = vpop.xlane.xlu1 %2657 }
 0x7e8   :  { %v2675_v35 = vsub.f32 %v15866_v13, %v2658_v12  ;;  %2729 = vadd.xlane.f32.xlu1 %v15960_v48  ;;  %v18673_v13 = vld [vmem:[#allocation51_spill] sm:$0xff]  ;;  %v16012_v12 = vadd.f32 %v18679_v17, %v3454_v57 }
 0x7e9   :  { %v15975_v43 = vadd.f32 %v18673_v13, %v3457_v46  ;;  %v18681_v13 = vld [vmem:[#allocation53_spill] sm:$0xff] }
 0x7ea   :  { %v2705_v32 = vmul.f32 1.442695, %v2675_v35  ;;  %v16031_v18 = vadd.f32 %v18681_v13, %v3460_v61 }
 0x7eb   :  { %v2129_v1 = vpop.permute.xlu1 %2128 }
 0x7ec   :  { %13813 = vpow2.f32 %v2705_v32  ;;  %2733 = vadd.xlane.f32.xlu1 %v15966_v11  ;;  %11111 = vmatprep.subr.mxu0 %v2129_v1  ;;  %v16019_v32 = vadd.f32 %v18680_v34, %v3456_v39  ;;  %v18684_v34 = vld [vmem:[#allocation30_spill] sm:$0xff] }
 0x7ed   :  { %13815 = vpow2.f32 %v2707_v16 }
 0x7ef   :  { %v13207_v55 = vpop.permute.xlu1 %13206 }
 0x7f0   :  { %3490 = vmax.xlane.f32.xlu1 %v15970_v53  ;;  %v13209_v21 = vunpack.i.h.bf16 %v13207_v55  ;;  %v13208_v62 = vunpack.i.l.bf16 %v13207_v55 }
 0x7f2   :  { %v16001_v40 = vpack.c.bf16 %v13209_v21, %v13208_v62  ;;  %v13212_v21 = vpop.permute.xlu0 %13211 }
 0x7f3   :  { %v13222_v7 = vpop.permute.xlu1 %13221  ;;  %v13214_v39 = vunpack.i.h.bf16 %v13212_v21 }
 0x7f4   :  { %3494 = vmax.xlane.f32.xlu1 %v15975_v43 }
 0x7f6   :  { %v15979_v42 = vpop.eup %13813  ;;  %v13217_v57 = vpop.permute.xlu0 %13216 }
 0x7f7   :  { %2737 = vadd.xlane.f32.xlu0 %v15979_v42  ;;  %v15988_v50 = vpop.eup %13815  ;;  %v13232_v17 = vpop.permute.xlu1 %13231  ;;  %v13219_v61 = vunpack.i.h.bf16 %v13217_v57 }
 0x7f8   :  { %3498 = vmax.xlane.f32.xlu1 %v15982_v38 }
 0x7fb   :  { %v11063_v14 = vpop.f32.mrb[32].mxu0  ;;  %2739 = vadd.xlane.f32.xlu0 %v15988_v50 }
 0x7fc   :  { %v1851_v23 = vpop.f32.mrb[33].mxu0  ;;  %3502 = vmax.xlane.f32.xlu1 %v15991_v20 }
 0x7fd   :  { %11087 = vmatprep.mubr.msk.f32.mxu0 %vm677_vm3, %v1851_v23  ;;  %v18682_v23 = vld [vmem:[#allocation54_spill] sm:$0xff] }
 0x7fe   :  { %11088 = vmatmul.mubr.msk.f32.vlgmr.msra.gmra.mrb[48].mxu0 %vm677_vm3, %v11063_v14 }
 0x7ff   :  { %11112 = vmatpush3.msra.mxu0 %v2129_v1  ;;  %3484 = vmax.xlane.f32.xlu0 %v15997_v44  ;;  %v3458_v1 = vmul.f32 0.35355338, %v15715_v4 }
 0x800   :  { %12364 = vmatprep.subr.bf16.mxu0 %v16001_v40 }
 0x801   :  { %v16025_v16 = vadd.f32 %v15568_v52, %v3458_v1 }
 0x802   :  { %v11066_v56 = vpop.f32.mrb[34].mxu0 }
 0x803   :  { %v1861_v10 = vpop.f32.mrb[35].mxu0  ;;  %3486 = vmax.xlane.f32.xlu0 %v16006_v45 }
 0x804   :  { %11090 = vmatprep.mubr.msk.f32.mxu0 %vm677_vm3, %v1861_v10 }
 0x805   :  { %11091 = vmatmul.mubr.msk.f32.gmra.mrb[50].mxu0 %vm677_vm3, %v11066_v56 }
 0x806   :  { %v11069_v35 = vpop.f32.mrb[36].mxu0 }
 0x807   :  { %v1871_v58 = vpop.f32.mrb[37].mxu0  ;;  %3488 = vmax.xlane.f32.xlu0 %v16012_v12 }
 0x808   :  { %11093 = vmatprep.mubr.msk.f32.mxu0 %vm677_vm3, %v1871_v58  ;;  %v13227_v58 = vpop.permute.xlu0 %13226 }
 0x809   :  { %11094 = vmatmul.mubr.msk.f32.gmra.mrb[52].mxu0 %vm677_vm3, %v11069_v35  ;;  %v13213_v35 = vunpack.i.l.bf16 %v13212_v21  ;;  %v18688_v21 = vld [vmem:[#allocation36_spill] sm:$0xff] }
 0x80b   :  { %3492 = vmax.xlane.f32.xlu0 %v16019_v32  ;;  %v12367_v13 = vpack.c.bf16 %v13214_v39, %v13213_v35  ;;  %v18691_v39 = vld [vmem:[#allocation37_spill] sm:$0xff] }
 0x80e   :  { %v11072_v6 = vpop.f32.mrb[38].mxu0 }
 0x80f   :  { %v1881_v46 = vpop.f32.mrb[39].mxu0  ;;  %3496 = vmax.xlane.f32.xlu0 %v16025_v16 }
 0x810   :  { %11096 = vmatprep.mubr.msk.f32.mxu0 %vm677_vm3, %v1881_v46  ;;  %v18685_v46 = vld [vmem:[#allocation29_spill] sm:$0xff] }
 0x811   :  { %11097 = vmatmul.mubr.msk.f32.gmra.mrb[54].mxu0 %vm677_vm3, %v11072_v6  ;;  %v13218_v6 = vunpack.i.l.bf16 %v13217_v57  ;;  %v18690_v57 = vld [vmem:[#allocation38_spill] sm:$0xff] }
 0x812   :  { %v11075_v4 = vpop.f32.mrb[40].mxu0 }
 0x813   :  { %v1891_v27 = vpop.f32.mrb[41].mxu0  ;;  %3500 = vmax.xlane.f32.xlu0 %v16031_v18 }
 0x814   :  { %11099 = vmatprep.mubr.msk.f32.mxu0 %vm677_vm3, %v1891_v27  ;;  %v18686_v27 = vld [vmem:[#allocation33_spill] sm:$0xff] }
 0x815   :  { %11100 = vmatmul.mubr.msk.f32.gmra.mrb[56].mxu0 %vm677_vm3, %v11075_v4 }
 0x816   :  { %v11078_v52 = vpop.f32.mrb[42].mxu0 }
 0x817   :  { %v1901_v30 = vpop.f32.mrb[43].mxu0 }
 0x818   :  { %11102 = vmatprep.mubr.msk.f32.mxu0 %vm677_vm3, %v1901_v30  ;;  %v11324_v55 = vpop.f32.mrb[74].mxu1  ;;  %v2712_v4 = vpop.xlane.xlu0 %2711  ;;  %v13224_v30 = vunpack.i.h.bf16 %v13222_v7 }
 0x819   :  { %v3463_v5 = vmul.f32 0.35355338, %v11324_v55  ;;  %11103 = vmatmul.mubr.msk.f32.gmra.mrb[58].mxu0 %vm677_vm3, %v11078_v52  ;;  %v3423_v24 = vpop.f32.mrb[75].mxu1  ;;  %v13223_v55 = vunpack.i.l.bf16 %v13222_v7 }
 0x81a   :  { %v3462_v62 = vmul.f32 0.35355338, %v3423_v24  ;;  %v11081_v14 = vpop.f32.mrb[44].mxu0  ;;  %v12371_v24 = vpack.c.bf16 %v13219_v61, %v13218_v6  ;;  %v18692_v61 = vld [vmem:[#allocation40_spill] sm:$0xff] }
 0x81b   :  { %v16040_v54 = vadd.f32 %v18682_v23, %v3463_v5  ;;  %v1911_v47 = vpop.f32.mrb[45].mxu0  ;;  %v18687_v5 = vld [vmem:[#allocation34_spill] sm:$0xff]  ;;  %v13229_v23 = vunpack.i.h.bf16 %v13227_v58 }
 0x81c   :  { %v16043_v41 = vadd.f32 %v18683_v37, %v3462_v62  ;;  %11105 = vmatprep.mubr.msk.f32.mxu0 %vm677_vm3, %v1911_v47  ;;  %v2718_v62 = vpop.xlane.xlu0 %2717  ;;  %v18689_v47 = vld [vmem:[#allocation35_spill] sm:$0xff]  ;;  %v12375_v37 = vpack.c.bf16 %v13224_v30, %v13223_v55 }
 0x81d   :  { %3506 = vmax.xlane.f32.xlu1 %v16040_v54  ;;  %11106 = vmatmul.mubr.msk.f32.gmra.mrb[60].mxu0 %vm677_vm3, %v11081_v14 }
 0x81e   :  { %3504 = vmax.xlane.f32.xlu0 %v16043_v41 }
 0x822   :  { %v11084_v56 = vpop.f32.mrb[46].mxu0 }
 0x823   :  { %v1921_v10 = vpop.f32.mrb[47].mxu0 }
 0x824   :  { %11108 = vmatprep.mubr.msk.f32.mxu0 %vm677_vm3, %v1921_v10  ;;  %v13233_v10 = vunpack.i.l.bf16 %v13232_v17 }
 0x825   :  { %11109 = vmatmul.mubr.msk.f32.gmra.mrb[62].mxu0 %vm677_vm3, %v11084_v56  ;;  %v13234_v56 = vunpack.i.h.bf16 %v13232_v17  ;;  %v18694_v17 = vld [vmem:[#allocation42_spill] sm:$0xff] }
 0x826   :  { %11113 = vmatprep.mubr.msk.f32.mxu0 %vm677_vm3, %v18684_v34  ;;  %v13237_v34 = vpop.permute.xlu0 %13236 }
 0x827   :  { %v13238_v6 = vunpack.i.l.bf16 %v13237_v34 }
 0x828   :  { %v2710_v1 = vpop.xlane.xlu1 %2709 }
 0x829   :  { %11114 = vmatmul.mubr.msk.f32.vlgmr.msra.gmra.mrb[48].mxu0 %vm677_vm3, %v18685_v46  ;;  %13817 = vrcp.f32 %v2710_v1  ;;  %v18693_v46 = vld [vmem:[#allocation39_spill] sm:$0xff] }
 0x82a   :  { %12366 = vmatpush3.bf16.msra.mxu0 %v16001_v40  ;;  %11116 = vmatprep.mubr.msk.f32.mxu0 %vm677_vm3, %v18686_v27  ;;  %v13228_v40 = vunpack.i.l.bf16 %v13227_v58  ;;  %v13239_v58 = vunpack.i.h.bf16 %v13237_v34  ;;  %13819 = vrcp.f32 %v2712_v4 }
 0x82b   :  { %12368 = vmatprep.subr.bf16.mxu0 %v12367_v13 }
 0x82c   :  { %v2716_v52 = vpop.xlane.xlu1 %2715  ;;  %v12379_v35 = vpack.c.bf16 %v13229_v23, %v13228_v40  ;;  %v12387_v1 = vpack.c.bf16 %v13239_v58, %v13238_v6 }
 0x82d   :  { %11117 = vmatmul.mubr.msk.f32.gmra.mrb[50].mxu0 %vm677_vm3, %v18687_v5  ;;  %v18695_v5 = vld [vmem:[#allocation41_spill] sm:$0xff] }
 0x82e   :  { %12370 = vmatpush3.bf16.msra.mxu0 %v12367_v13  ;;  %11119 = vmatprep.mubr.msk.f32.mxu0 %vm677_vm3, %v18688_v21  ;;  %v12383_v13 = vpack.c.bf16 %v13234_v56, %v13233_v10  ;;  %v18697_v21 = vld [vmem:[#allocation43_spill] sm:$0xff] }
 0x82f   :  { %12372 = vmatprep.subr.bf16.mxu0 %v12371_v24 }
 0x830   :  { %v2714_v14 = vpop.xlane.xlu1 %2713 }
 0x831   :  { %11120 = vmatmul.mubr.msk.f32.gmra.mrb[52].mxu0 %vm677_vm3, %v18689_v47  ;;  %13821 = vrcp.f32 %v2714_v14  ;;  %v18698_v14 = vld [vmem:[#allocation46_spill] sm:$0xff] }
 0x832   :  { %12374 = vmatpush3.bf16.msra.mxu0 %v12371_v24  ;;  %11122 = vmatprep.mubr.msk.f32.mxu0 %vm677_vm3, %v18690_v57  ;;  %13823 = vrcp.f32 %v2716_v52  ;;  %v18696_v24 = vld [vmem:[#allocation44_spill] sm:$0xff] }
 0x833   :  { %12376 = vmatprep.subr.bf16.mxu0 %v12375_v37  ;;  %13825 = vrcp.f32 %v2718_v62  ;;  %v13818_v4 = vpop.eup %13817 }
 0x834   :  { %v2720_v7 = vpop.xlane.xlu1 %2719  ;;  %v13820_v40 = vpop.eup %13819  ;;  %v2757_v52 = vmul.f32 %v13818_v4, %v15913_v19 }
 0x835   :  { %11123 = vmatmul.mubr.msk.f32.gmra.mrb[54].mxu0 %vm677_vm3, %v18691_v39  ;;  %13827 = vrcp.f32 %v2720_v7  ;;  %v2758_v62 = vmul.f32 %v13820_v40, %v15901_v51 }
 0x836   :  { %12378 = vmatpush3.bf16.msra.mxu0 %v12375_v37  ;;  %11125 = vmatprep.mubr.msk.f32.mxu0 %vm677_vm3, %v18692_v61  ;;  %v18699_v37 = vld [vmem:[#allocation45_spill] sm:$0xff] }
 0x837   :  { %12380 = vmatprep.subr.bf16.mxu0 %v12379_v35 }
 0x838   :  { %v13242_v27 = vpop.permute.xlu1 %13241 }
 0x839   :  { %11126 = vmatmul.mubr.msk.f32.gmra.mrb[56].mxu0 %vm677_vm3, %v18693_v46  ;;  %v13244_v30 = vunpack.i.h.bf16 %v13242_v27  ;;  %v13243_v55 = vunpack.i.l.bf16 %v13242_v27 }
 0x83a   :  { %12382 = vmatpush3.bf16.msra.mxu0 %v12379_v35  ;;  %11128 = vmatprep.mubr.msk.f32.mxu0 %vm677_vm3, %v18694_v17 }
 0x83b   :  { %12384 = vmatprep.subr.bf16.mxu0 %v12383_v13  ;;  %v12391_v23 = vpack.c.bf16 %v13244_v30, %v13243_v55  ;;  %v13822_v47 = vpop.eup %13821 }
 0x83c   :  { %v13824_v57 = vpop.eup %13823  ;;  %v2759_v56 = vmul.f32 %v13822_v47, %v15919_v59  ;;  %v14319_v59 = vld [vmem:[%s18488_s1 + $0x68] sm:$0xff] }
 0x83d   :  { %11129 = vmatmul.mubr.msk.f32.gmra.mrb[58].mxu0 %vm677_vm3, %v18695_v5  ;;  %v13826_v7 = vpop.eup %13825  ;;  %v2760_v10 = vmul.f32 %v13824_v57, %v15916_v49  ;;  %v14320_v49 = vld [vmem:[%s18488_s1 + $0x60] sm:$0xff] }
 0x83e   :  { %12386 = vmatpush3.bf16.msra.mxu0 %v12383_v13  ;;  %11131 = vmatprep.mubr.msk.f32.mxu0 %vm677_vm3, %v18696_v24  ;;  %v2761_v35 = vmul.f32 %v13826_v7, %v15906_v2 }
 0x83f   :  { %12388 = vmatprep.subr.bf16.mxu0 %v12387_v1  ;;  %v13828_v39 = vpop.eup %13827 }
 0x840   :  { %v2762_v19 = vmul.f32 %v13828_v39, %v15924_v36 }
 0x841   :  { %11132 = vmatmul.mubr.msk.f32.gmra.mrb[60].mxu0 %vm677_vm3, %v18697_v21 }
 0x842   :  { %12390 = vmatpush3.bf16.msra.mxu0 %v12387_v1  ;;  %11134 = vmatprep.mubr.msk.f32.mxu0 %vm677_vm3, %v18698_v14 }
 0x843   :  { %12392 = vmatprep.subr.bf16.mxu0 %v12391_v23 }
 0x845   :  { %11135 = vmatmul.mubr.msk.f32.gmra.mrb[62].mxu0 %vm677_vm3, %v18699_v37 }
 0x846   :  { %12394 = vmatpush3.bf16.msra.mxu0 %v12391_v23  ;;  %11225 = vmatprep.mubr.f32.mxu0 %v2757_v52 }
 0x849   :  { %11226 = vmatmul.mubr.f32.vlgmr.msra.gmra.mrb[64].mxu0 %v2758_v62 }
 0x84a   :  { %11228 = vmatprep.mubr.f32.mxu0 %v2759_v56 }
 0x84d   :  { %11229 = vmatmul.mubr.f32.gmra.mrb[66].mxu0 %v2760_v10 }
 0x84e   :  { %11231 = vmatprep.mubr.f32.mxu0 %v2761_v35 }
 0x851   :  { %v11327_v34 = vpop.f32.mrb[76].mxu1  ;;  %11232 = vmatmul.mubr.f32.gmra.mrb[68].mxu0 %v2762_v19  ;;  %v2726_v36 = vpop.xlane.xlu0 %2725 }
 0x852   :  { %v3465_v61 = vmul.f32 0.35355338, %v11327_v34  ;;  %v3433_v58 = vpop.f32.mrb[77].mxu1  ;;  %13829 = vrcp.f32 %v2726_v36 }
 0x853   :  { %v3464_v51 = vmul.f32 0.35355338, %v3433_v58 }
 0x854   :  { %v16093_v6 = vadd.f32 %v14319_v59, %v3465_v61  ;;  %v14323_v59 = vld [vmem:[#allocation2 + $0x20] sm:$0xff] }
 0x855   :  { %v16098_v2 = vadd.f32 %v14320_v49, %v3464_v51  ;;  %v2732_v27 = vpop.xlane.xlu0 %2731 }
 0x856   :  { %3510 = vmax.xlane.f32.xlu1 %v16093_v6 }
 0x857   :  { %3508 = vmax.xlane.f32.xlu0 %v16098_v2 }
 0x859   :  { %v2736_v5 = vpop.xlane.xlu0 %2735 }
 0x85c   :  { %v13830_v55 = vpop.eup %13829 }
 0x85d   :  { %v2765_v14 = vmul.f32 %v13830_v55, %v15934_v63 }
 0x869   :  { %v2724_v46 = vpop.xlane.xlu1 %2723 }
 0x86a   :  { %13831 = vrcp.f32 %v2724_v46 }
 0x86d   :  { %v2722_v13 = vpop.xlane.xlu1 %2721 }
 0x86e   :  { %13833 = vrcp.f32 %v2722_v13 }
 0x871   :  { %v2728_v17 = vpop.xlane.xlu1 %2727 }
 0x872   :  { %13835 = vrcp.f32 %v2728_v17 }
 0x873   :  { %13837 = vrcp.f32 %v2732_v27 }
 0x874   :  { %v13832_v1 = vpop.eup %13831 }
 0x875   :  { %v2730_v30 = vpop.xlane.xlu1 %2729  ;;  %v2764_v23 = vmul.f32 %v13832_v1, %v15951_v15 }
 0x876   :  { %13839 = vrcp.f32 %v2730_v30 }
 0x877   :  { %13841 = vrcp.f32 %v2736_v5 }
 0x878   :  { %v13834_v24 = vpop.eup %13833 }
 0x879   :  { %v2734_v4 = vpop.xlane.xlu1 %2733  ;;  %v2763_v21 = vmul.f32 %v13834_v24, %v15954_v8 }
 0x87a   :  { %13843 = vrcp.f32 %v2734_v4 }
 0x87b   :  { %11234 = vmatprep.mubr.f32.mxu0 %v2763_v21 }
 0x87c   :  { %v13836_v40 = vpop.eup %13835  ;;  %11235 = vmatmul.mubr.f32.gmra.mrb[70].mxu0 %v2764_v23 }
 0x87d   :  { %11237 = vmatprep.mubr.f32.mxu0 %v2765_v14  ;;  %v2766_v52 = vmul.f32 %v13836_v40, %v15957_v0  ;;  %v13838_v47 = vpop.eup %13837  ;;  %v3491_v49 = vpop.xlane.xlu1 %3490 }
 0x87e   :  { %v2768_v57 = vmul.f32 %v13838_v47, %v15937_v3  ;;  %v14321_v3 = vld [vmem:[%s18488_s1 + $0x78] sm:$0xff] }
 0x880   :  { %v13840_v37 = vpop.eup %13839  ;;  %11238 = vmatmul.mubr.f32.gmra.mrb[72].mxu0 %v2766_v52 }
 0x881   :  { %v2767_v62 = vmul.f32 %v13840_v37, %v15960_v48  ;;  %v13842_v56 = vpop.eup %13841  ;;  %v3495_v17 = vpop.xlane.xlu1 %3494 }
 0x882   :  { %v2770_v15 = vmul.f32 %v13842_v56, %v15942_v22  ;;  %v3521_v55 = vsub.f32 %v15975_v43, %v3495_v17 }
 0x883   :  { %11240 = vmatprep.mubr.f32.mxu0 %v2767_v62 }
 0x884   :  { %v13844_v8 = vpop.eup %13843  ;;  %v2738_v7 = vpop.xlane.xlu0 %2737  ;;  %11241 = vmatmul.mubr.f32.gmra.mrb[74].mxu0 %v2768_v57 }
 0x885   :  { %13845 = vrcp.f32 %v2738_v7  ;;  %v2769_v63 = vmul.f32 %v13844_v8, %v15966_v11  ;;  %v14322_v11 = vld [vmem:[%s18488_s1 + $0x70] sm:$0xff]  ;;  %v3499_v4 = vpop.xlane.xlu1 %3498 }
 0x886   :  { %v3523_v14 = vsub.f32 %v15982_v38, %v3499_v4 }
 0x887   :  { %11243 = vmatprep.mubr.f32.mxu0 %v2769_v63 }
 0x888   :  { %v2740_v10 = vpop.xlane.xlu0 %2739  ;;  %11244 = vmatmul.mubr.f32.gmra.mrb[76].mxu0 %v2770_v15  ;;  %v3546_v62 = vmul.f32 1.442695, %v3523_v14 }
 0x889   :  { %13847 = vrcp.f32 %v2740_v10  ;;  %v3503_v37 = vpop.xlane.xlu1 %3502 }
 0x88a   :  { %v11330_v0 = vpop.f32.mrb[78].mxu1 }
 0x88b   :  { %v3467_v39 = vmul.f32 0.35355338, %v11330_v0  ;;  %v3443_v35 = vpop.f32.mrb[79].mxu1 }
 0x88c   :  { %v3466_v48 = vmul.f32 0.35355338, %v3443_v35 }
 0x88d   :  { %v16113_v19 = vadd.f32 %v14321_v3, %v3467_v39 }
 0x88e   :  { %v16118_v34 = vadd.f32 %v14322_v11, %v3466_v48 }
 0x88f   :  { %v13846_v22 = vpop.eup %13845  ;;  %3514 = vmax.xlane.f32.xlu1 %v16113_v19 }
 0x890   :  { %3512 = vmax.xlane.f32.xlu0 %v16118_v34  ;;  %v2771_v61 = vmul.f32 %v13846_v22, %v15979_v42  ;;  %v3485_v42 = vpop.xlane.xlu0 %3484 }
 0x892   :  { %11246 = vmatprep.mubr.f32.mxu0 %v2771_v61 }
 0x893   :  { %v13848_v58 = vpop.eup %13847 }
 0x894   :  { %v2772_v51 = vmul.f32 %v13848_v58, %v15988_v50 }
 0x896   :  { %11247 = vmatmul.mubr.f32.gmra.mrb[78].mxu0 %v2772_v51 }
 0x8a0   :  { %13246 = vrot.lane.b32.xlu1 %v14861_v28, %s14428_s9  ;;  %v3487_v28 = vpop.xlane.xlu0 %3486 }
 0x8a1   :  { %v3517_v36 = vsub.f32 %v16006_v45, %v3487_v28  ;;  %v3542_v45 = vmul.f32 1.442695, %v3521_v55 }
 0x8a3   :  { %v3534_v27 = vmul.f32 1.442695, %v3517_v36 }
 0x8a4   :  { %13251 = vrot.lane.b32.xlu1 %v18628_v31, %s14428_s9  ;;  %v3489_v50 = vpop.xlane.xlu0 %3488  ;;  %v3516_v31 = vsub.f32 %v15997_v44, %v3485_v42 }
 0x8a6   :  { %2967 = vrot.lane.b32.xlu0 %v14323_v59, %s14417_s0  ;;  %v3532_v46 = vmul.f32 1.442695, %v3516_v31 }
 0x8a8   :  { %13261 = vrot.lane.b32.xlu1 %v18629_v25, %s14428_s9  ;;  %v3518_v25 = vsub.f32 %v16012_v12, %v3489_v50  ;;  %v3493_v13 = vpop.xlane.xlu0 %3492  ;;  %13849 = vpow2.f32 %v3532_v46 }
 0x8a9   :  { %v3520_v30 = vsub.f32 %v16019_v32, %v3493_v13  ;;  %13851 = vpow2.f32 %v3534_v27 }
 0x8aa   :  { %13256 = vrot.lane.b32.xlu0 %v14865_v33, %s14428_s9  ;;  %v3519_v33 = vsub.f32 %v15970_v53, %v3491_v49  ;;  %v3507_v8 = vpop.xlane.xlu1 %3506 }
 0x8ab   :  { %v3540_v44 = vmul.f32 1.442695, %v3520_v30  ;;  %v3527_v38 = vsub.f32 %v16040_v54, %v3507_v8 }
 0x8ac   :  { %13271 = vrot.lane.b32.xlu1 %v14875_v60, %s14428_s9  ;;  %v3536_v60 = vmul.f32 1.442695, %v3518_v25  ;;  %v3497_v24 = vpop.xlane.xlu0 %3496 }
 0x8ad   :  { %v3522_v21 = vsub.f32 %v16025_v16, %v3497_v24  ;;  %v3554_v10 = vmul.f32 1.442695, %v3527_v38 }
 0x8ae   :  { %13266 = vrot.lane.b32.xlu0 %v14881_v9, %s14428_s9  ;;  %v3538_v9 = vmul.f32 1.442695, %v3519_v33  ;;  %13853 = vpow2.f32 %v3536_v60 }
 0x8af   :  { %v3544_v40 = vmul.f32 1.442695, %v3522_v21 }
 0x8b0   :  { %13855 = vpow2.f32 %v3538_v9  ;;  %v3501_v23 = vpop.xlane.xlu0 %3500 }
 0x8b1   :  { %13857 = vpow2.f32 %v3540_v44  ;;  %v3524_v52 = vsub.f32 %v16031_v18, %v3501_v23 }
 0x8b2   :  { %v16143_v5 = vpop.eup %13849  ;;  %13859 = vpow2.f32 %v3542_v45 }
 0x8b3   :  { %v16146_v53 = vpop.eup %13851  ;;  %13861 = vpow2.f32 %v3544_v40  ;;  %v3548_v56 = vmul.f32 1.442695, %v3524_v52 }
 0x8b4   :  { %v3505_v47 = vpop.xlane.xlu0 %3504  ;;  %13863 = vpow2.f32 %v3546_v62 }
 0x8b5   :  { %v3526_v57 = vsub.f32 %v16043_v41, %v3505_v47  ;;  %13865 = vpow2.f32 %v3548_v56 }
 0x8b7   :  { %v3552_v7 = vmul.f32 1.442695, %v3526_v57 }
 0x8b8   :  { %v16148_v12 = vpop.eup %13853 }
 0x8b9   :  { %13867 = vpow2.f32 %v3552_v7 }
 0x8ba   :  { %v16152_v43 = vpop.eup %13855 }
 0x8bb   :  { %v16154_v32 = vpop.eup %13857 }
 0x8bc   :  { %v16158_v1 = vpop.eup %13859 }
 0x8cd   :  { %3564 = vadd.xlane.f32.xlu0 %v16143_v5 }
 0x8d0   :  { %3566 = vadd.xlane.f32.xlu1 %v16146_v53 }
 0x8d1   :  { %3568 = vadd.xlane.f32.xlu0 %v16148_v12 }
 0x8d4   :  { %3570 = vadd.xlane.f32.xlu1 %v16152_v43 }
 0x8d5   :  { %3572 = vadd.xlane.f32.xlu0 %v16154_v32 }
 0x8d8   :  { %3574 = vadd.xlane.f32.xlu1 %v16158_v1 }
 0x8e3   :  { %v3511_v18 = vpop.xlane.xlu1 %3510 }
 0x8e4   :  { %v3529_v41 = vsub.f32 %v16093_v6, %v3511_v18 }
 0x8e6   :  { %v3558_v0 = vmul.f32 1.442695, %v3529_v41 }
 0x8e9   :  { %13281 = vrot.lane.b32.xlu1 %v18670_v26, %s14428_s9  ;;  %v3525_v26 = vsub.f32 %v15991_v20, %v3503_v37  ;;  %v16173_v20 = vpop.eup %13861 }
 0x8ea   :  { %v16176_v39 = vpop.eup %13863 }
 0x8eb   :  { %13276 = vrot.lane.b32.xlu0 %v18669_v29, %s14428_s9  ;;  %v3509_v29 = vpop.xlane.xlu0 %3508  ;;  %v3550_v63 = vmul.f32 1.442695, %v3525_v26 }
 0x8ec   :  { %v3528_v16 = vsub.f32 %v16098_v2, %v3509_v29  ;;  %v16178_v2 = vpop.eup %13865  ;;  %v14324_v29 = vld [vmem:[#allocation2 + $0x30] sm:$0xff] }
 0x8ed   :  { %13869 = vpow2.f32 %v3550_v63  ;;  %v16182_v54 = vpop.eup %13867 }
 0x8ee   :  { %v3556_v15 = vmul.f32 1.442695, %v3528_v16 }
 0x8f0   :  { %13871 = vpow2.f32 %v3556_v15 }
 0x8f1   :  { %13873 = vpow2.f32 %v3554_v10 }
 0x8f2   :  { %13875 = vpow2.f32 %v3558_v0 }
 0x8f7   :  { %v16184_v35 = vpop.eup %13869 }
 0x8fa   :  { %v16188_v6 = vpop.eup %13871 }
 0x8fb   :  { %v16190_v48 = vpop.eup %13873 }
 0x8fc   :  { %v16194_v3 = vpop.eup %13875 }
 0x90a   :  { %3576 = vadd.xlane.f32.xlu0 %v16173_v20 }
 0x90d   :  { %3578 = vadd.xlane.f32.xlu1 %v16176_v39 }
 0x90e   :  { %3580 = vadd.xlane.f32.xlu0 %v16178_v2 }
 0x911   :  { %3584 = vadd.xlane.f32.xlu1 %v16182_v54 }
 0x912   :  { %3582 = vadd.xlane.f32.xlu0 %v16184_v35 }
 0x915   :  { %3588 = vadd.xlane.f32.xlu1 %v16188_v6 }
 0x916   :  { %3586 = vadd.xlane.f32.xlu0 %v16190_v48 }
 0x91a   :  { %3590 = vadd.xlane.f32.xlu0 %v16194_v3 }
 0x91c   :  { %v3515_v11 = vpop.xlane.xlu1 %3514  ;;  %v11227_v22 = vpop.f32.mrb[64].mxu0 }
 0x91d   :  { %v3531_v61 = vsub.f32 %v16113_v19, %v3515_v11  ;;  %v3513_v58 = vpop.xlane.xlu0 %3512  ;;  %v2887_v51 = vpop.f32.mrb[65].mxu0 }
 0x91e   :  { %v3530_v59 = vsub.f32 %v16118_v34, %v3513_v58  ;;  %11251 = vmatprep.mubr.msk.f32.mxu0 %vm677_vm3, %v2887_v51 }
 0x91f   :  { %v3562_v42 = vmul.f32 1.442695, %v3531_v61 }
 0x920   :  { %v3560_v28 = vmul.f32 1.442695, %v3530_v59  ;;  %v13247_v50 = vpop.permute.xlu1 %13246  ;;  %v11230_v31 = vpop.f32.mrb[66].mxu0 }
 0x921   :  { %13877 = vpow2.f32 %v3562_v42  ;;  %v13249_v49 = vunpack.i.h.bf16 %v13247_v50  ;;  %v13248_v36 = vunpack.i.l.bf16 %v13247_v50  ;;  %v2968_v46 = vpop.permute.xlu0 %2967  ;;  %v2897_v25 = vpop.f32.mrb[67].mxu0 }
 0x922   :  { %13879 = vpow2.f32 %v3560_v28  ;;  %11249 = vmatprep.subr.mxu0 %v2968_v46 }
 0x923   :  { %11250 = vmatpush3.msra.mxu0 %v2968_v46  ;;  %v12443_v13 = vpack.c.bf16 %v13249_v49, %v13248_v36 }
 0x924   :  { %v13252_v19 = vpop.permute.xlu1 %13251  ;;  %v11233_v33 = vpop.f32.mrb[68].mxu0  ;;  %11252 = vmatmul.mubr.msk.f32.vlgmr.msra.gmra.mrb[48].mxu0 %vm677_vm3, %v11227_v22 }
 0x925   :  { %v13254_v34 = vunpack.i.h.bf16 %v13252_v19  ;;  %v13253_v27 = vunpack.i.l.bf16 %v13252_v19  ;;  %v13257_v17 = vpop.permute.xlu0 %13256  ;;  %v2907_v60 = vpop.f32.mrb[69].mxu0  ;;  %11254 = vmatprep.mubr.msk.f32.mxu0 %vm677_vm3, %v2897_v25  ;;  %12444 = vmatprep.subr.bf16.mxu0 %v12443_v13 }
 0x926   :  { %v13259_v30 = vunpack.i.h.bf16 %v13257_v17  ;;  %v13258_v9 = vunpack.i.l.bf16 %v13257_v17  ;;  %12446 = vmatpush3.bf16.msra.mxu0 %v12443_v13 }
 0x927   :  { %v12447_v55 = vpack.c.bf16 %v13254_v34, %v13253_v27 }
 0x928   :  { %v13262_v44 = vpop.permute.xlu1 %13261  ;;  %11255 = vmatmul.mubr.msk.f32.gmra.mrb[50].mxu0 %vm677_vm3, %v11230_v31  ;;  %v12451_v45 = vpack.c.bf16 %v13259_v30, %v13258_v9 }
 0x929   :  { %v13264_v24 = vunpack.i.h.bf16 %v13262_v44  ;;  %v13263_v4 = vunpack.i.l.bf16 %v13262_v44  ;;  %11257 = vmatprep.mubr.msk.f32.mxu0 %vm677_vm3, %v2907_v60  ;;  %12448 = vmatprep.subr.bf16.mxu0 %v12447_v55  ;;  %v13267_v21 = vpop.permute.xlu0 %13266 }
 0x92a   :  { %12450 = vmatpush3.bf16.msra.mxu0 %v12447_v55  ;;  %v13269_v40 = vunpack.i.h.bf16 %v13267_v21  ;;  %v13268_v52 = vunpack.i.l.bf16 %v13267_v21 }
 0x92b   :  { %v16204_v23 = vpop.eup %13877  ;;  %12452 = vmatprep.subr.bf16.mxu0 %v12451_v45  ;;  %v12455_v47 = vpack.c.bf16 %v13264_v24, %v13263_v4 }
 0x92c   :  { %v16206_v14 = vpop.eup %13879  ;;  %3594 = vadd.xlane.f32.xlu0 %v16204_v23  ;;  %11258 = vmatmul.mubr.msk.f32.gmra.mrb[52].mxu0 %vm677_vm3, %v11233_v33  ;;  %v13272_v37 = vpop.permute.xlu1 %13271  ;;  %v12459_v26 = vpack.c.bf16 %v13269_v40, %v13268_v52 }
 0x92d   :  { %3592 = vadd.xlane.f32.xlu1 %v16206_v14  ;;  %v13274_v62 = vunpack.i.h.bf16 %v13272_v37  ;;  %v13273_v57 = vunpack.i.l.bf16 %v13272_v37 }
 0x92e   :  { %12454 = vmatpush3.bf16.msra.mxu0 %v12451_v45 }
 0x92f   :  { %12456 = vmatprep.subr.bf16.mxu0 %v12455_v47  ;;  %v12463_v56 = vpack.c.bf16 %v13274_v62, %v13273_v57 }
 0x932   :  { %12458 = vmatpush3.bf16.msra.mxu0 %v12455_v47 }
 0x933   :  { %12460 = vmatprep.subr.bf16.mxu0 %v12459_v26 }
 0x936   :  { %12462 = vmatpush3.bf16.msra.mxu0 %v12459_v26 }
 0x937   :  { %12464 = vmatprep.subr.bf16.mxu0 %v12463_v56 }
 0x93a   :  { %12466 = vmatpush3.bf16.msra.mxu0 %v12463_v56 }
 0x93e   :  { %3822 = vrot.lane.b32.xlu1 %v14324_v29, %s14417_s0 }
 0x94f   :  { %v11236_v8 = vpop.f32.mrb[70].mxu0 }
 0x950   :  { %v2917_v7 = vpop.f32.mrb[71].mxu0 }
 0x951   :  { %11260 = vmatprep.mubr.msk.f32.mxu0 %vm677_vm3, %v2917_v7 }
 0x952   :  { %11261 = vmatmul.mubr.msk.f32.gmra.mrb[54].mxu0 %vm677_vm3, %v11236_v8 }
 0x953   :  { %v11239_v16 = vpop.f32.mrb[72].mxu0 }
 0x954   :  { %v2927_v63 = vpop.f32.mrb[73].mxu0 }
 0x955   :  { %11263 = vmatprep.mubr.msk.f32.mxu0 %vm677_vm3, %v2927_v63 }
 0x956   :  { %11264 = vmatmul.mubr.msk.f32.gmra.mrb[56].mxu0 %vm677_vm3, %v11239_v16 }
 0x957   :  { %v11242_v38 = vpop.f32.mrb[74].mxu0 }
 0x958   :  { %v2937_v18 = vpop.f32.mrb[75].mxu0 }
 0x959   :  { %11266 = vmatprep.mubr.msk.f32.mxu0 %vm677_vm3, %v2937_v18 }
 0x95a   :  { %v3565_v15 = vpop.xlane.xlu0 %3564  ;;  %11267 = vmatmul.mubr.msk.f32.gmra.mrb[58].mxu0 %vm677_vm3, %v11242_v38 }
 0x95b   :  { %v11245_v10 = vpop.f32.mrb[76].mxu0  ;;  %13881 = vrcp.f32 %v3565_v15 }
 0x95c   :  { %v2947_v41 = vpop.f32.mrb[77].mxu0 }
 0x95d   :  { %v3567_v0 = vpop.xlane.xlu1 %3566  ;;  %11269 = vmatprep.mubr.msk.f32.mxu0 %vm677_vm3, %v2947_v41 }
 0x95e   :  { %v3569_v11 = vpop.xlane.xlu0 %3568  ;;  %11270 = vmatmul.mubr.msk.f32.gmra.mrb[60].mxu0 %vm677_vm3, %v11245_v10  ;;  %13883 = vrcp.f32 %v3567_v0  ;;  %v361_v10 = vld [vmem:[#allocation2 + $0x18] sm:$0xff] }
 0x95f   :  { %13885 = vrcp.f32 %v3569_v11 }
 0x961   :  { %v3571_v22 = vpop.xlane.xlu1 %3570 }
 0x962   :  { %v3573_v61 = vpop.xlane.xlu0 %3572  ;;  %13887 = vrcp.f32 %v3571_v22 }
 0x963   :  { %13889 = vrcp.f32 %v3573_v61 }
 0x965   :  { %v3575_v58 = vpop.xlane.xlu1 %3574  ;;  %v13882_v28 = vpop.eup %13881 }
 0x966   :  { %v13277_v51 = vpop.permute.xlu0 %13276  ;;  %v3612_v13 = vmul.f32 %v13882_v28, %v16143_v5  ;;  %13891 = vrcp.f32 %v3575_v58 }
 0x967   :  { %v13279_v59 = vunpack.i.h.bf16 %v13277_v51  ;;  %v13278_v42 = vunpack.i.l.bf16 %v13277_v51 }
 0x968   :  { %v13884_v33 = vpop.eup %13883 }
 0x969   :  { %v13282_v50 = vpop.permute.xlu1 %13281  ;;  %v11248_v31 = vpop.f32.mrb[78].mxu0  ;;  %v12467_v49 = vpack.c.bf16 %v13279_v59, %v13278_v42  ;;  %v3613_v27 = vmul.f32 %v13884_v33, %v16146_v53 }
 0x96a   :  { %v13284_v36 = vunpack.i.h.bf16 %v13282_v50  ;;  %v13283_v46 = vunpack.i.l.bf16 %v13282_v50  ;;  %v2957_v25 = vpop.f32.mrb[79].mxu0  ;;  %v13886_v34 = vpop.eup %13885 }
 0x96b   :  { %11272 = vmatprep.mubr.msk.f32.mxu0 %vm677_vm3, %v2957_v25  ;;  %12468 = vmatprep.subr.bf16.mxu0 %v12467_v49  ;;  %v3614_v60 = vmul.f32 %v13886_v34, %v16148_v12  ;;  %v363_v25 = vld [vmem:[#allocation2 + $0x28] sm:$0xff]  ;;  %v18700_v34 = vld [vmem:[#allocation8_spill] sm:$0xff] }
 0x96c   :  { %11273 = vmatmul.mubr.msk.f32.gmra.mrb[62].mxu0 %vm677_vm3, %v11248_v31  ;;  %v12471_v19 = vpack.c.bf16 %v13284_v36, %v13283_v46  ;;  %v13888_v17 = vpop.eup %13887 }
 0x96d   :  { %12470 = vmatpush3.bf16.msra.mxu0 %v12467_v49  ;;  %11363 = vmatprep.mubr.f32.mxu0 %v3612_v13  ;;  %v13890_v30 = vpop.eup %13889  ;;  %v3615_v5 = vmul.f32 %v13888_v17, %v16152_v43  ;;  %v365_v13 = vld [vmem:[#allocation2 + $0x38] sm:$0xff]  ;;  %v16262_v17 = vld [vmem:[%s18491_s4] sm:$0x3f] }
 0x96e   :  { %12472 = vmatprep.subr.bf16.mxu0 %v12471_v19  ;;  %v3616_v55 = vmul.f32 %v13890_v30, %v16154_v32  ;;  %v12479_v33 = vpack.c.bf16 %v365_v13, %v363_v25 }
 0x970   :  { %v13892_v9 = vpop.eup %13891 }
 0x971   :  { %12474 = vmatpush3.bf16.msra.mxu0 %v12471_v19  ;;  %v3617_v44 = vmul.f32 %v13892_v9, %v16158_v1  ;;  %v13290_v19 = vpack.i.bf16 %v365_v13, %v363_v25 }
 0x973   :  { %13291 = vrot.lane.b32.xlu1 %v13290_v19, %s14418_s26 }
 0x974   :  { %11364 = vmatmul.mubr.f32.vlgmr.msra.gmra.mrb[80].mxu0 %v3613_v27  ;;  %v16257_v27 = vsub.s32 3, %v18700_v34 }
 0x975   :  { %11366 = vmatprep.mubr.f32.mxu0 %v3614_v60 }
 0x976   :  { %18701 = vst [vmem:[#allocation57_spill] sm:$0xff] %v16257_v27  ;;  %v4037_v60 = vrot.slane %v16262_v17, %v16257_v27 }
 0x978   :  { %11367 = vmatmul.mubr.f32.gmra.mrb[82].mxu0 %v3615_v5 }
 0x979   :  { %11369 = vmatprep.mubr.f32.mxu0 %v3616_v55 }
 0x97c   :  { %11370 = vmatmul.mubr.f32.gmra.mrb[84].mxu0 %v3617_v44  ;;  %v18702_v44 = vld [vmem:[#allocation11_spill] sm:$0xff] }
 0x997   :  { %v3577_v45 = vpop.xlane.xlu0 %3576 }
 0x998   :  { %13893 = vrcp.f32 %v3577_v45 }
 0x99a   :  { %v3579_v24 = vpop.xlane.xlu1 %3578 }
 0x99b   :  { %13895 = vrcp.f32 %v3579_v24  ;;  %v3581_v53 = vpop.xlane.xlu0 %3580 }
 0x99c   :  { %13897 = vrcp.f32 %v3581_v53  ;;  %v18703_v53 = vld [vmem:[#allocation12_spill] sm:$0xff] }
 0x99e   :  { %v3585_v12 = vpop.xlane.xlu1 %3584 }
 0x99f   :  { %13899 = vrcp.f32 %v3585_v12  ;;  %v3583_v4 = vpop.xlane.xlu0 %3582 }
 0x9a0   :  { %13901 = vrcp.f32 %v3583_v4 }
 0x9a2   :  { %v13894_v21 = vpop.eup %13893  ;;  %v3589_v43 = vpop.xlane.xlu1 %3588 }
 0x9a3   :  { %13903 = vrcp.f32 %v3589_v43  ;;  %v3587_v40 = vpop.xlane.xlu0 %3586  ;;  %v3618_v32 = vmul.f32 %v13894_v21, %v16173_v20 }
 0x9a4   :  { %13905 = vrcp.f32 %v3587_v40  ;;  %v18704_v40 = vld [vmem:[#allocation13_spill] sm:$0xff] }
 0x9a5   :  { %v13896_v52 = vpop.eup %13895  ;;  %11372 = vmatprep.mubr.f32.mxu0 %v3618_v32 }
 0x9a6   :  { %v13898_v1 = vpop.eup %13897  ;;  %v3619_v47 = vmul.f32 %v13896_v52, %v16176_v39 }
 0x9a7   :  { %v3591_v37 = vpop.xlane.xlu0 %3590  ;;  %v3620_v62 = vmul.f32 %v13898_v1, %v16178_v2  ;;  %v18705_v1 = vld [vmem:[#allocation14_spill] sm:$0xff] }
 0x9a8   :  { %13907 = vrcp.f32 %v3591_v37  ;;  %11373 = vmatmul.mubr.f32.gmra.mrb[86].mxu0 %v3619_v47 }
 0x9a9   :  { %v13900_v57 = vpop.eup %13899  ;;  %11375 = vmatprep.mubr.f32.mxu0 %v3620_v62 }
 0x9aa   :  { %v13902_v26 = vpop.eup %13901  ;;  %v3622_v29 = vmul.f32 %v13900_v57, %v16182_v54 }
 0x9ab   :  { %v3621_v56 = vmul.f32 %v13902_v26, %v16184_v35  ;;  %v18706_v26 = vld [vmem:[#allocation15_spill] sm:$0xff] }
 0x9ad   :  { %v13904_v8 = vpop.eup %13903  ;;  %11376 = vmatmul.mubr.f32.gmra.mrb[88].mxu0 %v3621_v56 }
 0x9ae   :  { %v13906_v20 = vpop.eup %13905  ;;  %11378 = vmatprep.mubr.f32.mxu0 %v3622_v29  ;;  %v3624_v39 = vmul.f32 %v13904_v8, %v16188_v6  ;;  %v359_v6 = vld [vmem:[#allocation2 + $0x8] sm:$0xff]  ;;  %v18707_v29 = vld [vmem:[#allocation16_spill] sm:$0xff] }
 0x9af   :  { %v3623_v7 = vmul.f32 %v13906_v20, %v16190_v48  ;;  %v13285_v41 = vpack.i.bf16 %v361_v10, %v359_v6 }
 0x9b1   :  { %11379 = vmatmul.mubr.f32.gmra.mrb[90].mxu0 %v3623_v7  ;;  %13286 = vrot.lane.b32.xlu0 %v13285_v41, %s14418_s26 }
 0x9b2   :  { %v13908_v16 = vpop.eup %13907  ;;  %11381 = vmatprep.mubr.f32.mxu0 %v3624_v39 }
 0x9b3   :  { %v3625_v2 = vmul.f32 %v13908_v16, %v16194_v3  ;;  %v12475_v3 = vpack.c.bf16 %v361_v10, %v359_v6  ;;  %v18710_v6 = vld [vmem:[#allocation20_spill] sm:$0xff] }
 0x9b5   :  { %11382 = vmatmul.mubr.f32.gmra.mrb[92].mxu0 %v3625_v2  ;;  %12476 = vmatprep.subr.bf16.mxu1 %v12475_v3  ;;  %v18708_v2 = vld [vmem:[#allocation17_spill] sm:$0xff] }
 0x9b6   :  { %12478 = vmatpush3.bf16.msra.mxu1 %v12475_v3  ;;  %v18711_v3 = vld [vmem:[#allocation19_spill] sm:$0xff] }
 0x9b7   :  { %12480 = vmatprep.subr.bf16.mxu1 %v12479_v33 }
 0x9b9   :  { %v3595_v63 = vpop.xlane.xlu0 %3594 }
 0x9ba   :  { %13909 = vrcp.f32 %v3595_v63  ;;  %v3593_v38 = vpop.xlane.xlu1 %3592  ;;  %12482 = vmatpush3.bf16.msra.mxu1 %v12479_v33 }
 0x9bb   :  { %13911 = vrcp.f32 %v3593_v38  ;;  %v18709_v38 = vld [vmem:[#allocation18_spill] sm:$0xff] }
 0x9be   :  { %v3823_v35 = vpop.permute.xlu1 %3822 }
 0x9bf   :  { %11387 = vmatprep.subr.mxu0 %v3823_v35 }
 0x9c0   :  { %11388 = vmatpush3.msra.mxu0 %v3823_v35 }
 0x9c4   :  { %v13910_v54 = vpop.eup %13909 }
 0x9c5   :  { %v13912_v18 = vpop.eup %13911  ;;  %v3627_v48 = vmul.f32 %v13910_v54, %v16204_v23 }
 0x9c6   :  { %v3626_v15 = vmul.f32 %v13912_v18, %v16206_v14 }
 0x9c8   :  { %11384 = vmatprep.mubr.f32.mxu0 %v3626_v15 }
 0x9c9   :  { %11385 = vmatmul.mubr.f32.gmra.mrb[94].mxu0 %v3627_v48 }
 0xa47   :  { %v11365_v0 = vpop.f32.mrb[80].mxu0 }
 0xa48   :  { %v3742_v11 = vpop.f32.mrb[81].mxu0 }
 0xa49   :  { %11389 = vmatprep.mubr.msk.f32.mxu0 %vm677_vm3, %v3742_v11 }
 0xa4a   :  { %11390 = vmatmul.mubr.msk.f32.vlgmr.msra.gmra.mrb[48].mxu0 %vm677_vm3, %v11365_v0 }
 0xa4b   :  { %v11368_v22 = vpop.f32.mrb[82].mxu0 }
 0xa4c   :  { %v3752_v14 = vpop.f32.mrb[83].mxu0 }
 0xa4d   :  { %11392 = vmatprep.mubr.msk.f32.mxu0 %vm677_vm3, %v3752_v14 }
 0xa4e   :  { %11393 = vmatmul.mubr.msk.f32.gmra.mrb[50].mxu0 %vm677_vm3, %v11368_v22 }
 0xa4f   :  { %v11371_v23 = vpop.f32.mrb[84].mxu0 }
 0xa50   :  { %v3762_v61 = vpop.f32.mrb[85].mxu0 }
 0xa51   :  { %11395 = vmatprep.mubr.msk.f32.mxu0 %vm677_vm3, %v3762_v61 }
 0xa52   :  { %11396 = vmatmul.mubr.msk.f32.gmra.mrb[52].mxu0 %vm677_vm3, %v11371_v23  ;;  %v18712_v23 = vld [vmem:[#allocation22_spill] sm:$0xff] }
 0xa7b   :  { %v11374_v58 = vpop.f32.mrb[86].mxu0 }
 0xa7c   :  { %v3772_v51 = vpop.f32.mrb[87].mxu0 }
 0xa7d   :  { %11398 = vmatprep.mubr.msk.f32.mxu0 %vm677_vm3, %v3772_v51  ;;  %v18713_v51 = vld [vmem:[#allocation21_spill] sm:$0xff] }
 0xa7e   :  { %11399 = vmatmul.mubr.msk.f32.gmra.mrb[54].mxu0 %vm677_vm3, %v11374_v58 }
 0xa80   :  { %v11377_v59 = vpop.f32.mrb[88].mxu0 }
 0xa81   :  { %v3782_v42 = vpop.f32.mrb[89].mxu0 }
 0xa82   :  { %11401 = vmatprep.mubr.msk.f32.mxu0 %vm677_vm3, %v3782_v42 }
 0xa83   :  { %11402 = vmatmul.mubr.msk.f32.gmra.mrb[56].mxu0 %vm677_vm3, %v11377_v59 }
 0xa84   :  { %v11380_v28 = vpop.f32.mrb[90].mxu0 }
 0xa85   :  { %v3792_v50 = vpop.f32.mrb[91].mxu0 }
 0xa86   :  { %11404 = vmatprep.mubr.msk.f32.mxu0 %vm677_vm3, %v3792_v50 }
 0xa87   :  { %11405 = vmatmul.mubr.msk.f32.gmra.mrb[58].mxu0 %vm677_vm3, %v11380_v28 }
 0xa88   :  { %v11383_v31 = vpop.f32.mrb[92].mxu0 }
 0xa89   :  { %v3802_v49 = vpop.f32.mrb[93].mxu0 }
 0xa8a   :  { %11407 = vmatprep.mubr.msk.f32.mxu0 %vm677_vm3, %v3802_v49 }
 0xa8b   :  { %11408 = vmatmul.mubr.msk.f32.gmra.mrb[60].mxu0 %vm677_vm3, %v11383_v31  ;;  %v18714_v31 = vld [vmem:[#allocation24_spill] sm:$0xff] }
 0xa9c   :  { %v11386_v36 = vpop.f32.mrb[94].mxu0 }
 0xa9d   :  { %v3812_v46 = vpop.f32.mrb[95].mxu0 }
 0xa9e   :  { %11410 = vmatprep.mubr.msk.f32.mxu0 %vm677_vm3, %v3812_v46 }
 0xa9f   :  { %11411 = vmatmul.mubr.msk.f32.gmra.mrb[62].mxu0 %vm677_vm3, %v11386_v36  ;;  %v18715_v36 = vld [vmem:[#allocation23_spill] sm:$0xff] }
 0xb1d   :  { %v11391_v30 = vpop.f32.mrb[48].mxu0 }
 0xb1e   :  { %v4039_v5 = vadd.f32 %v11391_v30, %v4037_v60  ;;  %v3939_v9 = vpop.f32.mrb[49].mxu0  ;;  %v18716_v30 = vld [vmem:[#allocation26_spill] sm:$0xff] }
 0xb1f   :  { %v4038_v55 = vadd.f32 %v4037_v60, %v3939_v9  ;;  %v18717_v9 = vld [vmem:[#allocation25_spill] sm:$0xff] }
 0xb20   :  { %v16270_v12 = vadd.f32 %v4039_v5, %v18703_v53 }
 0xb21   :  { %v16267_v45 = vadd.f32 %v4038_v55, %v18702_v44  ;;  %v11394_v24 = vpop.f32.mrb[50].mxu0  ;;  %v13287_v44 = vpop.permute.xlu0 %13286 }
 0xb22   :  { %v4041_v4 = vadd.f32 %v11394_v24, %v4037_v60  ;;  %v3949_v21 = vpop.f32.mrb[51].mxu0  ;;  %v13289_v24 = vunpack.i.h.bf16 %v13287_v44  ;;  %v13288_v53 = vunpack.i.l.bf16 %v13287_v44 }
 0xb23   :  { %v4040_v43 = vadd.f32 %v4037_v60, %v3949_v21  ;;  %11421 = vmatprep.mubr.msk.f32.mxu1 %vm367_vm2, %v16267_v45  ;;  %v13292_v21 = vpop.permute.xlu1 %13291 }
 0xb24   :  { %11422 = vmatmul.mubr.msk.f32.vlgmr.msra.gmra.mrb[80].mxu1 %vm367_vm2, %v16270_v12  ;;  %v16280_v47 = vadd.f32 %v4041_v4, %v18705_v1  ;;  %v12483_v4 = vpack.c.bf16 %v13289_v24, %v13288_v53  ;;  %v4579_v1 = vld [vmem:[#allocation2 + $0x50] sm:$0xff] }
 0xb25   :  { %v16277_v32 = vadd.f32 %v4040_v43, %v18704_v40  ;;  %v11397_v52 = vpop.f32.mrb[52].mxu0  ;;  %v13294_v43 = vunpack.i.h.bf16 %v13292_v21  ;;  %v13293_v40 = vunpack.i.l.bf16 %v13292_v21 }
 0xb26   :  { %v4043_v37 = vadd.f32 %v11397_v52, %v4037_v60  ;;  %v3959_v62 = vpop.f32.mrb[53].mxu0  ;;  %12484 = vmatprep.subr.bf16.mxu1 %v12483_v4  ;;  %v4577_v52 = vld [vmem:[#allocation2 + $0x40] sm:$0xff] }
 0xb27   :  { %v4042_v57 = vadd.f32 %v4037_v60, %v3959_v62  ;;  %11424 = vmatprep.mubr.msk.f32.mxu1 %vm367_vm2, %v16277_v32  ;;  %12486 = vmatpush3.bf16.msra.mxu1 %v12483_v4  ;;  %v18544_v62 = vsub.s32 4, %v18700_v34 }
 0xb28   :  { %11425 = vmatmul.mubr.msk.f32.gmra.mrb[82].mxu1 %vm367_vm2, %v16280_v47  ;;  %v16290_v8 = vadd.f32 %v4043_v37, %v18707_v29  ;;  %v12491_v37 = vpack.c.bf16 %v4579_v1, %v4577_v52 }
 0xb29   :  { %v16287_v56 = vadd.f32 %v4042_v57, %v18706_v26  ;;  %v16350_v57 = vrot.slane %v16262_v17, %v18544_v62 }
 0xb2a   :  { %12492 = vmatprep.subr.bf16.mxu0 %v12491_v37 }
 0xb2b   :  { %11427 = vmatprep.mubr.msk.f32.mxu1 %vm367_vm2, %v16287_v56  ;;  %12494 = vmatpush3.bf16.msra.mxu0 %v12491_v37 }
 0xb2c   :  { %11428 = vmatmul.mubr.msk.f32.gmra.mrb[84].mxu1 %vm367_vm2, %v16290_v8 }
 0xb51   :  { %v11400_v20 = vpop.f32.mrb[54].mxu0 }
 0xb52   :  { %v4045_v7 = vadd.f32 %v11400_v20, %v4037_v60  ;;  %v3969_v39 = vpop.f32.mrb[55].mxu0 }
 0xb53   :  { %v4044_v16 = vadd.f32 %v4037_v60, %v3969_v39 }
 0xb54   :  { %v16300_v35 = vadd.f32 %v4045_v7, %v18709_v38 }
 0xb55   :  { %v16297_v63 = vadd.f32 %v4044_v16, %v18708_v2 }
 0xb56   :  { %v11403_v54 = vpop.f32.mrb[56].mxu0 }
 0xb57   :  { %v4047_v18 = vadd.f32 %v11403_v54, %v4037_v60  ;;  %v3979_v15 = vpop.f32.mrb[57].mxu0  ;;  %11430 = vmatprep.mubr.msk.f32.mxu1 %vm367_vm2, %v16297_v63 }
 0xb58   :  { %v4046_v48 = vadd.f32 %v4037_v60, %v3979_v15  ;;  %11431 = vmatmul.mubr.msk.f32.gmra.mrb[86].mxu1 %vm367_vm2, %v16300_v35 }
 0xb59   :  { %v16310_v0 = vadd.f32 %v4047_v18, %v18711_v3 }
 0xb5a   :  { %v16307_v10 = vadd.f32 %v4046_v48, %v18710_v6  ;;  %v11406_v41 = vpop.f32.mrb[58].mxu0 }
 0xb5b   :  { %v4049_v11 = vadd.f32 %v11406_v41, %v4037_v60  ;;  %v3989_v22 = vpop.f32.mrb[59].mxu0 }
 0xb5c   :  { %v4048_v14 = vadd.f32 %v4037_v60, %v3989_v22  ;;  %11433 = vmatprep.mubr.msk.f32.mxu1 %vm367_vm2, %v16307_v10 }
 0xb5d   :  { %11434 = vmatmul.mubr.msk.f32.gmra.mrb[88].mxu1 %vm367_vm2, %v16310_v0  ;;  %v16320_v59 = vadd.f32 %v4049_v11, %v18713_v51 }
 0xb5e   :  { %v16317_v61 = vadd.f32 %v4048_v14, %v18712_v23  ;;  %v11409_v58 = vpop.f32.mrb[60].mxu0 }
 0xb5f   :  { %v4051_v42 = vadd.f32 %v11409_v58, %v4037_v60  ;;  %v3999_v28 = vpop.f32.mrb[61].mxu0 }
 0xb60   :  { %v4050_v50 = vadd.f32 %v4037_v60, %v3999_v28  ;;  %11436 = vmatprep.mubr.msk.f32.mxu1 %vm367_vm2, %v16317_v61 }
 0xb61   :  { %11437 = vmatmul.mubr.msk.f32.gmra.mrb[90].mxu1 %vm367_vm2, %v16320_v59  ;;  %v16330_v46 = vadd.f32 %v4051_v42, %v18715_v36 }
 0xb62   :  { %v16327_v49 = vadd.f32 %v4050_v50, %v18714_v31 }
 0xb64   :  { %11439 = vmatprep.mubr.msk.f32.mxu1 %vm367_vm2, %v16327_v49 }
 0xb65   :  { %11440 = vmatmul.mubr.msk.f32.gmra.mrb[92].mxu1 %vm367_vm2, %v16330_v46 }
 0xb72   :  { %v11412_v25 = vpop.f32.mrb[62].mxu0 }
 0xb73   :  { %v4053_v13 = vadd.f32 %v11412_v25, %v4037_v60  ;;  %v4009_v19 = vpop.f32.mrb[63].mxu0 }
 0xb74   :  { %v4052_v33 = vadd.f32 %v4037_v60, %v4009_v19  ;;  %v12487_v60 = vpack.c.bf16 %v13294_v43, %v13293_v40 }
 0xb75   :  { %v16340_v55 = vadd.f32 %v4053_v13, %v18717_v9 }
 0xb76   :  { %v16337_v5 = vadd.f32 %v4052_v33, %v18716_v30  ;;  %12488 = vmatprep.subr.bf16.mxu1 %v12487_v60 }
 0xb77   :  { %12490 = vmatpush3.bf16.msra.mxu1 %v12487_v60 }
 0xb78   :  { %11442 = vmatprep.mubr.msk.f32.mxu1 %vm367_vm2, %v16337_v5 }
 0xb79   :  { %11443 = vmatmul.mubr.msk.f32.gmra.mrb[94].mxu1 %vm367_vm2, %v16340_v55 }
 0xbf7   :  { %v11423_v26 = vpop.f32.mrb[80].mxu1 }
 0xbf8   :  { %v4194_v29 = vadd.f32 %v11423_v26, %v16350_v57  ;;  %v4188_v20 = vpop.f32.mrb[81].mxu1 }
 0xbf9   :  { %v4189_v7 = vadd.f32 %v4188_v20, %v16350_v57 }
 0xbfa   :  { %v4284_v39 = vmul.f32 0.70710677, %v4194_v29  ;;  %v4268_v50 = vmul.f32 0.5, %v4194_v29 }
 0xbfb   :  { %v4283_v16 = vmul.f32 0.70710677, %v4189_v7  ;;  %v11426_v2 = vpop.f32.mrb[82].mxu1  ;;  %v4267_v42 = vmul.f32 0.5, %v4189_v7 }
 0xbfc   :  { %13913 = verf.f32 %v4284_v39  ;;  %v4204_v38 = vadd.f32 %v11426_v2, %v16350_v57  ;;  %v4198_v54 = vpop.f32.mrb[83].mxu1 }
 0xbfd   :  { %13915 = verf.f32 %v4283_v16  ;;  %v4199_v18 = vadd.f32 %v4198_v54, %v16350_v57 }
 0xbfe   :  { %v4286_v15 = vmul.f32 0.70710677, %v4204_v38  ;;  %v4270_v9 = vmul.f32 0.5, %v4204_v38 }
 0xbff   :  { %v4285_v48 = vmul.f32 0.70710677, %v4199_v18  ;;  %v11429_v6 = vpop.f32.mrb[84].mxu1  ;;  %v4269_v33 = vmul.f32 0.5, %v4199_v18 }
 0xc00   :  { %13917 = verf.f32 %v4286_v15  ;;  %v4214_v41 = vadd.f32 %v11429_v6, %v16350_v57  ;;  %v4208_v3 = vpop.f32.mrb[85].mxu1 }
 0xc01   :  { %13919 = verf.f32 %v4285_v48  ;;  %v4209_v11 = vadd.f32 %v4208_v3, %v16350_v57 }
 0xc02   :  { %v4288_v22 = vmul.f32 0.70710677, %v4214_v41  ;;  %v4272_v60 = vmul.f32 0.5, %v4214_v41 }
 0xc03   :  { %v4287_v14 = vmul.f32 0.70710677, %v4209_v11  ;;  %v4271_v43 = vmul.f32 0.5, %v4209_v11 }
 0xc04   :  { %13921 = verf.f32 %v4288_v22 }
 0xc05   :  { %13923 = verf.f32 %v4287_v14 }
 0xc06   :  { %v13914_v23 = vpop.eup %13913 }
 0xc07   :  { %v13916_v58 = vpop.eup %13915  ;;  %v4316_v51 = vadd.f32 1.0, %v13914_v23 }
 0xc08   :  { %v4315_v28 = vadd.f32 1.0, %v13916_v58 }
 0xc09   :  { %v4332_v13 = vmul.f32 %v4316_v51, %v4268_v50 }
 0xc0a   :  { %v13918_v31 = vpop.eup %13917  ;;  %v4331_v36 = vmul.f32 %v4315_v28, %v4267_v42 }
 0xc0b   :  { %v13920_v25 = vpop.eup %13919  ;;  %v4318_v19 = vadd.f32 1.0, %v13918_v31 }
 0xc0c   :  { %v4317_v30 = vadd.f32 1.0, %v13920_v25  ;;  %11453 = vmatprep.mubr.msk.f32.mxu1 %vm367_vm2, %v4331_v36 }
 0xc0d   :  { %11454 = vmatmul.mubr.msk.f32.vlgmr.msra.gmra.mrb[96].mxu1 %vm367_vm2, %v4332_v13  ;;  %v4334_v4 = vmul.f32 %v4318_v19, %v4270_v9 }
 0xc0e   :  { %v13922_v44 = vpop.eup %13921  ;;  %v4333_v24 = vmul.f32 %v4317_v30, %v4269_v33 }
 0xc0f   :  { %v13924_v53 = vpop.eup %13923  ;;  %v4320_v21 = vadd.f32 1.0, %v13922_v44 }
 0xc10   :  { %v4319_v40 = vadd.f32 1.0, %v13924_v53  ;;  %11456 = vmatprep.mubr.msk.f32.mxu1 %vm367_vm2, %v4333_v24 }
 0xc11   :  { %11457 = vmatmul.mubr.msk.f32.gmra.mrb[98].mxu1 %vm367_vm2, %v4334_v4  ;;  %v4336_v1 = vmul.f32 %v4320_v21, %v4272_v60 }
 0xc12   :  { %v4335_v52 = vmul.f32 %v4319_v40, %v4271_v43 }
 0xc14   :  { %11459 = vmatprep.mubr.msk.f32.mxu1 %vm367_vm2, %v4335_v52 }
 0xc15   :  { %11460 = vmatmul.mubr.msk.f32.gmra.mrb[100].mxu1 %vm367_vm2, %v4336_v1 }
 0xc2b   :  { %v11432_v37 = vpop.f32.mrb[86].mxu1 }
 0xc2c   :  { %v4224_v26 = vadd.f32 %v11432_v37, %v16350_v57  ;;  %v4218_v29 = vpop.f32.mrb[87].mxu1 }
 0xc2d   :  { %v4219_v20 = vadd.f32 %v4218_v29, %v16350_v57 }
 0xc2e   :  { %v4290_v7 = vmul.f32 0.70710677, %v4224_v26  ;;  %v4274_v19 = vmul.f32 0.5, %v4224_v26 }
 0xc2f   :  { %v4289_v39 = vmul.f32 0.70710677, %v4219_v20  ;;  %v4273_v36 = vmul.f32 0.5, %v4219_v20 }
 0xc30   :  { %13925 = verf.f32 %v4290_v7  ;;  %v11435_v16 = vpop.f32.mrb[88].mxu1 }
 0xc31   :  { %13927 = verf.f32 %v4289_v39  ;;  %v4234_v2 = vadd.f32 %v11435_v16, %v16350_v57  ;;  %v4228_v38 = vpop.f32.mrb[89].mxu1 }
 0xc32   :  { %v4229_v54 = vadd.f32 %v4228_v38, %v16350_v57 }
 0xc33   :  { %v4292_v18 = vmul.f32 0.70710677, %v4234_v2  ;;  %v4276_v21 = vmul.f32 0.5, %v4234_v2 }
 0xc34   :  { %v4291_v15 = vmul.f32 0.70710677, %v4229_v54  ;;  %v11438_v48 = vpop.f32.mrb[90].mxu1  ;;  %v4275_v53 = vmul.f32 0.5, %v4229_v54 }
 0xc35   :  { %13929 = verf.f32 %v4292_v18  ;;  %v4244_v6 = vadd.f32 %v11438_v48, %v16350_v57  ;;  %v4238_v41 = vpop.f32.mrb[91].mxu1 }
 0xc36   :  { %13931 = verf.f32 %v4291_v15  ;;  %v4239_v3 = vadd.f32 %v4238_v41, %v16350_v57 }
 0xc37   :  { %v4294_v11 = vmul.f32 0.70710677, %v4244_v6  ;;  %v4278_v29 = vmul.f32 0.5, %v4244_v6 }
 0xc38   :  { %v4293_v22 = vmul.f32 0.70710677, %v4239_v3  ;;  %v11441_v14 = vpop.f32.mrb[92].mxu1  ;;  %v4277_v37 = vmul.f32 0.5, %v4239_v3 }
 0xc39   :  { %13933 = verf.f32 %v4294_v11  ;;  %v4254_v23 = vadd.f32 %v11441_v14, %v16350_v57  ;;  %v4248_v58 = vpop.f32.mrb[93].mxu1 }
 0xc3a   :  { %v13926_v51 = vpop.eup %13925  ;;  %13935 = verf.f32 %v4293_v22  ;;  %v4249_v42 = vadd.f32 %v4248_v58, %v16350_v57 }
 0xc3b   :  { %v13928_v28 = vpop.eup %13927  ;;  %v4322_v50 = vadd.f32 1.0, %v13926_v51  ;;  %v4296_v31 = vmul.f32 0.70710677, %v4254_v23  ;;  %v4280_v2 = vmul.f32 0.5, %v4254_v23 }
 0xc3c   :  { %v4321_v25 = vadd.f32 1.0, %v13928_v28  ;;  %v4295_v13 = vmul.f32 0.70710677, %v4249_v42  ;;  %v4279_v54 = vmul.f32 0.5, %v4249_v42 }
 0xc3d   :  { %13937 = verf.f32 %v4296_v31  ;;  %v4338_v9 = vmul.f32 %v4322_v50, %v4274_v19  ;;  %v16387_v19 = vld [vmem:[%s18491_s4 + $0x8] sm:$0x3f] }
 0xc3e   :  { %v4337_v33 = vmul.f32 %v4321_v25, %v4273_v36  ;;  %13939 = verf.f32 %v4295_v13  ;;  %v4581_v25 = vld [vmem:[#allocation2 + $0x60] sm:$0xff] }
 0xc3f   :  { %v13930_v30 = vpop.eup %13929 }
 0xc40   :  { %v13932_v44 = vpop.eup %13931  ;;  %v4324_v24 = vadd.f32 1.0, %v13930_v30  ;;  %11462 = vmatprep.mubr.msk.f32.mxu1 %vm367_vm2, %v4337_v33  ;;  %v18718_v33 = vld [vmem:[#allocation9_spill] sm:$0xff] }
 0xc41   :  { %v4323_v4 = vadd.f32 1.0, %v13932_v44  ;;  %11463 = vmatmul.mubr.msk.f32.gmra.mrb[102].mxu1 %vm367_vm2, %v4338_v9  ;;  %v4803_v30 = vrot.slane %v16387_v19, %v18718_v33  ;;  %v18543_v9 = vsub.s32 5, %v18700_v34 }
 0xc42   :  { %v4340_v52 = vmul.f32 %v4324_v24, %v4276_v21 }
 0xc43   :  { %v13934_v43 = vpop.eup %13933  ;;  %v4339_v40 = vmul.f32 %v4323_v4, %v4275_v53  ;;  %4805 = vrot.lane.b32.xlu1 %v4803_v30, %s14417_s0  ;;  %v4350_v44 = vrot.slane %v16262_v17, %v18543_v9 }
 0xc44   :  { %v13936_v60 = vpop.eup %13935  ;;  %v4326_v1 = vadd.f32 1.0, %v13934_v43 }
 0xc45   :  { %v4325_v26 = vadd.f32 1.0, %v13936_v60  ;;  %11465 = vmatprep.mubr.msk.f32.mxu1 %vm367_vm2, %v4339_v40 }
 0xc46   :  { %11466 = vmatmul.mubr.msk.f32.gmra.mrb[104].mxu1 %vm367_vm2, %v4340_v52  ;;  %v4342_v16 = vmul.f32 %v4326_v1, %v4278_v29 }
 0xc47   :  { %v13938_v20 = vpop.eup %13937  ;;  %v4341_v7 = vmul.f32 %v4325_v26, %v4277_v37 }
 0xc48   :  { %v13940_v39 = vpop.eup %13939  ;;  %v4328_v38 = vadd.f32 1.0, %v13938_v20 }
 0xc49   :  { %v4327_v18 = vadd.f32 1.0, %v13940_v39  ;;  %11468 = vmatprep.mubr.msk.f32.mxu1 %vm367_vm2, %v4341_v7 }
 0xc4a   :  { %11469 = vmatmul.mubr.msk.f32.gmra.mrb[106].mxu1 %vm367_vm2, %v4342_v16  ;;  %v4344_v48 = vmul.f32 %v4328_v38, %v4280_v2 }
 0xc4b   :  { %v4343_v15 = vmul.f32 %v4327_v18, %v4279_v54 }
 0xc4c   :  { %v11444_v41 = vpop.f32.mrb[94].mxu1 }
 0xc4d   :  { %v4264_v3 = vadd.f32 %v11444_v41, %v16350_v57  ;;  %v4258_v6 = vpop.f32.mrb[95].mxu1  ;;  %11471 = vmatprep.mubr.msk.f32.mxu1 %vm367_vm2, %v4343_v15 }
 0xc4e   :  { %v4259_v11 = vadd.f32 %v4258_v6, %v16350_v57  ;;  %11472 = vmatmul.mubr.msk.f32.gmra.mrb[108].mxu1 %vm367_vm2, %v4344_v48  ;;  %v4583_v57 = vld [vmem:[#allocation2 + $0x70] sm:$0xff] }
 0xc4f   :  { %v4298_v22 = vmul.f32 0.70710677, %v4264_v3  ;;  %v4282_v50 = vmul.f32 0.5, %v4264_v3  ;;  %v12495_v13 = vpack.c.bf16 %v4583_v57, %v4581_v25 }
 0xc50   :  { %v4297_v14 = vmul.f32 0.70710677, %v4259_v11  ;;  %v4281_v42 = vmul.f32 0.5, %v4259_v11 }
 0xc51   :  { %13941 = verf.f32 %v4298_v22  ;;  %12496 = vmatprep.subr.bf16.mxu0 %v12495_v13 }
 0xc52   :  { %13943 = verf.f32 %v4297_v14  ;;  %12498 = vmatpush3.bf16.msra.mxu0 %v12495_v13 }
 0xc5b   :  { %v13942_v58 = vpop.eup %13941 }
 0xc5c   :  { %v13944_v23 = vpop.eup %13943  ;;  %v4330_v51 = vadd.f32 1.0, %v13942_v58 }
 0xc5d   :  { %v4329_v28 = vadd.f32 1.0, %v13944_v23 }
 0xc5e   :  { %v4346_v36 = vmul.f32 %v4330_v51, %v4282_v50 }
 0xc5f   :  { %v4345_v31 = vmul.f32 %v4329_v28, %v4281_v42 }
 0xc61   :  { %11474 = vmatprep.mubr.msk.f32.mxu1 %vm367_vm2, %v4345_v31 }
 0xc62   :  { %11475 = vmatmul.mubr.msk.f32.gmra.mrb[110].mxu1 %vm367_vm2, %v4346_v36 }
 0xcb5   :  { %v4806_v36 = vpop.permute.xlu1 %4805 }
 0xce0   :  { %v11455_v24 = vpop.f32.mrb[96].mxu1 }
 0xce1   :  { %v4487_v53 = vadd.f32 %v11455_v24, %v4350_v44  ;;  %v4481_v4 = vpop.f32.mrb[97].mxu1 }
 0xce2   :  { %v4482_v21 = vadd.f32 %v4481_v4, %v4350_v44 }
 0xce3   :  { %v16400_v60 = vadd.f32 %v4487_v53, %v16270_v12 }
 0xce4   :  { %v16397_v43 = vadd.f32 %v4482_v21, %v16267_v45  ;;  %v11458_v40 = vpop.f32.mrb[98].mxu1 }
 0xce5   :  { %18720 = vst [vmem:[#allocation58_spill] sm:$0xff] %v16400_v60  ;;  %v4497_v52 = vadd.f32 %v11458_v40, %v4350_v44  ;;  %v4491_v1 = vpop.f32.mrb[99].mxu1 }
 0xce6   :  { %18719 = vst [vmem:[#allocation56_spill] sm:$0xff] %v16397_v43  ;;  %v4492_v37 = vadd.f32 %v4491_v1, %v4350_v44  ;;  %11485 = vmatprep.mubr.msk.f32.mxu0 %vm367_vm2, %v16397_v43 }
 0xce7   :  { %11486 = vmatmul.mubr.msk.f32.vlgmr.msra.gmra.mrb[96].mxu0 %vm367_vm2, %v16400_v60  ;;  %v16410_v45 = vadd.f32 %v4497_v52, %v16280_v47  ;;  %v16828_v60 = vld [vmem:[%s18488_s1 + $0x48] sm:$0xff] }
 0xce8   :  { %v16407_v17 = vadd.f32 %v4492_v37, %v16277_v32  ;;  %v11461_v26 = vpop.f32.mrb[100].mxu1  ;;  %18753 = vst [vmem:[#allocation46_spill] sm:$0xff] %v16828_v60 }
 0xce9   :  { %18722 = vst [vmem:[#allocation32_spill] sm:$0xff] %v16410_v45  ;;  %v4507_v29 = vadd.f32 %v11461_v26, %v4350_v44  ;;  %v4501_v20 = vpop.f32.mrb[101].mxu1 }
 0xcea   :  { %18721 = vst [vmem:[#allocation31_spill] sm:$0xff] %v16407_v17  ;;  %v4502_v12 = vadd.f32 %v4501_v20, %v4350_v44  ;;  %11488 = vmatprep.mubr.msk.f32.mxu0 %vm367_vm2, %v16407_v17 }
 0xceb   :  { %11489 = vmatmul.mubr.msk.f32.gmra.mrb[98].mxu0 %vm367_vm2, %v16410_v45  ;;  %v16420_v39 = vadd.f32 %v4507_v29, %v16290_v8 }
 0xcec   :  { %v16417_v7 = vadd.f32 %v4502_v12, %v16287_v56 }
 0xced   :  { %18724 = vst [vmem:[#allocation49_spill] sm:$0xff] %v16420_v39 }
 0xcee   :  { %18723 = vst [vmem:[#allocation61_spill] sm:$0xff] %v16417_v7  ;;  %11491 = vmatprep.mubr.msk.f32.mxu0 %vm367_vm2, %v16417_v7 }
 0xcef   :  { %11492 = vmatmul.mubr.msk.f32.gmra.mrb[100].mxu0 %vm367_vm2, %v16420_v39 }
 0xd14   :  { %v11464_v32 = vpop.f32.mrb[102].mxu1 }
 0xd15   :  { %v4517_v47 = vadd.f32 %v11464_v32, %v4350_v44  ;;  %v4511_v16 = vpop.f32.mrb[103].mxu1 }
 0xd16   :  { %v4512_v38 = vadd.f32 %v4511_v16, %v4350_v44 }
 0xd17   :  { %v16430_v18 = vadd.f32 %v4517_v47, %v16300_v35 }
 0xd18   :  { %v16427_v54 = vadd.f32 %v4512_v38, %v16297_v63 }
 0xd19   :  { %18726 = vst [vmem:[#allocation60_spill] sm:$0xff] %v16430_v18  ;;  %v11467_v56 = vpop.f32.mrb[104].mxu1 }
 0xd1a   :  { %18725 = vst [vmem:[#allocation51_spill] sm:$0xff] %v16427_v54  ;;  %v4527_v2 = vadd.f32 %v11467_v56, %v4350_v44  ;;  %v4521_v8 = vpop.f32.mrb[105].mxu1  ;;  %11494 = vmatprep.mubr.msk.f32.mxu0 %vm367_vm2, %v16427_v54 }
 0xd1b   :  { %v4522_v15 = vadd.f32 %v4521_v8, %v4350_v44  ;;  %11495 = vmatmul.mubr.msk.f32.gmra.mrb[102].mxu0 %vm367_vm2, %v16430_v18 }
 0xd1c   :  { %v16440_v63 = vadd.f32 %v4527_v2, %v16310_v0 }
 0xd1d   :  { %v16437_v48 = vadd.f32 %v4522_v15, %v16307_v10  ;;  %v11470_v41 = vpop.f32.mrb[106].mxu1 }
 0xd1e   :  { %18728 = vst [vmem:[#allocation48_spill] sm:$0xff] %v16440_v63  ;;  %v4537_v3 = vadd.f32 %v11470_v41, %v4350_v44  ;;  %v4531_v35 = vpop.f32.mrb[107].mxu1 }
 0xd1f   :  { %18727 = vst [vmem:[#allocation59_spill] sm:$0xff] %v16437_v48  ;;  %v4532_v6 = vadd.f32 %v4531_v35, %v4350_v44  ;;  %11497 = vmatprep.mubr.msk.f32.mxu0 %vm367_vm2, %v16437_v48  ;;  %v16805_v48 = vld [vmem:[%s18488_s1 + $0x38] sm:$0xff] }
 0xd20   :  { %11498 = vmatmul.mubr.msk.f32.gmra.mrb[104].mxu0 %vm367_vm2, %v16440_v63  ;;  %v16450_v10 = vadd.f32 %v4537_v3, %v16320_v59  ;;  %18752 = vst [vmem:[#allocation43_spill] sm:$0xff] %v16805_v48 }
 0xd21   :  { %v16447_v11 = vadd.f32 %v4532_v6, %v16317_v61  ;;  %v11473_v22 = vpop.f32.mrb[108].mxu1 }
 0xd22   :  { %18730 = vst [vmem:[#allocation62_spill] sm:$0xff] %v16450_v10  ;;  %v4547_v14 = vadd.f32 %v11473_v22, %v4350_v44  ;;  %v4541_v58 = vpop.f32.mrb[109].mxu1 }
 0xd23   :  { %18729 = vst [vmem:[#allocation47_spill] sm:$0xff] %v16447_v11  ;;  %v4542_v0 = vadd.f32 %v4541_v58, %v4350_v44  ;;  %11500 = vmatprep.mubr.msk.f32.mxu0 %vm367_vm2, %v16447_v11 }
 0xd24   :  { %11501 = vmatmul.mubr.msk.f32.gmra.mrb[106].mxu0 %vm367_vm2, %v16450_v10  ;;  %v16460_v51 = vadd.f32 %v4547_v14, %v16330_v46 }
 0xd25   :  { %v16457_v23 = vadd.f32 %v4542_v0, %v16327_v49  ;;  %v18735_v49 = vld [vmem:[#allocation10_spill] sm:$0xff] }
 0xd26   :  { %18732 = vst [vmem:[#allocation52_spill] sm:$0xff] %v16460_v51  ;;  %v16478_v46 = vrot.slane %v16387_v19, %v18735_v49 }
 0xd27   :  { %18731 = vst [vmem:[#allocation50_spill] sm:$0xff] %v16457_v23  ;;  %11503 = vmatprep.mubr.msk.f32.mxu0 %vm367_vm2, %v16457_v23 }
 0xd28   :  { %11504 = vmatmul.mubr.msk.f32.gmra.mrb[108].mxu0 %vm367_vm2, %v16460_v51 }
 0xd35   :  { %v11476_v61 = vpop.f32.mrb[110].mxu1 }
 0xd36   :  { %v4557_v59 = vadd.f32 %v11476_v61, %v4350_v44  ;;  %v4551_v42 = vpop.f32.mrb[111].mxu1 }
 0xd37   :  { %v4552_v28 = vadd.f32 %v4551_v42, %v4350_v44 }
 0xd38   :  { %v16470_v31 = vadd.f32 %v4557_v59, %v16340_v55  ;;  %v18736_v59 = vld [vmem:[#allocation27_spill] sm:$0xff] }
 0xd39   :  { %v16467_v50 = vadd.f32 %v4552_v28, %v16337_v5  ;;  %v4827_v42 = vrot.slane %v16387_v19, %v18736_v59 }
 0xd3a   :  { %18734 = vst [vmem:[#allocation54_spill] sm:$0xff] %v16470_v31 }
 0xd3b   :  { %18733 = vst [vmem:[#allocation53_spill] sm:$0xff] %v16467_v50  ;;  %11506 = vmatprep.mubr.msk.f32.mxu0 %vm367_vm2, %v16467_v50 }
 0xd3c   :  { %11507 = vmatmul.mubr.msk.f32.gmra.mrb[110].mxu0 %vm367_vm2, %v16470_v31 }
 0xdba   :  { %v16480_v25 = vpop.f32.mrb[96].mxu0 }
 0xdbb   :  { %v4809_v57 = vadd.f32 %v16480_v25, %v4806_v36  ;;  %v16483_v5 = vpop.f32.mrb[97].mxu0 }
 0xdbc   :  { %v16487_v55 = vadd.f32 %v16478_v46, %v16483_v5  ;;  %v4808_v13 = vadd.f32 %v4806_v36, %v16483_v5 }
 0xdbe   :  { %v16490_v30 = vpop.f32.mrb[98].mxu0  ;;  %11541 = vmatprep.mubr.msk.f32.mxu1 %vm677_vm3, %v16487_v55  ;;  %v16494_v44 = vpack.i.bf16 %v4809_v57, %v4808_v13 }
 0xdbf   :  { %v4811_v24 = vadd.f32 %v16490_v30, %v4806_v36  ;;  %v16497_v53 = vpop.f32.mrb[99].mxu0 }
 0xdc0   :  { %v4810_v4 = vadd.f32 %v4806_v36, %v16497_v53  ;;  %13296 = vrot.lane.b32.xlu0 %v16494_v44, %s14418_s26 }
 0xdc2   :  { %v16502_v21 = vpop.f32.mrb[100].mxu0  ;;  %v16504_v40 = vpack.i.bf16 %v4811_v24, %v4810_v4 }
 0xdc3   :  { %v4813_v52 = vadd.f32 %v16502_v21, %v4806_v36  ;;  %v16507_v1 = vpop.f32.mrb[101].mxu0 }
 0xdc4   :  { %v4812_v37 = vadd.f32 %v4806_v36, %v16507_v1  ;;  %13301 = vrot.lane.b32.xlu1 %v16504_v40, %s14418_s26 }
 0xdc6   :  { %v16512_v26 = vpack.i.bf16 %v4813_v52, %v4812_v37 }
 0xdc8   :  { %13306 = vrot.lane.b32.xlu0 %v16512_v26, %s14418_s26 }
 0xdee   :  { %v16516_v29 = vpop.f32.mrb[102].mxu0 }
 0xdef   :  { %v4815_v20 = vadd.f32 %v16516_v29, %v4806_v36  ;;  %v16519_v12 = vpop.f32.mrb[103].mxu0 }
 0xdf0   :  { %v4814_v32 = vadd.f32 %v4806_v36, %v16519_v12 }
 0xdf2   :  { %v16522_v47 = vpack.i.bf16 %v4815_v20, %v4814_v32 }
 0xdf3   :  { %v16524_v16 = vpop.f32.mrb[104].mxu0 }
 0xdf4   :  { %v4817_v38 = vadd.f32 %v16524_v16, %v4806_v36  ;;  %13311 = vrot.lane.b32.xlu1 %v16522_v47, %s14418_s26  ;;  %v16529_v56 = vpop.f32.mrb[105].mxu0 }
 0xdf5   :  { %v4816_v2 = vadd.f32 %v4806_v36, %v16529_v56 }
 0xdf7   :  { %v16532_v8 = vpop.f32.mrb[106].mxu0  ;;  %v16534_v15 = vpack.i.bf16 %v4817_v38, %v4816_v2 }
 0xdf8   :  { %v4819_v41 = vadd.f32 %v16532_v8, %v4806_v36  ;;  %v16537_v3 = vpop.f32.mrb[107].mxu0 }
 0xdf9   :  { %v4818_v35 = vadd.f32 %v4806_v36, %v16537_v3  ;;  %13316 = vrot.lane.b32.xlu0 %v16534_v15, %s14418_s26 }
 0xdfb   :  { %v16542_v6 = vpop.f32.mrb[108].mxu0  ;;  %v16544_v22 = vpack.i.bf16 %v4819_v41, %v4818_v35 }
 0xdfc   :  { %v4821_v14 = vadd.f32 %v16542_v6, %v4806_v36  ;;  %v16547_v58 = vpop.f32.mrb[109].mxu0 }
 0xdfd   :  { %v4820_v0 = vadd.f32 %v4806_v36, %v16547_v58  ;;  %13321 = vrot.lane.b32.xlu1 %v16544_v22, %s14418_s26 }
 0xdff   :  { %v16552_v61 = vpack.i.bf16 %v4821_v14, %v4820_v0 }
 0xe01   :  { %13326 = vrot.lane.b32.xlu0 %v16552_v61, %s14418_s26 }
 0xe05   :  { %4829 = vrot.lane.b32.xlu0 %v4827_v42, %s14419_s27 }
 0xe0f   :  { %v16559_v28 = vpop.f32.mrb[110].mxu0 }
 0xe10   :  { %v4823_v49 = vadd.f32 %v16559_v28, %v4806_v36  ;;  %v16562_v57 = vpop.f32.mrb[111].mxu0 }
 0xe11   :  { %v4822_v13 = vadd.f32 %v4806_v36, %v16562_v57 }
 0xe13   :  { %v16565_v24 = vpack.i.bf16 %v4823_v49, %v4822_v13 }
 0xe15   :  { %13331 = vrot.lane.b32.xlu1 %v16565_v24, %s14418_s26 }
 0xe32   :  { %v13297_v4 = vpop.permute.xlu0 %13296 }
 0xe33   :  { %v13299_v52 = vunpack.i.h.bf16 %v13297_v4  ;;  %v13298_v37 = vunpack.i.l.bf16 %v13297_v4 }
 0xe35   :  { %v12499_v20 = vpack.c.bf16 %v13299_v52, %v13298_v37 }
 0xe36   :  { %v13302_v19 = vpop.permute.xlu1 %13301 }
 0xe37   :  { %v13304_v32 = vunpack.i.h.bf16 %v13302_v19  ;;  %v13303_v38 = vunpack.i.l.bf16 %v13302_v19  ;;  %12501 = vmatprep.subr.msk.bf16.mxu1 %vm14829_vm4, %v12499_v20 }
 0xe38   :  { %12504 = vmatpush3.bf16.xpose.msk.msra.mxu1 %vm14829_vm4, %v12499_v20 }
 0xe39   :  { %v12505_v41 = vpack.c.bf16 %v13304_v32, %v13303_v38 }
 0xe3a   :  { %v13307_v36 = vpop.permute.xlu0 %13306 }
 0xe3b   :  { %v13309_v35 = vunpack.i.h.bf16 %v13307_v36  ;;  %v13308_v14 = vunpack.i.l.bf16 %v13307_v36  ;;  %12507 = vmatprep.subr.msk.bf16.mxu1 %vm14829_vm4, %v12505_v41 }
 0xe3d   :  { %v12511_v0 = vpack.c.bf16 %v13309_v35, %v13308_v14 }
 0xe40   :  { %12510 = vmatpush3.bf16.xpose.msk.msra.mxu1 %vm14829_vm4, %v12505_v41 }
 0xe41   :  { %12513 = vmatprep.subr.msk.bf16.mxu1 %vm14829_vm4, %v12511_v0 }
 0xe48   :  { %12516 = vmatpush3.bf16.xpose.msk.msra.mxu1 %vm14829_vm4, %v12511_v0 }
 0xe66   :  { %v13312_v42 = vpop.permute.xlu1 %13311 }
 0xe67   :  { %v13314_v49 = vunpack.i.h.bf16 %v13312_v42  ;;  %v13313_v13 = vunpack.i.l.bf16 %v13312_v42 }
 0xe69   :  { %v12517_v4 = vpack.c.bf16 %v13314_v49, %v13313_v13 }
 0xe6b   :  { %12519 = vmatprep.subr.msk.bf16.mxu1 %vm14829_vm4, %v12517_v4  ;;  %v13317_v52 = vpop.permute.xlu0 %13316 }
 0xe6c   :  { %v13319_v37 = vunpack.i.h.bf16 %v13317_v52  ;;  %v13318_v20 = vunpack.i.l.bf16 %v13317_v52  ;;  %12522 = vmatpush3.bf16.xpose.msk.msra.mxu1 %vm14829_vm4, %v12517_v4 }
 0xe6e   :  { %v12523_v19 = vpack.c.bf16 %v13319_v37, %v13318_v20 }
 0xe6f   :  { %v13322_v32 = vpop.permute.xlu1 %13321 }
 0xe70   :  { %v13324_v38 = vunpack.i.h.bf16 %v13322_v32  ;;  %v13323_v41 = vunpack.i.l.bf16 %v13322_v32  ;;  %12525 = vmatprep.subr.msk.bf16.mxu1 %vm14829_vm4, %v12523_v19 }
 0xe72   :  { %v12529_v36 = vpack.c.bf16 %v13324_v38, %v13323_v41 }
 0xe73   :  { %v13327_v35 = vpop.permute.xlu0 %13326 }
 0xe74   :  { %v13329_v14 = vunpack.i.h.bf16 %v13327_v35  ;;  %v13328_v0 = vunpack.i.l.bf16 %v13327_v35  ;;  %12528 = vmatpush3.bf16.xpose.msk.msra.mxu1 %vm14829_vm4, %v12523_v19 }
 0xe75   :  { %12531 = vmatprep.subr.msk.bf16.mxu1 %vm14829_vm4, %v12529_v36 }
 0xe76   :  { %v12535_v42 = vpack.c.bf16 %v13329_v14, %v13328_v0 }
 0xe77   :  { %v4830_v49 = vpop.permute.xlu0 %4829 }
 0xe78   :  { %v4834_v13 = vadd.f32 %v4830_v49, %v16497_v53  ;;  %v4835_v4 = vadd.f32 %v16490_v30, %v4830_v49  ;;  %v4832_v52 = vadd.f32 %v4830_v49, %v16483_v5  ;;  %v4833_v37 = vadd.f32 %v16480_v25, %v4830_v49 }
 0xe79   :  { %v4838_v20 = vadd.f32 %v4830_v49, %v16519_v12  ;;  %v4839_v32 = vadd.f32 %v16516_v29, %v4830_v49  ;;  %v4836_v38 = vadd.f32 %v4830_v49, %v16507_v1  ;;  %v4837_v19 = vadd.f32 %v16502_v21, %v4830_v49 }
 0xe7a   :  { %v16599_v41 = vpack.i.bf16 %v4835_v4, %v4834_v13  ;;  %v16601_v35 = vpack.i.bf16 %v4833_v37, %v4832_v52  ;;  %v4842_v14 = vadd.f32 %v4830_v49, %v16537_v3  ;;  %v4843_v0 = vadd.f32 %v16532_v8, %v4830_v49 }
 0xe7b   :  { %v16605_v9 = vpack.i.bf16 %v4839_v32, %v4838_v20  ;;  %v16607_v5 = vpack.i.bf16 %v4837_v19, %v4836_v38  ;;  %v4840_v62 = vadd.f32 %v4830_v49, %v16529_v56  ;;  %v4841_v33 = vadd.f32 %v16524_v16, %v4830_v49 }
 0xe7c   :  { %18738 = vst [vmem:[#allocation55_spill] sm:$0xff] %v16599_v41  ;;  %18739 = vst [vmem:[#allocation30_spill] sm:$0xff] %v16601_v35  ;;  %12534 = vmatpush3.bf16.xpose.msk.msra.mxu1 %vm14829_vm4, %v12529_v36  ;;  %13341 = vrot.lane.b32.xlu0 %v16599_v41, %s14419_s27  ;;  %v16615_v13 = vpack.i.bf16 %v4843_v0, %v4842_v14  ;;  %v4844_v4 = vadd.f32 %v4830_v49, %v16547_v58 }
 0xe7d   :  { %18740 = vst [vmem:[#allocation29_spill] sm:$0xff] %v16605_v9  ;;  %18741 = vst [vmem:[#allocation33_spill] sm:$0xff] %v16607_v5  ;;  %v4845_v52 = vadd.f32 %v16542_v6, %v4830_v49  ;;  %13336 = vrot.lane.b32.xlu1 %v16601_v35, %s14419_s27  ;;  %12537 = vmatprep.subr.msk.bf16.mxu1 %vm14829_vm4, %v12535_v42  ;;  %v16623_v37 = vpack.i.bf16 %v4841_v33, %v4840_v62 }
 0xe7e   :  { %18742 = vst [vmem:[#allocation34_spill] sm:$0xff] %v16615_v13  ;;  %v4846_v20 = vadd.f32 %v4830_v49, %v16562_v57  ;;  %v4847_v36 = vadd.f32 %v16559_v28, %v4830_v49  ;;  %v16655_v14 = vadd.f32 %v16478_v46, %v16497_v53  ;;  %v16663_v0 = vadd.f32 %v16490_v30, %v16478_v46 }
 0xe7f   :  { %18743 = vst [vmem:[#allocation36_spill] sm:$0xff] %v16623_v37  ;;  %v16627_v32 = vpack.i.bf16 %v4845_v52, %v4844_v4  ;;  %v16667_v4 = vadd.f32 %v16478_v46, %v16507_v1  ;;  %v16679_v53 = vadd.f32 %v16478_v46, %v16519_v12  ;;  %v16687_v30 = vadd.f32 %v16516_v29, %v16478_v46 }
 0xe80   :  { %v16629_v38 = vpack.i.bf16 %v4847_v36, %v4846_v20  ;;  %13351 = vrot.lane.b32.xlu0 %v16605_v9, %s14419_s27  ;;  %v16691_v1 = vadd.f32 %v16478_v46, %v16529_v56  ;;  %v16703_v12 = vadd.f32 %v16478_v46, %v16537_v3  ;;  %v16711_v29 = vadd.f32 %v16532_v8, %v16478_v46 }
 0xe81   :  { %18744 = vst [vmem:[#allocation35_spill] sm:$0xff] %v16627_v32  ;;  %13346 = vrot.lane.b32.xlu1 %v16607_v5, %s14419_s27  ;;  %v16715_v56 = vadd.f32 %v16478_v46, %v16547_v58  ;;  %v16727_v3 = vadd.f32 %v16478_v46, %v16562_v57  ;;  %v16735_v8 = vadd.f32 %v16559_v28, %v16478_v46 }
 0xe82   :  { %18745 = vst [vmem:[#allocation38_spill] sm:$0xff] %v16629_v38 }
 0xe84   :  { %13361 = vrot.lane.b32.xlu0 %v16615_v13, %s14419_s27  ;;  %12540 = vmatpush3.bf16.xpose.msk.msra.mxu1 %vm14829_vm4, %v12535_v42  ;;  %v16651_v42 = vadd.f32 %v16480_v25, %v16478_v46  ;;  %v16675_v25 = vadd.f32 %v16502_v21, %v16478_v46  ;;  %v16699_v21 = vadd.f32 %v16524_v16, %v16478_v46  ;;  %v16864_v13 = vld [vmem:[%s18488_s1 + $0x68] sm:$0xff] }
 0xe85   :  { %13356 = vrot.lane.b32.xlu1 %v16623_v37, %s14419_s27  ;;  %v16723_v16 = vadd.f32 %v16542_v6, %v16478_v46  ;;  %18757 = vst [vmem:[#allocation13_spill] sm:$0xff] %v16864_v13 }
 0xe87   :  { %v13332_v62 = vpop.permute.xlu1 %13331 }
 0xe88   :  { %v13334_v33 = vunpack.i.h.bf16 %v13332_v62  ;;  %v13333_v49 = vunpack.i.l.bf16 %v13332_v62 }
 0xe89   :  { %13366 = vrot.lane.b32.xlu1 %v16627_v32, %s14419_s27  ;;  %v16873_v32 = vld [vmem:[%s18488_s1 + $0x60] sm:$0xff] }
 0xe8a   :  { %v12541_v19 = vpack.c.bf16 %v13334_v33, %v13333_v49  ;;  %18758 = vst [vmem:[#allocation14_spill] sm:$0xff] %v16873_v32 }
 0xe8c   :  { %12543 = vmatprep.subr.msk.bf16.mxu1 %vm14829_vm4, %v12541_v19 }
 0xe8d   :  { %13371 = vrot.lane.b32.xlu1 %v16629_v38, %s14419_s27  ;;  %12546 = vmatpush3.bf16.xpose.msk.msra.mxu1 %vm14829_vm4, %v12541_v19  ;;  %v16855_v38 = vld [vmem:[%s18488_s1 + $0x50] sm:$0xff] }
 0xe8e   :  { %18756 = vst [vmem:[#allocation12_spill] sm:$0xff] %v16855_v38 }
 0xe94   :  { %11542 = vmatmul.mubr.msk.f32.vlgmr.msra.gmra.mrb[112].mxu1 %vm677_vm3, %v16651_v42 }
 0xe95   :  { %11544 = vmatprep.mubr.msk.f32.mxu1 %vm677_vm3, %v16655_v14 }
 0xe98   :  { %11545 = vmatmul.mubr.msk.f32.gmra.mrb[114].mxu1 %vm677_vm3, %v16663_v0 }
 0xe99   :  { %11547 = vmatprep.mubr.msk.f32.mxu1 %vm677_vm3, %v16667_v4 }
 0xe9c   :  { %11548 = vmatmul.mubr.msk.f32.gmra.mrb[116].mxu1 %vm677_vm3, %v16675_v25 }
 0xe9d   :  { %11550 = vmatprep.mubr.msk.f32.mxu1 %vm677_vm3, %v16679_v53 }
 0xea0   :  { %11551 = vmatmul.mubr.msk.f32.gmra.mrb[118].mxu1 %vm677_vm3, %v16687_v30 }
 0xea1   :  { %11553 = vmatprep.mubr.msk.f32.mxu1 %vm677_vm3, %v16691_v1 }
 0xea4   :  { %11554 = vmatmul.mubr.msk.f32.gmra.mrb[120].mxu1 %vm677_vm3, %v16699_v21 }
 0xea5   :  { %11556 = vmatprep.mubr.msk.f32.mxu1 %vm677_vm3, %v16703_v12 }
 0xea8   :  { %11557 = vmatmul.mubr.msk.f32.gmra.mrb[122].mxu1 %vm677_vm3, %v16711_v29 }
 0xea9   :  { %11559 = vmatprep.mubr.msk.f32.mxu1 %vm677_vm3, %v16715_v56 }
 0xeac   :  { %11560 = vmatmul.mubr.msk.f32.gmra.mrb[124].mxu1 %vm677_vm3, %v16723_v16 }
 0xead   :  { %11562 = vmatprep.mubr.msk.f32.mxu1 %vm677_vm3, %v16727_v3 }
 0xeb0   :  { %11563 = vmatmul.mubr.msk.f32.gmra.mrb[126].mxu1 %vm677_vm3, %v16735_v8 }
 0xeee   :  { %v13342_v58 = vpop.permute.xlu0 %13341 }
 0xeef   :  { %v13337_v6 = vpop.permute.xlu1 %13336  ;;  %v13344_v52 = vunpack.i.h.bf16 %v13342_v58  ;;  %v13343_v20 = vunpack.i.l.bf16 %v13342_v58 }
 0xef0   :  { %v13339_v36 = vunpack.i.h.bf16 %v13337_v6  ;;  %v13338_v57 = vunpack.i.l.bf16 %v13337_v6 }
 0xef1   :  { %v12551_v59 = vpack.c.bf16 %v13344_v52, %v13343_v20 }
 0xef2   :  { %v12547_v62 = vpack.c.bf16 %v13339_v36, %v13338_v57  ;;  %v13352_v34 = vpop.permute.xlu0 %13351 }
 0xef3   :  { %v13347_v33 = vpop.permute.xlu1 %13346  ;;  %v13354_v46 = vunpack.i.h.bf16 %v13352_v34  ;;  %v13353_v28 = vunpack.i.l.bf16 %v13352_v34 }
 0xef4   :  { %v13349_v49 = vunpack.i.h.bf16 %v13347_v33  ;;  %v13348_v19 = vunpack.i.l.bf16 %v13347_v33  ;;  %12548 = vmatprep.subr.bf16.mxu0 %v12547_v62 }
 0xef5   :  { %12550 = vmatpush3.bf16.msra.mxu0 %v12547_v62  ;;  %v12559_v58 = vpack.c.bf16 %v13354_v46, %v13353_v28  ;;  %v16742_v46 = vld [vmem:[%s18488_s1 + $0x8] sm:$0xff] }
 0xef6   :  { %12552 = vmatprep.subr.bf16.mxu0 %v12551_v59  ;;  %v12555_v31 = vpack.c.bf16 %v13349_v49, %v13348_v19  ;;  %v13362_v10 = vpop.permute.xlu0 %13361 }
 0xef7   :  { %v13357_v50 = vpop.permute.xlu1 %13356  ;;  %v13364_v36 = vunpack.i.h.bf16 %v13362_v10  ;;  %v13363_v57 = vunpack.i.l.bf16 %v13362_v10 }
 0xef8   :  { %v13359_v51 = vunpack.i.h.bf16 %v13357_v50  ;;  %v13358_v23 = vunpack.i.l.bf16 %v13357_v50 }
 0xef9   :  { %12554 = vmatpush3.bf16.msra.mxu0 %v12551_v59  ;;  %v12567_v62 = vpack.c.bf16 %v13364_v36, %v13363_v57 }
 0xefa   :  { %12556 = vmatprep.subr.bf16.mxu0 %v12555_v31  ;;  %v12563_v33 = vpack.c.bf16 %v13359_v51, %v13358_v23 }
 0xefb   :  { %v13367_v6 = vpop.permute.xlu1 %13366 }
 0xefc   :  { %v13369_v52 = vunpack.i.h.bf16 %v13367_v6  ;;  %v13368_v20 = vunpack.i.l.bf16 %v13367_v6 }
 0xefd   :  { %12558 = vmatpush3.bf16.msra.mxu0 %v12555_v31 }
 0xefe   :  { %12560 = vmatprep.subr.bf16.mxu0 %v12559_v58  ;;  %v12571_v19 = vpack.c.bf16 %v13369_v52, %v13368_v20  ;;  %v16760_v52 = vld [vmem:[%s18488_s1 + $0x18] sm:$0xff] }
 0xeff   :  { %v13372_v34 = vpop.permute.xlu1 %13371  ;;  %18747 = vst [vmem:[#allocation40_spill] sm:$0xff] %v16760_v52 }
 0xf00   :  { %v13374_v59 = vunpack.i.h.bf16 %v13372_v34  ;;  %v13373_v49 = vunpack.i.l.bf16 %v13372_v34 }
 0xf01   :  { %12562 = vmatpush3.bf16.msra.mxu0 %v12559_v58  ;;  %v16750_v58 = vld [vmem:[%s18488_s1] sm:$0xff] }
 0xf02   :  { %12564 = vmatprep.subr.bf16.mxu0 %v12563_v33  ;;  %v12575_v50 = vpack.c.bf16 %v13374_v59, %v13373_v49  ;;  %18746 = vst [vmem:[#allocation37_spill] sm:$0xff] %v16750_v58  ;;  %v16769_v49 = vld [vmem:[%s18488_s1 + $0x10] sm:$0xff] }
 0xf03   :  { %18748 = vst [vmem:[#allocation39_spill] sm:$0xff] %v16769_v49 }
 0xf05   :  { %12566 = vmatpush3.bf16.msra.mxu0 %v12563_v33 }
 0xf06   :  { %12568 = vmatprep.subr.bf16.mxu0 %v12567_v62 }
 0xf09   :  { %12570 = vmatpush3.bf16.msra.mxu0 %v12567_v62 }
 0xf0a   :  { %12572 = vmatprep.subr.bf16.mxu0 %v12571_v19 }
 0xf0d   :  { %12574 = vmatpush3.bf16.msra.mxu0 %v12571_v19 }
 0xf0e   :  { %12576 = vmatprep.subr.bf16.mxu0 %v12575_v50 }
 0xf11   :  { %12578 = vmatpush3.bf16.msra.mxu0 %v12575_v50 }
 0xf67   :  { %v11543_v31 = vpop.f32.mrb[112].mxu1 }
 0xf68   :  { %v5122_v10 = vmul.f32 0.35355338, %v11543_v31  ;;  %v5042_v23 = vpop.f32.mrb[113].mxu1 }
 0xf69   :  { %v5121_v51 = vmul.f32 0.35355338, %v5042_v23 }
 0xf6a   :  { %v16745_v28 = vadd.f32 %v16742_v46, %v5122_v10 }
 0xf6b   :  { %v16753_v6 = vadd.f32 %v16750_v58, %v5121_v51  ;;  %v11546_v36 = vpop.f32.mrb[114].mxu1  ;;  %v16778_v51 = vld [vmem:[%s18488_s1 + $0x28] sm:$0xff] }
 0xf6c   :  { %v5124_v57 = vmul.f32 0.35355338, %v11546_v36  ;;  %5155 = vmax.xlane.f32.xlu1 %v16745_v28  ;;  %v5052_v33 = vpop.f32.mrb[115].mxu1  ;;  %18749 = vst [vmem:[#allocation42_spill] sm:$0xff] %v16778_v51 }
 0xf6d   :  { %5153 = vmax.xlane.f32.xlu0 %v16753_v6  ;;  %v5123_v62 = vmul.f32 0.35355338, %v5052_v33  ;;  %v16786_v33 = vld [vmem:[%s18488_s1 + $0x30] sm:$0xff] }
 0xf6e   :  { %v16763_v20 = vadd.f32 %v16760_v52, %v5124_v57  ;;  %18750 = vst [vmem:[#allocation41_spill] sm:$0xff] %v16786_v33 }
 0xf6f   :  { %v11549_v34 = vpop.f32.mrb[116].mxu1  ;;  %v16772_v19 = vadd.f32 %v16769_v49, %v5123_v62 }
 0xf70   :  { %5159 = vmax.xlane.f32.xlu1 %v16763_v20  ;;  %v5062_v59 = vpop.f32.mrb[117].mxu1  ;;  %v5126_v50 = vmul.f32 0.35355338, %v11549_v34 }
 0xf71   :  { %v5125_v57 = vmul.f32 0.35355338, %v5062_v59 }
 0xf72   :  { %v16781_v36 = vadd.f32 %v16778_v51, %v5126_v50  ;;  %v16796_v50 = vld [vmem:[%s18488_s1 + $0x20] sm:$0xff] }
 0xf73   :  { %v11552_v31 = vpop.f32.mrb[118].mxu1  ;;  %18751 = vst [vmem:[#allocation44_spill] sm:$0xff] %v16796_v50  ;;  %v16799_v59 = vadd.f32 %v16796_v50, %v5125_v57 }
 0xf74   :  { %5157 = vmax.xlane.f32.xlu1 %v16772_v19  ;;  %v5072_v10 = vpop.f32.mrb[119].mxu1  ;;  %v5128_v11 = vmul.f32 0.35355338, %v11552_v31  ;;  %v14334_v31 = vld [vmem:[%s18488_s1 + $0x78] sm:$0xff] }
 0xf75   :  { %v5127_v23 = vmul.f32 0.35355338, %v5072_v10 }
 0xf76   :  { %v16808_v18 = vadd.f32 %v16805_v48, %v5128_v11 }
 0xf77   :  { %v16789_v62 = vadd.f32 %v16786_v33, %v5127_v23  ;;  %v11555_v34 = vpop.f32.mrb[120].mxu1 }
 0xf78   :  { %5163 = vmax.xlane.f32.xlu1 %v16781_v36  ;;  %v5082_v10 = vpop.f32.mrb[121].mxu1  ;;  %v5130_v17 = vmul.f32 0.35355338, %v11555_v34 }
 0xf79   :  { %5165 = vmax.xlane.f32.xlu0 %v16789_v62  ;;  %v5129_v27 = vmul.f32 0.35355338, %v5082_v10 }
 0xf7a   :  { %v16831_v43 = vadd.f32 %v16828_v60, %v5130_v17 }
 0xf7b   :  { %v11558_v63 = vpop.f32.mrb[122].mxu1 }
 0xf7c   :  { %5161 = vmax.xlane.f32.xlu1 %v16799_v59  ;;  %v5092_v23 = vpop.f32.mrb[123].mxu1  ;;  %v5132_v34 = vmul.f32 0.35355338, %v11558_v63 }
 0xf7d   :  { %v5131_v10 = vmul.f32 0.35355338, %v5092_v23 }
 0xf7f   :  { %v11561_v54 = vpop.f32.mrb[124].mxu1 }
 0xf80   :  { %5167 = vmax.xlane.f32.xlu1 %v16808_v18  ;;  %v5102_v39 = vpop.f32.mrb[125].mxu1  ;;  %v5134_v63 = vmul.f32 0.35355338, %v11561_v54 }
 0xf82   :  { %v16867_v23 = vadd.f32 %v16864_v13, %v5134_v63 }
 0xf83   :  { %v11564_v7 = vpop.f32.mrb[126].mxu1 }
 0xf84   :  { %v5112_v57 = vpop.f32.mrb[127].mxu1  ;;  %v5136_v11 = vmul.f32 0.35355338, %v11564_v7  ;;  %v16837_v7 = vld [vmem:[%s18488_s1 + $0x40] sm:$0xff] }
 0xf85   :  { %18754 = vst [vmem:[#allocation45_spill] sm:$0xff] %v16837_v7 }
 0xf86   :  { %v16822_v45 = vadd.f32 %v14334_v31, %v5136_v11  ;;  %v16840_v11 = vadd.f32 %v16837_v7, %v5129_v27  ;;  %v16846_v31 = vld [vmem:[%s18488_s1 + $0x58] sm:$0xff]  ;;  %v16858_v27 = vadd.f32 %v16855_v38, %v5131_v10  ;;  %v5135_v10 = vmul.f32 0.35355338, %v5112_v57  ;;  %v16882_v38 = vld [vmem:[%s18488_s1 + $0x70] sm:$0xff] }
 0xf87   :  { %18755 = vst [vmem:[#allocation11_spill] sm:$0xff] %v16846_v31  ;;  %v16849_v17 = vadd.f32 %v16846_v31, %v5132_v34  ;;  %v5133_v34 = vmul.f32 0.35355338, %v5102_v39  ;;  %18759 = vst [vmem:[#allocation15_spill] sm:$0xff] %v16882_v38 }
 0xf88   :  { %v16885_v39 = vadd.f32 %v16882_v38, %v5135_v10 }
 0xf89   :  { %v16876_v54 = vadd.f32 %v16873_v32, %v5133_v34 }
 0xf8f   :  { %13376 = vrot.lane.b32.xlu0 %v16494_v44, %s14420_s28 }
 0xf91   :  { %13381 = vrot.lane.b32.xlu1 %v16504_v40, %s14420_s28 }
 0xf95   :  { %13386 = vrot.lane.b32.xlu1 %v16512_v26, %s14420_s28 }
 0xf99   :  { %13391 = vrot.lane.b32.xlu1 %v16522_v47, %s14420_s28 }
 0xfae   :  { %5183 = vmax.xlane.f32.xlu0 %v16822_v45 }
 0xfbd   :  { %5171 = vmax.xlane.f32.xlu1 %v16831_v43 }
 0xfc1   :  { %5169 = vmax.xlane.f32.xlu1 %v16840_v11 }
 0xfc5   :  { %5175 = vmax.xlane.f32.xlu1 %v16849_v17 }
 0xfc9   :  { %5173 = vmax.xlane.f32.xlu1 %v16858_v27 }
 0xfcd   :  { %5179 = vmax.xlane.f32.xlu1 %v16867_v23 }
 0xfd1   :  { %5177 = vmax.xlane.f32.xlu1 %v16876_v54 }
 0xfd5   :  { %5181 = vmax.xlane.f32.xlu1 %v16885_v39 }
 0xfe6   :  { %13401 = vrot.lane.b32.xlu1 %v16544_v22, %s14420_s28 }
 0xfea   :  { %13406 = vrot.lane.b32.xlu1 %v16552_v61, %s14420_s28 }
 0xff9   :  { %v5156_v63 = vpop.xlane.xlu1 %5155 }
 0xffa   :  { %v5186_v57 = vsub.f32 %v16745_v28, %v5156_v63  ;;  %v5154_v34 = vpop.xlane.xlu0 %5153 }
 0xffb   :  { %v5185_v32 = vsub.f32 %v16753_v6, %v5154_v34 }
 0xffc   :  { %v5203_v13 = vmul.f32 1.442695, %v5186_v57 }
 0xffd   :  { %v5160_v31 = vpop.xlane.xlu1 %5159  ;;  %v5201_v7 = vmul.f32 1.442695, %v5185_v32 }
 0xffe   :  { %13945 = vpow2.f32 %v5203_v13  ;;  %v5188_v10 = vsub.f32 %v16763_v20, %v5160_v31 }
 0xfff   :  { %13947 = vpow2.f32 %v5201_v7 }
0x1000   :  { %v5207_v38 = vmul.f32 1.442695, %v5188_v10 }
0x1001   :  { %v5158_v32 = vpop.xlane.xlu1 %5157 }
0x1002   :  { %13949 = vpow2.f32 %v5207_v38  ;;  %v5187_v38 = vsub.f32 %v16772_v19, %v5158_v32 }
0x1006   :  { %v5166_v60 = vpop.xlane.xlu0 %5165 }
0x1007   :  { %v5191_v49 = vsub.f32 %v16789_v62, %v5166_v60 }
0x1008   :  { %v16895_v33 = vpop.eup %13945 }
0x1009   :  { %5235 = vadd.xlane.f32.xlu0 %v16895_v33  ;;  %v16898_v63 = vpop.eup %13947 }
0x100a   :  { %v13377_v48 = vpop.permute.xlu0 %13376 }
0x100b   :  { %v13379_v50 = vunpack.i.h.bf16 %v13377_v48  ;;  %v13378_v28 = vunpack.i.l.bf16 %v13377_v48  ;;  %v5164_v48 = vpop.xlane.xlu1 %5163 }
0x100c   :  { %v16906_v13 = vpop.eup %13949  ;;  %v5190_v7 = vsub.f32 %v16781_v36, %v5164_v48  ;;  %v5213_v36 = vmul.f32 1.442695, %v5191_v49 }
0x100d   :  { %v16900_v6 = vpack.c.bf16 %v13379_v50, %v13378_v28  ;;  %v5205_v50 = vmul.f32 1.442695, %v5187_v38 }
0x100e   :  { %5233 = vadd.xlane.f32.xlu1 %v16898_v63  ;;  %v5211_v31 = vmul.f32 1.442695, %v5190_v7 }
0x100f   :  { %12581 = vmatprep.subr.msk.bf16.mxu0 %vm14829_vm4, %v16900_v6  ;;  %v5162_v20 = vpop.xlane.xlu1 %5161  ;;  %13951 = vpow2.f32 %v5205_v50 }
0x1010   :  { %v5189_v57 = vsub.f32 %v16799_v59, %v5162_v20  ;;  %13953 = vpow2.f32 %v5211_v31 }
0x1012   :  { %5239 = vadd.xlane.f32.xlu1 %v16906_v13  ;;  %v5209_v10 = vmul.f32 1.442695, %v5189_v57 }
0x1013   :  { %v5168_v34 = vpop.xlane.xlu1 %5167 }
0x1014   :  { %v5192_v28 = vsub.f32 %v16808_v18, %v5168_v34  ;;  %13955 = vpow2.f32 %v5209_v10 }
0x1016   :  { %v5215_v52 = vmul.f32 1.442695, %v5192_v28 }
0x1017   :  { %v16917_v51 = vpop.permute.xlu1 %13381 }
0x1018   :  { %13957 = vpow2.f32 %v5215_v52 }
0x1019   :  { %v16920_v19 = vpop.eup %13951  ;;  %13959 = vpow2.f32 %v5213_v36 }
0x101a   :  { %v16925_v59 = vpop.eup %13953 }
0x101b   :  { %v16923_v32 = vpop.permute.xlu1 %13386 }
0x101e   :  { %v16928_v18 = vpop.eup %13955 }
0x101f   :  { %13396 = vrot.lane.b32.xlu0 %v16534_v15, %s14420_s28  ;;  %v16930_v48 = vpop.permute.xlu1 %13391 }
0x1022   :  { %v16933_v60 = vpop.eup %13957 }
0x1023   :  { %13411 = vrot.lane.b32.xlu1 %v16565_v24, %s14420_s28  ;;  %v16937_v49 = vpop.eup %13959 }
0x103b   :  { %v5184_v50 = vpop.xlane.xlu0 %5183 }
0x103c   :  { %v5200_v57 = vsub.f32 %v16822_v45, %v5184_v50 }
0x103e   :  { %5237 = vadd.xlane.f32.xlu0 %v16920_v19  ;;  %v5231_v36 = vmul.f32 1.442695, %v5200_v57 }
0x1042   :  { %5243 = vadd.xlane.f32.xlu0 %v16925_v59 }
0x1046   :  { %5241 = vadd.xlane.f32.xlu0 %v16928_v18 }
0x104a   :  { %v5172_v62 = vpop.xlane.xlu1 %5171  ;;  %5247 = vadd.xlane.f32.xlu0 %v16933_v60 }
0x104b   :  { %v5194_v52 = vsub.f32 %v16831_v43, %v5172_v62 }
0x104d   :  { %v5219_v38 = vmul.f32 1.442695, %v5194_v52 }
0x104e   :  { %v5170_v20 = vpop.xlane.xlu1 %5169  ;;  %5245 = vadd.xlane.f32.xlu0 %v16937_v49 }
0x104f   :  { %13961 = vpow2.f32 %v5219_v38  ;;  %v5193_v7 = vsub.f32 %v16840_v11, %v5170_v20 }
0x1051   :  { %v5217_v31 = vmul.f32 1.442695, %v5193_v7 }
0x1052   :  { %v5176_v34 = vpop.xlane.xlu1 %5175 }
0x1053   :  { %13963 = vpow2.f32 %v5217_v31  ;;  %v5196_v10 = vsub.f32 %v16849_v17, %v5176_v34 }
0x1055   :  { %v5223_v28 = vmul.f32 1.442695, %v5196_v10 }
0x1056   :  { %v5174_v43 = vpop.xlane.xlu1 %5173 }
0x1057   :  { %13965 = vpow2.f32 %v5223_v28  ;;  %v5195_v62 = vsub.f32 %v16858_v27, %v5174_v43 }
0x1058   :  { %13967 = vpow2.f32 %v5231_v36 }
0x1059   :  { %v16944_v52 = vpop.eup %13961  ;;  %v5221_v58 = vmul.f32 1.442695, %v5195_v62 }
0x105a   :  { %v5180_v38 = vpop.xlane.xlu1 %5179  ;;  %5251 = vadd.xlane.f32.xlu0 %v16944_v52 }
0x105b   :  { %13969 = vpow2.f32 %v5221_v58  ;;  %v5198_v45 = vsub.f32 %v16867_v23, %v5180_v38 }
0x105d   :  { %v16948_v11 = vpop.eup %13963  ;;  %v5227_v20 = vmul.f32 1.442695, %v5198_v45 }
0x105e   :  { %v5178_v17 = vpop.xlane.xlu1 %5177  ;;  %5249 = vadd.xlane.f32.xlu0 %v16948_v11 }
0x105f   :  { %13971 = vpow2.f32 %v5227_v20  ;;  %v5197_v50 = vsub.f32 %v16876_v54, %v5178_v17  ;;  %v13384_v20 = vunpack.i.h.bf16 %v16917_v51  ;;  %v13383_v17 = vunpack.i.l.bf16 %v16917_v51 }
0x1060   :  { %v13389_v51 = vunpack.i.h.bf16 %v16923_v32 }
0x1061   :  { %v16952_v27 = vpop.eup %13965  ;;  %v5225_v7 = vmul.f32 1.442695, %v5197_v50 }
0x1062   :  { %5255 = vadd.xlane.f32.xlu1 %v16952_v27  ;;  %v5182_v31 = vpop.xlane.xlu1 %5181  ;;  %v16956_v57 = vpop.eup %13967 }
0x1063   :  { %13973 = vpow2.f32 %v5225_v7  ;;  %v5199_v58 = vsub.f32 %v16885_v39, %v5182_v31  ;;  %v12585_v31 = vpack.c.bf16 %v13384_v20, %v13383_v17 }
0x1065   :  { %v16958_v23 = vpop.eup %13969  ;;  %v5229_v34 = vmul.f32 1.442695, %v5199_v58 }
0x1066   :  { %5253 = vadd.xlane.f32.xlu0 %v16958_v23  ;;  %5263 = vadd.xlane.f32.xlu1 %v16956_v57  ;;  %v16991_v39 = vpop.permute.xlu1 %13401 }
0x1067   :  { %13975 = vpow2.f32 %v5229_v34 }
0x1069   :  { %v16962_v54 = vpop.eup %13971 }
0x106a   :  { %5259 = vadd.xlane.f32.xlu0 %v16962_v54  ;;  %v16997_v36 = vpop.permute.xlu1 %13406 }
0x106d   :  { %v16965_v10 = vpop.eup %13973 }
0x106e   :  { %5257 = vadd.xlane.f32.xlu0 %v16965_v10 }
0x1071   :  { %v16968_v28 = vpop.eup %13975 }
0x1072   :  { %5261 = vadd.xlane.f32.xlu0 %v16968_v28 }
0x1077   :  { %5508 = vrot.lane.b32.xlu1 %v16651_v42, %s14421_s16 }
0x107b   :  { %5510 = vrot.lane.b32.xlu1 %v16655_v14, %s14421_s16 }
0x107f   :  { %5512 = vrot.lane.b32.xlu1 %v16663_v0, %s14421_s16 }
0x1083   :  { %5514 = vrot.lane.b32.xlu1 %v16667_v4, %s14421_s16 }
0x1087   :  { %5516 = vrot.lane.b32.xlu1 %v16675_v25, %s14421_s16 }
0x1088   :  { %5506 = vrot.lane.b32.xlu0 %v16487_v55, %s14421_s16 }
0x108b   :  { %5520 = vrot.lane.b32.xlu1 %v16687_v30, %s14421_s16 }
0x108c   :  { %5518 = vrot.lane.b32.xlu0 %v16679_v53, %s14421_s16 }
0x108f   :  { %5524 = vrot.lane.b32.xlu1 %v16699_v21, %s14421_s16 }
0x1090   :  { %5522 = vrot.lane.b32.xlu0 %v16691_v1, %s14421_s16 }
0x1093   :  { %5528 = vrot.lane.b32.xlu1 %v16711_v29, %s14421_s16 }
0x1094   :  { %5526 = vrot.lane.b32.xlu0 %v16703_v12, %s14421_s16 }
0x1096   :  { %v5236_v43 = vpop.xlane.xlu0 %5235 }
0x1097   :  { %5532 = vrot.lane.b32.xlu1 %v16723_v16, %s14421_s16  ;;  %13977 = vrcp.f32 %v5236_v43 }
0x1098   :  { %5530 = vrot.lane.b32.xlu0 %v16715_v56, %s14421_s16 }
0x109a   :  { %v13397_v34 = vpop.permute.xlu0 %13396 }
0x109b   :  { %5536 = vrot.lane.b32.xlu1 %v16735_v8, %s14421_s16  ;;  %v5234_v62 = vpop.xlane.xlu1 %5233  ;;  %v13398_v43 = vunpack.i.l.bf16 %v13397_v34 }
0x109c   :  { %13979 = vrcp.f32 %v5234_v62  ;;  %5534 = vrot.lane.b32.xlu0 %v16727_v3, %s14421_s16 }
0x109f   :  { %13421 = vrot.lane.b32.xlu1 %v16504_v40, %s14422_s17  ;;  %v5240_v20 = vpop.xlane.xlu1 %5239 }
0x10a0   :  { %13416 = vrot.lane.b32.xlu0 %v16494_v44, %s14422_s17  ;;  %13981 = vrcp.f32 %v5240_v20 }
0x10a1   :  { %v13978_v38 = vpop.eup %13977 }
0x10a2   :  { %v5282_v7 = vmul.f32 %v13978_v38, %v16895_v33  ;;  %v13388_v33 = vunpack.i.l.bf16 %v16923_v32  ;;  %v13393_v32 = vunpack.i.l.bf16 %v16930_v48  ;;  %v13404_v38 = vunpack.i.h.bf16 %v16991_v39 }
0x10a3   :  { %13431 = vrot.lane.b32.xlu1 %v16522_v47, %s14422_s17 }
0x10a4   :  { %13426 = vrot.lane.b32.xlu0 %v16512_v26, %s14422_s17 }
0x10a6   :  { %v13980_v45 = vpop.eup %13979 }
0x10a7   :  { %13441 = vrot.lane.b32.xlu1 %v16544_v22, %s14422_s17  ;;  %v5281_v50 = vmul.f32 %v13980_v45, %v16898_v63  ;;  %v12591_v63 = vpack.c.bf16 %v13389_v51, %v13388_v33  ;;  %v13403_v45 = vunpack.i.l.bf16 %v16991_v39  ;;  %v13409_v39 = vunpack.i.h.bf16 %v16997_v36  ;;  %v13412_v33 = vpop.permute.xlu1 %13411 }
0x10a8   :  { %13436 = vrot.lane.b32.xlu0 %v16534_v15, %s14422_s17 }
0x10a9   :  { %11597 = vmatprep.mubr.f32.mxu0 %v5281_v50  ;;  %v12609_v17 = vpack.c.bf16 %v13404_v38, %v13403_v45 }
0x10aa   :  { %11598 = vmatmul.mubr.f32.vlgmr.msra.gmra.mrb[112].mxu0 %v5282_v7  ;;  %v13408_v7 = vunpack.i.l.bf16 %v16997_v36  ;;  %v13982_v36 = vpop.eup %13981 }
0x10ab   :  { %12584 = vmatpush3.bf16.xpose.msk.msra.mxu0 %vm14829_vm4, %v16900_v6  ;;  %13451 = vrot.lane.b32.xlu1 %v16565_v24, %s14422_s17  ;;  %v13394_v6 = vunpack.i.h.bf16 %v16930_v48  ;;  %v13399_v48 = vunpack.i.h.bf16 %v13397_v34 }
0x10ac   :  { %12587 = vmatprep.subr.msk.bf16.mxu0 %vm14829_vm4, %v12585_v31  ;;  %13446 = vrot.lane.b32.xlu0 %v16552_v61, %s14422_s17  ;;  %v12615_v51 = vpack.c.bf16 %v13409_v39, %v13408_v7 }
0x10ad   :  { %v12597_v58 = vpack.c.bf16 %v13394_v6, %v13393_v32  ;;  %v12603_v62 = vpack.c.bf16 %v13399_v48, %v13398_v43  ;;  %v13414_v32 = vunpack.i.h.bf16 %v13412_v33  ;;  %v5284_v43 = vmul.f32 %v13982_v36, %v16906_v13 }
0x10af   :  { %6544 = vrot.lane.b32.xlu1 %v16651_v42, %s14423_s18 }
0x10b0   :  { %6542 = vrot.lane.b32.xlu0 %v16487_v55, %s14423_s18 }
0x10b3   :  { %12590 = vmatpush3.bf16.xpose.msk.msra.mxu0 %vm14829_vm4, %v12585_v31  ;;  %6548 = vrot.lane.b32.xlu1 %v16663_v0, %s14423_s18 }
0x10b4   :  { %12593 = vmatprep.subr.msk.bf16.mxu0 %vm14829_vm4, %v12591_v63  ;;  %6546 = vrot.lane.b32.xlu0 %v16655_v14, %s14423_s18 }
0x10b7   :  { %6552 = vrot.lane.b32.xlu1 %v16675_v25, %s14423_s18 }
0x10b8   :  { %6550 = vrot.lane.b32.xlu0 %v16667_v4, %s14423_s18 }
0x10bb   :  { %12596 = vmatpush3.bf16.xpose.msk.msra.mxu0 %vm14829_vm4, %v12591_v63  ;;  %6556 = vrot.lane.b32.xlu1 %v16687_v30, %s14423_s18 }
0x10bc   :  { %12599 = vmatprep.subr.msk.bf16.mxu0 %vm14829_vm4, %v12597_v58  ;;  %6554 = vrot.lane.b32.xlu0 %v16679_v53, %s14423_s18 }
0x10bf   :  { %6560 = vrot.lane.b32.xlu1 %v16699_v21, %s14423_s18 }
0x10c0   :  { %6558 = vrot.lane.b32.xlu0 %v16691_v1, %s14423_s18 }
0x10c3   :  { %12602 = vmatpush3.bf16.xpose.msk.msra.mxu0 %vm14829_vm4, %v12597_v58  ;;  %6564 = vrot.lane.b32.xlu1 %v16711_v29, %s14423_s18  ;;  %v13413_v58 = vunpack.i.l.bf16 %v13412_v33 }
0x10c4   :  { %12605 = vmatprep.subr.msk.bf16.mxu0 %vm14829_vm4, %v12603_v62  ;;  %6562 = vrot.lane.b32.xlu0 %v16703_v12, %s14423_s18 }
0x10c7   :  { %6568 = vrot.lane.b32.xlu1 %v16723_v16, %s14423_s18 }
0x10c8   :  { %6566 = vrot.lane.b32.xlu0 %v16715_v56, %s14423_s18 }
0x10cb   :  { %12608 = vmatpush3.bf16.xpose.msk.msra.mxu0 %vm14829_vm4, %v12603_v62  ;;  %v5238_v50 = vpop.xlane.xlu0 %5237  ;;  %6572 = vrot.lane.b32.xlu1 %v16735_v8, %s14423_s18  ;;  %v12621_v62 = vpack.c.bf16 %v13414_v32, %v13413_v58 }
0x10cc   :  { %13983 = vrcp.f32 %v5238_v50  ;;  %12611 = vmatprep.subr.msk.bf16.mxu0 %vm14829_vm4, %v12609_v17  ;;  %6570 = vrot.lane.b32.xlu0 %v16727_v3, %s14423_s18 }
0x10cf   :  { %v5244_v31 = vpop.xlane.xlu0 %5243  ;;  %13461 = vrot.lane.b32.xlu1 %v16599_v41, %s14424_s19 }
0x10d0   :  { %13456 = vrot.lane.b32.xlu0 %v16601_v35, %s14424_s19  ;;  %13985 = vrcp.f32 %v5244_v31 }
0x10d3   :  { %12614 = vmatpush3.bf16.xpose.msk.msra.mxu0 %vm14829_vm4, %v12609_v17  ;;  %v5242_v63 = vpop.xlane.xlu0 %5241  ;;  %13471 = vrot.lane.b32.xlu1 %v16605_v9, %s14424_s19 }
0x10d4   :  { %13987 = vrcp.f32 %v5242_v63  ;;  %12617 = vmatprep.subr.msk.bf16.mxu0 %vm14829_vm4, %v12615_v51  ;;  %13466 = vrot.lane.b32.xlu0 %v16607_v5, %s14424_s19 }
0x10d6   :  { %v13984_v6 = vpop.eup %13983 }
0x10d7   :  { %v5248_v34 = vpop.xlane.xlu0 %5247  ;;  %v5283_v48 = vmul.f32 %v13984_v6, %v16920_v19 }
0x10d8   :  { %13476 = vrot.lane.b32.xlu0 %v16623_v37, %s14424_s19  ;;  %13989 = vrcp.f32 %v5248_v34 }
0x10d9   :  { %11600 = vmatprep.mubr.f32.mxu0 %v5283_v48 }
0x10da   :  { %11601 = vmatmul.mubr.f32.gmra.mrb[114].mxu0 %v5284_v43  ;;  %v13986_v45 = vpop.eup %13985 }
0x10db   :  { %12620 = vmatpush3.bf16.xpose.msk.msra.mxu0 %vm14829_vm4, %v12615_v51  ;;  %v5246_v38 = vpop.xlane.xlu0 %5245  ;;  %v5286_v17 = vmul.f32 %v13986_v45, %v16925_v59 }
0x10dc   :  { %13991 = vrcp.f32 %v5246_v38  ;;  %12623 = vmatprep.subr.msk.bf16.mxu0 %vm14829_vm4, %v12621_v62 }
0x10de   :  { %v13988_v20 = vpop.eup %13987 }
0x10df   :  { %v5285_v19 = vmul.f32 %v13988_v20, %v16928_v18 }
0x10e1   :  { %11603 = vmatprep.mubr.f32.mxu0 %v5285_v19 }
0x10e2   :  { %11604 = vmatmul.mubr.f32.gmra.mrb[116].mxu0 %v5286_v17  ;;  %v13990_v13 = vpop.eup %13989 }
0x10e3   :  { %12626 = vmatpush3.bf16.xpose.msk.msra.mxu0 %vm14829_vm4, %v12621_v62  ;;  %v5288_v31 = vmul.f32 %v13990_v13, %v16933_v60 }
0x10e6   :  { %v13992_v50 = vpop.eup %13991 }
0x10e7   :  { %v5252_v39 = vpop.xlane.xlu0 %5251  ;;  %v5287_v7 = vmul.f32 %v13992_v50, %v16937_v49 }
0x10e8   :  { %13993 = vrcp.f32 %v5252_v39 }
0x10e9   :  { %11606 = vmatprep.mubr.f32.mxu0 %v5287_v7 }
0x10ea   :  { %11607 = vmatmul.mubr.f32.gmra.mrb[118].mxu0 %v5288_v31 }
0x10eb   :  { %v5250_v51 = vpop.xlane.xlu0 %5249 }
0x10ec   :  { %13995 = vrcp.f32 %v5250_v51 }
0x10ef   :  { %v5256_v18 = vpop.xlane.xlu1 %5255 }
0x10f0   :  { %13997 = vrcp.f32 %v5256_v18 }
0x10f2   :  { %v13994_v63 = vpop.eup %13993 }
0x10f3   :  { %v5254_v59 = vpop.xlane.xlu0 %5253  ;;  %v5264_v33 = vpop.xlane.xlu1 %5263  ;;  %v5290_v49 = vmul.f32 %v13994_v63, %v16944_v52 }
0x10f4   :  { %13999 = vrcp.f32 %v5254_v59 }
0x10f6   :  { %v13996_v36 = vpop.eup %13995 }
0x10f7   :  { %v5260_v6 = vpop.xlane.xlu0 %5259  ;;  %v5509_v32 = vpop.permute.xlu1 %5508  ;;  %v5289_v58 = vmul.f32 %v13996_v36, %v16948_v11 }
0x10f8   :  { %14001 = vrcp.f32 %v5260_v6 }
0x10f9   :  { %11609 = vmatprep.mubr.f32.mxu0 %v5289_v58 }
0x10fa   :  { %11610 = vmatmul.mubr.f32.gmra.mrb[120].mxu0 %v5290_v49  ;;  %v13998_v48 = vpop.eup %13997 }
0x10fb   :  { %v5258_v60 = vpop.xlane.xlu0 %5257  ;;  %v5511_v34 = vpop.permute.xlu1 %5510  ;;  %v5292_v20 = vmul.f32 %v13998_v48, %v16952_v27 }
0x10fc   :  { %14003 = vrcp.f32 %v5258_v60 }
0x10fd   :  { %14005 = vrcp.f32 %v5264_v33 }
0x10fe   :  { %v14000_v43 = vpop.eup %13999 }
0x10ff   :  { %v5262_v62 = vpop.xlane.xlu0 %5261  ;;  %v5513_v38 = vpop.permute.xlu1 %5512  ;;  %v5291_v45 = vmul.f32 %v14000_v43, %v16958_v23 }
0x1100   :  { %14007 = vrcp.f32 %v5262_v62 }
0x1101   :  { %11612 = vmatprep.mubr.f32.mxu0 %v5291_v45 }
0x1102   :  { %11613 = vmatmul.mubr.f32.gmra.mrb[122].mxu0 %v5292_v20  ;;  %v14002_v19 = vpop.eup %14001 }
0x1103   :  { %v5507_v11 = vpop.permute.xlu0 %5506  ;;  %v5515_v52 = vpop.permute.xlu1 %5514  ;;  %v5294_v7 = vmul.f32 %v14002_v19, %v16962_v54 }
0x1106   :  { %v14004_v17 = vpop.eup %14003 }
0x1107   :  { %v5519_v13 = vpop.permute.xlu0 %5518  ;;  %v5517_v50 = vpop.permute.xlu1 %5516  ;;  %v5293_v39 = vmul.f32 %v14004_v17, %v16965_v10 }
0x1108   :  { %v14006_v31 = vpop.eup %14005 }
0x1109   :  { %11615 = vmatprep.mubr.f32.mxu0 %v5293_v39  ;;  %v5296_v59 = vmul.f32 %v14006_v31, %v16956_v57 }
0x110a   :  { %v14008_v51 = vpop.eup %14007  ;;  %11616 = vmatmul.mubr.f32.gmra.mrb[124].mxu0 %v5294_v7 }
0x110b   :  { %v5523_v23 = vpop.permute.xlu0 %5522  ;;  %v5521_v18 = vpop.permute.xlu1 %5520  ;;  %v5295_v27 = vmul.f32 %v14008_v51, %v16968_v28 }
0x110d   :  { %11618 = vmatprep.mubr.f32.mxu0 %v5295_v27 }
0x110e   :  { %11619 = vmatmul.mubr.f32.gmra.mrb[126].mxu0 %v5296_v59 }
0x110f   :  { %v5527_v33 = vpop.permute.xlu0 %5526  ;;  %11653 = vmatprep.mubr.msk.f32.mxu0 %vm677_vm3, %v5507_v11  ;;  %v5525_v63 = vpop.permute.xlu1 %5524 }
0x1112   :  { %11654 = vmatmul.mubr.msk.f32.vlgmr.msra.gmra.mrb[128].mxu0 %vm677_vm3, %v5509_v32 }
0x1113   :  { %v5531_v10 = vpop.permute.xlu0 %5530  ;;  %v5529_v54 = vpop.permute.xlu1 %5528  ;;  %11656 = vmatprep.mubr.msk.f32.mxu0 %vm677_vm3, %v5511_v34 }
0x1116   :  { %11657 = vmatmul.mubr.msk.f32.gmra.mrb[130].mxu0 %vm677_vm3, %v5513_v38 }
0x1117   :  { %v5535_v36 = vpop.permute.xlu0 %5534  ;;  %v5533_v6 = vpop.permute.xlu1 %5532  ;;  %11659 = vmatprep.mubr.msk.f32.mxu0 %vm677_vm3, %v5515_v52 }
0x111a   :  { %11660 = vmatmul.mubr.msk.f32.gmra.mrb[132].mxu0 %vm677_vm3, %v5517_v50 }
0x111b   :  { %v13417_v57 = vpop.permute.xlu0 %13416  ;;  %v5537_v28 = vpop.permute.xlu1 %5536  ;;  %11662 = vmatprep.mubr.msk.f32.mxu0 %vm677_vm3, %v5519_v13 }
0x111c   :  { %v13419_v58 = vunpack.i.h.bf16 %v13417_v57  ;;  %v13418_v49 = vunpack.i.l.bf16 %v13417_v57 }
0x111e   :  { %v12659_v60 = vpack.c.bf16 %v13419_v58, %v13418_v49  ;;  %11663 = vmatmul.mubr.msk.f32.gmra.mrb[134].mxu0 %vm677_vm3, %v5521_v18 }
0x111f   :  { %v13427_v32 = vpop.permute.xlu0 %13426  ;;  %v13422_v48 = vpop.permute.xlu1 %13421  ;;  %11665 = vmatprep.mubr.msk.f32.mxu0 %vm677_vm3, %v5523_v23 }
0x1120   :  { %v13424_v34 = vunpack.i.h.bf16 %v13422_v48  ;;  %v13423_v43 = vunpack.i.l.bf16 %v13422_v48  ;;  %12661 = vmatprep.subr.msk.bf16.mxu0 %vm14829_vm4, %v12659_v60  ;;  %v13429_v20 = vunpack.i.h.bf16 %v13427_v32  ;;  %v13428_v11 = vunpack.i.l.bf16 %v13427_v32 }
0x1121   :  { %12664 = vmatpush3.bf16.xpose.msk.msra.mxu0 %vm14829_vm4, %v12659_v60 }
0x1122   :  { %v12665_v62 = vpack.c.bf16 %v13424_v34, %v13423_v43  ;;  %11666 = vmatmul.mubr.msk.f32.gmra.mrb[136].mxu0 %vm677_vm3, %v5525_v63  ;;  %v12671_v17 = vpack.c.bf16 %v13429_v20, %v13428_v11 }
0x1123   :  { %v13437_v38 = vpop.permute.xlu0 %13436  ;;  %v13432_v45 = vpop.permute.xlu1 %13431  ;;  %11668 = vmatprep.mubr.msk.f32.mxu0 %vm677_vm3, %v5527_v33 }
0x1124   :  { %12667 = vmatprep.subr.msk.bf16.mxu0 %vm14829_vm4, %v12665_v62  ;;  %v13434_v39 = vunpack.i.h.bf16 %v13432_v45  ;;  %v13433_v7 = vunpack.i.l.bf16 %v13432_v45  ;;  %v13439_v59 = vunpack.i.h.bf16 %v13437_v38  ;;  %v13438_v33 = vunpack.i.l.bf16 %v13437_v38 }
0x1126   :  { %11669 = vmatmul.mubr.msk.f32.gmra.mrb[138].mxu0 %vm677_vm3, %v5529_v54  ;;  %v12677_v23 = vpack.c.bf16 %v13434_v39, %v13433_v7  ;;  %v12683_v54 = vpack.c.bf16 %v13439_v59, %v13438_v33 }
0x1127   :  { %v13447_v52 = vpop.permute.xlu0 %13446  ;;  %v13442_v19 = vpop.permute.xlu1 %13441  ;;  %11671 = vmatprep.mubr.msk.f32.mxu0 %vm677_vm3, %v5531_v10 }
0x1128   :  { %v13444_v57 = vunpack.i.h.bf16 %v13442_v19  ;;  %v13449_v34 = vunpack.i.h.bf16 %v13447_v52  ;;  %v13448_v43 = vunpack.i.l.bf16 %v13447_v52 }
0x1129   :  { %12670 = vmatpush3.bf16.xpose.msk.msra.mxu0 %vm14829_vm4, %v12665_v62 }
0x112a   :  { %11672 = vmatmul.mubr.msk.f32.gmra.mrb[140].mxu0 %vm677_vm3, %v5533_v6  ;;  %12673 = vmatprep.subr.msk.bf16.mxu0 %vm14829_vm4, %v12671_v17  ;;  %v12695_v45 = vpack.c.bf16 %v13449_v34, %v13448_v43 }
0x112b   :  { %v6543_v13 = vpop.permute.xlu0 %6542  ;;  %v13452_v50 = vpop.permute.xlu1 %13451  ;;  %11674 = vmatprep.mubr.msk.f32.mxu0 %vm677_vm3, %v5535_v36 }
0x112c   :  { %v13454_v20 = vunpack.i.h.bf16 %v13452_v50  ;;  %v13453_v11 = vunpack.i.l.bf16 %v13452_v50 }
0x112e   :  { %11675 = vmatmul.mubr.msk.f32.gmra.mrb[142].mxu0 %vm677_vm3, %v5537_v28  ;;  %v13443_v28 = vunpack.i.l.bf16 %v13442_v19 }
0x112f   :  { %v17148_v31 = vpop.permute.xlu0 %6546  ;;  %v17150_v51 = vpop.permute.xlu1 %6544  ;;  %11817 = vmatprep.mubr.msk.f32.mxu0 %vm677_vm3, %v6543_v13 }
0x1130   :  { %v12689_v60 = vpack.c.bf16 %v13444_v57, %v13443_v28 }
0x1131   :  { %12676 = vmatpush3.bf16.xpose.msk.msra.mxu0 %vm14829_vm4, %v12671_v17 }
0x1132   :  { %12679 = vmatprep.subr.msk.bf16.mxu0 %vm14829_vm4, %v12677_v23 }
0x1133   :  { %v17157_v18 = vpop.permute.xlu0 %6550  ;;  %v17159_v27 = vpop.permute.xlu1 %6548 }
0x1137   :  { %v17161_v63 = vpop.permute.xlu0 %6554  ;;  %v17163_v10 = vpop.permute.xlu1 %6552 }
0x1139   :  { %12682 = vmatpush3.bf16.xpose.msk.msra.mxu0 %vm14829_vm4, %v12677_v23  ;;  %v12701_v23 = vpack.c.bf16 %v13454_v20, %v13453_v11 }
0x113a   :  { %12685 = vmatprep.subr.msk.bf16.mxu0 %vm14829_vm4, %v12683_v54 }
0x113b   :  { %v6559_v36 = vpop.permute.xlu0 %6558  ;;  %v6557_v6 = vpop.permute.xlu1 %6556 }
0x113f   :  { %v6563_v58 = vpop.permute.xlu0 %6562  ;;  %v6561_v49 = vpop.permute.xlu1 %6560 }
0x1141   :  { %12688 = vmatpush3.bf16.xpose.msk.msra.mxu0 %vm14829_vm4, %v12683_v54 }
0x1142   :  { %12691 = vmatprep.subr.msk.bf16.mxu0 %vm14829_vm4, %v12689_v60 }
0x1143   :  { %v6567_v32 = vpop.permute.xlu0 %6566  ;;  %v6565_v48 = vpop.permute.xlu1 %6564 }
0x1147   :  { %v6571_v62 = vpop.permute.xlu0 %6570  ;;  %v6569_v38 = vpop.permute.xlu1 %6568 }
0x1149   :  { %12694 = vmatpush3.bf16.xpose.msk.msra.mxu0 %vm14829_vm4, %v12689_v60 }
0x114a   :  { %12697 = vmatprep.subr.msk.bf16.mxu0 %vm14829_vm4, %v12695_v45 }
0x114b   :  { %v13457_v19 = vpop.permute.xlu0 %13456  ;;  %v6573_v17 = vpop.permute.xlu1 %6572 }
0x114c   :  { %v13459_v13 = vunpack.i.h.bf16 %v13457_v19  ;;  %v13458_v39 = vunpack.i.l.bf16 %v13457_v19 }
0x114e   :  { %v12627_v7 = vpack.c.bf16 %v13459_v13, %v13458_v39 }
0x114f   :  { %v13467_v59 = vpop.permute.xlu0 %13466  ;;  %v13462_v33 = vpop.permute.xlu1 %13461 }
0x1150   :  { %v13469_v52 = vunpack.i.h.bf16 %v13467_v59  ;;  %v13468_v54 = vunpack.i.l.bf16 %v13467_v59  ;;  %v13464_v57 = vunpack.i.h.bf16 %v13462_v33  ;;  %v13463_v28 = vunpack.i.l.bf16 %v13462_v33  ;;  %12628 = vmatprep.subr.bf16.mxu1 %v12627_v7 }
0x1151   :  { %12630 = vmatpush3.bf16.msra.mxu1 %v12627_v7  ;;  %12700 = vmatpush3.bf16.xpose.msk.msra.mxu0 %vm14829_vm4, %v12695_v45 }
0x1152   :  { %12703 = vmatprep.subr.msk.bf16.mxu0 %vm14829_vm4, %v12701_v23  ;;  %v12631_v50 = vpack.c.bf16 %v13464_v57, %v13463_v28  ;;  %v12635_v20 = vpack.c.bf16 %v13469_v52, %v13468_v54  ;;  %v18776_v57 = vld [vmem:[#allocation37_spill] sm:$0xff] }
0x1153   :  { %v13472_v60 = vpop.permute.xlu1 %13471  ;;  %v13477_v11 = vpop.permute.xlu0 %13476 }
0x1154   :  { %v13474_v34 = vunpack.i.h.bf16 %v13472_v60  ;;  %v13473_v43 = vunpack.i.l.bf16 %v13472_v60  ;;  %12632 = vmatprep.subr.bf16.mxu1 %v12631_v50  ;;  %v13479_v19 = vunpack.i.h.bf16 %v13477_v11  ;;  %v13478_v13 = vunpack.i.l.bf16 %v13477_v11 }
0x1155   :  { %12634 = vmatpush3.bf16.msra.mxu1 %v12631_v50 }
0x1156   :  { %12636 = vmatprep.subr.bf16.mxu1 %v12635_v20  ;;  %v12639_v39 = vpack.c.bf16 %v13474_v34, %v13473_v43  ;;  %v12643_v45 = vpack.c.bf16 %v13479_v19, %v13478_v13  ;;  %v18778_v19 = vld [vmem:[#allocation39_spill] sm:$0xff] }
0x1159   :  { %12638 = vmatpush3.bf16.msra.mxu1 %v12635_v20  ;;  %12706 = vmatpush3.bf16.xpose.msk.msra.mxu0 %vm14829_vm4, %v12701_v23  ;;  %v18777_v20 = vld [vmem:[#allocation40_spill] sm:$0xff] }
0x115a   :  { %12640 = vmatprep.subr.bf16.mxu1 %v12639_v39 }
0x115d   :  { %12642 = vmatpush3.bf16.msra.mxu1 %v12639_v39 }
0x115e   :  { %12644 = vmatprep.subr.bf16.mxu1 %v12643_v45 }
0x1160   :  { %11818 = vmatmul.mubr.msk.f32.vlgmr.msra.gmra.mrb[144].mxu0 %vm677_vm3, %v17150_v51 }
0x1161   :  { %12646 = vmatpush3.bf16.msra.mxu1 %v12643_v45  ;;  %11820 = vmatprep.mubr.msk.f32.mxu0 %vm677_vm3, %v17148_v31 }
0x1164   :  { %11821 = vmatmul.mubr.msk.f32.gmra.mrb[146].mxu0 %vm677_vm3, %v17159_v27 }
0x1165   :  { %11823 = vmatprep.mubr.msk.f32.mxu0 %vm677_vm3, %v17157_v18 }
0x1168   :  { %11824 = vmatmul.mubr.msk.f32.gmra.mrb[148].mxu0 %vm677_vm3, %v17163_v10 }
0x1169   :  { %11826 = vmatprep.mubr.msk.f32.mxu0 %vm677_vm3, %v17161_v63 }
0x116c   :  { %11827 = vmatmul.mubr.msk.f32.gmra.mrb[150].mxu0 %vm677_vm3, %v6557_v6 }
0x116d   :  { %11829 = vmatprep.mubr.msk.f32.mxu0 %vm677_vm3, %v6559_v36 }
0x1170   :  { %11830 = vmatmul.mubr.msk.f32.gmra.mrb[152].mxu0 %vm677_vm3, %v6561_v49 }
0x1171   :  { %11832 = vmatprep.mubr.msk.f32.mxu0 %vm677_vm3, %v6563_v58 }
0x1174   :  { %11833 = vmatmul.mubr.msk.f32.gmra.mrb[154].mxu0 %vm677_vm3, %v6565_v48 }
0x1175   :  { %11835 = vmatprep.mubr.msk.f32.mxu0 %vm677_vm3, %v6567_v32 }
0x1178   :  { %11836 = vmatmul.mubr.msk.f32.gmra.mrb[156].mxu0 %vm677_vm3, %v6569_v38 }
0x1179   :  { %11838 = vmatprep.mubr.msk.f32.mxu0 %vm677_vm3, %v6571_v62 }
0x117c   :  { %11839 = vmatmul.mubr.msk.f32.gmra.mrb[158].mxu0 %vm677_vm3, %v6573_v17 }
0x117d   :  { %v17204_v31 = vpop.f32.mrb[112].mxu0 }
0x117e   :  { %18760 = vst [vmem:[#allocation16_spill] sm:$0xff] %v17204_v31  ;;  %v17206_v51 = vpop.f32.mrb[113].mxu0 }
0x117f   :  { %18761 = vst [vmem:[#allocation17_spill] sm:$0xff] %v17206_v51 }
0x11ad   :  { %v17208_v18 = vpop.f32.mrb[114].mxu0 }
0x11ae   :  { %18762 = vst [vmem:[#allocation18_spill] sm:$0xff] %v17208_v18  ;;  %v17210_v27 = vpop.f32.mrb[115].mxu0 }
0x11af   :  { %18763 = vst [vmem:[#allocation20_spill] sm:$0xff] %v17210_v27 }
0x11b5   :  { %v17212_v63 = vpop.f32.mrb[116].mxu0 }
0x11b6   :  { %18764 = vst [vmem:[#allocation19_spill] sm:$0xff] %v17212_v63  ;;  %v17214_v10 = vpop.f32.mrb[117].mxu0 }
0x11b7   :  { %18765 = vst [vmem:[#allocation22_spill] sm:$0xff] %v17214_v10 }
0x11bd   :  { %v17216_v36 = vpop.f32.mrb[118].mxu0 }
0x11be   :  { %18766 = vst [vmem:[#allocation21_spill] sm:$0xff] %v17216_v36  ;;  %v17218_v6 = vpop.f32.mrb[119].mxu0 }
0x11bf   :  { %18767 = vst [vmem:[#allocation24_spill] sm:$0xff] %v17218_v6 }
0x11cd   :  { %v17220_v58 = vpop.f32.mrb[120].mxu0 }
0x11ce   :  { %18768 = vst [vmem:[#allocation23_spill] sm:$0xff] %v17220_v58  ;;  %v17222_v49 = vpop.f32.mrb[121].mxu0 }
0x11cf   :  { %18769 = vst [vmem:[#allocation26_spill] sm:$0xff] %v17222_v49 }
0x11d5   :  { %v17224_v32 = vpop.f32.mrb[122].mxu0 }
0x11d6   :  { %18770 = vst [vmem:[#allocation25_spill] sm:$0xff] %v17224_v32  ;;  %v17226_v48 = vpop.f32.mrb[123].mxu0 }
0x11d7   :  { %18771 = vst [vmem:[#allocation10_spill] sm:$0xff] %v17226_v48 }
0x11dd   :  { %v17228_v62 = vpop.f32.mrb[124].mxu0 }
0x11de   :  { %18772 = vst [vmem:[#allocation63_spill] sm:$0xff] %v17228_v62  ;;  %v17230_v38 = vpop.f32.mrb[125].mxu0 }
0x11df   :  { %18773 = vst [vmem:[#allocation64_spill] sm:$0xff] %v17230_v38 }
0x11e1   :  { %v17232_v17 = vpop.f32.mrb[126].mxu0 }
0x11e2   :  { %18774 = vst [vmem:[#allocation65_spill] sm:$0xff] %v17232_v17  ;;  %v17234_v7 = vpop.f32.mrb[127].mxu0 }
0x11e3   :  { %18775 = vst [vmem:[#allocation66_spill] sm:$0xff] %v17234_v7 }
0x11e5   :  { %v11655_v23 = vpop.f32.mrb[128].mxu0 }
0x11e6   :  { %v5780_v59 = vmul.f32 0.35355338, %v11655_v23  ;;  %v5700_v33 = vpop.f32.mrb[129].mxu0 }
0x11e7   :  { %v5779_v52 = vmul.f32 0.35355338, %v5700_v33 }
0x11e8   :  { %v17237_v54 = vadd.f32 %v16742_v46, %v5780_v59  ;;  %v18779_v59 = vld [vmem:[#allocation42_spill] sm:$0xff] }
0x11e9   :  { %v17240_v28 = vadd.f32 %v18776_v57, %v5779_v52  ;;  %v11658_v50 = vpop.f32.mrb[130].mxu0  ;;  %v18780_v52 = vld [vmem:[#allocation44_spill] sm:$0xff] }
0x11ea   :  { %v5782_v60 = vmul.f32 0.35355338, %v11658_v50  ;;  %5813 = vmax.xlane.f32.xlu1 %v17237_v54  ;;  %v5710_v34 = vpop.f32.mrb[131].mxu0 }
0x11eb   :  { %v5781_v43 = vmul.f32 0.35355338, %v5710_v34  ;;  %5811 = vmax.xlane.f32.xlu0 %v17240_v28 }
0x11ec   :  { %v17245_v11 = vadd.f32 %v18777_v20, %v5782_v60  ;;  %v18781_v20 = vld [vmem:[#allocation43_spill] sm:$0xff] }
0x11ed   :  { %v17248_v13 = vadd.f32 %v18778_v19, %v5781_v43  ;;  %v11661_v39 = vpop.f32.mrb[132].mxu0 }
0x11ee   :  { %v5784_v46 = vmul.f32 0.35355338, %v11661_v39  ;;  %5817 = vmax.xlane.f32.xlu1 %v17245_v11  ;;  %v5720_v45 = vpop.f32.mrb[133].mxu0  ;;  %v18782_v39 = vld [vmem:[#allocation41_spill] sm:$0xff] }
0x11ef   :  { %v5783_v23 = vmul.f32 0.35355338, %v5720_v45  ;;  %5815 = vmax.xlane.f32.xlu0 %v17248_v13 }
0x11f0   :  { %v17253_v33 = vadd.f32 %v18779_v59, %v5784_v46 }
0x11f1   :  { %v17256_v57 = vadd.f32 %v18780_v52, %v5783_v23  ;;  %v11664_v50 = vpop.f32.mrb[134].mxu0  ;;  %v18783_v52 = vld [vmem:[#allocation46_spill] sm:$0xff] }
0x11f2   :  { %v5786_v60 = vmul.f32 0.35355338, %v11664_v50  ;;  %5821 = vmax.xlane.f32.xlu1 %v17253_v33  ;;  %v5730_v34 = vpop.f32.mrb[135].mxu0 }
0x11f3   :  { %v5785_v43 = vmul.f32 0.35355338, %v5730_v34  ;;  %5819 = vmax.xlane.f32.xlu0 %v17256_v57  ;;  %v18784_v34 = vld [vmem:[#allocation45_spill] sm:$0xff] }
0x11f4   :  { %v17261_v19 = vadd.f32 %v18781_v20, %v5786_v60 }
0x11f5   :  { %v17264_v45 = vadd.f32 %v18782_v39, %v5785_v43  ;;  %v11667_v17 = vpop.f32.mrb[136].mxu0 }
0x11f6   :  { %v5788_v46 = vmul.f32 0.35355338, %v11667_v17  ;;  %5825 = vmax.xlane.f32.xlu1 %v17261_v19  ;;  %v5740_v23 = vpop.f32.mrb[137].mxu0  ;;  %v18785_v17 = vld [vmem:[#allocation11_spill] sm:$0xff] }
0x11f7   :  { %v5787_v59 = vmul.f32 0.35355338, %v5740_v23  ;;  %5823 = vmax.xlane.f32.xlu0 %v17264_v45  ;;  %v18786_v23 = vld [vmem:[#allocation12_spill] sm:$0xff] }
0x11f8   :  { %v17269_v50 = vadd.f32 %v18783_v52, %v5788_v46 }
0x11f9   :  { %v17272_v7 = vadd.f32 %v18784_v34, %v5787_v59  ;;  %v11670_v62 = vpop.f32.mrb[138].mxu0 }
0x11fa   :  { %v5790_v60 = vmul.f32 0.35355338, %v11670_v62  ;;  %5829 = vmax.xlane.f32.xlu1 %v17269_v50  ;;  %v5750_v43 = vpop.f32.mrb[139].mxu0  ;;  %v18787_v62 = vld [vmem:[#allocation13_spill] sm:$0xff] }
0x11fb   :  { %v5789_v20 = vmul.f32 0.35355338, %v5750_v43  ;;  %5827 = vmax.xlane.f32.xlu0 %v17272_v7  ;;  %v18788_v43 = vld [vmem:[#allocation14_spill] sm:$0xff] }
0x11fc   :  { %v17277_v39 = vadd.f32 %v18785_v17, %v5790_v60 }
0x11fd   :  { %v17280_v38 = vadd.f32 %v18786_v23, %v5789_v20  ;;  %v11673_v32 = vpop.f32.mrb[140].mxu0 }
0x11fe   :  { %v5792_v46 = vmul.f32 0.35355338, %v11673_v32  ;;  %5833 = vmax.xlane.f32.xlu1 %v17277_v39  ;;  %v5760_v59 = vpop.f32.mrb[141].mxu0  ;;  %v17295_v32 = vld [vmem:[%s18488_s1 + $0x78] sm:$0xff] }
0x11ff   :  { %v5791_v52 = vmul.f32 0.35355338, %v5760_v59  ;;  %5831 = vmax.xlane.f32.xlu0 %v17280_v38  ;;  %18789 = vst [vmem:[#allocation37_spill] sm:$0xff] %v17295_v32 }
0x1200   :  { %v17285_v34 = vadd.f32 %v18787_v62, %v5792_v46  ;;  %v18790_v46 = vld [vmem:[#allocation15_spill] sm:$0xff] }
0x1201   :  { %v17288_v48 = vadd.f32 %v18788_v43, %v5791_v52  ;;  %v11676_v58 = vpop.f32.mrb[142].mxu0  ;;  %v18792_v52 = vld [vmem:[#allocation34_spill] sm:$0xff] }
0x1202   :  { %v5794_v60 = vmul.f32 0.35355338, %v11676_v58  ;;  %5837 = vmax.xlane.f32.xlu1 %v17285_v34  ;;  %v5770_v20 = vpop.f32.mrb[143].mxu0  ;;  %v18791_v58 = vld [vmem:[#allocation35_spill] sm:$0xff] }
0x1203   :  { %v5793_v17 = vmul.f32 0.35355338, %v5770_v20  ;;  %5835 = vmax.xlane.f32.xlu0 %v17288_v48 }
0x1204   :  { %v17298_v23 = vadd.f32 %v17295_v32, %v5794_v60 }
0x1205   :  { %v17301_v59 = vadd.f32 %v18790_v46, %v5793_v17 }
0x1206   :  { %5841 = vmax.xlane.f32.xlu1 %v17298_v23 }
0x1207   :  { %5839 = vmax.xlane.f32.xlu0 %v17301_v59 }
0x1217   :  { %13486 = vrot.lane.b32.xlu1 %v18791_v58, %s14424_s19 }
0x121d   :  { %13481 = vrot.lane.b32.xlu0 %v18792_v52, %s14424_s19 }
0x1233   :  { %v17309_v62 = vpop.f32.mrb[144].mxu0 }
0x1234   :  { %v17311_v43 = vpop.f32.mrb[145].mxu0 }
0x1237   :  { %v17313_v20 = vpop.f32.mrb[146].mxu0 }
0x1238   :  { %v17315_v60 = vpop.f32.mrb[147].mxu0 }
0x123b   :  { %v17317_v17 = vpop.f32.mrb[148].mxu0 }
0x123c   :  { %v17319_v46 = vpop.f32.mrb[149].mxu0 }
0x123f   :  { %v17321_v49 = vpop.f32.mrb[150].mxu0 }
0x1240   :  { %v17323_v36 = vpop.f32.mrb[151].mxu0 }
0x1243   :  { %v17325_v6 = vpop.f32.mrb[152].mxu0 }
0x1244   :  { %v17327_v63 = vpop.f32.mrb[153].mxu0 }
0x1245   :  { %18793 = vst [vmem:[#allocation40_spill] sm:$0xff] %v17327_v63 }
0x1247   :  { %v17329_v10 = vpop.f32.mrb[154].mxu0 }
0x1248   :  { %v17331_v18 = vpop.f32.mrb[155].mxu0 }
0x1249   :  { %18794 = vst [vmem:[#allocation39_spill] sm:$0xff] %v17331_v18 }
0x124b   :  { %v17333_v27 = vpop.f32.mrb[156].mxu0 }
0x124c   :  { %18795 = vst [vmem:[#allocation42_spill] sm:$0xff] %v17333_v27  ;;  %v17335_v31 = vpop.f32.mrb[157].mxu0 }
0x124d   :  { %18796 = vst [vmem:[#allocation44_spill] sm:$0xff] %v17335_v31 }
0x124f   :  { %v17337_v51 = vpop.f32.mrb[158].mxu0 }
0x1250   :  { %18797 = vst [vmem:[#allocation43_spill] sm:$0xff] %v17337_v51  ;;  %v17339_v58 = vpop.f32.mrb[159].mxu0 }
0x1251   :  { %18798 = vst [vmem:[#allocation41_spill] sm:$0xff] %v17339_v58 }
0x1277   :  { %v5814_v37 = vpop.xlane.xlu1 %5813 }
0x1278   :  { %v5844_v5 = vsub.f32 %v17237_v54, %v5814_v37  ;;  %v5812_v41 = vpop.xlane.xlu0 %5811 }
0x1279   :  { %v5843_v52 = vsub.f32 %v17240_v28, %v5812_v41 }
0x127a   :  { %v5861_v9 = vmul.f32 1.442695, %v5844_v5 }
0x127b   :  { %v5859_v35 = vmul.f32 1.442695, %v5843_v52  ;;  %v5818_v2 = vpop.xlane.xlu1 %5817 }
0x127c   :  { %14009 = vpow2.f32 %v5861_v9  ;;  %v5846_v32 = vsub.f32 %v17245_v11, %v5818_v2  ;;  %v5816_v18 = vpop.xlane.xlu0 %5815 }
0x127d   :  { %14011 = vpow2.f32 %v5859_v35  ;;  %v5845_v31 = vsub.f32 %v17248_v13, %v5816_v18 }
0x127e   :  { %v5865_v27 = vmul.f32 1.442695, %v5846_v32 }
0x127f   :  { %v5822_v51 = vpop.xlane.xlu1 %5821  ;;  %v5863_v58 = vmul.f32 1.442695, %v5845_v31 }
0x1280   :  { %14013 = vpow2.f32 %v5865_v27  ;;  %v5848_v63 = vsub.f32 %v17253_v33, %v5822_v51  ;;  %v5820_v37 = vpop.xlane.xlu0 %5819 }
0x1281   :  { %v5847_v54 = vsub.f32 %v17256_v57, %v5820_v37  ;;  %14015 = vpow2.f32 %v5863_v58 }
0x1282   :  { %v5869_v28 = vmul.f32 1.442695, %v5848_v63 }
0x1283   :  { %v5867_v41 = vmul.f32 1.442695, %v5847_v54  ;;  %v5826_v5 = vpop.xlane.xlu1 %5825 }
0x1284   :  { %v5850_v9 = vsub.f32 %v17261_v19, %v5826_v5  ;;  %v5824_v2 = vpop.xlane.xlu0 %5823 }
0x1285   :  { %14017 = vpow2.f32 %v5867_v41  ;;  %v5849_v51 = vsub.f32 %v17264_v45, %v5824_v2 }
0x1286   :  { %v17348_v35 = vpop.eup %14009  ;;  %14019 = vpow2.f32 %v5869_v28  ;;  %v5873_v31 = vmul.f32 1.442695, %v5850_v9 }
0x1287   :  { %v17350_v18 = vpop.eup %14011  ;;  %v17352_v11 = vpop.xlane.xlu1 %5829  ;;  %5893 = vadd.xlane.f32.xlu1 %v17348_v35  ;;  %v5871_v33 = vmul.f32 1.442695, %v5849_v51 }
0x1288   :  { %v5828_v27 = vpop.xlane.xlu0 %5827  ;;  %5891 = vadd.xlane.f32.xlu0 %v17350_v18  ;;  %14021 = vpow2.f32 %v5873_v31 }
0x1289   :  { %v5851_v57 = vsub.f32 %v17272_v7, %v5828_v27  ;;  %14023 = vpow2.f32 %v5871_v33 }
0x128a   :  { %v17357_v63 = vpop.eup %14013 }
0x128b   :  { %v5834_v13 = vpop.xlane.xlu1 %5833  ;;  %5897 = vadd.xlane.f32.xlu1 %v17357_v63  ;;  %v17361_v32 = vpop.eup %14015  ;;  %v5875_v45 = vmul.f32 1.442695, %v5851_v57 }
0x128c   :  { %v5832_v19 = vpop.xlane.xlu0 %5831 }
0x128d   :  { %v5853_v37 = vsub.f32 %v17280_v38, %v5832_v19  ;;  %14025 = vpow2.f32 %v5875_v45 }
0x128f   :  { %v17363_v58 = vpop.eup %14017  ;;  %v5838_v52 = vpop.xlane.xlu1 %5837  ;;  %5895 = vadd.xlane.f32.xlu1 %v17361_v32  ;;  %v5879_v5 = vmul.f32 1.442695, %v5853_v37 }
0x1290   :  { %18799 = vst [vmem:[#allocation46_spill] sm:$0xff] %v17363_v58  ;;  %v5836_v54 = vpop.xlane.xlu0 %5835  ;;  %5899 = vadd.xlane.f32.xlu0 %v17363_v58  ;;  %v17368_v41 = vpop.eup %14019 }
0x1291   :  { %18800 = vst [vmem:[#allocation45_spill] sm:$0xff] %v17368_v41  ;;  %v5855_v28 = vsub.f32 %v17288_v48, %v5836_v54  ;;  %14027 = vpow2.f32 %v5879_v5 }
0x1292   :  { %v17372_v2 = vpop.eup %14021 }
0x1293   :  { %5901 = vadd.xlane.f32.xlu1 %v17368_v41  ;;  %v5842_v7 = vpop.xlane.xlu1 %5841  ;;  %v5883_v38 = vmul.f32 1.442695, %v5855_v28  ;;  %v17376_v58 = vpop.eup %14023 }
0x1294   :  { %v5840_v9 = vpop.xlane.xlu0 %5839  ;;  %v5858_v45 = vsub.f32 %v17298_v23, %v5842_v7  ;;  %v18801_v23 = vld [vmem:[#allocation38_spill] sm:$0xff] }
0x1295   :  { %v5857_v51 = vsub.f32 %v17301_v59, %v5840_v9  ;;  %14029 = vpow2.f32 %v5883_v38 }
0x1296   :  { %v5889_v59 = vmul.f32 1.442695, %v5858_v45  ;;  %v6821_v45 = vmul.f32 0.35355338, %v17323_v36  ;;  %v6826_v36 = vmul.f32 0.35355338, %v17329_v10 }
0x1297   :  { %5905 = vadd.xlane.f32.xlu1 %v17372_v2  ;;  %v13487_v31 = vpop.permute.xlu1 %13486  ;;  %v5887_v37 = vmul.f32 1.442695, %v5857_v51  ;;  %v17380_v5 = vpop.eup %14025  ;;  %v5854_v51 = vsub.f32 %v17277_v39, %v5834_v13 }
0x1298   :  { %v13482_v27 = vpop.permute.xlu0 %13481  ;;  %v13489_v33 = vunpack.i.h.bf16 %v13487_v31  ;;  %v13488_v57 = vunpack.i.l.bf16 %v13487_v31  ;;  %v5852_v31 = vsub.f32 %v17269_v50, %v17352_v11  ;;  %v6824_v11 = vmul.f32 0.35355338, %v17325_v6 }
0x1299   :  { %v13484_v19 = vunpack.i.h.bf16 %v13482_v27  ;;  %v13483_v41 = vunpack.i.l.bf16 %v13482_v27  ;;  %14031 = vpow2.f32 %v5887_v37  ;;  %v5881_v27 = vmul.f32 1.442695, %v5854_v51 }
0x129a   :  { %v12651_v54 = vpack.c.bf16 %v13489_v33, %v13488_v57  ;;  %14033 = vpow2.f32 %v5889_v59  ;;  %v5877_v38 = vmul.f32 1.442695, %v5852_v31  ;;  %v5856_v33 = vsub.f32 %v17285_v34, %v5838_v52  ;;  %v17523_v52 = vld [vmem:[%s18488_s1 + $0x20] sm:$0xff] }
0x129b   :  { %5903 = vadd.xlane.f32.xlu1 %v17376_v58  ;;  %v12647_v48 = vpack.c.bf16 %v13484_v19, %v13483_v41  ;;  %v17383_v28 = vpop.eup %14027 }
0x129c   :  { %14035 = vpow2.f32 %v5877_v38  ;;  %v5885_v57 = vmul.f32 1.442695, %v5856_v33  ;;  %v17535_v38 = vld [vmem:[%s18488_s1 + $0x48] sm:$0xff] }
0x129d   :  { %12648 = vmatprep.subr.bf16.mxu1 %v12647_v48  ;;  %14037 = vpow2.f32 %v5881_v27  ;;  %v17538_v51 = vadd.f32 %v17535_v38, %v6824_v11  ;;  %v18802_v27 = vld [vmem:[#allocation40_spill] sm:$0xff] }
0x129e   :  { %12650 = vmatpush3.bf16.msra.mxu1 %v12647_v48  ;;  %14039 = vpow2.f32 %v5885_v57  ;;  %v6823_v33 = vmul.f32 0.35355338, %v18802_v27  ;;  %v18808_v11 = vld [vmem:[#allocation44_spill] sm:$0xff] }
0x129f   :  { %5907 = vadd.xlane.f32.xlu1 %v17380_v5  ;;  %12652 = vmatprep.subr.bf16.mxu1 %v12651_v54  ;;  %v17386_v41 = vpop.eup %14029 }
0x12a2   :  { %12654 = vmatpush3.bf16.msra.mxu1 %v12651_v54 }
0x12a3   :  { %5911 = vadd.xlane.f32.xlu1 %v17383_v28  ;;  %v17391_v7 = vpop.eup %14031 }
0x12a4   :  { %v17394_v9 = vpop.eup %14033 }
0x12a6   :  { %13491 = vrot.lane.b32.xlu0 %v18801_v23, %s14424_s19  ;;  %v17403_v19 = vpop.eup %14035 }
0x12a7   :  { %5915 = vadd.xlane.f32.xlu1 %v17386_v41  ;;  %v17408_v50 = vpop.eup %14037 }
0x12a8   :  { %v17413_v39 = vpop.eup %14039 }
0x12ab   :  { %5919 = vadd.xlane.f32.xlu1 %v17391_v7 }
0x12af   :  { %5921 = vadd.xlane.f32.xlu1 %v17394_v9 }
0x12c0   :  { %13496 = vrot.lane.b32.xlu1 %v16494_v44, %s14425_s20 }
0x12c4   :  { %13501 = vrot.lane.b32.xlu1 %v16504_v40, %s14425_s20  ;;  %v6815_v40 = vmul.f32 0.35355338, %v17311_v43  ;;  %v17504_v43 = vld [vmem:[%s18488_s1 + $0x10] sm:$0xff] }
0x12c5   :  { %5909 = vadd.xlane.f32.xlu0 %v17403_v19 }
0x12c8   :  { %13506 = vrot.lane.b32.xlu1 %v16512_v26, %s14425_s20 }
0x12c9   :  { %5913 = vadd.xlane.f32.xlu0 %v17408_v50 }
0x12cc   :  { %13516 = vrot.lane.b32.xlu1 %v16534_v15, %s14425_s20 }
0x12cd   :  { %5917 = vadd.xlane.f32.xlu0 %v17413_v39 }
0x12d0   :  { %13521 = vrot.lane.b32.xlu1 %v16544_v22, %s14425_s20  ;;  %v6818_v22 = vmul.f32 0.35355338, %v17313_v20 }
0x12d4   :  { %13526 = vrot.lane.b32.xlu1 %v16552_v61, %s14425_s20  ;;  %v6816_v61 = vmul.f32 0.35355338, %v17309_v62  ;;  %v6819_v62 = vmul.f32 0.35355338, %v17319_v46 }
0x12d6   :  { %v17526_v48 = vadd.f32 %v17523_v52, %v6819_v62 }
0x12d8   :  { %13531 = vrot.lane.b32.xlu1 %v16565_v24, %s14425_s20 }
0x12dc   :  { %7397 = vrot.lane.b32.xlu1 %v16487_v55, %s14426_s3 }
0x12e0   :  { %7401 = vrot.lane.b32.xlu1 %v16655_v14, %s14426_s3  ;;  %v17473_v14 = vld [vmem:[%s18488_s1 + $0x18] sm:$0xff] }
0x12e3   :  { %13511 = vrot.lane.b32.xlu0 %v16522_v47, %s14425_s20  ;;  %v17462_v47 = vld [vmem:[%s18488_s1] sm:$0xff] }
0x12e4   :  { %7405 = vrot.lane.b32.xlu1 %v16667_v4, %s14426_s3  ;;  %v17465_v15 = vadd.f32 %v17462_v47, %v6815_v40  ;;  %v6820_v4 = vmul.f32 0.35355338, %v17317_v17 }
0x12e7   :  { %7399 = vrot.lane.b32.xlu0 %v16651_v42, %s14426_s3 }
0x12e8   :  { %7409 = vrot.lane.b32.xlu1 %v16679_v53, %s14426_s3  ;;  %v17482_v53 = vld [vmem:[%s18488_s1 + $0x8] sm:$0xff] }
0x12eb   :  { %7403 = vrot.lane.b32.xlu0 %v16663_v0, %s14426_s3  ;;  %v17476_v0 = vadd.f32 %v17473_v14, %v6818_v22 }
0x12ec   :  { %7413 = vrot.lane.b32.xlu1 %v16691_v1, %s14426_s3  ;;  %v6817_v1 = vmul.f32 0.35355338, %v17315_v60 }
0x12ee   :  { %v17507_v20 = vadd.f32 %v17504_v43, %v6817_v1 }
0x12ef   :  { %7407 = vrot.lane.b32.xlu0 %v16675_v25, %s14426_s3 }
0x12f0   :  { %7417 = vrot.lane.b32.xlu1 %v16703_v12, %s14426_s3 }
0x12f3   :  { %7411 = vrot.lane.b32.xlu0 %v16687_v30, %s14426_s3  ;;  %v17485_v30 = vadd.f32 %v17482_v53, %v6816_v61  ;;  %v18804_v61 = vld [vmem:[#allocation42_spill] sm:$0xff] }
0x12f4   :  { %7421 = vrot.lane.b32.xlu1 %v16715_v56, %s14426_s3  ;;  %v17493_v56 = vld [vmem:[%s18488_s1 + $0x28] sm:$0xff] }
0x12f7   :  { %7415 = vrot.lane.b32.xlu0 %v16699_v21, %s14426_s3 }
0x12f8   :  { %7425 = vrot.lane.b32.xlu1 %v16727_v3, %s14426_s3  ;;  %v6822_v3 = vmul.f32 0.35355338, %v17321_v49 }
0x12fb   :  { %7419 = vrot.lane.b32.xlu0 %v16711_v29, %s14426_s3 }
0x12ff   :  { %7423 = vrot.lane.b32.xlu0 %v16723_v16, %s14426_s3  ;;  %v17496_v16 = vadd.f32 %v17493_v56, %v6820_v4  ;;  %v18805_v4 = vld [vmem:[#allocation39_spill] sm:$0xff] }
0x1303   :  { %7427 = vrot.lane.b32.xlu0 %v16735_v8, %s14426_s3 }
0x1314   :  { %v5894_v55 = vpop.xlane.xlu1 %5893 }
0x1315   :  { %v5892_v44 = vpop.xlane.xlu0 %5891 }
0x1316   :  { %14041 = vrcp.f32 %v5892_v44  ;;  %v18803_v44 = vld [vmem:[#allocation46_spill] sm:$0xff] }
0x1317   :  { %14043 = vrcp.f32 %v5894_v55 }
0x1318   :  { %v5898_v26 = vpop.xlane.xlu1 %5897 }
0x131c   :  { %v5896_v24 = vpop.xlane.xlu1 %5895  ;;  %6847 = vmax.xlane.f32.xlu1 %v17465_v15 }
0x131d   :  { %14045 = vrcp.f32 %v5896_v24  ;;  %v5900_v42 = vpop.xlane.xlu0 %5899  ;;  %v6828_v24 = vmul.f32 0.35355338, %v18804_v61 }
0x131e   :  { %14047 = vrcp.f32 %v5898_v26  ;;  %v17557_v26 = vld [vmem:[%s18488_s1 + $0x58] sm:$0xff] }
0x131f   :  { %14049 = vrcp.f32 %v5900_v42  ;;  %v17560_v22 = vadd.f32 %v17557_v26, %v6826_v36  ;;  %v17604_v36 = vld [vmem:[%s18488_s1 + $0x60] sm:$0xff] }
0x1320   :  { %v14042_v25 = vpop.eup %14041  ;;  %v5902_v21 = vpop.xlane.xlu1 %5901  ;;  %6853 = vmax.xlane.f32.xlu1 %v17476_v0 }
0x1321   :  { %v13492_v12 = vpop.permute.xlu0 %13491  ;;  %v5939_v29 = vmul.f32 %v14042_v25, %v17350_v18  ;;  %14051 = vrcp.f32 %v5902_v21  ;;  %v14044_v17 = vpop.eup %14043  ;;  %v17513_v18 = vld [vmem:[%s18488_s1 + $0x38] sm:$0xff]  ;;  %v6825_v25 = vmul.f32 0.35355338, %v18805_v4 }
0x1322   :  { %v13494_v8 = vunpack.i.h.bf16 %v13492_v12  ;;  %v13493_v34 = vunpack.i.l.bf16 %v13492_v12  ;;  %6849 = vmax.xlane.f32.xlu0 %v17485_v30  ;;  %v17516_v46 = vadd.f32 %v17513_v18, %v6822_v3  ;;  %v5940_v6 = vmul.f32 %v14044_v17, %v17348_v35  ;;  %v17545_v35 = vld [vmem:[%s18488_s1 + $0x30] sm:$0xff]  ;;  %v18806_v21 = vld [vmem:[#allocation45_spill] sm:$0xff]  ;;  %v17578_v3 = vld [vmem:[%s18488_s1 + $0x68] sm:$0xff] }
0x1323   :  { %11709 = vmatprep.mubr.f32.mxu1 %v5939_v29 }
0x1324   :  { %v5906_v60 = vpop.xlane.xlu1 %5905  ;;  %6857 = vmax.xlane.f32.xlu1 %v17496_v16  ;;  %v12655_v49 = vpack.c.bf16 %v13494_v8, %v13493_v34  ;;  %v17581_v8 = vadd.f32 %v17578_v3, %v6828_v24  ;;  %v18807_v34 = vld [vmem:[#allocation43_spill] sm:$0xff] }
0x1325   :  { %14053 = vrcp.f32 %v5906_v60  ;;  %v6830_v62 = vmul.f32 0.35355338, %v18807_v34 }
0x1326   :  { %6851 = vmax.xlane.f32.xlu0 %v17507_v20  ;;  %12656 = vmatprep.subr.bf16.mxu1 %v12655_v49 }
0x1327   :  { %v14046_v13 = vpop.eup %14045  ;;  %12658 = vmatpush3.bf16.msra.mxu1 %v12655_v49  ;;  %v17588_v49 = vld [vmem:[%s18488_s1 + $0x50] sm:$0xff] }
0x1328   :  { %v5904_v37 = vpop.xlane.xlu1 %5903  ;;  %6861 = vmax.xlane.f32.xlu1 %v17516_v46  ;;  %v5941_v54 = vmul.f32 %v14046_v13, %v17361_v32  ;;  %v14048_v59 = vpop.eup %14047  ;;  %v17548_v32 = vadd.f32 %v17545_v35, %v6821_v45  ;;  %v17591_v17 = vadd.f32 %v17588_v49, %v6825_v25  ;;  %v6827_v13 = vmul.f32 0.35355338, %v18808_v11  ;;  %v14358_v11 = vld [vmem:[#allocation2 + $0x40] sm:$0xff] }
0x1329   :  { %14055 = vrcp.f32 %v5904_v37  ;;  %v14050_v31 = vpop.eup %14049  ;;  %v5942_v55 = vmul.f32 %v14048_v59, %v17357_v63  ;;  %v17567_v63 = vld [vmem:[%s18488_s1 + $0x40] sm:$0xff] }
0x132a   :  { %6855 = vmax.xlane.f32.xlu0 %v17526_v48  ;;  %11710 = vmatmul.mubr.f32.vlgmr.msra.gmra.mrb[128].mxu1 %v5940_v6  ;;  %v5943_v40 = vmul.f32 %v14050_v31, %v18803_v44  ;;  %v17570_v42 = vadd.f32 %v17567_v63, %v6823_v33  ;;  %v17607_v27 = vadd.f32 %v17604_v36, %v6827_v13  ;;  %v18810_v33 = vld [vmem:[#allocation41_spill] sm:$0xff] }
0x132b   :  { %11712 = vmatprep.mubr.f32.mxu1 %v5941_v54  ;;  %v14052_v10 = vpop.eup %14051  ;;  %v18809_v54 = vld [vmem:[#allocation37_spill] sm:$0xff] }
0x132c   :  { %v5908_v57 = vpop.xlane.xlu1 %5907  ;;  %6865 = vmax.xlane.f32.xlu1 %v17538_v51  ;;  %v5944_v12 = vmul.f32 %v14052_v10, %v18806_v21  ;;  %v17598_v59 = vadd.f32 %v18809_v54, %v6830_v62 }
0x132d   :  { %14057 = vrcp.f32 %v5908_v57 }
0x132e   :  { %6859 = vmax.xlane.f32.xlu0 %v17548_v32  ;;  %11713 = vmatmul.mubr.f32.gmra.mrb[130].mxu1 %v5942_v55  ;;  %v17616_v55 = vld [vmem:[%s18488_s1 + $0x70] sm:$0xff] }
0x132f   :  { %11715 = vmatprep.mubr.f32.mxu1 %v5943_v40  ;;  %v14054_v29 = vpop.eup %14053 }
0x1330   :  { %v5912_v1 = vpop.xlane.xlu1 %5911  ;;  %6869 = vmax.xlane.f32.xlu1 %v17560_v22  ;;  %v5946_v6 = vmul.f32 %v14054_v29, %v17372_v2 }
0x1331   :  { %14059 = vrcp.f32 %v5912_v1 }
0x1332   :  { %6863 = vmax.xlane.f32.xlu0 %v17570_v42  ;;  %11716 = vmatmul.mubr.f32.gmra.mrb[132].mxu1 %v5944_v12 }
0x1333   :  { %v14056_v60 = vpop.eup %14055 }
0x1334   :  { %v5916_v45 = vpop.xlane.xlu1 %5915  ;;  %6873 = vmax.xlane.f32.xlu1 %v17581_v8  ;;  %v5945_v37 = vmul.f32 %v14056_v60, %v17376_v58  ;;  %v6829_v58 = vmul.f32 0.35355338, %v18810_v33 }
0x1336   :  { %6867 = vmax.xlane.f32.xlu0 %v17591_v17  ;;  %11718 = vmatprep.mubr.f32.mxu1 %v5945_v37  ;;  %v17619_v10 = vadd.f32 %v17616_v55, %v6829_v58  ;;  %v14359_v58 = vld [vmem:[#allocation2 + $0x50] sm:$0xff] }
0x1337   :  { %v14058_v31 = vpop.eup %14057  ;;  %11719 = vmatmul.mubr.f32.gmra.mrb[134].mxu1 %v5946_v6  ;;  %v18812_v6 = vld [vmem:[#allocation30_spill] sm:$0xff] }
0x1338   :  { %6877 = vmax.xlane.f32.xlu1 %v17598_v59  ;;  %v5920_v2 = vpop.xlane.xlu1 %5919  ;;  %v5947_v57 = vmul.f32 %v14058_v31, %v17380_v5  ;;  %v18813_v31 = vld [vmem:[#allocation29_spill] sm:$0xff] }
0x133a   :  { %6871 = vmax.xlane.f32.xlu0 %v17607_v27  ;;  %11721 = vmatprep.mubr.f32.mxu1 %v5947_v57 }
0x133c   :  { %v5922_v44 = vpop.xlane.xlu1 %5921 }
0x133e   :  { %6875 = vmax.xlane.f32.xlu0 %v17619_v10 }
0x1340   :  { %v13497_v40 = vpop.permute.xlu1 %13496 }
0x1341   :  { %v13499_v61 = vunpack.i.h.bf16 %v13497_v40  ;;  %v13498_v24 = vunpack.i.l.bf16 %v13497_v40  ;;  %v18814_v40 = vld [vmem:[#allocation34_spill] sm:$0xff] }
0x1343   :  { %v12739_v4 = vpack.c.bf16 %v13499_v61, %v13498_v24  ;;  %v18815_v24 = vld [vmem:[#allocation55_spill] sm:$0xff] }
0x1344   :  { %v13502_v25 = vpop.permute.xlu1 %13501 }
0x1345   :  { %v13504_v5 = vunpack.i.h.bf16 %v13502_v25  ;;  %v13503_v21 = vunpack.i.l.bf16 %v13502_v25  ;;  %12741 = vmatprep.subr.msk.bf16.mxu0 %vm14829_vm4, %v12739_v4  ;;  %v14060_v25 = vpop.eup %14059 }
0x1346   :  { %12744 = vmatpush3.bf16.xpose.msk.msra.mxu0 %vm14829_vm4, %v12739_v4 }
0x1347   :  { %v12745_v29 = vpack.c.bf16 %v13504_v5, %v13503_v21  ;;  %v18816_v5 = vld [vmem:[#allocation33_spill] sm:$0xff] }
0x1348   :  { %v13507_v34 = vpop.permute.xlu1 %13506 }
0x1349   :  { %v13509_v62 = vunpack.i.h.bf16 %v13507_v34  ;;  %v13508_v60 = vunpack.i.l.bf16 %v13507_v34  ;;  %6346 = vrot.lane.b32.xlu1 %v14358_v11, %s14417_s0  ;;  %12747 = vmatprep.subr.msk.bf16.mxu0 %vm14829_vm4, %v12745_v29  ;;  %v5949_v11 = vmul.f32 %v14060_v25, %v17383_v28  ;;  %v18818_v28 = vld [vmem:[#allocation35_spill] sm:$0xff] }
0x134b   :  { %v12751_v37 = vpack.c.bf16 %v13509_v62, %v13508_v60 }
0x134c   :  { %v13517_v13 = vpop.permute.xlu1 %13516 }
0x134d   :  { %13536 = vrot.lane.b32.xlu1 %v18812_v6, %s14427_s21 }
0x134e   :  { %12750 = vmatpush3.bf16.xpose.msk.msra.mxu0 %vm14829_vm4, %v12745_v29 }
0x134f   :  { %12753 = vmatprep.subr.msk.bf16.mxu0 %vm14829_vm4, %v12751_v37 }
0x1350   :  { %v13522_v54 = vpop.permute.xlu1 %13521 }
0x1351   :  { %13551 = vrot.lane.b32.xlu1 %v18813_v31, %s14427_s21 }
0x1352   :  { %v5910_v33 = vpop.xlane.xlu0 %5909 }
0x1353   :  { %14061 = vrcp.f32 %v5910_v33  ;;  %v13518_v33 = vunpack.i.l.bf16 %v13517_v13 }
0x1354   :  { %6149 = vrot.lane.b32.xlu0 %v14359_v58, %s14417_s0  ;;  %v13527_v57 = vpop.permute.xlu1 %13526  ;;  %14063 = vrcp.f32 %v5916_v45  ;;  %v18817_v58 = vld [vmem:[#allocation36_spill] sm:$0xff] }
0x1355   :  { %13561 = vrot.lane.b32.xlu1 %v18814_v40, %s14427_s21 }
0x1356   :  { %12756 = vmatpush3.bf16.xpose.msk.msra.mxu0 %vm14829_vm4, %v12751_v37  ;;  %v5914_v61 = vpop.xlane.xlu0 %5913 }
0x1357   :  { %14065 = vrcp.f32 %v5914_v61 }
0x1358   :  { %13541 = vrot.lane.b32.xlu0 %v18815_v24, %s14427_s21  ;;  %v13532_v4 = vpop.permute.xlu1 %13531  ;;  %14067 = vrcp.f32 %v5920_v2  ;;  %v13519_v2 = vunpack.i.h.bf16 %v13517_v13 }
0x135a   :  { %v5918_v1 = vpop.xlane.xlu0 %5917 }
0x135b   :  { %14069 = vrcp.f32 %v5918_v1 }
0x135c   :  { %13546 = vrot.lane.b32.xlu0 %v18816_v5, %s14427_s21  ;;  %v7398_v21 = vpop.permute.xlu1 %7397  ;;  %14071 = vrcp.f32 %v5922_v44 }
0x135d   :  { %v14062_v29 = vpop.eup %14061  ;;  %11955 = vmatprep.mubr.msk.f32.mxu0 %vm677_vm3, %v7398_v21 }
0x135e   :  { %v13512_v45 = vpop.permute.xlu0 %13511  ;;  %v5948_v34 = vmul.f32 %v14062_v29, %v17403_v19  ;;  %v14064_v37 = vpop.eup %14063  ;;  %v12763_v29 = vpack.c.bf16 %v13519_v2, %v13518_v33 }
0x135f   :  { %v13514_v62 = vunpack.i.h.bf16 %v13512_v45  ;;  %v13513_v60 = vunpack.i.l.bf16 %v13512_v45  ;;  %v5951_v19 = vmul.f32 %v14064_v37, %v17386_v41  ;;  %v13524_v41 = vunpack.i.h.bf16 %v13522_v54 }
0x1360   :  { %13556 = vrot.lane.b32.xlu0 %v18817_v58, %s14427_s21  ;;  %11722 = vmatmul.mubr.f32.gmra.mrb[136].mxu1 %v5948_v34  ;;  %v13523_v34 = vunpack.i.l.bf16 %v13522_v54  ;;  %v13528_v37 = vunpack.i.l.bf16 %v13527_v57  ;;  %v13533_v54 = vunpack.i.l.bf16 %v13532_v4  ;;  %v7402_v33 = vpop.permute.xlu1 %7401 }
0x1361   :  { %v14066_v61 = vpop.eup %14065  ;;  %v12757_v1 = vpack.c.bf16 %v13514_v62, %v13513_v60  ;;  %11724 = vmatprep.mubr.f32.mxu1 %v5949_v11  ;;  %v13529_v11 = vunpack.i.h.bf16 %v13527_v57 }
0x1362   :  { %v5950_v44 = vmul.f32 %v14066_v61, %v17408_v50  ;;  %v14068_v21 = vpop.eup %14067  ;;  %v12769_v60 = vpack.c.bf16 %v13524_v41, %v13523_v34  ;;  %v7400_v2 = vpop.permute.xlu0 %7399 }
0x1363   :  { %12759 = vmatprep.subr.msk.bf16.mxu0 %vm14829_vm4, %v12757_v1  ;;  %v5953_v45 = vmul.f32 %v14068_v21, %v17391_v7  ;;  %v13534_v7 = vunpack.i.h.bf16 %v13532_v4 }
0x1364   :  { %13566 = vrot.lane.b32.xlu0 %v18818_v28, %s14427_s21  ;;  %11725 = vmatmul.mubr.f32.gmra.mrb[138].mxu1 %v5950_v44  ;;  %v7406_v57 = vpop.permute.xlu1 %7405 }
0x1365   :  { %v14070_v13 = vpop.eup %14069  ;;  %12762 = vmatpush3.bf16.xpose.msk.msra.mxu0 %vm14829_vm4, %v12757_v1  ;;  %11727 = vmatprep.mubr.f32.mxu1 %v5951_v19 }
0x1366   :  { %12765 = vmatprep.subr.msk.bf16.mxu0 %vm14829_vm4, %v12763_v29  ;;  %v5952_v50 = vmul.f32 %v14070_v13, %v17413_v39  ;;  %v14072_v25 = vpop.eup %14071  ;;  %v12775_v39 = vpack.c.bf16 %v13529_v11, %v13528_v37  ;;  %v7404_v61 = vpop.permute.xlu0 %7403 }
0x1367   :  { %v5954_v62 = vmul.f32 %v14072_v25, %v17394_v9  ;;  %v12781_v9 = vpack.c.bf16 %v13534_v7, %v13533_v54 }
0x1368   :  { %11728 = vmatmul.mubr.f32.gmra.mrb[140].mxu1 %v5952_v50  ;;  %v7410_v44 = vpop.permute.xlu1 %7409 }
0x1369   :  { %11730 = vmatprep.mubr.f32.mxu1 %v5953_v45 }
0x136a   :  { %v7408_v1 = vpop.permute.xlu0 %7407 }
0x136c   :  { %11731 = vmatmul.mubr.f32.gmra.mrb[142].mxu1 %v5954_v62  ;;  %v7414_v19 = vpop.permute.xlu1 %7413 }
0x136d   :  { %12768 = vmatpush3.bf16.xpose.msk.msra.mxu0 %vm14829_vm4, %v12763_v29 }
0x136e   :  { %12771 = vmatprep.subr.msk.bf16.mxu0 %vm14829_vm4, %v12769_v60  ;;  %v7412_v4 = vpop.permute.xlu0 %7411 }
0x1370   :  { %v7418_v12 = vpop.permute.xlu1 %7417 }
0x1372   :  { %v7416_v21 = vpop.permute.xlu0 %7415 }
0x1374   :  { %v7422_v13 = vpop.permute.xlu1 %7421 }
0x1375   :  { %12774 = vmatpush3.bf16.xpose.msk.msra.mxu0 %vm14829_vm4, %v12769_v60 }
0x1376   :  { %12777 = vmatprep.subr.msk.bf16.mxu0 %vm14829_vm4, %v12775_v39  ;;  %v7420_v29 = vpop.permute.xlu0 %7419 }
0x1378   :  { %v7426_v25 = vpop.permute.xlu1 %7425 }
0x137a   :  { %v7424_v50 = vpop.permute.xlu0 %7423 }
0x137d   :  { %12780 = vmatpush3.bf16.xpose.msk.msra.mxu0 %vm14829_vm4, %v12775_v39 }
0x137e   :  { %12783 = vmatprep.subr.msk.bf16.mxu0 %vm14829_vm4, %v12781_v9  ;;  %v7428_v45 = vpop.permute.xlu0 %7427 }
0x1385   :  { %12786 = vmatpush3.bf16.xpose.msk.msra.mxu0 %vm14829_vm4, %v12781_v9 }
0x138c   :  { %11956 = vmatmul.mubr.msk.f32.vlgmr.msra.gmra.mrb[160].mxu0 %vm677_vm3, %v7400_v2 }
0x138d   :  { %11958 = vmatprep.mubr.msk.f32.mxu0 %vm677_vm3, %v7402_v33 }
0x1390   :  { %11959 = vmatmul.mubr.msk.f32.gmra.mrb[162].mxu0 %vm677_vm3, %v7404_v61 }
0x1391   :  { %11961 = vmatprep.mubr.msk.f32.mxu0 %vm677_vm3, %v7406_v57 }
0x1394   :  { %11962 = vmatmul.mubr.msk.f32.gmra.mrb[164].mxu0 %vm677_vm3, %v7408_v1 }
0x1395   :  { %11964 = vmatprep.mubr.msk.f32.mxu0 %vm677_vm3, %v7410_v44 }
0x1398   :  { %11965 = vmatmul.mubr.msk.f32.gmra.mrb[166].mxu0 %vm677_vm3, %v7412_v4 }
0x1399   :  { %11967 = vmatprep.mubr.msk.f32.mxu0 %vm677_vm3, %v7414_v19 }
0x139c   :  { %11968 = vmatmul.mubr.msk.f32.gmra.mrb[168].mxu0 %vm677_vm3, %v7416_v21 }
0x139d   :  { %11970 = vmatprep.mubr.msk.f32.mxu0 %vm677_vm3, %v7418_v12 }
0x13a0   :  { %11971 = vmatmul.mubr.msk.f32.gmra.mrb[170].mxu0 %vm677_vm3, %v7420_v29 }
0x13a1   :  { %11973 = vmatprep.mubr.msk.f32.mxu0 %vm677_vm3, %v7422_v13 }
0x13a4   :  { %11974 = vmatmul.mubr.msk.f32.gmra.mrb[172].mxu0 %vm677_vm3, %v7424_v50 }
0x13a5   :  { %11976 = vmatprep.mubr.msk.f32.mxu0 %vm677_vm3, %v7426_v25 }
0x13a8   :  { %11977 = vmatmul.mubr.msk.f32.gmra.mrb[174].mxu0 %vm677_vm3, %v7428_v45 }
0x13a9   :  { %v6848_v41 = vpop.xlane.xlu1 %6847 }
0x13aa   :  { %v6879_v34 = vsub.f32 %v17465_v15, %v6848_v41 }
0x13ac   :  { %v6895_v62 = vmul.f32 1.442695, %v6879_v34 }
0x13ad   :  { %v6854_v60 = vpop.xlane.xlu1 %6853 }
0x13ae   :  { %14073 = vpow2.f32 %v6895_v62  ;;  %v6882_v11 = vsub.f32 %v17476_v0, %v6854_v60 }
0x13af   :  { %v6850_v37 = vpop.xlane.xlu0 %6849 }
0x13b0   :  { %v6901_v39 = vmul.f32 1.442695, %v6882_v11  ;;  %v6880_v7 = vsub.f32 %v17485_v30, %v6850_v37 }
0x13b1   :  { %v6858_v54 = vpop.xlane.xlu1 %6857 }
0x13b2   :  { %14075 = vpow2.f32 %v6901_v39  ;;  %v6897_v9 = vmul.f32 1.442695, %v6880_v7  ;;  %v6884_v2 = vsub.f32 %v17496_v16, %v6858_v54 }
0x13b3   :  { %v6852_v33 = vpop.xlane.xlu0 %6851 }
0x13b4   :  { %14077 = vpow2.f32 %v6897_v9  ;;  %v6881_v61 = vsub.f32 %v17507_v20, %v6852_v33  ;;  %v6905_v1 = vmul.f32 1.442695, %v6884_v2 }
0x13b5   :  { %v6862_v57 = vpop.xlane.xlu1 %6861 }
0x13b6   :  { %v6899_v15 = vmul.f32 1.442695, %v6881_v61  ;;  %v6886_v0 = vsub.f32 %v17516_v46, %v6862_v57 }
0x13b7   :  { %v6856_v44 = vpop.xlane.xlu0 %6855 }
0x13b8   :  { %v17698_v4 = vpop.eup %14073  ;;  %14079 = vpow2.f32 %v6899_v15  ;;  %v6883_v30 = vsub.f32 %v17526_v48, %v6856_v44  ;;  %v6909_v20 = vmul.f32 1.442695, %v6886_v0 }
0x13b9   :  { %6927 = vadd.xlane.f32.xlu1 %v17698_v4  ;;  %v6866_v19 = vpop.xlane.xlu1 %6865  ;;  %14081 = vpow2.f32 %v6905_v1 }
0x13ba   :  { %v6903_v21 = vmul.f32 1.442695, %v6883_v30  ;;  %v6888_v25 = vsub.f32 %v17538_v51, %v6866_v19 }
0x13bb   :  { %v6860_v16 = vpop.xlane.xlu0 %6859 }
0x13bc   :  { %v17703_v12 = vpop.eup %14075  ;;  %14083 = vpow2.f32 %v6903_v21  ;;  %v6885_v29 = vsub.f32 %v17548_v32, %v6860_v16  ;;  %v6913_v62 = vmul.f32 1.442695, %v6888_v25 }
0x13bd   :  { %6933 = vadd.xlane.f32.xlu1 %v17703_v12  ;;  %v6870_v46 = vpop.xlane.xlu1 %6869  ;;  %14085 = vpow2.f32 %v6909_v20 }
0x13be   :  { %v17707_v13 = vpop.eup %14077  ;;  %v6907_v50 = vmul.f32 1.442695, %v6885_v29  ;;  %v6890_v60 = vsub.f32 %v17560_v22, %v6870_v46 }
0x13bf   :  { %6929 = vadd.xlane.f32.xlu0 %v17707_v13  ;;  %v6864_v48 = vpop.xlane.xlu0 %6863 }
0x13c0   :  { %v6887_v45 = vsub.f32 %v17570_v42, %v6864_v48  ;;  %14087 = vpow2.f32 %v6907_v50  ;;  %v6917_v42 = vmul.f32 1.442695, %v6890_v60 }
0x13c1   :  { %v6874_v37 = vpop.xlane.xlu1 %6873 }
0x13c2   :  { %v17712_v41 = vpop.eup %14079  ;;  %v6911_v34 = vmul.f32 1.442695, %v6887_v45  ;;  %v6892_v29 = vsub.f32 %v17581_v8, %v6874_v37 }
0x13c3   :  { %6931 = vadd.xlane.f32.xlu1 %v17712_v41  ;;  %v6868_v32 = vpop.xlane.xlu0 %6867  ;;  %v17716_v11 = vpop.eup %14081 }
0x13c4   :  { %14089 = vpow2.f32 %v6911_v34  ;;  %v6889_v7 = vsub.f32 %v17591_v17, %v6868_v32  ;;  %v6921_v50 = vmul.f32 1.442695, %v6892_v29 }
0x13c5   :  { %14091 = vpow2.f32 %v6913_v62  ;;  %v6878_v9 = vpop.xlane.xlu1 %6877 }
0x13c6   :  { %v17718_v39 = vpop.eup %14083  ;;  %14093 = vpow2.f32 %v6917_v42  ;;  %v6915_v2 = vmul.f32 1.442695, %v6889_v7 }
0x13c7   :  { %6937 = vadd.xlane.f32.xlu1 %v17716_v11  ;;  %6935 = vadd.xlane.f32.xlu0 %v17718_v39  ;;  %v6872_v51 = vpop.xlane.xlu0 %6871  ;;  %v17723_v54 = vpop.eup %14085 }
0x13c8   :  { %v6891_v33 = vsub.f32 %v17607_v27, %v6872_v51  ;;  %14095 = vpow2.f32 %v6915_v2  ;;  %v6894_v27 = vsub.f32 %v17598_v59, %v6878_v9 }
0x13c9   :  { %v6347_v44 = vpop.permute.xlu1 %6346 }
0x13ca   :  { %v17727_v61 = vpop.eup %14087  ;;  %v6919_v17 = vmul.f32 1.442695, %v6891_v33  ;;  %v6925_v21 = vmul.f32 1.442695, %v6894_v27 }
0x13cb   :  { %6941 = vadd.xlane.f32.xlu1 %v17723_v54  ;;  %v6876_v22 = vpop.xlane.xlu0 %6875 }
0x13cc   :  { %v6893_v1 = vsub.f32 %v17619_v10, %v6876_v22  ;;  %14097 = vpow2.f32 %v6919_v17 }
0x13cd   :  { %v13537_v46 = vpop.permute.xlu1 %13536 }
0x13ce   :  { %v17729_v57 = vpop.eup %14089  ;;  %v6923_v30 = vmul.f32 1.442695, %v6893_v1  ;;  %v13539_v48 = vunpack.i.h.bf16 %v13537_v46  ;;  %v13538_v25 = vunpack.i.l.bf16 %v13537_v46 }
0x13cf   :  { %6939 = vadd.xlane.f32.xlu1 %v17727_v61  ;;  %6943 = vadd.xlane.f32.xlu0 %v17729_v57  ;;  %v6150_v15 = vpop.permute.xlu0 %6149  ;;  %v17734_v0 = vpop.eup %14091 }
0x13d0   :  { %11733 = vmatprep.subr.mxu1 %v6150_v15  ;;  %v17738_v19 = vpop.eup %14093  ;;  %14099 = vpow2.f32 %v6923_v30  ;;  %v12707_v32 = vpack.c.bf16 %v13539_v48, %v13538_v25  ;;  %v18819_v48 = vld [vmem:[#allocation17_spill] sm:$0xff] }
0x13d1   :  { %11734 = vmatpush3.msra.mxu1 %v6150_v15  ;;  %14101 = vpow2.f32 %v6925_v21  ;;  %v13552_v17 = vpop.permute.xlu1 %13551 }
0x13d2   :  { %11759 = vmatprep.subr.mxu1 %v6347_v44  ;;  %v17741_v16 = vpop.eup %14095  ;;  %14103 = vpow2.f32 %v6921_v50 }
0x13d3   :  { %6945 = vadd.xlane.f32.xlu1 %v17734_v0 }
0x13d5   :  { %v13562_v50 = vpop.permute.xlu1 %13561 }
0x13d6   :  { %v17744_v10 = vpop.eup %14097 }
0x13d7   :  { %6949 = vadd.xlane.f32.xlu1 %v17738_v19 }
0x13da   :  { %v17747_v20 = vpop.eup %14099 }
0x13db   :  { %6947 = vadd.xlane.f32.xlu1 %v17741_v16  ;;  %v17752_v59 = vpop.eup %14101 }
0x13dc   :  { %v17758_v51 = vpop.eup %14103 }
0x13df   :  { %6951 = vadd.xlane.f32.xlu1 %v17744_v10 }
0x13e3   :  { %6955 = vadd.xlane.f32.xlu1 %v17747_v20 }
0x13e5   :  { %13571 = vrot.lane.b32.xlu0 %v18801_v23, %s14427_s21 }
0x13e7   :  { %6957 = vadd.xlane.f32.xlu1 %v17752_v59 }
0x13fd   :  { %v11711_v45 = vpop.f32.mrb[128].mxu1 }
0x13fe   :  { %v6069_v34 = vpop.f32.mrb[129].mxu1 }
0x13ff   :  { %11735 = vmatprep.mubr.msk.f32.mxu1 %vm677_vm3, %v6069_v34 }
0x1400   :  { %11736 = vmatmul.mubr.msk.f32.vlgmr.msra.gmra.mrb[144].mxu1 %vm677_vm3, %v11711_v45 }
0x1401   :  { %11760 = vmatpush3.msra.mxu1 %v6347_v44  ;;  %v11714_v62 = vpop.f32.mrb[130].mxu1  ;;  %v13542_v44 = vpop.permute.xlu0 %13541 }
0x1402   :  { %12708 = vmatprep.subr.bf16.mxu1 %v12707_v32  ;;  %v6079_v60 = vpop.f32.mrb[131].mxu1  ;;  %v13544_v21 = vunpack.i.h.bf16 %v13542_v44  ;;  %v13543_v29 = vunpack.i.l.bf16 %v13542_v44 }
0x1403   :  { %11738 = vmatprep.mubr.msk.f32.mxu1 %vm677_vm3, %v6079_v60  ;;  %v18820_v60 = vld [vmem:[#allocation16_spill] sm:$0xff] }
0x1404   :  { %6953 = vadd.xlane.f32.xlu0 %v17758_v51  ;;  %11739 = vmatmul.mubr.msk.f32.gmra.mrb[146].mxu1 %vm677_vm3, %v11714_v62  ;;  %v12711_v25 = vpack.c.bf16 %v13544_v21, %v13543_v29  ;;  %v13564_v21 = vunpack.i.h.bf16 %v13562_v50  ;;  %v13563_v29 = vunpack.i.l.bf16 %v13562_v50  ;;  %v18829_v50 = vld [vmem:[#allocation10_spill] sm:$0xff] }
0x1405   :  { %v11717_v8 = vpop.f32.mrb[132].mxu1  ;;  %v13547_v46 = vpop.permute.xlu0 %13546 }
0x1406   :  { %v6089_v37 = vpop.f32.mrb[133].mxu1  ;;  %v13549_v45 = vunpack.i.h.bf16 %v13547_v46  ;;  %v13548_v34 = vunpack.i.l.bf16 %v13547_v46 }
0x1407   :  { %11741 = vmatprep.mubr.msk.f32.mxu1 %vm677_vm3, %v6089_v37  ;;  %v13554_v37 = vunpack.i.h.bf16 %v13552_v17 }
0x1408   :  { %11742 = vmatmul.mubr.msk.f32.gmra.mrb[148].mxu1 %vm677_vm3, %v11717_v8  ;;  %v18821_v8 = vld [vmem:[#allocation20_spill] sm:$0xff] }
0x140a   :  { %v11720_v42 = vpop.f32.mrb[134].mxu1 }
0x140b   :  { %v6099_v7 = vpop.f32.mrb[135].mxu1 }
0x140c   :  { %11744 = vmatprep.mubr.msk.f32.mxu1 %vm677_vm3, %v6099_v7  ;;  %v12715_v7 = vpack.c.bf16 %v13549_v45, %v13548_v34 }
0x140d   :  { %11745 = vmatmul.mubr.msk.f32.gmra.mrb[150].mxu1 %vm677_vm3, %v11720_v42  ;;  %v13553_v42 = vunpack.i.l.bf16 %v13552_v17 }
0x140f   :  { %v12719_v44 = vpack.c.bf16 %v13554_v37, %v13553_v42  ;;  %v18828_v37 = vld [vmem:[#allocation23_spill] sm:$0xff]  ;;  %v12727_v42 = vpack.c.bf16 %v13564_v21, %v13563_v29 }
0x1433   :  { %v11723_v9 = vpop.f32.mrb[136].mxu1 }
0x1434   :  { %v6109_v22 = vpop.f32.mrb[137].mxu1 }
0x1435   :  { %11747 = vmatprep.mubr.msk.f32.mxu1 %vm677_vm3, %v6109_v22  ;;  %v18822_v22 = vld [vmem:[#allocation18_spill] sm:$0xff] }
0x1436   :  { %11748 = vmatmul.mubr.msk.f32.gmra.mrb[152].mxu1 %vm677_vm3, %v11723_v9  ;;  %v13557_v9 = vpop.permute.xlu0 %13556 }
0x1437   :  { %v11726_v2 = vpop.f32.mrb[138].mxu1 }
0x1438   :  { %v6119_v33 = vpop.f32.mrb[139].mxu1 }
0x1439   :  { %11750 = vmatprep.mubr.msk.f32.mxu1 %vm677_vm3, %v6119_v33 }
0x143a   :  { %11751 = vmatmul.mubr.msk.f32.gmra.mrb[154].mxu1 %vm677_vm3, %v11726_v2  ;;  %v18823_v2 = vld [vmem:[#allocation22_spill] sm:$0xff]  ;;  %v13567_v17 = vpop.permute.xlu0 %13566 }
0x143b   :  { %v11729_v15 = vpop.f32.mrb[140].mxu1 }
0x143c   :  { %v6129_v1 = vpop.f32.mrb[141].mxu1 }
0x143d   :  { %11753 = vmatprep.mubr.msk.f32.mxu1 %vm677_vm3, %v6129_v1  ;;  %v13558_v1 = vunpack.i.l.bf16 %v13557_v9 }
0x143e   :  { %11754 = vmatmul.mubr.msk.f32.gmra.mrb[156].mxu1 %vm677_vm3, %v11729_v15  ;;  %v13559_v15 = vunpack.i.h.bf16 %v13557_v9 }
0x143f   :  { %v11732_v27 = vpop.f32.mrb[142].mxu1 }
0x1440   :  { %v6139_v30 = vpop.f32.mrb[143].mxu1  ;;  %v12723_v46 = vpack.c.bf16 %v13559_v15, %v13558_v1 }
0x1441   :  { %11756 = vmatprep.mubr.msk.f32.mxu1 %vm677_vm3, %v6139_v30 }
0x1442   :  { %11757 = vmatmul.mubr.msk.f32.gmra.mrb[158].mxu1 %vm677_vm3, %v11732_v27  ;;  %v18825_v27 = vld [vmem:[#allocation24_spill] sm:$0xff] }
0x1443   :  { %11761 = vmatprep.mubr.msk.f32.mxu1 %vm677_vm3, %v18819_v48  ;;  %v18826_v48 = vld [vmem:[#allocation21_spill] sm:$0xff] }
0x1446   :  { %v6928_v62 = vpop.xlane.xlu1 %6927  ;;  %11762 = vmatmul.mubr.msk.f32.vlgmr.msra.gmra.mrb[144].mxu1 %vm677_vm3, %v18820_v60  ;;  %v13569_v60 = vunpack.i.h.bf16 %v13567_v17 }
0x1447   :  { %12710 = vmatpush3.bf16.msra.mxu1 %v12707_v32  ;;  %11764 = vmatprep.mubr.msk.f32.mxu1 %vm677_vm3, %v18821_v8  ;;  %v18824_v32 = vld [vmem:[#allocation19_spill] sm:$0xff]  ;;  %14105 = vrcp.f32 %v6928_v62  ;;  %v13568_v8 = vunpack.i.l.bf16 %v13567_v17  ;;  %v18831_v62 = vld [vmem:[#allocation64_spill] sm:$0xff]  ;;  %v18833_v17 = vld [vmem:[#allocation66_spill] sm:$0xff] }
0x1448   :  { %12712 = vmatprep.subr.bf16.mxu1 %v12711_v25 }
0x144a   :  { %11765 = vmatmul.mubr.msk.f32.gmra.mrb[146].mxu1 %vm677_vm3, %v18822_v22  ;;  %v6934_v33 = vpop.xlane.xlu1 %6933  ;;  %v12731_v22 = vpack.c.bf16 %v13569_v60, %v13568_v8  ;;  %v18834_v60 = vld [vmem:[#allocation65_spill] sm:$0xff] }
0x144b   :  { %12714 = vmatpush3.bf16.msra.mxu1 %v12711_v25  ;;  %11767 = vmatprep.mubr.msk.f32.mxu1 %vm677_vm3, %v18823_v2  ;;  %v18827_v25 = vld [vmem:[#allocation26_spill] sm:$0xff]  ;;  %v18830_v2 = vld [vmem:[#allocation25_spill] sm:$0xff] }
0x144c   :  { %12716 = vmatprep.subr.bf16.mxu1 %v12715_v7  ;;  %v6930_v45 = vpop.xlane.xlu0 %6929 }
0x144d   :  { %14107 = vrcp.f32 %v6930_v45 }
0x144e   :  { %11768 = vmatmul.mubr.msk.f32.gmra.mrb[148].mxu1 %vm677_vm3, %v18824_v32 }
0x144f   :  { %12718 = vmatpush3.bf16.msra.mxu1 %v12715_v7  ;;  %11770 = vmatprep.mubr.msk.f32.mxu1 %vm677_vm3, %v18825_v27 }
0x1450   :  { %12720 = vmatprep.subr.bf16.mxu1 %v12719_v44  ;;  %v6932_v30 = vpop.xlane.xlu1 %6931 }
0x1451   :  { %14109 = vrcp.f32 %v6932_v30  ;;  %v14106_v32 = vpop.eup %14105 }
0x1452   :  { %11771 = vmatmul.mubr.msk.f32.gmra.mrb[150].mxu1 %vm677_vm3, %v18826_v48  ;;  %14111 = vrcp.f32 %v6934_v33  ;;  %v6975_v30 = vmul.f32 %v14106_v32, %v17698_v4 }
0x1453   :  { %12722 = vmatpush3.bf16.msra.mxu1 %v12719_v44  ;;  %11773 = vmatprep.mubr.msk.f32.mxu1 %vm677_vm3, %v18827_v25  ;;  %v18832_v44 = vld [vmem:[#allocation63_spill] sm:$0xff] }
0x1454   :  { %12724 = vmatprep.subr.bf16.mxu1 %v12723_v46  ;;  %v6938_v34 = vpop.xlane.xlu1 %6937  ;;  %v6936_v7 = vpop.xlane.xlu0 %6935 }
0x1455   :  { %14113 = vrcp.f32 %v6936_v7 }
0x1456   :  { %11774 = vmatmul.mubr.msk.f32.gmra.mrb[152].mxu1 %vm677_vm3, %v18828_v37  ;;  %14115 = vrcp.f32 %v6938_v34 }
0x1457   :  { %12726 = vmatpush3.bf16.msra.mxu1 %v12723_v46  ;;  %11776 = vmatprep.mubr.msk.f32.mxu1 %vm677_vm3, %v18829_v50 }
0x1458   :  { %12728 = vmatprep.subr.bf16.mxu1 %v12727_v42  ;;  %v6942_v9 = vpop.xlane.xlu1 %6941 }
0x145a   :  { %11777 = vmatmul.mubr.msk.f32.gmra.mrb[154].mxu1 %vm677_vm3, %v18830_v2 }
0x145b   :  { %12730 = vmatpush3.bf16.msra.mxu1 %v12727_v42  ;;  %11779 = vmatprep.mubr.msk.f32.mxu1 %vm677_vm3, %v18831_v62 }
0x145c   :  { %12732 = vmatprep.subr.bf16.mxu1 %v12731_v22  ;;  %v6940_v15 = vpop.xlane.xlu1 %6939  ;;  %v6944_v1 = vpop.xlane.xlu0 %6943 }
0x145d   :  { %14117 = vrcp.f32 %v6940_v15 }
0x145e   :  { %11780 = vmatmul.mubr.msk.f32.gmra.mrb[156].mxu1 %vm677_vm3, %v18832_v44  ;;  %14119 = vrcp.f32 %v6942_v9 }
0x145f   :  { %12734 = vmatpush3.bf16.msra.mxu1 %v12731_v22  ;;  %v11957_v27 = vpop.f32.mrb[160].mxu0  ;;  %11782 = vmatprep.mubr.msk.f32.mxu1 %vm677_vm3, %v18833_v17  ;;  %v14108_v22 = vpop.eup %14107  ;;  %14121 = vrcp.f32 %v6944_v1 }
0x1460   :  { %v7591_v21 = vpop.f32.mrb[161].mxu0  ;;  %v6946_v29 = vpop.xlane.xlu1 %6945  ;;  %v7671_v8 = vmul.f32 0.35355338, %v11957_v27 }
0x1461   :  { %v7670_v46 = vmul.f32 0.35355338, %v7591_v21  ;;  %v13572_v48 = vpop.permute.xlu0 %13571  ;;  %v14110_v4 = vpop.eup %14109  ;;  %14123 = vrcp.f32 %v6946_v29 }
0x1462   :  { %v13574_v25 = vunpack.i.h.bf16 %v13572_v48  ;;  %v13573_v45 = vunpack.i.l.bf16 %v13572_v48  ;;  %11783 = vmatmul.mubr.msk.f32.gmra.mrb[158].mxu1 %vm677_vm3, %v18834_v60  ;;  %v17813_v2 = vadd.f32 %v17482_v53, %v7671_v8  ;;  %v14112_v27 = vpop.eup %14111  ;;  %v6977_v17 = vmul.f32 %v14110_v4, %v17712_v41 }
0x1463   :  { %v17809_v33 = vadd.f32 %v17462_v47, %v7670_v46  ;;  %v11960_v37 = vpop.f32.mrb[162].mxu0  ;;  %11873 = vmatprep.mubr.f32.mxu1 %v6975_v30  ;;  %v6976_v47 = vmul.f32 %v14108_v22, %v17707_v13  ;;  %v14114_v21 = vpop.eup %14113  ;;  %v6978_v30 = vmul.f32 %v14112_v27, %v17703_v12 }
0x1464   :  { %v12735_v42 = vpack.c.bf16 %v13574_v25, %v13573_v45  ;;  %v7601_v50 = vpop.f32.mrb[163].mxu0  ;;  %v6950_v7 = vpop.xlane.xlu1 %6949  ;;  %v7673_v53 = vmul.f32 0.35355338, %v11960_v37 }
0x1465   :  { %7702 = vmax.xlane.f32.xlu1 %v17809_v33  ;;  %v7672_v34 = vmul.f32 0.35355338, %v7601_v50  ;;  %v14116_v41 = vpop.eup %14115 }
0x1466   :  { %12736 = vmatprep.subr.bf16.mxu1 %v12735_v42 }
0x1467   :  { %12738 = vmatpush3.bf16.msra.mxu1 %v12735_v42  ;;  %v11963_v62 = vpop.f32.mrb[164].mxu0  ;;  %v17822_v46 = vadd.f32 %v17504_v43, %v7672_v34  ;;  %v14118_v29 = vpop.eup %14117  ;;  %v17832_v43 = vadd.f32 %v17473_v14, %v7673_v53  ;;  %v6980_v42 = vmul.f32 %v14116_v41, %v17716_v11 }
0x1468   :  { %v7675_v32 = vmul.f32 0.35355338, %v11963_v62  ;;  %v7611_v15 = vpop.f32.mrb[165].mxu0  ;;  %v6948_v44 = vpop.xlane.xlu1 %6947 }
0x1469   :  { %7704 = vmax.xlane.f32.xlu1 %v17813_v2  ;;  %14125 = vrcp.f32 %v6948_v44  ;;  %v7674_v60 = vmul.f32 0.35355338, %v7611_v15 }
0x146a   :  { %v17819_v9 = vadd.f32 %v17493_v56, %v7675_v32  ;;  %11874 = vmatmul.mubr.f32.vlgmr.msra.gmra.mrb[160].mxu1 %v6976_v47  ;;  %v6979_v56 = vmul.f32 %v14114_v21, %v17718_v39  ;;  %14127 = vrcp.f32 %v6950_v7  ;;  %v14120_v39 = vpop.eup %14119 }
0x146b   :  { %11876 = vmatprep.mubr.f32.mxu1 %v6977_v17  ;;  %v11966_v13 = vpop.f32.mrb[166].mxu0  ;;  %v14122_v50 = vpop.eup %14121  ;;  %v17842_v7 = vadd.f32 %v17523_v52, %v7674_v60  ;;  %v6982_v62 = vmul.f32 %v14120_v39, %v17723_v54 }
0x146c   :  { %v7677_v1 = vmul.f32 0.35355338, %v11966_v13  ;;  %7712 = vmax.xlane.f32.xlu0 %v17819_v9  ;;  %v7621_v48 = vpop.f32.mrb[167].mxu0  ;;  %v6952_v25 = vpop.xlane.xlu1 %6951 }
0x146d   :  { %7706 = vmax.xlane.f32.xlu1 %v17822_v46  ;;  %14129 = vrcp.f32 %v6952_v25  ;;  %v7676_v22 = vmul.f32 0.35355338, %v7621_v48  ;;  %v14124_v47 = vpop.eup %14123 }
0x146e   :  { %v17829_v45 = vadd.f32 %v17513_v18, %v7677_v1  ;;  %11877 = vmatmul.mubr.f32.gmra.mrb[162].mxu1 %v6978_v30  ;;  %v6981_v18 = vmul.f32 %v14118_v29, %v17727_v61  ;;  %v6983_v61 = vmul.f32 %v14122_v50, %v17729_v57  ;;  %v6984_v17 = vmul.f32 %v14124_v47, %v17734_v0 }
0x146f   :  { %11879 = vmatprep.mubr.f32.mxu1 %v6979_v56  ;;  %v11969_v8 = vpop.f32.mrb[168].mxu0  ;;  %v17852_v52 = vadd.f32 %v17545_v35, %v7676_v22 }
0x1470   :  { %v7679_v12 = vmul.f32 0.35355338, %v11969_v8  ;;  %7716 = vmax.xlane.f32.xlu0 %v17829_v45  ;;  %v7631_v37 = vpop.f32.mrb[169].mxu0  ;;  %v6956_v29 = vpop.xlane.xlu1 %6955 }
0x1471   :  { %7708 = vmax.xlane.f32.xlu1 %v17832_v43  ;;  %v7678_v15 = vmul.f32 0.35355338, %v7631_v37  ;;  %14131 = vrcp.f32 %v6956_v29 }
0x1472   :  { %v17839_v14 = vadd.f32 %v17535_v38, %v7679_v12  ;;  %11880 = vmatmul.mubr.f32.gmra.mrb[164].mxu1 %v6980_v42 }
0x1473   :  { %11882 = vmatprep.mubr.f32.mxu1 %v6981_v18  ;;  %v11972_v4 = vpop.f32.mrb[170].mxu0  ;;  %v14126_v38 = vpop.eup %14125  ;;  %v17862_v35 = vadd.f32 %v17567_v63, %v7678_v15 }
0x1474   :  { %v7681_v34 = vmul.f32 0.35355338, %v11972_v4  ;;  %7720 = vmax.xlane.f32.xlu0 %v17839_v14  ;;  %v7641_v11 = vpop.f32.mrb[171].mxu0  ;;  %v14128_v21 = vpop.eup %14127  ;;  %v6985_v57 = vmul.f32 %v14126_v38, %v17741_v16 }
0x1475   :  { %7710 = vmax.xlane.f32.xlu1 %v17842_v7  ;;  %v7680_v13 = vmul.f32 0.35355338, %v7641_v11  ;;  %v6986_v30 = vmul.f32 %v14128_v21, %v17738_v19 }
0x1476   :  { %v17849_v32 = vadd.f32 %v17557_v26, %v7681_v34  ;;  %11883 = vmatmul.mubr.f32.gmra.mrb[166].mxu1 %v6982_v62 }
0x1477   :  { %11885 = vmatprep.mubr.f32.mxu1 %v6983_v61  ;;  %v11975_v44 = vpop.f32.mrb[172].mxu0  ;;  %v14130_v26 = vpop.eup %14129  ;;  %v17874_v63 = vadd.f32 %v17588_v49, %v7680_v13 }
0x1478   :  { %v7683_v27 = vmul.f32 0.35355338, %v11975_v44  ;;  %7724 = vmax.xlane.f32.xlu0 %v17849_v32  ;;  %v7651_v54 = vpop.f32.mrb[173].mxu0  ;;  %v6987_v16 = vmul.f32 %v14130_v26, %v17744_v10  ;;  %v6958_v49 = vpop.xlane.xlu1 %6957 }
0x1479   :  { %7714 = vmax.xlane.f32.xlu1 %v17852_v52  ;;  %v7682_v25 = vmul.f32 0.35355338, %v7651_v54 }
0x147a   :  { %v17859_v53 = vadd.f32 %v17578_v3, %v7683_v27  ;;  %11886 = vmatmul.mubr.f32.gmra.mrb[168].mxu1 %v6984_v17  ;;  %v14360_v3 = vld [vmem:[%s18488_s1 + $0x78] sm:$0xff] }
0x147b   :  { %11888 = vmatprep.mubr.f32.mxu1 %v6985_v57  ;;  %v11978_v1 = vpop.f32.mrb[174].mxu0  ;;  %v17879_v19 = vadd.f32 %v17604_v36, %v7682_v25  ;;  %v14361_v36 = vld [vmem:[#allocation2 + $0x60] sm:$0xff]  ;;  %v14132_v8 = vpop.eup %14131 }
0x147c   :  { %v7685_v48 = vmul.f32 0.35355338, %v11978_v1  ;;  %7728 = vmax.xlane.f32.xlu0 %v17859_v53  ;;  %v7661_v0 = vpop.f32.mrb[175].mxu0  ;;  %v6989_v42 = vmul.f32 %v14132_v8, %v17747_v20 }
0x147d   :  { %7718 = vmax.xlane.f32.xlu1 %v17862_v35  ;;  %v7684_v10 = vmul.f32 0.35355338, %v7661_v0 }
0x147e   :  { %v17871_v41 = vadd.f32 %v14360_v3, %v7685_v48  ;;  %11889 = vmatmul.mubr.f32.gmra.mrb[170].mxu1 %v6986_v30 }
0x147f   :  { %11891 = vmatprep.mubr.f32.mxu1 %v6987_v16  ;;  %v17883_v56 = vadd.f32 %v17616_v55, %v7684_v10 }
0x1480   :  { %7732 = vmax.xlane.f32.xlu0 %v17871_v41 }
0x1481   :  { %7722 = vmax.xlane.f32.xlu1 %v17874_v63 }
0x1485   :  { %7726 = vmax.xlane.f32.xlu1 %v17879_v19 }
0x1489   :  { %7730 = vmax.xlane.f32.xlu1 %v17883_v56 }
0x1491   :  { %v6954_v60 = vpop.xlane.xlu0 %6953 }
0x1492   :  { %14133 = vrcp.f32 %v6954_v60 }
0x1493   :  { %14135 = vrcp.f32 %v6958_v49 }
0x1496   :  { %13576 = vrot.lane.b32.xlu0 %v18812_v6, %s14428_s9 }
0x149a   :  { %13586 = vrot.lane.b32.xlu0 %v18816_v5, %s14428_s9  ;;  %7185 = vrot.lane.b32.xlu1 %v14361_v36, %s14417_s0 }
0x149c   :  { %v14134_v55 = vpop.eup %14133 }
0x149d   :  { %v6988_v12 = vmul.f32 %v14134_v55, %v17758_v51  ;;  %v14136_v37 = vpop.eup %14135 }
0x149e   :  { %13596 = vrot.lane.b32.xlu0 %v18817_v58, %s14428_s9  ;;  %13581 = vrot.lane.b32.xlu1 %v18815_v24, %s14428_s9  ;;  %v6990_v6 = vmul.f32 %v14136_v37, %v17752_v59 }
0x149f   :  { %11892 = vmatmul.mubr.f32.gmra.mrb[172].mxu1 %v6988_v12 }
0x14a0   :  { %11894 = vmatprep.mubr.f32.mxu1 %v6989_v42 }
0x14a2   :  { %13606 = vrot.lane.b32.xlu0 %v18818_v28, %s14428_s9  ;;  %13591 = vrot.lane.b32.xlu1 %v18813_v31, %s14428_s9 }
0x14a3   :  { %11895 = vmatmul.mubr.f32.gmra.mrb[174].mxu1 %v6990_v6 }
0x14a6   :  { %13601 = vrot.lane.b32.xlu1 %v18814_v40, %s14428_s9 }
0x14f2   :  { %v7703_v5 = vpop.xlane.xlu1 %7702 }
0x14f3   :  { %v7734_v58 = vsub.f32 %v17809_v33, %v7703_v5 }
0x14f5   :  { %v7750_v24 = vmul.f32 1.442695, %v7734_v58 }
0x14f6   :  { %v7705_v51 = vpop.xlane.xlu1 %7704 }
0x14f7   :  { %14137 = vpow2.f32 %v7750_v24  ;;  %v7735_v20 = vsub.f32 %v17813_v2, %v7705_v51 }
0x14f9   :  { %v7752_v39 = vmul.f32 1.442695, %v7735_v20  ;;  %v7713_v59 = vpop.xlane.xlu0 %7712 }
0x14fa   :  { %v7707_v18 = vpop.xlane.xlu1 %7706  ;;  %v7739_v2 = vsub.f32 %v17819_v9, %v7713_v59 }
0x14fb   :  { %14139 = vpow2.f32 %v7752_v39  ;;  %v7736_v50 = vsub.f32 %v17822_v46, %v7707_v18 }
0x14fc   :  { %v7760_v15 = vmul.f32 1.442695, %v7739_v2 }
0x14fd   :  { %v7717_v28 = vpop.xlane.xlu0 %7716  ;;  %v7754_v33 = vmul.f32 1.442695, %v7736_v50 }
0x14fe   :  { %v7709_v31 = vpop.xlane.xlu1 %7708 }
0x14ff   :  { %v7737_v22 = vsub.f32 %v17832_v43, %v7709_v31  ;;  %v7741_v43 = vsub.f32 %v17829_v45, %v7717_v28 }
0x1501   :  { %v17908_v4 = vpop.eup %14137  ;;  %v7756_v40 = vmul.f32 1.442695, %v7737_v22  ;;  %v7721_v34 = vpop.xlane.xlu0 %7720  ;;  %v7764_v27 = vmul.f32 1.442695, %v7741_v43 }
0x1502   :  { %v7711_v11 = vpop.xlane.xlu1 %7710  ;;  %7782 = vadd.xlane.f32.xlu1 %v17908_v4  ;;  %v7743_v45 = vsub.f32 %v17839_v14, %v7721_v34 }
0x1503   :  { %14141 = vpow2.f32 %v7756_v40  ;;  %v7738_v62 = vsub.f32 %v17842_v7, %v7711_v11 }
0x1504   :  { %14143 = vpow2.f32 %v7754_v33  ;;  %v7768_v0 = vmul.f32 1.442695, %v7743_v45 }
0x1505   :  { %v17913_v47 = vpop.eup %14139  ;;  %v7758_v61 = vmul.f32 1.442695, %v7738_v62  ;;  %v7725_v46 = vpop.xlane.xlu0 %7724 }
0x1506   :  { %v7715_v38 = vpop.xlane.xlu1 %7714  ;;  %7784 = vadd.xlane.f32.xlu0 %v17913_v47 }
0x1507   :  { %14145 = vpow2.f32 %v7758_v61  ;;  %v7740_v9 = vsub.f32 %v17852_v52, %v7715_v38 }
0x1508   :  { %14147 = vpow2.f32 %v7760_v15  ;;  %v14362_v15 = vld [vmem:[#allocation2 + $0x70] sm:$0xff] }
0x1509   :  { %v17917_v44 = vpop.xlane.xlu0 %7728  ;;  %14149 = vpow2.f32 %v7764_v27  ;;  %v7762_v13 = vmul.f32 1.442695, %v7740_v9 }
0x150a   :  { %v7719_v54 = vpop.xlane.xlu1 %7718  ;;  %v7747_v39 = vsub.f32 %v17859_v53, %v17917_v44 }
0x150b   :  { %v7742_v7 = vsub.f32 %v17862_v35, %v7719_v54  ;;  %v7745_v35 = vsub.f32 %v17849_v32, %v7725_v46 }
0x150d   :  { %v17921_v17 = vpop.eup %14141  ;;  %v7766_v21 = vmul.f32 1.442695, %v7742_v7  ;;  %v7733_v57 = vpop.xlane.xlu0 %7732  ;;  %v7772_v3 = vmul.f32 1.442695, %v7745_v35 }
0x150e   :  { %v7723_v26 = vpop.xlane.xlu1 %7722  ;;  %7788 = vadd.xlane.f32.xlu1 %v17921_v17  ;;  %v17925_v1 = vpop.eup %14143  ;;  %v7749_v6 = vsub.f32 %v17871_v41, %v7733_v57 }
0x150f   :  { %14151 = vpow2.f32 %v7766_v21  ;;  %v7744_v25 = vsub.f32 %v17874_v63, %v7723_v26 }
0x1510   :  { %14153 = vpow2.f32 %v7762_v13  ;;  %v7780_v58 = vmul.f32 1.442695, %v7749_v6 }
0x1511   :  { %v17927_v48 = vpop.eup %14145  ;;  %v13577_v14 = vpop.permute.xlu0 %13576  ;;  %14155 = vpow2.f32 %v7768_v0  ;;  %v7770_v36 = vmul.f32 1.442695, %v7744_v25 }
0x1512   :  { %v7727_v52 = vpop.xlane.xlu1 %7726  ;;  %7790 = vadd.xlane.f32.xlu0 %v17927_v48  ;;  %7786 = vadd.xlane.f32.xlu1 %v17925_v1  ;;  %v17932_v30 = vpop.eup %14147  ;;  %v13579_v10 = vunpack.i.h.bf16 %v13577_v14  ;;  %v13578_v29 = vunpack.i.l.bf16 %v13577_v14  ;;  %14157 = vpow2.f32 %v7772_v3 }
0x1513   :  { %v17936_v49 = vpop.eup %14149  ;;  %v7746_v55 = vsub.f32 %v17879_v19, %v7727_v52  ;;  %14159 = vpow2.f32 %v7770_v36 }
0x1514   :  { %v12787_v8 = vpack.c.bf16 %v13579_v10, %v13578_v29 }
0x1515   :  { %v7774_v63 = vmul.f32 1.442695, %v7746_v55  ;;  %v13587_v28 = vpop.permute.xlu0 %13586 }
0x1516   :  { %7792 = vadd.xlane.f32.xlu1 %v17932_v30  ;;  %v7731_v16 = vpop.xlane.xlu1 %7730  ;;  %v13589_v22 = vunpack.i.h.bf16 %v13587_v28  ;;  %v13588_v40 = vunpack.i.l.bf16 %v13587_v28 }
0x1517   :  { %v7748_v37 = vsub.f32 %v17883_v56, %v7731_v16  ;;  %14161 = vpow2.f32 %v7774_v63 }
0x1518   :  { %v12795_v53 = vpack.c.bf16 %v13589_v22, %v13588_v40 }
0x1519   :  { %v17938_v60 = vpop.eup %14151  ;;  %v7778_v5 = vmul.f32 1.442695, %v7748_v37  ;;  %v13597_v46 = vpop.permute.xlu0 %13596 }
0x151a   :  { %7798 = vadd.xlane.f32.xlu0 %v17938_v60  ;;  %7796 = vadd.xlane.f32.xlu1 %v17936_v49  ;;  %v7186_v32 = vpop.permute.xlu1 %7185  ;;  %v17943_v12 = vpop.eup %14153  ;;  %v13599_v44 = vunpack.i.h.bf16 %v13597_v46  ;;  %v13598_v27 = vunpack.i.l.bf16 %v13597_v46 }
0x151b   :  { %11897 = vmatprep.subr.mxu1 %v7186_v32  ;;  %v17947_v42 = vpop.eup %14155  ;;  %14163 = vpow2.f32 %v7778_v5 }
0x151c   :  { %11898 = vmatpush3.msra.mxu1 %v7186_v32  ;;  %v17951_v19 = vpop.eup %14157  ;;  %14165 = vpow2.f32 %v7780_v58  ;;  %v12803_v45 = vpack.c.bf16 %v13599_v44, %v13598_v27 }
0x151d   :  { %12788 = vmatprep.subr.bf16.mxu1 %v12787_v8  ;;  %v17954_v24 = vpop.eup %14159  ;;  %v13607_v13 = vpop.permute.xlu0 %13606 }
0x151e   :  { %7794 = vadd.xlane.f32.xlu1 %v17943_v12  ;;  %v13582_v20 = vpop.permute.xlu1 %13581  ;;  %v13609_v14 = vunpack.i.h.bf16 %v13607_v13  ;;  %v13608_v16 = vunpack.i.l.bf16 %v13607_v13 }
0x151f   :  { %v13584_v59 = vunpack.i.h.bf16 %v13582_v20  ;;  %v13583_v18 = vunpack.i.l.bf16 %v13582_v20 }
0x1520   :  { %v12811_v29 = vpack.c.bf16 %v13609_v14, %v13608_v16 }
0x1521   :  { %v17957_v56 = vpop.eup %14161  ;;  %v12791_v34 = vpack.c.bf16 %v13584_v59, %v13583_v18 }
0x1522   :  { %7800 = vadd.xlane.f32.xlu1 %v17947_v42  ;;  %v13592_v33 = vpop.permute.xlu1 %13591 }
0x1523   :  { %v13594_v62 = vunpack.i.h.bf16 %v13592_v33  ;;  %v13593_v61 = vunpack.i.l.bf16 %v13592_v33 }
0x1525   :  { %v17962_v41 = vpop.eup %14163  ;;  %v12799_v54 = vpack.c.bf16 %v13594_v62, %v13593_v61 }
0x1526   :  { %7804 = vadd.xlane.f32.xlu1 %v17951_v19  ;;  %v17965_v51 = vpop.eup %14165  ;;  %v13602_v9 = vpop.permute.xlu1 %13601 }
0x1527   :  { %v13604_v57 = vunpack.i.h.bf16 %v13602_v9  ;;  %v13603_v26 = vunpack.i.l.bf16 %v13602_v9 }
0x1529   :  { %v12807_v3 = vpack.c.bf16 %v13604_v57, %v13603_v26 }
0x152a   :  { %7802 = vadd.xlane.f32.xlu1 %v17954_v24 }
0x152e   :  { %7806 = vadd.xlane.f32.xlu1 %v17957_v56 }
0x1530   :  { %13611 = vrot.lane.b32.xlu0 %v18801_v23, %s14428_s9  ;;  %v7776_v23 = vmul.f32 1.442695, %v7747_v39 }
0x1532   :  { %7810 = vadd.xlane.f32.xlu1 %v17962_v41  ;;  %14167 = vpow2.f32 %v7776_v23 }
0x1536   :  { %7812 = vadd.xlane.f32.xlu1 %v17965_v51 }
0x153c   :  { %v17979_v52 = vpop.eup %14167 }
0x153d   :  { %v11875_v50 = vpop.f32.mrb[160].mxu1 }
0x153e   :  { %v7105_v31 = vpop.f32.mrb[161].mxu1 }
0x153f   :  { %11899 = vmatprep.mubr.msk.f32.mxu1 %vm677_vm3, %v7105_v31 }
0x1540   :  { %11900 = vmatmul.mubr.msk.f32.vlgmr.msra.gmra.mrb[144].mxu1 %vm677_vm3, %v11875_v50 }
0x1541   :  { %12790 = vmatpush3.bf16.msra.mxu1 %v12787_v8  ;;  %v11878_v11 = vpop.f32.mrb[162].mxu1 }
0x1542   :  { %12792 = vmatprep.subr.bf16.mxu1 %v12791_v34  ;;  %v7115_v2 = vpop.f32.mrb[163].mxu1 }
0x1543   :  { %11902 = vmatprep.mubr.msk.f32.mxu1 %vm677_vm3, %v7115_v2 }
0x1544   :  { %11903 = vmatmul.mubr.msk.f32.gmra.mrb[146].mxu1 %vm677_vm3, %v11878_v11 }
0x1545   :  { %12794 = vmatpush3.bf16.msra.mxu1 %v12791_v34  ;;  %v11881_v43 = vpop.f32.mrb[164].mxu1 }
0x1546   :  { %12796 = vmatprep.subr.bf16.mxu1 %v12795_v53  ;;  %v7125_v38 = vpop.f32.mrb[165].mxu1 }
0x1547   :  { %11905 = vmatprep.mubr.msk.f32.mxu1 %vm677_vm3, %v7125_v38  ;;  %8040 = vrot.lane.b32.xlu1 %v14362_v15, %s14417_s0 }
0x1548   :  { %11906 = vmatmul.mubr.msk.f32.gmra.mrb[148].mxu1 %vm677_vm3, %v11881_v43 }
0x1549   :  { %12798 = vmatpush3.bf16.msra.mxu1 %v12795_v53  ;;  %v11884_v7 = vpop.f32.mrb[166].mxu1 }
0x154a   :  { %12800 = vmatprep.subr.bf16.mxu1 %v12799_v54  ;;  %v7135_v21 = vpop.f32.mrb[167].mxu1 }
0x154b   :  { %11908 = vmatprep.mubr.msk.f32.mxu1 %vm677_vm3, %v7135_v21 }
0x154c   :  { %11909 = vmatmul.mubr.msk.f32.gmra.mrb[150].mxu1 %vm677_vm3, %v11884_v7 }
0x154d   :  { %12802 = vmatpush3.bf16.msra.mxu1 %v12799_v54  ;;  %v11887_v0 = vpop.f32.mrb[168].mxu1 }
0x154e   :  { %12804 = vmatprep.subr.bf16.mxu1 %v12803_v45  ;;  %v7145_v35 = vpop.f32.mrb[169].mxu1 }
0x154f   :  { %7808 = vadd.xlane.f32.xlu0 %v17979_v52  ;;  %11911 = vmatprep.mubr.msk.f32.mxu1 %vm677_vm3, %v7145_v35 }
0x1550   :  { %11912 = vmatmul.mubr.msk.f32.gmra.mrb[152].mxu1 %vm677_vm3, %v11887_v0 }
0x1551   :  { %12806 = vmatpush3.bf16.msra.mxu1 %v12803_v45  ;;  %v11890_v25 = vpop.f32.mrb[170].mxu1 }
0x1552   :  { %12808 = vmatprep.subr.bf16.mxu1 %v12807_v3  ;;  %v7155_v10 = vpop.f32.mrb[171].mxu1 }
0x1553   :  { %11914 = vmatprep.mubr.msk.f32.mxu1 %vm677_vm3, %v7155_v10 }
0x1554   :  { %11915 = vmatmul.mubr.msk.f32.gmra.mrb[154].mxu1 %vm677_vm3, %v11890_v25  ;;  %v4580_v25 = vld [vmem:[#allocation2 + $0x58] sm:$0xff] }
0x1555   :  { %12810 = vmatpush3.bf16.msra.mxu1 %v12807_v3 }
0x1556   :  { %12812 = vmatprep.subr.bf16.mxu1 %v12811_v29 }
0x1559   :  { %12814 = vmatpush3.bf16.msra.mxu1 %v12811_v29 }
0x1572   :  { %v11893_v32 = vpop.f32.mrb[172].mxu1 }
0x1573   :  { %v7165_v36 = vpop.f32.mrb[173].mxu1 }
0x1574   :  { %11917 = vmatprep.mubr.msk.f32.mxu1 %vm677_vm3, %v7165_v36 }
0x1575   :  { %11918 = vmatmul.mubr.msk.f32.gmra.mrb[156].mxu1 %vm677_vm3, %v11893_v32 }
0x1576   :  { %v11896_v8 = vpop.f32.mrb[174].mxu1 }
0x1577   :  { %v7175_v55 = vpop.f32.mrb[175].mxu1 }
0x1578   :  { %11920 = vmatprep.mubr.msk.f32.mxu1 %vm677_vm3, %v7175_v55 }
0x1579   :  { %11921 = vmatmul.mubr.msk.f32.gmra.mrb[158].mxu1 %vm677_vm3, %v11896_v8 }
0x158f   :  { %v7783_v63 = vpop.xlane.xlu1 %7782 }
0x1590   :  { %14169 = vrcp.f32 %v7783_v63 }
0x1593   :  { %v7785_v58 = vpop.xlane.xlu0 %7784 }
0x1594   :  { %14171 = vrcp.f32 %v7785_v58 }
0x159a   :  { %v14170_v37 = vpop.eup %14169 }
0x159b   :  { %v7789_v6 = vpop.xlane.xlu1 %7788  ;;  %v7830_v5 = vmul.f32 %v14170_v37, %v17908_v4 }
0x159d   :  { %12011 = vmatprep.mubr.f32.mxu1 %v7830_v5 }
0x159e   :  { %v14172_v34 = vpop.eup %14171 }
0x159f   :  { %v7787_v20 = vpop.xlane.xlu1 %7786  ;;  %v7791_v39 = vpop.xlane.xlu0 %7790  ;;  %v7831_v11 = vmul.f32 %v14172_v34, %v17913_v47 }
0x15a0   :  { %14173 = vrcp.f32 %v7787_v20 }
0x15a1   :  { %14175 = vrcp.f32 %v7789_v6 }
0x15a2   :  { %14177 = vrcp.f32 %v7791_v39 }
0x15a3   :  { %v7793_v59 = vpop.xlane.xlu1 %7792 }
0x15a4   :  { %14179 = vrcp.f32 %v7793_v59 }
0x15a7   :  { %v7799_v18 = vpop.xlane.xlu0 %7798  ;;  %v7797_v28 = vpop.xlane.xlu1 %7796 }
0x15aa   :  { %v14174_v33 = vpop.eup %14173 }
0x15ab   :  { %v13612_v50 = vpop.permute.xlu0 %13611  ;;  %v7795_v31 = vpop.xlane.xlu1 %7794  ;;  %v7832_v62 = vmul.f32 %v14174_v33, %v17925_v1 }
0x15ac   :  { %v13614_v23 = vunpack.i.h.bf16 %v13612_v50  ;;  %v13613_v22 = vunpack.i.l.bf16 %v13612_v50  ;;  %14181 = vrcp.f32 %v7795_v31  ;;  %v14176_v2 = vpop.eup %14175  ;;  %v4584_v50 = vld [vmem:[#allocation2 + $0x78] sm:$0xff] }
0x15ad   :  { %14183 = vrcp.f32 %v7797_v28  ;;  %v14178_v61 = vpop.eup %14177  ;;  %v7833_v46 = vmul.f32 %v14176_v2, %v17921_v17  ;;  %v4582_v28 = vld [vmem:[#allocation2 + $0x68] sm:$0xff] }
0x15ae   :  { %v12815_v40 = vpack.c.bf16 %v13614_v23, %v13613_v22  ;;  %14185 = vrcp.f32 %v7799_v18  ;;  %v14180_v43 = vpop.eup %14179  ;;  %v7834_v15 = vmul.f32 %v14178_v61, %v17927_v48  ;;  %v13620_v31 = vpack.i.bf16 %v4584_v50, %v4582_v28  ;;  %v18027_v22 = vld [vmem:[%s18491_s4 + $0x8] sm:$0x3f] }
0x15af   :  { %v7801_v4 = vpop.xlane.xlu1 %7800  ;;  %v7835_v47 = vmul.f32 %v14180_v43, %v17932_v30  ;;  %v12823_v23 = vpack.c.bf16 %v4584_v50, %v4582_v28 }
0x15b0   :  { %12816 = vmatprep.subr.bf16.mxu1 %v12815_v40  ;;  %14187 = vrcp.f32 %v7801_v4  ;;  %13621 = vrot.lane.b32.xlu0 %v13620_v31, %s14418_s26 }
0x15b1   :  { %12818 = vmatpush3.bf16.msra.mxu1 %v12815_v40  ;;  %v18835_v40 = vld [vmem:[#allocation57_spill] sm:$0xff] }
0x15b2   :  { %v8255_v34 = vrot.slane %v18027_v22, %v18835_v40 }
0x15b3   :  { %v7805_v53 = vpop.xlane.xlu1 %7804 }
0x15b4   :  { %12012 = vmatmul.mubr.f32.vlgmr.msra.gmra.mrb[176].mxu1 %v7831_v11 }
0x15b5   :  { %12014 = vmatprep.mubr.f32.mxu1 %v7832_v62 }
0x15b6   :  { %v14182_v44 = vpop.eup %14181 }
0x15b7   :  { %v7803_v38 = vpop.xlane.xlu1 %7802  ;;  %v14184_v27 = vpop.eup %14183  ;;  %v7836_v1 = vmul.f32 %v14182_v44, %v17943_v12 }
0x15b8   :  { %14189 = vrcp.f32 %v7803_v38  ;;  %12015 = vmatmul.mubr.f32.gmra.mrb[178].mxu1 %v7833_v46  ;;  %v14186_v9 = vpop.eup %14185  ;;  %v7837_v17 = vmul.f32 %v14184_v27, %v17936_v49  ;;  %v18837_v46 = vld [vmem:[#allocation58_spill] sm:$0xff] }
0x15b9   :  { %14191 = vrcp.f32 %v7805_v53  ;;  %12017 = vmatprep.mubr.f32.mxu1 %v7834_v15  ;;  %v7838_v48 = vmul.f32 %v14186_v9, %v17938_v60  ;;  %v18836_v53 = vld [vmem:[#allocation56_spill] sm:$0xff] }
0x15ba   :  { %v14188_v7 = vpop.eup %14187 }
0x15bb   :  { %v7807_v54 = vpop.xlane.xlu1 %7806  ;;  %v7839_v57 = vmul.f32 %v14188_v7, %v17947_v42 }
0x15bc   :  { %14193 = vrcp.f32 %v7807_v54  ;;  %12018 = vmatmul.mubr.f32.gmra.mrb[180].mxu1 %v7835_v47  ;;  %v18838_v47 = vld [vmem:[#allocation31_spill] sm:$0xff] }
0x15bd   :  { %12020 = vmatprep.mubr.f32.mxu1 %v7836_v1  ;;  %v18839_v1 = vld [vmem:[#allocation32_spill] sm:$0xff] }
0x15bf   :  { %v7811_v21 = vpop.xlane.xlu1 %7810 }
0x15c0   :  { %12021 = vmatmul.mubr.f32.gmra.mrb[182].mxu1 %v7837_v17  ;;  %14195 = vrcp.f32 %v7811_v21 }
0x15c1   :  { %12023 = vmatprep.mubr.f32.mxu1 %v7838_v48  ;;  %v18840_v48 = vld [vmem:[#allocation61_spill] sm:$0xff] }
0x15c2   :  { %v14190_v45 = vpop.eup %14189 }
0x15c3   :  { %v14192_v30 = vpop.eup %14191  ;;  %v7813_v26 = vpop.xlane.xlu1 %7812  ;;  %v7840_v13 = vmul.f32 %v14190_v45, %v17954_v24 }
0x15c4   :  { %12024 = vmatmul.mubr.f32.gmra.mrb[184].mxu1 %v7839_v57  ;;  %v7841_v0 = vmul.f32 %v14192_v30, %v17951_v19  ;;  %v18841_v30 = vld [vmem:[#allocation49_spill] sm:$0xff] }
0x15c5   :  { %12026 = vmatprep.mubr.f32.mxu1 %v7840_v13 }
0x15c6   :  { %v14194_v12 = vpop.eup %14193 }
0x15c7   :  { %v7842_v49 = vmul.f32 %v14194_v12, %v17957_v56  ;;  %v8041_v35 = vpop.permute.xlu1 %8040  ;;  %v4578_v56 = vld [vmem:[#allocation2 + $0x48] sm:$0xff] }
0x15c8   :  { %12027 = vmatmul.mubr.f32.gmra.mrb[186].mxu1 %v7841_v0  ;;  %12035 = vmatprep.subr.mxu1 %v8041_v35  ;;  %v13615_v10 = vpack.i.bf16 %v4580_v25, %v4578_v56  ;;  %v12819_v29 = vpack.c.bf16 %v4580_v25, %v4578_v56 }
0x15c9   :  { %12029 = vmatprep.mubr.f32.mxu1 %v7842_v49  ;;  %12036 = vmatpush3.msra.mxu1 %v8041_v35  ;;  %v18842_v49 = vld [vmem:[#allocation51_spill] sm:$0xff] }
0x15ca   :  { %v14196_v42 = vpop.eup %14195  ;;  %12820 = vmatprep.subr.bf16.mxu0 %v12819_v29  ;;  %13616 = vrot.lane.b32.xlu1 %v13615_v10, %s14418_s26  ;;  %v18845_v10 = vld [vmem:[#allocation48_spill] sm:$0xff] }
0x15cb   :  { %v7844_v3 = vmul.f32 %v14196_v42, %v17962_v41  ;;  %12822 = vmatpush3.bf16.msra.mxu0 %v12819_v29  ;;  %v18843_v42 = vld [vmem:[#allocation60_spill] sm:$0xff] }
0x15cc   :  { %12824 = vmatprep.subr.bf16.mxu0 %v12823_v23 }
0x15cf   :  { %12826 = vmatpush3.bf16.msra.mxu0 %v12823_v23  ;;  %v18850_v23 = vld [vmem:[#allocation53_spill] sm:$0xff] }
0x15dc   :  { %v7809_v60 = vpop.xlane.xlu0 %7808 }
0x15dd   :  { %14197 = vrcp.f32 %v7809_v60 }
0x15de   :  { %14199 = vrcp.f32 %v7813_v26 }
0x15e7   :  { %v14198_v14 = vpop.eup %14197 }
0x15e8   :  { %v7843_v24 = vmul.f32 %v14198_v14, %v17979_v52  ;;  %v14200_v16 = vpop.eup %14199 }
0x15e9   :  { %v7845_v19 = vmul.f32 %v14200_v16, %v17965_v51 }
0x15ea   :  { %12030 = vmatmul.mubr.f32.gmra.mrb[188].mxu1 %v7843_v24 }
0x15eb   :  { %12032 = vmatprep.mubr.f32.mxu1 %v7844_v3 }
0x15ee   :  { %12033 = vmatmul.mubr.f32.gmra.mrb[190].mxu1 %v7845_v19  ;;  %v18844_v19 = vld [vmem:[#allocation59_spill] sm:$0xff] }
0x1687   :  { %v12013_v32 = vpop.f32.mrb[176].mxu1 }
0x1688   :  { %v7960_v36 = vpop.f32.mrb[177].mxu1 }
0x1689   :  { %12037 = vmatprep.mubr.msk.f32.mxu1 %vm677_vm3, %v7960_v36 }
0x168a   :  { %12038 = vmatmul.mubr.msk.f32.vlgmr.msra.gmra.mrb[144].mxu1 %vm677_vm3, %v12013_v32 }
0x168b   :  { %v12016_v41 = vpop.f32.mrb[178].mxu1 }
0x168c   :  { %v7970_v52 = vpop.f32.mrb[179].mxu1 }
0x168d   :  { %12040 = vmatprep.mubr.msk.f32.mxu1 %vm677_vm3, %v7970_v52  ;;  %v18846_v52 = vld [vmem:[#allocation47_spill] sm:$0xff] }
0x168e   :  { %12041 = vmatmul.mubr.msk.f32.gmra.mrb[146].mxu1 %vm677_vm3, %v12016_v41 }
0x168f   :  { %v12019_v51 = vpop.f32.mrb[180].mxu1 }
0x1690   :  { %v7980_v8 = vpop.f32.mrb[181].mxu1 }
0x1691   :  { %12043 = vmatprep.mubr.msk.f32.mxu1 %vm677_vm3, %v7980_v8  ;;  %v18847_v8 = vld [vmem:[#allocation62_spill] sm:$0xff] }
0x1692   :  { %12044 = vmatmul.mubr.msk.f32.gmra.mrb[148].mxu1 %vm677_vm3, %v12019_v51 }
0x1693   :  { %v12022_v55 = vpop.f32.mrb[182].mxu1 }
0x1694   :  { %v7990_v63 = vpop.f32.mrb[183].mxu1 }
0x1695   :  { %12046 = vmatprep.mubr.msk.f32.mxu1 %vm677_vm3, %v7990_v63 }
0x1696   :  { %12047 = vmatmul.mubr.msk.f32.gmra.mrb[150].mxu1 %vm677_vm3, %v12022_v55 }
0x1697   :  { %v12025_v37 = vpop.f32.mrb[184].mxu1 }
0x1698   :  { %v8000_v6 = vpop.f32.mrb[185].mxu1 }
0x1699   :  { %12049 = vmatprep.mubr.msk.f32.mxu1 %vm677_vm3, %v8000_v6 }
0x169a   :  { %12050 = vmatmul.mubr.msk.f32.gmra.mrb[152].mxu1 %vm677_vm3, %v12025_v37 }
0x169b   :  { %v12028_v5 = vpop.f32.mrb[186].mxu1 }
0x169c   :  { %v8010_v58 = vpop.f32.mrb[187].mxu1 }
0x169d   :  { %12052 = vmatprep.mubr.msk.f32.mxu1 %vm677_vm3, %v8010_v58  ;;  %v18848_v58 = vld [vmem:[#allocation50_spill] sm:$0xff] }
0x169e   :  { %12053 = vmatmul.mubr.msk.f32.gmra.mrb[154].mxu1 %vm677_vm3, %v12028_v5 }
0x16bd   :  { %v12031_v20 = vpop.f32.mrb[188].mxu1 }
0x16be   :  { %v8020_v39 = vpop.f32.mrb[189].mxu1 }
0x16bf   :  { %12055 = vmatprep.mubr.msk.f32.mxu1 %vm677_vm3, %v8020_v39 }
0x16c0   :  { %12056 = vmatmul.mubr.msk.f32.gmra.mrb[156].mxu1 %vm677_vm3, %v12031_v20 }
0x16c1   :  { %v12034_v59 = vpop.f32.mrb[190].mxu1 }
0x16c2   :  { %v8030_v18 = vpop.f32.mrb[191].mxu1 }
0x16c3   :  { %12058 = vmatprep.mubr.msk.f32.mxu1 %vm677_vm3, %v8030_v18 }
0x16c4   :  { %12059 = vmatmul.mubr.msk.f32.gmra.mrb[158].mxu1 %vm677_vm3, %v12034_v59  ;;  %v18849_v59 = vld [vmem:[#allocation52_spill] sm:$0xff] }
0x175d   :  { %v12039_v4 = vpop.f32.mrb[144].mxu1 }
0x175e   :  { %v8257_v33 = vadd.f32 %v12039_v4, %v8255_v34  ;;  %v8157_v11 = vpop.f32.mrb[145].mxu1 }
0x175f   :  { %v8256_v2 = vadd.f32 %v8255_v34, %v8157_v11 }
0x1760   :  { %v18035_v43 = vadd.f32 %v8257_v33, %v18837_v46  ;;  %v18851_v33 = vld [vmem:[#allocation54_spill] sm:$0xff]  ;;  %v13622_v46 = vpop.permute.xlu0 %13621 }
0x1761   :  { %v18032_v62 = vadd.f32 %v8256_v2, %v18836_v53  ;;  %v12042_v61 = vpop.f32.mrb[146].mxu1  ;;  %v13617_v2 = vpop.permute.xlu1 %13616 }
0x1762   :  { %v8259_v38 = vadd.f32 %v12042_v61, %v8255_v34  ;;  %v8167_v15 = vpop.f32.mrb[147].mxu1  ;;  %v13618_v53 = vunpack.i.l.bf16 %v13617_v2 }
0x1763   :  { %v8258_v44 = vadd.f32 %v8255_v34, %v8167_v15  ;;  %12069 = vmatprep.mubr.msk.f32.mxu0 %vm367_vm2, %v18032_v62  ;;  %v13623_v15 = vunpack.i.l.bf16 %v13622_v46 }
0x1764   :  { %12070 = vmatmul.mubr.msk.f32.vlgmr.msra.gmra.mrb[176].mxu0 %vm367_vm2, %v18035_v43  ;;  %v18045_v9 = vadd.f32 %v8259_v38, %v18839_v1  ;;  %v13624_v38 = vunpack.i.h.bf16 %v13622_v46 }
0x1765   :  { %v18042_v27 = vadd.f32 %v8258_v44, %v18838_v47  ;;  %v12045_v54 = vpop.f32.mrb[148].mxu1  ;;  %v18852_v47 = vld [vmem:[#allocation8_spill] sm:$0xff] }
0x1766   :  { %v8261_v17 = vadd.f32 %v12045_v54, %v8255_v34  ;;  %v8177_v7 = vpop.f32.mrb[149].mxu1  ;;  %v12831_v44 = vpack.c.bf16 %v13624_v38, %v13623_v15  ;;  %v18853_v54 = vsub.s32 4, %v18852_v47 }
0x1767   :  { %v8260_v21 = vadd.f32 %v8255_v34, %v8177_v7  ;;  %12072 = vmatprep.mubr.msk.f32.mxu0 %vm367_vm2, %v18042_v27 }
0x1768   :  { %12073 = vmatmul.mubr.msk.f32.gmra.mrb[178].mxu0 %vm367_vm2, %v18045_v9  ;;  %v18055_v26 = vadd.f32 %v8261_v17, %v18841_v30  ;;  %v18114_v1 = vrot.slane %v18027_v22, %v18853_v54 }
0x1769   :  { %v18052_v45 = vadd.f32 %v8260_v21, %v18840_v48  ;;  %v12048_v57 = vpop.f32.mrb[150].mxu1 }
0x176a   :  { %v8263_v13 = vadd.f32 %v12048_v57, %v8255_v34  ;;  %v8187_v12 = vpop.f32.mrb[151].mxu1 }
0x176b   :  { %v8262_v0 = vadd.f32 %v8255_v34, %v8187_v12  ;;  %12075 = vmatprep.mubr.msk.f32.mxu0 %vm367_vm2, %v18052_v45 }
0x176c   :  { %12076 = vmatmul.mubr.msk.f32.gmra.mrb[180].mxu0 %vm367_vm2, %v18055_v26  ;;  %v18065_v14 = vadd.f32 %v8263_v13, %v18843_v42 }
0x176d   :  { %v18062_v35 = vadd.f32 %v8262_v0, %v18842_v49  ;;  %v12051_v60 = vpop.f32.mrb[152].mxu1 }
0x176e   :  { %v8265_v24 = vadd.f32 %v12051_v60, %v8255_v34  ;;  %v8197_v16 = vpop.f32.mrb[153].mxu1 }
0x176f   :  { %v8264_v3 = vadd.f32 %v8255_v34, %v8197_v16  ;;  %12078 = vmatprep.mubr.msk.f32.mxu0 %vm367_vm2, %v18062_v35 }
0x1770   :  { %12079 = vmatmul.mubr.msk.f32.gmra.mrb[182].mxu0 %vm367_vm2, %v18065_v14  ;;  %v18075_v29 = vadd.f32 %v8265_v24, %v18845_v10 }
0x1771   :  { %v18072_v56 = vadd.f32 %v8264_v3, %v18844_v19  ;;  %v12054_v25 = vpop.f32.mrb[154].mxu1 }
0x1772   :  { %v8267_v32 = vadd.f32 %v12054_v25, %v8255_v34  ;;  %v8207_v36 = vpop.f32.mrb[155].mxu1 }
0x1773   :  { %v8266_v41 = vadd.f32 %v8255_v34, %v8207_v36  ;;  %12081 = vmatprep.mubr.msk.f32.mxu0 %vm367_vm2, %v18072_v56 }
0x1774   :  { %12082 = vmatmul.mubr.msk.f32.gmra.mrb[184].mxu0 %vm367_vm2, %v18075_v29  ;;  %v18085_v55 = vadd.f32 %v8267_v32, %v18847_v8 }
0x1775   :  { %v18082_v51 = vadd.f32 %v8266_v41, %v18846_v52 }
0x1777   :  { %12084 = vmatprep.mubr.msk.f32.mxu0 %vm367_vm2, %v18082_v51 }
0x1778   :  { %12085 = vmatmul.mubr.msk.f32.gmra.mrb[186].mxu0 %vm367_vm2, %v18085_v55 }
0x1793   :  { %v12057_v63 = vpop.f32.mrb[156].mxu1 }
0x1794   :  { %v8269_v37 = vadd.f32 %v12057_v63, %v8255_v34  ;;  %v8217_v6 = vpop.f32.mrb[157].mxu1 }
0x1795   :  { %v8268_v5 = vadd.f32 %v8255_v34, %v8217_v6 }
0x1796   :  { %v18095_v18 = vadd.f32 %v8269_v37, %v18849_v59 }
0x1797   :  { %v18092_v20 = vadd.f32 %v8268_v5, %v18848_v58  ;;  %v12060_v39 = vpop.f32.mrb[158].mxu1 }
0x1798   :  { %v8271_v28 = vadd.f32 %v12060_v39, %v8255_v34  ;;  %v8227_v50 = vpop.f32.mrb[159].mxu1 }
0x1799   :  { %v8270_v31 = vadd.f32 %v8255_v34, %v8227_v50  ;;  %12087 = vmatprep.mubr.msk.f32.mxu0 %vm367_vm2, %v18092_v20  ;;  %v13619_v34 = vunpack.i.h.bf16 %v13617_v2 }
0x179a   :  { %12088 = vmatmul.mubr.msk.f32.gmra.mrb[188].mxu0 %vm367_vm2, %v18095_v18  ;;  %v18105_v11 = vadd.f32 %v8271_v28, %v18851_v33 }
0x179b   :  { %v18102_v4 = vadd.f32 %v8270_v31, %v18850_v23  ;;  %v12827_v61 = vpack.c.bf16 %v13619_v34, %v13618_v53 }
0x179d   :  { %12090 = vmatprep.mubr.msk.f32.mxu0 %vm367_vm2, %v18102_v4  ;;  %12828 = vmatprep.subr.bf16.mxu0 %v12827_v61 }
0x179e   :  { %12091 = vmatmul.mubr.msk.f32.gmra.mrb[190].mxu0 %vm367_vm2, %v18105_v11 }
0x179f   :  { %12830 = vmatpush3.bf16.msra.mxu0 %v12827_v61 }
0x17a0   :  { %12832 = vmatprep.subr.bf16.mxu0 %v12831_v44 }
0x17a3   :  { %12834 = vmatpush3.bf16.msra.mxu0 %v12831_v44 }
0x1837   :  { %v12071_v17 = vpop.f32.mrb[176].mxu0 }
0x1838   :  { %v8412_v7 = vadd.f32 %v12071_v17, %v18114_v1  ;;  %v8406_v21 = vpop.f32.mrb[177].mxu0 }
0x1839   :  { %v8407_v48 = vadd.f32 %v8406_v21, %v18114_v1 }
0x183a   :  { %v8502_v57 = vmul.f32 0.70710677, %v8412_v7  ;;  %v8486_v31 = vmul.f32 0.5, %v8412_v7 }
0x183b   :  { %v8501_v30 = vmul.f32 0.70710677, %v8407_v48  ;;  %v12074_v13 = vpop.f32.mrb[178].mxu0  ;;  %v8485_v39 = vmul.f32 0.5, %v8407_v48 }
0x183c   :  { %14201 = verf.f32 %v8502_v57  ;;  %v8422_v12 = vadd.f32 %v12074_v13, %v18114_v1  ;;  %v8416_v0 = vpop.f32.mrb[179].mxu0 }
0x183d   :  { %14203 = verf.f32 %v8501_v30  ;;  %v8417_v49 = vadd.f32 %v8416_v0, %v18114_v1 }
0x183e   :  { %v8504_v60 = vmul.f32 0.70710677, %v8422_v12  ;;  %v8488_v7 = vmul.f32 0.5, %v8422_v12 }
0x183f   :  { %v8503_v42 = vmul.f32 0.70710677, %v8417_v49  ;;  %v12077_v24 = vpop.f32.mrb[180].mxu0  ;;  %v8487_v44 = vmul.f32 0.5, %v8417_v49 }
0x1840   :  { %14205 = verf.f32 %v8504_v60  ;;  %v8432_v16 = vadd.f32 %v12077_v24, %v18114_v1  ;;  %v8426_v3 = vpop.f32.mrb[181].mxu0 }
0x1841   :  { %14207 = verf.f32 %v8503_v42  ;;  %v8427_v19 = vadd.f32 %v8426_v3, %v18114_v1 }
0x1842   :  { %v8506_v25 = vmul.f32 0.70710677, %v8432_v16 }
0x1843   :  { %v8505_v10 = vmul.f32 0.70710677, %v8427_v19  ;;  %v12080_v32 = vpop.f32.mrb[182].mxu0  ;;  %v8489_v24 = vmul.f32 0.5, %v8427_v19 }
0x1844   :  { %14209 = verf.f32 %v8506_v25  ;;  %v8442_v36 = vadd.f32 %v12080_v32, %v18114_v1  ;;  %v8436_v41 = vpop.f32.mrb[183].mxu0  ;;  %v8490_v25 = vmul.f32 0.5, %v8432_v16 }
0x1845   :  { %14211 = verf.f32 %v8505_v10  ;;  %v8437_v52 = vadd.f32 %v8436_v41, %v18114_v1 }
0x1846   :  { %v14202_v8 = vpop.eup %14201  ;;  %v8508_v63 = vmul.f32 0.70710677, %v8442_v36 }
0x1847   :  { %v14204_v37 = vpop.eup %14203  ;;  %v8534_v6 = vadd.f32 1.0, %v14202_v8  ;;  %v8507_v5 = vmul.f32 0.70710677, %v8437_v52  ;;  %v12083_v58 = vpop.f32.mrb[184].mxu0 }
0x1848   :  { %v8533_v59 = vadd.f32 1.0, %v14204_v37  ;;  %14213 = verf.f32 %v8508_v63  ;;  %v8452_v28 = vadd.f32 %v12083_v58, %v18114_v1  ;;  %v8446_v50 = vpop.f32.mrb[185].mxu0  ;;  %v8491_v63 = vmul.f32 0.5, %v8437_v52 }
0x1849   :  { %14215 = verf.f32 %v8507_v5  ;;  %v8447_v23 = vadd.f32 %v8446_v50, %v18114_v1  ;;  %v8550_v61 = vmul.f32 %v8534_v6, %v8486_v31  ;;  %v8492_v6 = vmul.f32 0.5, %v8442_v36 }
0x184a   :  { %v14206_v33 = vpop.eup %14205  ;;  %v8549_v2 = vmul.f32 %v8533_v59, %v8485_v39  ;;  %v8510_v34 = vmul.f32 0.70710677, %v8452_v28  ;;  %v8494_v31 = vmul.f32 0.5, %v8452_v28 }
0x184b   :  { %v14208_v53 = vpop.eup %14207  ;;  %v8536_v46 = vadd.f32 1.0, %v14206_v33  ;;  %v8509_v38 = vmul.f32 0.70710677, %v8447_v23  ;;  %v12086_v15 = vpop.f32.mrb[186].mxu0  ;;  %v8493_v59 = vmul.f32 0.5, %v8447_v23 }
0x184c   :  { %v8535_v54 = vadd.f32 1.0, %v14208_v53  ;;  %14217 = verf.f32 %v8510_v34  ;;  %v8462_v17 = vadd.f32 %v12086_v15, %v18114_v1  ;;  %v8456_v21 = vpop.f32.mrb[187].mxu0  ;;  %12101 = vmatprep.mubr.msk.f32.mxu0 %vm367_vm2, %v8549_v2 }
0x184d   :  { %14219 = verf.f32 %v8509_v38  ;;  %v8457_v48 = vadd.f32 %v8456_v21, %v18114_v1  ;;  %12102 = vmatmul.mubr.msk.f32.vlgmr.msra.gmra.mrb[192].mxu0 %vm367_vm2, %v8550_v61  ;;  %v8552_v60 = vmul.f32 %v8536_v46, %v8488_v7 }
0x184e   :  { %v14210_v57 = vpop.eup %14209  ;;  %v8551_v30 = vmul.f32 %v8535_v54, %v8487_v44  ;;  %v8512_v13 = vmul.f32 0.70710677, %v8462_v17  ;;  %v8496_v46 = vmul.f32 0.5, %v8462_v17 }
0x184f   :  { %v14212_v0 = vpop.eup %14211  ;;  %v8538_v42 = vadd.f32 1.0, %v14210_v57  ;;  %v8511_v49 = vmul.f32 0.70710677, %v8457_v48  ;;  %v8495_v36 = vmul.f32 0.5, %v8457_v48 }
0x1850   :  { %v8537_v3 = vadd.f32 1.0, %v14212_v0  ;;  %14221 = verf.f32 %v8512_v13  ;;  %12104 = vmatprep.mubr.msk.f32.mxu0 %vm367_vm2, %v8551_v30 }
0x1851   :  { %14223 = verf.f32 %v8511_v49  ;;  %12105 = vmatmul.mubr.msk.f32.gmra.mrb[194].mxu0 %vm367_vm2, %v8552_v60  ;;  %v8554_v41 = vmul.f32 %v8538_v42, %v8490_v25 }
0x1852   :  { %v14214_v12 = vpop.eup %14213  ;;  %v8553_v10 = vmul.f32 %v8537_v3, %v8489_v24 }
0x1853   :  { %v14216_v32 = vpop.eup %14215  ;;  %v8540_v8 = vadd.f32 1.0, %v14214_v12 }
0x1854   :  { %v8539_v37 = vadd.f32 1.0, %v14216_v32  ;;  %12107 = vmatprep.mubr.msk.f32.mxu0 %vm367_vm2, %v8553_v10 }
0x1855   :  { %12108 = vmatmul.mubr.msk.f32.gmra.mrb[196].mxu0 %vm367_vm2, %v8554_v41  ;;  %v8556_v39 = vmul.f32 %v8540_v8, %v8492_v6 }
0x1856   :  { %v14218_v19 = vpop.eup %14217  ;;  %v8555_v5 = vmul.f32 %v8539_v37, %v8491_v63 }
0x1857   :  { %v14220_v58 = vpop.eup %14219  ;;  %v8542_v16 = vadd.f32 1.0, %v14218_v19 }
0x1858   :  { %v8541_v50 = vadd.f32 1.0, %v14220_v58  ;;  %12110 = vmatprep.mubr.msk.f32.mxu0 %vm367_vm2, %v8555_v5  ;;  %v18854_v5 = vsub.s32 5, %v18852_v47 }
0x1859   :  { %12111 = vmatmul.mubr.msk.f32.gmra.mrb[198].mxu0 %vm367_vm2, %v8556_v39  ;;  %v8558_v34 = vmul.f32 %v8542_v16, %v8494_v31  ;;  %v14364_v16 = vld [vmem:[%s18492_s5] sm:$0xf] }
0x185a   :  { %v14222_v33 = vpop.eup %14221  ;;  %v8557_v52 = vmul.f32 %v8541_v50, %v8493_v59  ;;  %v18151_v58 = vrot.slane %v18027_v22, %v18854_v5  ;;  %v18855_v59 = vld [vmem:[#allocation27_spill] sm:$0xff] }
0x185b   :  { %v14224_v2 = vpop.eup %14223  ;;  %v8544_v53 = vadd.f32 1.0, %v14222_v33  ;;  %v18157_v50 = vrot.slane %v14364_v16, %v18855_v59 }
0x185c   :  { %v8543_v61 = vadd.f32 1.0, %v14224_v2  ;;  %12113 = vmatprep.mubr.msk.f32.mxu0 %vm367_vm2, %v8557_v52 }
0x185d   :  { %12114 = vmatmul.mubr.msk.f32.gmra.mrb[200].mxu0 %vm367_vm2, %v8558_v34  ;;  %v8560_v23 = vmul.f32 %v8544_v53, %v8496_v46 }
0x185e   :  { %v8559_v38 = vmul.f32 %v8543_v61, %v8495_v36 }
0x1860   :  { %12116 = vmatprep.mubr.msk.f32.mxu0 %vm367_vm2, %v8559_v38 }
0x1861   :  { %12117 = vmatmul.mubr.msk.f32.gmra.mrb[202].mxu0 %vm367_vm2, %v8560_v23 }
0x186d   :  { %v12089_v28 = vpop.f32.mrb[188].mxu0 }
0x186e   :  { %v8472_v15 = vadd.f32 %v12089_v28, %v18114_v1  ;;  %v8466_v44 = vpop.f32.mrb[189].mxu0 }
0x186f   :  { %v8467_v54 = vadd.f32 %v8466_v44, %v18114_v1 }
0x1870   :  { %v8514_v21 = vmul.f32 0.70710677, %v8472_v15  ;;  %v8498_v25 = vmul.f32 0.5, %v8472_v15 }
0x1871   :  { %v8513_v7 = vmul.f32 0.70710677, %v8467_v54  ;;  %v12092_v48 = vpop.f32.mrb[190].mxu0  ;;  %v8497_v24 = vmul.f32 0.5, %v8467_v54 }
0x1872   :  { %14225 = verf.f32 %v8514_v21  ;;  %v8482_v17 = vadd.f32 %v12092_v48, %v18114_v1  ;;  %v8476_v57 = vpop.f32.mrb[191].mxu0 }
0x1873   :  { %14227 = verf.f32 %v8513_v7  ;;  %v8477_v30 = vadd.f32 %v8476_v57, %v18114_v1 }
0x1874   :  { %v8516_v13 = vmul.f32 0.70710677, %v8482_v17  ;;  %v8500_v1 = vmul.f32 0.5, %v8482_v17 }
0x1875   :  { %v8515_v0 = vmul.f32 0.70710677, %v8477_v30  ;;  %v8499_v63 = vmul.f32 0.5, %v8477_v30 }
0x1876   :  { %14229 = verf.f32 %v8516_v13 }
0x1877   :  { %14231 = verf.f32 %v8515_v0 }
0x187c   :  { %v14226_v60 = vpop.eup %14225 }
0x187d   :  { %v14228_v42 = vpop.eup %14227  ;;  %v8546_v49 = vadd.f32 1.0, %v14226_v60 }
0x187e   :  { %v8545_v3 = vadd.f32 1.0, %v14228_v42 }
0x187f   :  { %v8562_v41 = vmul.f32 %v8546_v49, %v8498_v25 }
0x1880   :  { %v14230_v12 = vpop.eup %14229  ;;  %v8561_v10 = vmul.f32 %v8545_v3, %v8497_v24 }
0x1881   :  { %v14232_v32 = vpop.eup %14231  ;;  %v8548_v8 = vadd.f32 1.0, %v14230_v12 }
0x1882   :  { %v8547_v37 = vadd.f32 1.0, %v14232_v32  ;;  %12119 = vmatprep.mubr.msk.f32.mxu0 %vm367_vm2, %v8561_v10 }
0x1883   :  { %12120 = vmatmul.mubr.msk.f32.gmra.mrb[204].mxu0 %vm367_vm2, %v8562_v41  ;;  %v8564_v19 = vmul.f32 %v8548_v8, %v8500_v1 }
0x1884   :  { %v8563_v6 = vmul.f32 %v8547_v37, %v8499_v63 }
0x1886   :  { %12122 = vmatprep.mubr.msk.f32.mxu0 %vm367_vm2, %v8563_v6 }
0x1887   :  { %12123 = vmatmul.mubr.msk.f32.gmra.mrb[206].mxu0 %vm367_vm2, %v8564_v19 }
0x1920   :  { %v12103_v39 = vpop.f32.mrb[192].mxu0 }
0x1921   :  { %v8705_v31 = vadd.f32 %v12103_v39, %v18151_v58  ;;  %v8699_v33 = vpop.f32.mrb[193].mxu0 }
0x1922   :  { %v8700_v52 = vadd.f32 %v8699_v33, %v18151_v58 }
0x1923   :  { %v18162_v2 = vadd.f32 %v8705_v31, %v18035_v43 }
0x1924   :  { %v18165_v47 = vadd.f32 %v8700_v52, %v18032_v62  ;;  %v12106_v22 = vpop.f32.mrb[194].mxu0 }
0x1925   :  { %v8715_v34 = vadd.f32 %v12106_v22, %v18151_v58  ;;  %v8709_v53 = vpop.f32.mrb[195].mxu0  ;;  %v8799_v36 = vmul.f32 %v18157_v50, %v18162_v2 }
0x1926   :  { %v8710_v61 = vadd.f32 %v8709_v53, %v18151_v58  ;;  %v8798_v46 = vmul.f32 %v18157_v50, %v18165_v47 }
0x1927   :  { %v18174_v38 = vadd.f32 %v8715_v34, %v18045_v9  ;;  %v8817_v43 = vsel %vm367_vm2, %v8799_v36, 0.0 }
0x1928   :  { %v18178_v62 = vadd.f32 %v8710_v61, %v18042_v27  ;;  %8818 = vadd.xlane.f32.xlu0 %v8817_v43  ;;  %v12109_v23 = vpop.f32.mrb[196].mxu0  ;;  %v8814_v28 = vsel %vm367_vm2, %v8798_v46, 0.0 }
0x1929   :  { %v8725_v15 = vadd.f32 %v12109_v23, %v18151_v58  ;;  %v8719_v44 = vpop.f32.mrb[197].mxu0  ;;  %8815 = vadd.xlane.f32.xlu1 %v8814_v28  ;;  %v8801_v54 = vmul.f32 %v18157_v50, %v18174_v38 }
0x192a   :  { %v8720_v21 = vadd.f32 %v8719_v44, %v18151_v58  ;;  %v8800_v17 = vmul.f32 %v18157_v50, %v18178_v62 }
0x192b   :  { %v18186_v9 = vadd.f32 %v8725_v15, %v18055_v26  ;;  %v8823_v7 = vsel %vm367_vm2, %v8801_v54, 0.0 }
0x192c   :  { %v18190_v27 = vadd.f32 %v8720_v21, %v18052_v45  ;;  %v12112_v48 = vpop.f32.mrb[198].mxu0  ;;  %v8820_v49 = vsel %vm367_vm2, %v8800_v17, 0.0 }
0x192d   :  { %v8735_v57 = vadd.f32 %v12112_v48, %v18151_v58  ;;  %v8729_v30 = vpop.f32.mrb[199].mxu0  ;;  %8824 = vadd.xlane.f32.xlu1 %v8823_v7  ;;  %v8803_v13 = vmul.f32 %v18157_v50, %v18186_v9 }
0x192e   :  { %v8730_v0 = vadd.f32 %v8729_v30, %v18151_v58  ;;  %v8802_v45 = vmul.f32 %v18157_v50, %v18190_v27 }
0x192f   :  { %v18199_v26 = vadd.f32 %v8735_v57, %v18065_v14  ;;  %v8829_v60 = vsel %vm367_vm2, %v8803_v13, 0.0 }
0x1930   :  { %8830 = vadd.xlane.f32.xlu0 %v8829_v60  ;;  %v12115_v42 = vpop.f32.mrb[200].mxu0  ;;  %v18207_v25 = vadd.f32 %v8730_v0, %v18062_v35  ;;  %v8826_v32 = vsel %vm367_vm2, %v8802_v45, 0.0  ;;  %v9263_v0 = vld [vmem:[%s18493_s6 + $0x8] sm:$0xff]  ;;  %v9265_v60 = vld [vmem:[%s18493_s6 + $0x18] sm:$0xff] }
0x1931   :  { %v8745_v24 = vadd.f32 %v12115_v42, %v18151_v58  ;;  %v8739_v3 = vpop.f32.mrb[201].mxu0  ;;  %8821 = vadd.xlane.f32.xlu1 %v8820_v49  ;;  %v8805_v14 = vmul.f32 %v18157_v50, %v18199_v26  ;;  %v12835_v42 = vpack.c.bf16 %v9265_v60, %v9263_v0  ;;  %v9269_v49 = vld [vmem:[%s18493_s6 + $0x38] sm:$0xff] }
0x1932   :  { %v8740_v12 = vadd.f32 %v8739_v3, %v18151_v58  ;;  %v8804_v6 = vmul.f32 %v18157_v50, %v18207_v25 }
0x1933   :  { %v18213_v10 = vadd.f32 %v8745_v24, %v18075_v29  ;;  %v8835_v1 = vsel %vm367_vm2, %v8805_v14, 0.0  ;;  %12836 = vmatprep.subr.bf16.mxu1 %v12835_v42 }
0x1934   :  { %v18217_v41 = vadd.f32 %v8740_v12, %v18072_v56  ;;  %v12118_v8 = vpop.f32.mrb[202].mxu0  ;;  %8827 = vadd.xlane.f32.xlu0 %v8826_v32  ;;  %v8832_v16 = vsel %vm367_vm2, %v8804_v6, 0.0  ;;  %12838 = vmatpush3.bf16.msra.mxu1 %v12835_v42 }
0x1935   :  { %v8755_v63 = vadd.f32 %v12118_v8, %v18151_v58  ;;  %v8749_v37 = vpop.f32.mrb[203].mxu0  ;;  %v8807_v35 = vmul.f32 %v18157_v50, %v18213_v10 }
0x1936   :  { %v8750_v19 = vadd.f32 %v8749_v37, %v18151_v58  ;;  %v8806_v5 = vmul.f32 %v18157_v50, %v18217_v41 }
0x1937   :  { %v18226_v29 = vadd.f32 %v8755_v63, %v18085_v55  ;;  %v8841_v56 = vsel %vm367_vm2, %v8807_v35, 0.0 }
0x1938   :  { %8836 = vadd.xlane.f32.xlu0 %v8835_v1  ;;  %8842 = vadd.xlane.f32.xlu1 %v8841_v56  ;;  %v18233_v39 = vadd.f32 %v8750_v19, %v18082_v51  ;;  %v8838_v59 = vsel %vm367_vm2, %v8806_v5, 0.0 }
0x1939   :  { %v8809_v55 = vmul.f32 %v18157_v50, %v18226_v29 }
0x193a   :  { %v8808_v33 = vmul.f32 %v18157_v50, %v18233_v39 }
0x193b   :  { %v8847_v31 = vsel %vm367_vm2, %v8809_v55, 0.0 }
0x193c   :  { %8833 = vadd.xlane.f32.xlu0 %v8832_v16  ;;  %8839 = vadd.xlane.f32.xlu1 %v8838_v59  ;;  %v8844_v52 = vsel %vm367_vm2, %v8808_v33, 0.0 }
0x1940   :  { %8848 = vadd.xlane.f32.xlu1 %v8847_v31 }
0x1944   :  { %8845 = vadd.xlane.f32.xlu1 %v8844_v52 }
0x1956   :  { %v12121_v51 = vpop.f32.mrb[204].mxu0 }
0x1957   :  { %v8765_v22 = vadd.f32 %v12121_v51, %v18151_v58  ;;  %v8759_v34 = vpop.f32.mrb[205].mxu0 }
0x1958   :  { %v8760_v53 = vadd.f32 %v8759_v34, %v18151_v58 }
0x1959   :  { %v18246_v36 = vadd.f32 %v8765_v22, %v18095_v18 }
0x195a   :  { %v18249_v61 = vadd.f32 %v8760_v53, %v18092_v20  ;;  %v12124_v46 = vpop.f32.mrb[206].mxu0 }
0x195b   :  { %v8775_v43 = vadd.f32 %v12124_v46, %v18151_v58  ;;  %v8769_v23 = vpop.f32.mrb[207].mxu0  ;;  %v8811_v28 = vmul.f32 %v18157_v50, %v18246_v36 }
0x195c   :  { %v8770_v15 = vadd.f32 %v8769_v23, %v18151_v58  ;;  %v8810_v18 = vmul.f32 %v18157_v50, %v18249_v61 }
0x195d   :  { %v18256_v44 = vadd.f32 %v8775_v43, %v18105_v11  ;;  %v8853_v54 = vsel %vm367_vm2, %v8811_v28, 0.0 }
0x195e   :  { %v18262_v20 = vadd.f32 %v8770_v15, %v18102_v4  ;;  %8854 = vadd.xlane.f32.xlu1 %v8853_v54  ;;  %v8850_v7 = vsel %vm367_vm2, %v8810_v18, 0.0 }
0x195f   :  { %v8813_v21 = vmul.f32 %v18157_v50, %v18256_v44 }
0x1960   :  { %v8812_v11 = vmul.f32 %v18157_v50, %v18262_v20  ;;  %v9267_v50 = vld [vmem:[%s18493_s6 + $0x28] sm:$0xff] }
0x1961   :  { %v8859_v48 = vsel %vm367_vm2, %v8813_v21, 0.0  ;;  %v12839_v12 = vpack.c.bf16 %v9269_v49, %v9267_v50 }
0x1962   :  { %8851 = vadd.xlane.f32.xlu1 %v8850_v7  ;;  %8860 = vadd.xlane.f32.xlu0 %v8859_v48  ;;  %v8856_v58 = vsel %vm367_vm2, %v8812_v11, 0.0 }
0x1963   :  { %12840 = vmatprep.subr.bf16.mxu1 %v12839_v12 }
0x1964   :  { %12842 = vmatpush3.bf16.msra.mxu1 %v12839_v12 }
0x1966   :  { %8857 = vadd.xlane.f32.xlu1 %v8856_v58 }
0x19b5   :  { %v8819_v17 = vpop.xlane.xlu0 %8818 }
0x19b6   :  { %v8868_v57 = vrot.slane %v8819_v17, 4  ;;  %v8816_v4 = vpop.xlane.xlu1 %8815 }
0x19b7   :  { %v8862_v30 = vrot.slane %v8816_v4, 4 }
0x19b8   :  { %v8869_v13 = vmax.f32 %v8819_v17, %v8868_v57 }
0x19b9   :  { %v8863_v45 = vmax.f32 %v8816_v4, %v8862_v30 }
0x19ba   :  { %v8870_v24 = vrot.slane %v8869_v13, 2  ;;  %v8825_v3 = vpop.xlane.xlu1 %8824 }
0x19bb   :  { %v8864_v14 = vrot.slane %v8863_v45, 2  ;;  %v8880_v32 = vrot.slane %v8825_v3, 4 }
0x19bc   :  { %v8871_v8 = vmax.f32 %v8869_v13, %v8870_v24 }
0x19bd   :  { %v8865_v63 = vmax.f32 %v8863_v45, %v8864_v14  ;;  %v8881_v37 = vmax.f32 %v8825_v3, %v8880_v32  ;;  %v8831_v35 = vpop.xlane.xlu0 %8830 }
0x19be   :  { %v8872_v1 = vrot.slane %v8871_v8, 1  ;;  %v8892_v6 = vrot.slane %v8831_v35, 4  ;;  %v8822_v19 = vpop.xlane.xlu1 %8821 }
0x19bf   :  { %v8866_v56 = vrot.slane %v8865_v63, 1  ;;  %v8882_v5 = vrot.slane %v8881_v37, 2  ;;  %v8874_v16 = vrot.slane %v8822_v19, 4 }
0x19c0   :  { %v8873_v59 = vmax.f32 %v8871_v8, %v8872_v1  ;;  %v8893_v55 = vmax.f32 %v8831_v35, %v8892_v6 }
0x19c1   :  { %v8867_v31 = vmax.f32 %v8865_v63, %v8866_v56  ;;  %v8883_v33 = vmax.f32 %v8881_v37, %v8882_v5  ;;  %v8875_v52 = vmax.f32 %v8822_v19, %v8874_v16  ;;  %v8828_v51 = vpop.xlane.xlu0 %8827 }
0x19c2   :  { %v8959_v22 = vsub.f32 %v8819_v17, %v8873_v59  ;;  %v8894_v34 = vrot.slane %v8893_v55, 2  ;;  %v8886_v53 = vrot.slane %v8828_v51, 4 }
0x19c3   :  { %v8958_v46 = vsub.f32 %v8816_v4, %v8867_v31  ;;  %v8884_v43 = vrot.slane %v8883_v33, 1  ;;  %v8876_v23 = vrot.slane %v8875_v52, 2 }
0x19c4   :  { %v8976_v28 = vmul.f32 1.442695, %v8959_v22  ;;  %v8895_v15 = vmax.f32 %v8893_v55, %v8894_v34  ;;  %v8887_v54 = vmax.f32 %v8828_v51, %v8886_v53 }
0x19c5   :  { %v8974_v18 = vmul.f32 1.442695, %v8958_v46  ;;  %v8885_v21 = vmax.f32 %v8883_v33, %v8884_v43  ;;  %v8877_v7 = vmax.f32 %v8875_v52, %v8876_v23  ;;  %v8837_v48 = vpop.xlane.xlu0 %8836  ;;  %v18283_v11 = vpop.xlane.xlu1 %8842 }
0x19c6   :  { %14233 = vpow2.f32 %v8976_v28  ;;  %v8896_v58 = vrot.slane %v8895_v15, 1  ;;  %v8888_v57 = vrot.slane %v8887_v54, 2  ;;  %v8904_v30 = vrot.slane %v8837_v48, 4 }
0x19c7   :  { %14235 = vpow2.f32 %v8974_v18  ;;  %v8961_v17 = vsub.f32 %v8825_v3, %v8885_v21  ;;  %v8878_v13 = vrot.slane %v8877_v7, 1  ;;  %v8916_v4 = vrot.slane %v18283_v11, 4 }
0x19c8   :  { %v8897_v0 = vmax.f32 %v8895_v15, %v8896_v58  ;;  %v8889_v60 = vmax.f32 %v8887_v54, %v8888_v57  ;;  %v8905_v50 = vmax.f32 %v8837_v48, %v8904_v30 }
0x19c9   :  { %v8980_v45 = vmul.f32 1.442695, %v8961_v17  ;;  %v8879_v42 = vmax.f32 %v8877_v7, %v8878_v13  ;;  %v8917_v49 = vmax.f32 %v18283_v11, %v8916_v4  ;;  %v18287_v24 = vpop.xlane.xlu0 %8833  ;;  %v18289_v12 = vpop.xlane.xlu1 %8839 }
0x19ca   :  { %v8963_v14 = vsub.f32 %v8831_v35, %v8897_v0  ;;  %v8890_v32 = vrot.slane %v8889_v60, 1  ;;  %v8906_v8 = vrot.slane %v8905_v50, 2  ;;  %v8898_v63 = vrot.slane %v18287_v24, 4 }
0x19cb   :  { %14237 = vpow2.f32 %v8980_v45  ;;  %v8960_v3 = vsub.f32 %v8822_v19, %v8879_v42  ;;  %v8918_v37 = vrot.slane %v8917_v49, 2  ;;  %v8910_v1 = vrot.slane %v18289_v12, 4 }
0x19cc   :  { %v8984_v6 = vmul.f32 1.442695, %v8963_v14  ;;  %v8891_v56 = vmax.f32 %v8889_v60, %v8890_v32  ;;  %v8907_v5 = vmax.f32 %v8905_v50, %v8906_v8  ;;  %v8899_v16 = vmax.f32 %v18287_v24, %v8898_v63 }
0x19cd   :  { %v8978_v59 = vmul.f32 1.442695, %v8960_v3  ;;  %v8919_v55 = vmax.f32 %v8917_v49, %v8918_v37  ;;  %v8911_v31 = vmax.f32 %v18289_v12, %v8910_v1  ;;  %v18295_v33 = vpop.xlane.xlu1 %8848 }
0x19ce   :  { %14239 = vpow2.f32 %v8984_v6  ;;  %v8962_v35 = vsub.f32 %v8828_v51, %v8891_v56  ;;  %v8908_v52 = vrot.slane %v8907_v5, 1  ;;  %v8900_v22 = vrot.slane %v8899_v16, 2 }
0x19cf   :  { %14241 = vpow2.f32 %v8978_v59  ;;  %v8920_v19 = vrot.slane %v8919_v55, 1  ;;  %v8912_v34 = vrot.slane %v8911_v31, 2  ;;  %v8928_v53 = vrot.slane %v18295_v33, 4 }
0x19d0   :  { %v18298_v46 = vpop.eup %14233  ;;  %v8982_v43 = vmul.f32 1.442695, %v8962_v35  ;;  %v8909_v23 = vmax.f32 %v8907_v5, %v8908_v52  ;;  %v8901_v28 = vmax.f32 %v8899_v16, %v8900_v22 }
0x19d1   :  { %v18300_v15 = vpop.eup %14235  ;;  %v9012_v54 = vrot.slane %v18298_v46, 4  ;;  %v8921_v18 = vmax.f32 %v8919_v55, %v8920_v19  ;;  %v8913_v21 = vmax.f32 %v8911_v31, %v8912_v34  ;;  %v8929_v51 = vmax.f32 %v18295_v33, %v8928_v53  ;;  %v18304_v7 = vpop.xlane.xlu1 %8845 }
0x19d2   :  { %v9006_v58 = vrot.slane %v18300_v15, 4  ;;  %14243 = vpow2.f32 %v8982_v43  ;;  %v8965_v57 = vsub.f32 %v8837_v48, %v8909_v23  ;;  %v8902_v30 = vrot.slane %v8901_v28, 1 }
0x19d3   :  { %v9013_v17 = vadd.f32 %v18298_v46, %v9012_v54  ;;  %v8967_v13 = vsub.f32 %v18283_v11, %v8921_v18  ;;  %v8914_v4 = vrot.slane %v8913_v21, 1  ;;  %v8930_v0 = vrot.slane %v8929_v51, 2 }
0x19d4   :  { %v9007_v60 = vadd.f32 %v18300_v15, %v9006_v58  ;;  %v8988_v50 = vmul.f32 1.442695, %v8965_v57  ;;  %v8903_v45 = vmax.f32 %v8901_v28, %v8902_v30  ;;  %v8922_v42 = vrot.slane %v18304_v7, 4 }
0x19d5   :  { %v18311_v49 = vpop.eup %14237  ;;  %v9014_v14 = vrot.slane %v9013_v17, 2  ;;  %v8992_v32 = vmul.f32 1.442695, %v8967_v13  ;;  %v8915_v8 = vmax.f32 %v8913_v21, %v8914_v4  ;;  %v8931_v63 = vmax.f32 %v8929_v51, %v8930_v0 }
0x19d6   :  { %v9008_v48 = vrot.slane %v9007_v60, 2  ;;  %v9024_v3 = vrot.slane %v18311_v49, 4  ;;  %14245 = vpow2.f32 %v8988_v50  ;;  %v8964_v11 = vsub.f32 %v18287_v24, %v8903_v45 }
0x19d7   :  { %v9015_v37 = vadd.f32 %v9014_v14, %v9013_v17  ;;  %14247 = vpow2.f32 %v8992_v32  ;;  %v8966_v1 = vsub.f32 %v18289_v12, %v8915_v8  ;;  %v8932_v6 = vrot.slane %v8931_v63, 1 }
0x19d8   :  { %v18316_v56 = vpop.eup %14239  ;;  %v9009_v5 = vadd.f32 %v9008_v48, %v9007_v60  ;;  %v9025_v16 = vadd.f32 %v18311_v49, %v9024_v3  ;;  %v8986_v59 = vmul.f32 1.442695, %v8964_v11  ;;  %v8923_v55 = vmax.f32 %v18304_v7, %v8922_v42 }
0x19d9   :  { %v18320_v31 = vpop.eup %14241  ;;  %v9016_v35 = vrot.slane %v9015_v37, 1  ;;  %v9036_v52 = vrot.slane %v18316_v56, 4  ;;  %v8990_v22 = vmul.f32 1.442695, %v8966_v1  ;;  %v8933_v24 = vmax.f32 %v8931_v63, %v8932_v6 }
0x19da   :  { %v9010_v19 = vrot.slane %v9009_v5, 1  ;;  %v9026_v34 = vrot.slane %v9025_v16, 2  ;;  %v9018_v12 = vrot.slane %v18320_v31, 4  ;;  %14249 = vpow2.f32 %v8986_v59 }
0x19db   :  { %v9017_v53 = vadd.f32 %v9016_v35, %v9015_v37  ;;  %v9037_v43 = vadd.f32 %v18316_v56, %v9036_v52  ;;  %14251 = vpow2.f32 %v8990_v22  ;;  %v8969_v23 = vsub.f32 %v18295_v33, %v8933_v24 }
0x19dc   :  { %v18326_v28 = vpop.eup %14243  ;;  %v9011_v54 = vadd.f32 %v9010_v19, %v9009_v5  ;;  %v9027_v18 = vadd.f32 %v9026_v34, %v9025_v16  ;;  %v9019_v21 = vadd.f32 %v18320_v31, %v9018_v12  ;;  %v8924_v51 = vrot.slane %v8923_v55, 2 }
0x19dd   :  { %v9038_v58 = vrot.slane %v9037_v43, 2  ;;  %v9030_v57 = vrot.slane %v18326_v28, 4  ;;  %v8996_v30 = vmul.f32 1.442695, %v8969_v23 }
0x19de   :  { %14253 = vrcp.f32 %v9011_v54  ;;  %v9028_v17 = vrot.slane %v9027_v18, 1  ;;  %v9020_v13 = vrot.slane %v9019_v21, 2  ;;  %v8925_v4 = vmax.f32 %v8923_v55, %v8924_v51 }
0x19df   :  { %v9039_v0 = vadd.f32 %v9038_v58, %v9037_v43  ;;  %v9031_v60 = vadd.f32 %v18326_v28, %v9030_v57  ;;  %14255 = vpow2.f32 %v8996_v30 }
0x19e0   :  { %v18331_v33 = vpop.eup %14245  ;;  %14257 = vrcp.f32 %v9017_v53  ;;  %v9029_v50 = vadd.f32 %v9028_v17, %v9027_v18  ;;  %v9021_v45 = vadd.f32 %v9020_v13, %v9019_v21  ;;  %v8926_v42 = vrot.slane %v8925_v4, 1 }
0x19e1   :  { %v18333_v14 = vpop.eup %14247  ;;  %v9040_v32 = vrot.slane %v9039_v0, 1  ;;  %v9032_v8 = vrot.slane %v9031_v60, 2  ;;  %v9048_v63 = vrot.slane %v18331_v33, 4 }
0x19e2   :  { %14259 = vrcp.f32 %v9029_v50  ;;  %v9022_v48 = vrot.slane %v9021_v45, 1  ;;  %v9060_v3 = vrot.slane %v18333_v14, 4  ;;  %v8927_v11 = vmax.f32 %v8925_v4, %v8926_v42 }
0x19e3   :  { %v9033_v37 = vadd.f32 %v9032_v8, %v9031_v60  ;;  %v9049_v1 = vadd.f32 %v18331_v33, %v9048_v63  ;;  %v9041_v12 = vadd.f32 %v9040_v32, %v9039_v0 }
0x19e4   :  { %v18338_v6 = vpop.eup %14249  ;;  %v9023_v5 = vadd.f32 %v9022_v48, %v9021_v45  ;;  %v9061_v16 = vadd.f32 %v18333_v14, %v9060_v3  ;;  %v8968_v59 = vsub.f32 %v18304_v7, %v8927_v11 }
0x19e5   :  { %v18342_v55 = vpop.eup %14251  ;;  %v9034_v35 = vrot.slane %v9033_v37, 1  ;;  %v9050_v52 = vrot.slane %v9049_v1, 2  ;;  %v9042_v22 = vrot.slane %v18338_v6, 4 }
0x19e6   :  { %v9062_v24 = vrot.slane %v9061_v16, 2  ;;  %v9054_v19 = vrot.slane %v18342_v55, 4  ;;  %v8994_v34 = vmul.f32 1.442695, %v8968_v59  ;;  %14261 = vrcp.f32 %v9023_v5 }
0x19e7   :  { %v9043_v53 = vadd.f32 %v18338_v6, %v9042_v22  ;;  %v9051_v43 = vadd.f32 %v9050_v52, %v9049_v1  ;;  %v9035_v54 = vadd.f32 %v9034_v35, %v9033_v37 }
0x19e8   :  { %v14254_v23 = vpop.eup %14253  ;;  %v9063_v18 = vadd.f32 %v9062_v24, %v9061_v16  ;;  %v9055_v7 = vadd.f32 %v18342_v55, %v9054_v19  ;;  %14263 = vpow2.f32 %v8994_v34 }
0x19e9   :  { %v18348_v21 = vpop.eup %14255  ;;  %v9118_v51 = vmul.f32 %v14254_v23, %v18300_v15  ;;  %v9044_v58 = vrot.slane %v9043_v53, 2  ;;  %v9052_v57 = vrot.slane %v9051_v43, 1  ;;  %14265 = vrcp.f32 %v9041_v12 }
0x19ea   :  { %v14258_v30 = vpop.eup %14257  ;;  %v9064_v17 = vrot.slane %v9063_v18, 1  ;;  %v9056_v13 = vrot.slane %v9055_v7, 2  ;;  %v9072_v4 = vrot.slane %v18348_v21, 4  ;;  %14267 = vrcp.f32 %v9035_v54 }
0x19eb   :  { %v9045_v0 = vadd.f32 %v9044_v58, %v9043_v53  ;;  %v18352_v60 = vpop.xlane.xlu1 %8854  ;;  %v9053_v50 = vadd.f32 %v9052_v57, %v9051_v43  ;;  %v9134_v45 = vmul.f32 %v9118_v51, %v18165_v47  ;;  %v9119_v63 = vmul.f32 %v14258_v30, %v18298_v46 }
0x19ec   :  { %v14260_v42 = vpop.eup %14259  ;;  %v9057_v32 = vadd.f32 %v9056_v13, %v9055_v7  ;;  %v9073_v8 = vadd.f32 %v18348_v21, %v9072_v4  ;;  %v8940_v15 = vrot.slane %v18352_v60, 4  ;;  %v9065_v3 = vadd.f32 %v9064_v17, %v9063_v18 }
0x19ed   :  { %v9046_v48 = vrot.slane %v9045_v0, 1  ;;  %14269 = vrcp.f32 %v9053_v50  ;;  %v9121_v47 = vmul.f32 %v14260_v42, %v18311_v49  ;;  %v9150_v59 = vsel %vm367_vm2, %v9134_v45, 0.0 }
0x19ee   :  { %v9074_v11 = vrot.slane %v9073_v8, 2  ;;  %v8941_v37 = vmax.f32 %v18352_v60, %v8940_v15  ;;  %v9058_v35 = vrot.slane %v9057_v32, 1  ;;  %v9135_v34 = vmul.f32 %v9119_v63, %v18162_v2 }
0x19ef   :  { %v18359_v1 = vpop.xlane.xlu1 %8851  ;;  %v18361_v5 = vpop.xlane.xlu0 %8860  ;;  %v9047_v16 = vadd.f32 %v9046_v48, %v9045_v0  ;;  %v9151_v49 = vrot.slane %v9150_v59, 4  ;;  %v9137_v51 = vmul.f32 %v9121_v47, %v18174_v38 }
0x19f0   :  { %v9075_v52 = vadd.f32 %v9074_v11, %v9073_v8  ;;  %v8942_v22 = vrot.slane %v8941_v37, 2  ;;  %v8934_v46 = vrot.slane %v18359_v1, 4  ;;  %v14262_v24 = vpop.eup %14261  ;;  %v8952_v19 = vrot.slane %v18361_v5, 4 }
0x19f1   :  { %14271 = vrcp.f32 %v9047_v16  ;;  %v9059_v57 = vadd.f32 %v9058_v35, %v9057_v32  ;;  %v9120_v0 = vmul.f32 %v14262_v24, %v18320_v31  ;;  %v9157_v50 = vsel %vm367_vm2, %v9135_v34, 0.0 }
0x19f2   :  { %v18368_v12 = vpop.eup %14263  ;;  %14273 = vrcp.f32 %v9065_v3  ;;  %v8943_v53 = vmax.f32 %v8941_v37, %v8942_v22  ;;  %v8935_v43 = vmax.f32 %v18359_v1, %v8934_v46  ;;  %v9076_v23 = vrot.slane %v9075_v52, 1 }
0x19f3   :  { %v9066_v54 = vrot.slane %v18368_v12, 4  ;;  %v8953_v18 = vmax.f32 %v18361_v5, %v8952_v19  ;;  %v18373_v7 = vpop.xlane.xlu1 %8857  ;;  %v14266_v58 = vpop.eup %14265  ;;  %v9152_v63 = vadd.f32 %v9151_v49, %v9150_v59  ;;  %14275 = vrcp.f32 %v9059_v57 }
0x19f4   :  { %v8944_v30 = vrot.slane %v8943_v53, 1  ;;  %v8936_v2 = vrot.slane %v8935_v43, 2  ;;  %v8946_v17 = vrot.slane %v18373_v7, 4  ;;  %v14268_v45 = vpop.eup %14267  ;;  %v9077_v38 = vadd.f32 %v9076_v23, %v9075_v52 }
0x19f5   :  { %v9067_v13 = vadd.f32 %v18368_v12, %v9066_v54  ;;  %v8954_v4 = vrot.slane %v8953_v18, 2  ;;  %v9123_v3 = vmul.f32 %v14266_v58, %v18316_v56  ;;  %v9122_v22 = vmul.f32 %v14268_v45, %v18326_v28 }
0x19f6   :  { %v8945_v42 = vmax.f32 %v8943_v53, %v8944_v30  ;;  %v8937_v8 = vmax.f32 %v8935_v43, %v8936_v2  ;;  %v8947_v15 = vmax.f32 %v18373_v7, %v8946_v17  ;;  %v9136_v46 = vmul.f32 %v9120_v0, %v18178_v62 }
0x19f7   :  { %v9068_v48 = vrot.slane %v9067_v13, 2  ;;  %v8955_v32 = vmax.f32 %v8953_v18, %v8954_v4  ;;  %v14270_v47 = vpop.eup %14269  ;;  %v9153_v52 = vrot.slane %v9152_v63, 2  ;;  %14277 = vrcp.f32 %v9077_v38 }
0x19f8   :  { %v8971_v11 = vsub.f32 %v18352_v60, %v8945_v42  ;;  %v8938_v37 = vrot.slane %v8937_v8, 1  ;;  %v8948_v16 = vrot.slane %v8947_v15, 2  ;;  %v9139_v43 = vmul.f32 %v9123_v3, %v18186_v9 }
0x19f9   :  { %v9069_v31 = vadd.f32 %v9068_v48, %v9067_v13  ;;  %v8956_v35 = vrot.slane %v8955_v32, 1  ;;  %v9125_v18 = vmul.f32 %v14270_v47, %v18331_v33  ;;  %v9138_v58 = vmul.f32 %v9122_v22, %v18190_v27 }
0x19fa   :  { %v9000_v24 = vmul.f32 1.442695, %v8971_v11  ;;  %v8939_v19 = vmax.f32 %v8937_v8, %v8938_v37  ;;  %v8949_v59 = vmax.f32 %v8947_v15, %v8948_v16  ;;  %v9154_v2 = vadd.f32 %v9153_v52, %v9152_v63 }
0x19fb   :  { %v14272_v34 = vpop.eup %14271  ;;  %v9070_v53 = vrot.slane %v9069_v31, 1  ;;  %v8957_v56 = vmax.f32 %v8955_v32, %v8956_v35  ;;  %v9158_v17 = vrot.slane %v9157_v50, 4  ;;  %v9141_v33 = vmul.f32 %v9125_v18, %v18199_v26 }
0x19fc   :  { %v14274_v60 = vpop.eup %14273  ;;  %14279 = vpow2.f32 %v9000_v24  ;;  %v8970_v49 = vsub.f32 %v18359_v1, %v8939_v19  ;;  %v8950_v23 = vrot.slane %v8949_v59, 1  ;;  %v9124_v54 = vmul.f32 %v14272_v34, %v18338_v6 }
0x19fd   :  { %v9071_v28 = vadd.f32 %v9070_v53, %v9069_v31  ;;  %v8973_v62 = vsub.f32 %v18361_v5, %v8957_v56  ;;  %v9164_v1 = vsel %vm367_vm2, %v9136_v46, 0.0  ;;  %v9159_v4 = vadd.f32 %v9158_v17, %v9157_v50  ;;  %v14276_v45 = vpop.eup %14275 }
0x19fe   :  { %v8998_v57 = vmul.f32 1.442695, %v8970_v49  ;;  %v8951_v30 = vmax.f32 %v8949_v59, %v8950_v23  ;;  %v9140_v13 = vmul.f32 %v9124_v54, %v18207_v25  ;;  %v9165_v0 = vrot.slane %v9164_v1, 4 }
0x19ff   :  { %14281 = vrcp.f32 %v9071_v28  ;;  %v9004_v9 = vmul.f32 1.442695, %v8973_v62  ;;  %v9171_v27 = vsel %vm367_vm2, %v9137_v51, 0.0  ;;  %v9178_v5 = vsel %vm367_vm2, %v9138_v58, 0.0 }
0x1a00   :  { %14283 = vpow2.f32 %v8998_v57  ;;  %v8972_v6 = vsub.f32 %v18373_v7, %v8951_v30  ;;  %v9160_v8 = vrot.slane %v9159_v4, 2  ;;  %v9166_v15 = vadd.f32 %v9165_v0, %v9164_v1 }
0x1a01   :  { %14285 = vpow2.f32 %v9004_v9  ;;  %v9172_v63 = vrot.slane %v9171_v27, 4  ;;  %v9179_v25 = vrot.slane %v9178_v5, 4  ;;  %v9185_v38 = vsel %vm367_vm2, %v9139_v43, 0.0  ;;  %v14278_v26 = vpop.eup %14277 }
0x1a02   :  { %v9002_v42 = vmul.f32 1.442695, %v8972_v6  ;;  %v9192_v48 = vsel %vm367_vm2, %v9140_v13, 0.0  ;;  %v9127_v7 = vmul.f32 %v14274_v60, %v18333_v14  ;;  %v9155_v50 = vrot.slane %v9154_v2, 1 }
0x1a03   :  { %v9173_v32 = vadd.f32 %v9172_v63, %v9171_v27  ;;  %v9180_v3 = vadd.f32 %v9179_v25, %v9178_v5  ;;  %v9186_v51 = vrot.slane %v9185_v38, 4  ;;  %v9193_v11 = vrot.slane %v9192_v48, 4 }
0x1a04   :  { %14287 = vpow2.f32 %v9002_v42  ;;  %v9199_v37 = vsel %vm367_vm2, %v9141_v33, 0.0  ;;  %v9161_v47 = vadd.f32 %v9160_v8, %v9159_v4  ;;  %v9167_v31 = vrot.slane %v9166_v15, 2 }
0x1a05   :  { %v9174_v35 = vrot.slane %v9173_v32, 2  ;;  %v9200_v22 = vrot.slane %v9199_v37, 4  ;;  %v9126_v46 = vmul.f32 %v14276_v45, %v18342_v55  ;;  %v9181_v14 = vrot.slane %v9180_v3, 2 }
0x1a06   :  { %v18401_v16 = vpop.eup %14279  ;;  %v9187_v19 = vadd.f32 %v9186_v51, %v9185_v38  ;;  %v9194_v59 = vadd.f32 %v9193_v11, %v9192_v48  ;;  %v9143_v34 = vmul.f32 %v9127_v7, %v18213_v10  ;;  %v9129_v53 = vmul.f32 %v14278_v26, %v18348_v21 }
0x1a07   :  { %v9084_v24 = vrot.slane %v18401_v16, 4  ;;  %v9201_v43 = vadd.f32 %v9200_v22, %v9199_v37  ;;  %v9156_v49 = vadd.f32 %v9155_v50, %v9154_v2  ;;  %v9162_v23 = vrot.slane %v9161_v47, 1 }
0x1a08   :  { %v9168_v54 = vadd.f32 %v9167_v31, %v9166_v15  ;;  %v9175_v28 = vadd.f32 %v9174_v35, %v9173_v32  ;;  %v9142_v62 = vmul.f32 %v9126_v46, %v18217_v41  ;;  %v9182_v57 = vadd.f32 %v9181_v14, %v9180_v3 }
0x1a09   :  { %v14282_v52 = vpop.eup %14281  ;;  %v9085_v56 = vadd.f32 %v18401_v16, %v9084_v24  ;;  %v9188_v30 = vrot.slane %v9187_v19, 2  ;;  %v9195_v17 = vrot.slane %v9194_v59, 2  ;;  %v9145_v13 = vmul.f32 %v9129_v53, %v18226_v29 }
0x1a0a   :  { %v18408_v60 = vpop.eup %14283  ;;  %v9128_v10 = vmul.f32 %v14282_v52, %v18368_v12  ;;  %v9202_v1 = vrot.slane %v9201_v43, 2  ;;  %v9163_v4 = vadd.f32 %v9162_v23, %v9161_v47  ;;  %v9169_v0 = vrot.slane %v9168_v54, 1 }
0x1a0b   :  { %v18410_v55 = vpop.eup %14285  ;;  %v9086_v18 = vrot.slane %v9085_v56, 2  ;;  %v9078_v58 = vrot.slane %v18408_v60, 4  ;;  %v9176_v33 = vrot.slane %v9175_v28, 1  ;;  %v9183_v45 = vrot.slane %v9182_v57, 1 }
0x1a0c   :  { %v9096_v21 = vrot.slane %v18410_v55, 4  ;;  %v9144_v8 = vmul.f32 %v9128_v10, %v18233_v39  ;;  %v9189_v15 = vadd.f32 %v9188_v30, %v9187_v19  ;;  %v9196_v29 = vadd.f32 %v9195_v17, %v9194_v59 }
0x1a0d   :  { %v9087_v2 = vadd.f32 %v9086_v18, %v9085_v56  ;;  %v9079_v9 = vadd.f32 %v18408_v60, %v9078_v58  ;;  %v9203_v48 = vadd.f32 %v9202_v1, %v9201_v43  ;;  %v9170_v50 = vadd.f32 %v9169_v0, %v9168_v54 }
0x1a0e   :  { %v18418_v6 = vpop.eup %14287  ;;  %v9097_v41 = vadd.f32 %v18410_v55, %v9096_v21  ;;  %v9177_v32 = vadd.f32 %v9176_v33, %v9175_v28  ;;  %v9206_v26 = vsel %vm367_vm2, %v9142_v62, 0.0  ;;  %v9213_v11 = vsel %vm367_vm2, %v9143_v34, 0.0 }
0x1a0f   :  { %v9088_v12 = vrot.slane %v9087_v2, 1  ;;  %v9080_v27 = vrot.slane %v9079_v9, 2  ;;  %v9090_v5 = vrot.slane %v18418_v6, 4  ;;  %v9184_v47 = vadd.f32 %v9183_v45, %v9182_v57 }
0x1a10   :  { %v9098_v42 = vrot.slane %v9097_v41, 2  ;;  %v9197_v39 = vrot.slane %v9196_v29, 1  ;;  %v9220_v31 = vsel %vm367_vm2, %v9144_v8, 0.0  ;;  %v9190_v46 = vrot.slane %v9189_v15, 1 }
0x1a11   :  { %v9089_v63 = vadd.f32 %v9088_v12, %v9087_v2  ;;  %v9081_v25 = vadd.f32 %v9080_v27, %v9079_v9  ;;  %v9091_v38 = vadd.f32 %v18418_v6, %v9090_v5  ;;  %v9204_v24 = vrot.slane %v9203_v48, 1 }
0x1a12   :  { %v9099_v7 = vadd.f32 %v9098_v42, %v9097_v41  ;;  %v9207_v19 = vrot.slane %v9206_v26, 4  ;;  %v9214_v59 = vrot.slane %v9213_v11, 4  ;;  %v9291_v52 = vsel %vm9290_vm5, %v9163_v4, %v9156_v49 }
0x1a13   :  { %14289 = vrcp.f32 %v9089_v63  ;;  %v9082_v3 = vrot.slane %v9081_v25, 1  ;;  %v9092_v51 = vrot.slane %v9091_v38, 2  ;;  %v9221_v56 = vrot.slane %v9220_v31, 4 }
0x1a14   :  { %v9100_v37 = vrot.slane %v9099_v7, 1  ;;  %v9293_v43 = vsel %vm9292_vm6, %v9170_v50, %v9291_v52  ;;  %v9198_v34 = vadd.f32 %v9197_v39, %v9196_v29  ;;  %v9191_v54 = vadd.f32 %v9190_v46, %v9189_v15 }
0x1a15   :  { %v9083_v35 = vadd.f32 %v9082_v3, %v9081_v25  ;;  %v9093_v22 = vadd.f32 %v9092_v51, %v9091_v38  ;;  %v9227_v28 = vsel %vm367_vm2, %v9145_v13, 0.0  ;;  %v9295_v62 = vsel %vm9294_vm7, %v9177_v32, %v9293_v43 }
0x1a16   :  { %v9101_v14 = vadd.f32 %v9100_v37, %v9099_v7  ;;  %v9205_v18 = vadd.f32 %v9204_v24, %v9203_v48  ;;  %v9208_v58 = vadd.f32 %v9207_v19, %v9206_v26  ;;  %v9297_v57 = vsel %vm9296_vm8, %v9184_v47, %v9295_v62 }
0x1a17   :  { %14291 = vrcp.f32 %v9083_v35  ;;  %v9094_v53 = vrot.slane %v9093_v22, 1  ;;  %v9215_v49 = vadd.f32 %v9214_v59, %v9213_v11  ;;  %v9222_v10 = vadd.f32 %v9221_v56, %v9220_v31 }
0x1a18   :  { %14293 = vrcp.f32 %v9101_v14  ;;  %v9299_v21 = vsel %vm9298_vm9, %v9191_v54, %v9297_v57  ;;  %v9228_v30 = vrot.slane %v9227_v28, 4  ;;  %v9209_v1 = vrot.slane %v9208_v58, 2 }
0x1a19   :  { %v9095_v23 = vadd.f32 %v9094_v53, %v9093_v22  ;;  %v9301_v17 = vsel %vm9300_vm10, %v9198_v34, %v9299_v21  ;;  %v9216_v41 = vrot.slane %v9215_v49, 2  ;;  %v9223_v4 = vrot.slane %v9222_v10, 2 }
0x1a1a   :  { %v9303_v9 = vsel %vm9302_vm11, %v9205_v18, %v9301_v17  ;;  %v9229_v33 = vadd.f32 %v9228_v30, %v9227_v28  ;;  %v9210_v45 = vadd.f32 %v9209_v1, %v9208_v58  ;;  %v9264_v1 = vld [vmem:[%s18493_s6 + $0x10] sm:$0xff] }
0x1a1b   :  { %14295 = vrcp.f32 %v9095_v23  ;;  %12133 = vmatprep.mubr.msk.f32.mxu1 %vm367_vm2, %v9303_v9  ;;  %v9217_v15 = vadd.f32 %v9216_v41, %v9215_v49  ;;  %v9224_v29 = vadd.f32 %v9223_v4, %v9222_v10  ;;  %v9266_v41 = vld [vmem:[%s18493_s6 + $0x20] sm:$0xff] }
0x1a1c   :  { %v9230_v25 = vrot.slane %v9229_v33, 2  ;;  %v9211_v50 = vrot.slane %v9210_v45, 1 }
0x1a1d   :  { %v14290_v2 = vpop.eup %14289  ;;  %v9218_v32 = vrot.slane %v9217_v15, 1  ;;  %v9225_v26 = vrot.slane %v9224_v29, 1 }
0x1a1e   :  { %v9131_v13 = vmul.f32 %v14290_v2, %v18401_v16  ;;  %v9231_v11 = vadd.f32 %v9230_v25, %v9229_v33  ;;  %v9212_v39 = vadd.f32 %v9211_v50, %v9210_v45 }
0x1a1f   :  { %v9226_v35 = vadd.f32 %v9225_v26, %v9224_v29  ;;  %v9219_v46 = vadd.f32 %v9218_v32, %v9217_v15 }
0x1a20   :  { %v9147_v0 = vmul.f32 %v9131_v13, %v18246_v36  ;;  %v9232_v24 = vrot.slane %v9231_v11, 1  ;;  %v9262_v13 = vld [vmem:[%s18493_s6] sm:$0xff] }
0x1a21   :  { %v14292_v12 = vpop.eup %14291  ;;  %v12843_v4 = vpack.c.bf16 %v9264_v1, %v9262_v13 }
0x1a22   :  { %v14294_v27 = vpop.eup %14293  ;;  %v9130_v5 = vmul.f32 %v14292_v12, %v18408_v60  ;;  %v9241_v42 = vsel %vm367_vm2, %v9147_v0, 0.0  ;;  %v9233_v23 = vadd.f32 %v9232_v24, %v9231_v11  ;;  %v9268_v0 = vld [vmem:[%s18493_s6 + $0x30] sm:$0xff]  ;;  %v14365_v12 = vld [vmem:[%s18492_s5] sm:$0xf]  ;;  %s14429_s5 = smov [#allocation5]  }
0x1a23   :  { %v9133_v8 = vmul.f32 %v14294_v27, %v18410_v55  ;;  %v9242_v16 = vrot.slane %v9241_v42, 4  ;;  %v12847_v33 = vpack.c.bf16 %v9268_v0, %v9266_v41  ;;  %12844 = vmatprep.subr.bf16.mxu1 %v12843_v4  ;;  %v18856_v27 = vld [vmem:[#allocation9_spill] sm:$0xff]  ;;  %v9403_v32 = vrot.slane %v14365_v12, %v18835_v40  ;;  %s9492_s6 = sshll.u32 %s14429_s5, 4  ;;  %s9493_s6 = int_to_ptr.vmem [resolvable:$true] %s9492_s6 }
0x1a24   :  { %v9146_v63 = vmul.f32 %v9130_v5, %v18249_v61  ;;  %v9273_v5 = vrot.slane %v14365_v12, %v18856_v27  ;;  %s14388_s3 = scalar_lea.vmem %s9493_s6, 256  ;;  %p14393_p9 = scmp.lt.s32.totalorder %s9493_s6, %s9493_s6 }
0x1a25   :  { %v14296_v38 = vpop.eup %14295  ;;  %v9149_v48 = vmul.f32 %v9133_v8, %v18256_v44  ;;  %v9243_v36 = vadd.f32 %v9242_v16, %v9241_v42  ;;  %p14389_p8 = scmp.ne.s32.totalorder %s9493_s6, %s14388_s3  ;;  %p14394_p10 = scmp.lt.s32.totalorder %s14388_s3, %s14388_s3 }
0x1a26   :  { %v9132_v7 = vmul.f32 %v14296_v38, %v18418_v6  ;;  %v9234_v60 = vsel %vm367_vm2, %v9146_v63, 0.0 }
0x1a27   :  { %v9235_v3 = vrot.slane %v9234_v60, 4  ;;  %v9255_v55 = vsel %vm367_vm2, %v9149_v48, 0.0  ;;  %v9244_v37 = vrot.slane %v9243_v36, 2  ;;  %p14395_p11 = por %p14394_p10, %p14393_p9 }
0x1a28   :  { %v9148_v51 = vmul.f32 %v9132_v7, %v18262_v20  ;;  %v9256_v61 = vrot.slane %v9255_v55, 4  ;;  %v9304_v20 = vsel %vm9290_vm5, %v9219_v46, %v9212_v39 }
0x1a29   :  { %v9236_v47 = vadd.f32 %v9235_v3, %v9234_v60  ;;  %v9245_v14 = vadd.f32 %v9244_v37, %v9243_v36  ;;  %v9305_v34 = vsel %vm9292_vm6, %v9226_v35, %v9304_v20  ;;  %p14396_p12 = pnand %p14395_p11, %p14389_p8 }
0x1a2a   :  { %v9248_v44 = vsel %vm367_vm2, %v9148_v51, 0.0  ;;  %v9257_v31 = vadd.f32 %v9256_v61, %v9255_v55  ;;  %v9306_v58 = vsel %vm9294_vm7, %v9233_v23, %v9305_v34 }
0x1a2b   :  { %v9237_v6 = vrot.slane %v9236_v47, 2  ;;  %v9249_v22 = vrot.slane %v9248_v44, 4  ;;  %v9246_v54 = vrot.slane %v9245_v14, 1 }
0x1a2c   :  { %v9258_v19 = vrot.slane %v9257_v31, 2 }
0x1a2d   :  { %v9238_v59 = vadd.f32 %v9237_v6, %v9236_v47  ;;  %v9250_v52 = vadd.f32 %v9249_v22, %v9248_v44  ;;  %v9247_v10 = vadd.f32 %v9246_v54, %v9245_v14 }
0x1a2e   :  { %v9259_v53 = vadd.f32 %v9258_v19, %v9257_v31 }
0x1a2f   :  { %v9239_v56 = vrot.slane %v9238_v59, 1  ;;  %v9251_v43 = vrot.slane %v9250_v52, 2 }
0x1a30   :  { %v9260_v18 = vrot.slane %v9259_v53, 1 }
0x1a31   :  { %v9240_v28 = vadd.f32 %v9239_v56, %v9238_v59  ;;  %v9252_v62 = vadd.f32 %v9251_v43, %v9250_v52 }
0x1a32   :  { %v9261_v30 = vadd.f32 %v9260_v18, %v9259_v53 }
0x1a33   :  { %v9253_v57 = vrot.slane %v9252_v62, 1  ;;  %v9307_v49 = vsel %vm9296_vm8, %v9240_v28, %v9306_v58 }
0x1a34   :  { %v9308_v17 = vsel %vm9298_vm9, %v9247_v10, %v9307_v49 }
0x1a35   :  { %v9254_v21 = vadd.f32 %v9253_v57, %v9252_v62 }
0x1a37   :  { %v9309_v2 = vsel %vm9300_vm10, %v9254_v21, %v9308_v17 }
0x1a38   :  { %v9310_v9 = vsel %vm9302_vm11, %v9261_v30, %v9309_v2 }
0x1a39   :  { %12134 = vmatmul.mubr.msk.f32.vlgmr.msra.gmra.mrb[192].mxu1 %vm367_vm2, %v9310_v9 }
0x1a3a   :  { %12846 = vmatpush3.bf16.msra.mxu1 %v12843_v4 }
0x1a3b   :  { %12848 = vmatprep.subr.bf16.mxu1 %v12847_v33 }
0x1a3e   :  { %12850 = vmatpush3.bf16.msra.mxu1 %v12847_v33 }
0x1b0c   :  { %v12135_v45 = vpop.f32.mrb[192].mxu1 }
0x1b0d   :  { %v9387_v42 = vadd.f32 %v12135_v45, %v9273_v5  ;;  %v9381_v8 = vpop.f32.mrb[193].mxu1 }
0x1b0e   :  { %v9382_v15 = vadd.f32 %v9381_v8, %v9273_v5 }
0x1b0f   :  { %v9393_v29 = vmul.f32 0.70710677, %v9387_v42  ;;  %v9391_v7 = vmul.f32 0.5, %v9387_v42 }
0x1b10   :  { %v9392_v16 = vmul.f32 0.70710677, %v9382_v15  ;;  %v9390_v48 = vmul.f32 0.5, %v9382_v15 }
0x1b11   :  { %14297 = verf.f32 %v9393_v29 }
0x1b12   :  { %14299 = verf.f32 %v9392_v16 }
0x1b1b   :  { %v14298_v63 = vpop.eup %14297 }
0x1b1c   :  { %v14300_v25 = vpop.eup %14299  ;;  %v9397_v38 = vadd.f32 1.0, %v14298_v63 }
0x1b1d   :  { %v9396_v36 = vadd.f32 1.0, %v14300_v25 }
0x1b1e   :  { %v9399_v60 = vmul.f32 %v9397_v38, %v9391_v7 }
0x1b1f   :  { %v9398_v50 = vmul.f32 %v9396_v36, %v9390_v48 }
0x1b21   :  { %12144 = vmatprep.mubr.msk.f32.mxu1 %vm367_vm2, %v9398_v50 }
0x1b22   :  { %12145 = vmatmul.mubr.msk.f32.vlgmr.msra.gmra.mrb[194].mxu1 %vm367_vm2, %v9399_v60 }
0x1bf5   :  { %v12146_v26 = vpop.f32.mrb[194].mxu1 }
0x1bf6   :  { %v9482_v3 = vadd.f32 %v12146_v26, %v9403_v32  ;;  %v9476_v55 = vpop.f32.mrb[195].mxu1 }
0x1bf7   :  { %v9477_v51 = vadd.f32 %v9476_v55, %v9403_v32 }
0x1bf8   :  { %9486 = vst [vmem:[#allocation5 + $0x8] sm:$0xff] %v9482_v3 }
0x1bf9   :  { %9485 = vst [vmem:[#allocation5] sm:$0xff] %v9477_v51 }
0x1bfa   :  { %14399 = shalt.err (!%p14396_p12)
}
0x1bfb   :  { %s14400_s22 = scalar_lea.hbm %s18494_s7, 256 }
0x1bfc   :  { %p14401_p13 = scmp.ne.s32.totalorder %s18494_s7, %s14400_s22  ;;  %p14404_p0 = scmp.lt.u32.totalorder %s14400_s22, %s18494_s7 }
0x1bfe   :  { %p14406_p1 = pnand %p14404_p0, %p14401_p13 }
0x1c00   :  { %14409 = shalt.err (!%p14406_p1)
}
0x1c01   :  { %s14430_s4 = smov 128   ;;  %s14431_s26 = smov 8  }
0x1c02   :  { %9498 = dma.vmem_to_hbm [thread:$0]  %s9493_s6, 256, %s18494_s7, [#allocation4], %s14430_s4, %s14430_s4, %s14431_s26  }
0x1c03   :  { %14412 = dma.done.wait [#allocation4], 256  }
0x1c04   :  { %14413 = vsyncadd [#allocation4], 4294967040 }
0x1c05   :  { %9502 = vsyncpa [#allocation3], 1 }
0x1c06   :  { %9503 = vsyncpa [#allocation4], 1 }

</bundles_post_ra>
